<compile_context>
chip_gen: v7x
topology: tpu7x:2x2x1
jax: 0.10.0
libtpu: 0.0.40
codegen_flags: <defaults>
</compile_context>

<pallas_src>
import functools

import jax
import jax.numpy as jnp
from jax import lax
from jax.experimental import pallas as pl
from jax.experimental.pallas import tpu as pltpu


# ----------------------------------------------------------------------------
# Pallas kernel: one (batch, time-block) grid step of one RBM layer.
# ----------------------------------------------------------------------------
def rbm_layer_kernel(x_ref, wx_ref, wc_ref, bias_ref, h_ref, clast_ref,
                     s_scr, c_scr, *, kh, H, Hp, Tb, ph, Lh):
    """
    x_ref    : (Tb*Hp, Lx)    bf16  Tb H-padded frames stacked along rows,
                                    lanes = (channel, width), channel-major
    wx_ref   : (kh, Lx, 2*Lh) bf16  banded x-path weights
                                    (cols [:Lh] -> data conv, [Lh:] -> ctrl conv)
    wc_ref   : (kh, Lh, Lh)   bf16  banded recurrent c-path weights (ctrl only)
    bias_ref : (1, 2*Lh)      f32   [b_data | b_ctrl] repeated over width
    h_ref    : (Tb*H, Lh)           h = ctrl * data for this time block
    clast_ref: (H, Lh)        f32   running c (resident over tb; last value wins)
    s_scr    : (Tb*Hp, 2*Lh)  f32   hoisted x-path pre-activations (+ bias)
    c_scr    : (Hp, Lh)       bf16  recurrent state, zero halo rows
    """
    tb = pl.program_id(1)

    @pl.when(tb == 0)
    def _init():
        # Reset the recurrent state once per batch element (time-BLOCK index
        # == 0).  Halo rows stay zero forever; the interior is overwritten
        # every timestep.
        c_scr[...] = jnp.zeros(c_scr.shape, c_scr.dtype)

    # ------------------------------------------------------------------
    # Hoisted non-recurrent x path: kh matmuls with M = Tb*Hp rows covering
    # all Tb frames of this block at once (instead of kh*Tb matmuls of M=H).
    # Height taps become row-shifted adds of the f32 results; width taps and
    # channels are already folded into the banded weights.
    # ------------------------------------------------------------------
    nv = Tb * Hp - (kh - 1)          # rows of the shifted tap-sum we ever read
    xv = x_ref[...]                  # (Tb*Hp, Lx) bf16
    s_scr[...] = (jnp.dot(xv, wx_ref[0], preferred_element_type=jnp.float32)
                  + bias_ref[...])
    for dy in range(1, kh):
        a = jnp.dot(xv, wx_ref[dy], preferred_element_type=jnp.float32)
        s_scr[0:nv, :] += a[dy:dy + nv, :]

    # ------------------------------------------------------------------
    # Serial recurrence over the Tb timesteps of this block: only the small
    # c @ Wc matmuls (K = N = Lh) + activations remain on the critical chain.
    # ------------------------------------------------------------------
    ctrl = None
    for t in range(Tb):
        cp = jnp.dot(c_scr[0:H, :], wc_ref[0],
                     preferred_element_type=jnp.float32)
        for dy in range(1, kh):
            cp += jnp.dot(c_scr[dy:dy + H, :], wc_ref[dy],
                          preferred_element_type=jnp.float32)
        sx = s_scr[t * Hp:t * Hp + H, :]              # (H, 2*Lh) f32, has bias
        data = jnp.tanh(sx[:, :Lh])
        ctrl = jax.nn.sigmoid(sx[:, Lh:] + cp)
        h_ref[t * H:(t + 1) * H, :] = (ctrl * data).astype(h_ref.dtype)
        c_scr[ph:ph + H, :] = ctrl.astype(c_scr.dtype)   # interior rows only

    # clast block has a constant index_map over tb -> VMEM-resident; only the
    # final time-block's (f32) value ever reaches HBM.
    clast_ref[...] = ctrl.astype(clast_ref.dtype)


# ----------------------------------------------------------------------------
# Per-layer pallas_call wrapper.
# ----------------------------------------------------------------------------
def rbm_layer(x_blk, Wx, Wc, bias_row, *, Chid, kh, H, Hp, W, ph, Tb,
              out_dtype):
    """Run one RBM layer over all (b, time-block) with a single pallas_call."""
    nTb, B, TbHp, Lx = x_blk.shape
    Lh = Chid * W
    Lo = 2 * Lh

    kernel = functools.partial(rbm_layer_kernel, kh=kh, H=H, Hp=Hp, Tb=Tb,
                               ph=ph, Lh=Lh)
    h_blk, c_last = pl.pallas_call(
        kernel,
        grid=(B, nTb),
        out_shape=(jax.ShapeDtypeStruct((nTb, B, Tb * H, Lh), out_dtype),
                   jax.ShapeDtypeStruct((B, H, Lh), jnp.float32)),
        in_specs=[
            # per-(b, tb) flattened frame block
            pl.BlockSpec((None, None, TbHp, Lx), lambda b, tb: (tb, b, 0, 0)),
            # weights / bias: constant index_map -> resident in VMEM
            pl.BlockSpec((kh, Lx, Lo), lambda b, tb: (0, 0, 0)),
            pl.BlockSpec((kh, Lh, Lh), lambda b, tb: (0, 0, 0)),
            pl.BlockSpec((1, Lo), lambda b, tb: (0, 0)),
        ],
        out_specs=(
            pl.BlockSpec((None, None, Tb * H, Lh), lambda b, tb: (tb, b, 0, 0)),
            pl.BlockSpec((None, H, Lh), lambda b, tb: (b, 0, 0)),
        ),
        scratch_shapes=[
            pltpu.VMEM((TbHp, Lo), jnp.float32),      # hoisted x pre-acts
            pltpu.VMEM((Hp, Lh), jnp.bfloat16),       # recurrent c state
        ],
        compiler_params=pltpu.CompilerParams(
            dimension_semantics=("parallel", "arbitrary")),
    )(x_blk, Wx, Wc, bias_row)
    return h_blk, c_last


# ----------------------------------------------------------------------------
# Wrapper-side operand construction (once per layer, pure JAX, f32 -> bf16).
# ----------------------------------------------------------------------------
def _banded_conv_matrix(w_taps, W):
    """w_taps: (kh, kw, Cin_part, Cout) -> (kh, Cin_part*W, Cout*W).

    Result[dy][(c, w), (o, j)] = w_taps[dy, w - j + pw, c, o] inside the width
    band, 0 outside (this also encodes width zero-padding).  Rows are lanes
    (channel, width) channel-major; cols are (out_channel, width) channel-major.
    Built with gathers only, so values are exactly the f32 taps.
    """
    kh, kw, cin, cout = w_taps.shape
    pw = kw // 2
    widx = jnp.arange(W)
    dx = widx[:, None] - widx[None, :] + pw                  # (w, j)
    valid = ((dx >= 0) & (dx < kw)).astype(w_taps.dtype)
    g = w_taps[:, jnp.clip(dx, 0, kw - 1), :, :]             # (kh, w, j, cin, cout)
    g = g * valid[None, :, :, None, None]
    return jnp.transpose(g, (0, 3, 1, 4, 2)).reshape(kh, cin * W, cout * W)


def build_layer_operands(wd, wcc, wcx, bd, bc, W):
    """Fold width taps + channels into banded bf16 MXU weights + f32 bias row."""
    kh, kw, cin, chid = wd.shape
    # x path drives both convs: cols [:Chid*W] = data, [Chid*W:] = ctrl.
    Wx = _banded_conv_matrix(jnp.concatenate([wd, wcx], axis=-1), W)
    # c path drives only the ctrl conv.
    Wc = _banded_conv_matrix(wcc, W)
    bias = jnp.concatenate(
        [jnp.repeat(bd.reshape(chid, 1), W, axis=1).reshape(1, chid * W),
         jnp.repeat(bc.reshape(chid, 1), W, axis=1).reshape(1, chid * W)],
        axis=-1)
    return (Wx.astype(jnp.bfloat16), Wc.astype(jnp.bfloat16),
            bias.astype(jnp.float32))


# ----------------------------------------------------------------------------
# Full forward (hidden_state=None, batch-first input, return_all_layers=False)
# ----------------------------------------------------------------------------
def rbm_forward(x_btchw, params, Tb=None):
    """Returns ([layer_output], [last_state]) with layer_output of shape
    (B, T, Chid_last, H, W) and last_state of shape (B, Chid_last, H, W)."""
    B, T, Cin, H, W = x_btchw.shape
    if Tb is None:
        # Largest divisor of T <= 16 (bounds the in-kernel unroll / VMEM block).
        Tb = max(d for d in range(1, min(T, 16) + 1) if T % d == 0)
    assert T % Tb == 0
    nTb = T // Tb

    # One whole-tensor transpose: (B,T,C,H,W) -> (T,B,H,C*W); lanes are
    # (channel, width) channel-major to match the banded weights.  bf16 MXU
    # operands (perf review item 4).
    cur = jnp.transpose(x_btchw, (1, 0, 3, 2, 4)).reshape(T, B, H, Cin * W)
    cur = cur.astype(jnp.bfloat16)

    c_last = None
    n_layers = len(params)
    for li, p in enumerate(params):
        kh, kw = p['kh'], p['kw']
        assert kh % 2 == 1 and kw % 2 == 1      # same-padding path, odd kernels
        ph = kh // 2
        Hp = H + 2 * ph
        Chid = p['wd'].shape[-1]
        Lx = cur.shape[-1]

        Wx, Wc, bias = build_layer_operands(p['wd'], p['wcc'], p['wcx'],
                                            p['bd'], p['bc'], W)

        # Height padding once per layer (width padding lives in the weights),
        # then flatten Tb frames into one lane-dense row slab per grid step.
        x_pad = jnp.pad(cur, ((0, 0), (0, 0), (ph, ph), (0, 0)))   # (T,B,Hp,Lx)
        x_blk = (x_pad.reshape(nTb, Tb, B, Hp, Lx)
                 .transpose(0, 2, 1, 3, 4)
                 .reshape(nTb, B, Tb * Hp, Lx))

        # Intermediate layers only feed the next layer's bf16 matmuls -> write
        # them as bf16 (halves the only large HBM write stream); final layer
        # stays f32 to preserve the module's output dtype/precision.
        out_dtype = jnp.float32 if li == n_layers - 1 else jnp.bfloat16
        h_blk, c_last = rbm_layer(x_blk, Wx, Wc, bias, Chid=Chid, kh=kh, H=H,
                                  Hp=Hp, W=W, ph=ph, Tb=Tb, out_dtype=out_dtype)

        cur = (h_blk.reshape(nTb, B, Tb, H, Chid * W)
               .transpose(0, 2, 1, 3, 4)
               .reshape(T, B, H, Chid * W))

    Chid = params[-1]['wd'].shape[-1]
    layer_out = jnp.transpose(cur.reshape(T, B, H, Chid, W), (1, 0, 3, 2, 4))
    last_state = jnp.transpose(c_last.reshape(B, H, Chid, W), (0, 2, 1, 3))
    return [layer_out], [last_state]
    # TODO(synk): stateful hidden_state input is not implemented (the PyTorch
    # module itself leaves it as a todo and always starts from zeros).


# ----------------------------------------------------------------------------
# Synthetic parameters (same tensor shapes / semantics as the PyTorch module).
# ----------------------------------------------------------------------------
def init_rbm_params(key, input_dim, hidden_dims, kernel_sizes):
    params = []
    for i, (chid, (kh, kw)) in enumerate(zip(hidden_dims, kernel_sizes)):
        cin = input_dim if i == 0 else hidden_dims[i - 1]
        key, k1, k2, k3, k4, k5 = jax.random.split(key, 6)
        sd = 1.0 / jnp.sqrt(cin * kh * kw)
        sc = 1.0 / jnp.sqrt((cin + chid) * kh * kw)
        # data_cnn taps: (kh, kw, Cin, Chid).  ctrl_cnn (input = cat([c, x]))
        # split into its c part (wcc) and x part (wcx).
        wd = jax.random.uniform(k1, (kh, kw, cin, chid), jnp.float32, -sd, sd)
        wcc = jax.random.uniform(k2, (kh, kw, chid, chid), jnp.float32, -sc, sc)
        wcx = jax.random.uniform(k3, (kh, kw, cin, chid), jnp.float32, -sc, sc)
        bd = jax.random.uniform(k4, (chid,), jnp.float32, -sd, sd)
        bc = jax.random.uniform(k5, (chid,), jnp.float32, -sc, sc)
        params.append(dict(wd=wd, bd=bd, wcc=wcc, wcx=wcx, bc=bc, kh=kh, kw=kw))
    return params


# ----------------------------------------------------------------------------
# Pure-JAX reference (lax.conv) used only to validate kernel values.
# quantize=True mirrors the kernel's bf16 operand casts exactly so the
# comparison isolates kernel logic from the (intentional) bf16 precision.
# ----------------------------------------------------------------------------
def _conv2d_ref(x_nhwc, w_hwio, b, ph, pw):
    out = lax.conv_general_dilated(
        x_nhwc, w_hwio, window_strides=(1, 1),
        padding=((ph, ph), (pw, pw)),
        dimension_numbers=('NHWC', 'HWIO', 'NHWC'),
        precision=lax.Precision.HIGHEST)
    return out + b.reshape(1, 1, 1, -1)


def rbm_forward_ref(x_btchw, params, quantize=True):
    q = ((lambda a: a.astype(jnp.bfloat16).astype(jnp.float32))
         if quantize else (lambda a: a))
    B, T, Cin, H, W = x_btchw.shape
    cur = [jnp.transpose(x_btchw[:, t], (0, 2, 3, 1)).astype(jnp.float32)
           for t in range(T)]
    c = None
    for p in params:
        kh, kw = p['kh'], p['kw']
        ph, pw = kh // 2, kw // 2
        Chid = p['wd'].shape[-1]
        wd, wcc, wcx = q(p['wd']), q(p['wcc']), q(p['wcx'])
        w_ctrl = jnp.concatenate([wcc, wcx], axis=2)       # in-ch order [c, x]
        c = jnp.zeros((B, H, W, Chid), jnp.float32)
        nxt = []
        for t in range(T):
            x = q(cur[t])
            data = jnp.tanh(_conv2d_ref(x, wd, p['bd'], ph, pw))
            ctrl = jax.nn.sigmoid(
                _conv2d_ref(jnp.concatenate([q(c), x], axis=-1),
                            w_ctrl, p['bc'], ph, pw))
            nxt.append(ctrl * data)
            c = ctrl
        cur = nxt
    out = jnp.stack([jnp.transpose(h, (0, 3, 1, 2)) for h in cur], axis=1)
    return out, jnp.transpose(c, (0, 3, 1, 2))


if __name__ == "__main__":
    # Small shapes consistent with the module's 5-D (b, t, c, h, w) input.
    # B=2 keeps the "parallel" batch axis balanced across v7x's 2 TensorCores.
    B, T, Cin, H, W = 2, 8, 4, 16, 16
    hidden_dims = [8, 8]
    kernel_sizes = [(3, 3), (3, 3)]

    key = jax.random.PRNGKey(0)
    kx, kp = jax.random.split(key)
    x = jax.random.normal(kx, (B, T, Cin, H, W), jnp.float32)
    params = init_rbm_params(kp, Cin, hidden_dims, kernel_sizes)

    fwd = jax.jit(lambda xx: rbm_forward(xx, params))
    layer_output_list, last_state_list = fwd(x)
    out = jax.block_until_ready(layer_output_list[0])
    last = jax.block_until_ready(last_state_list[0])

    assert out.shape == (B, T, hidden_dims[-1], H, W), out.shape
    assert last.shape == (B, hidden_dims[-1], H, W), last.shape
    assert bool(jnp.all(jnp.isfinite(out))) and bool(jnp.all(jnp.isfinite(last)))

    # Tight check against a reference with identical bf16 operand quantization
    # (isolates layout / recurrence / banded-weight correctness).
    ref_out_q, ref_last_q = rbm_forward_ref(x, params, quantize=True)
    err_q = float(jnp.max(jnp.abs(out - ref_out_q)))
    assert jnp.allclose(out, ref_out_q, atol=5e-3, rtol=5e-3), err_q
    assert jnp.allclose(last, ref_last_q, atol=5e-3, rtol=5e-3)

    # Loose sanity check against the full-f32 reference: bounds the drift
    # introduced by the (intentional) bf16 MXU operands.
    ref_out, ref_last = rbm_forward_ref(x, params, quantize=False)
    assert float(jnp.max(jnp.abs(out - ref_out))) < 0.1
    assert float(jnp.max(jnp.abs(last - ref_last))) < 0.1

    print("KERNEL_OK")
</pallas_src>

<mosaic_0001>
module attributes {stable_mosaic.version = 11 : i64} {
  func.func @rbm_layer_kernel(%arg0: i32, %arg1: i32, %arg2: memref<1x1x144x64xbf16, #tpu.memory_space<vmem>>, %arg3: memref<3x64x256xbf16, #tpu.memory_space<vmem>>, %arg4: memref<3x128x128xbf16, #tpu.memory_space<vmem>>, %arg5: memref<1x256xf32, #tpu.memory_space<vmem>>, %arg6: memref<1x1x128x128xbf16, #tpu.memory_space<vmem>>, %arg7: memref<1x16x128xf32, #tpu.memory_space<vmem>>, %arg8: memref<144x256xf32, #tpu.memory_space<vmem>>, %arg9: memref<18x128xbf16, #tpu.memory_space<vmem>>) attributes {dimension_semantics = [#tpu.dimension_semantics<parallel>, #tpu.dimension_semantics<arbitrary>], iteration_bounds = array<i64: 2, 1>, scalar_prefetch = 0 : i64, scratch_operands = 2 : i64, tpu.core_type = #tpu.core_type<tc>, window_params = [{transform_indices = @transform_0, window_bounds = array<i64: 1, 1, 144, 64>}, {pipeline_mode = #tpu.pipeline_mode<synchronous>, transform_indices = @transform_1, window_bounds = array<i64: 3, 64, 256>}, {pipeline_mode = #tpu.pipeline_mode<synchronous>, transform_indices = @transform_2, window_bounds = array<i64: 3, 128, 128>}, {pipeline_mode = #tpu.pipeline_mode<synchronous>, transform_indices = @transform_3, window_bounds = array<i64: 1, 256>}, {transform_indices = @transform_4, window_bounds = array<i64: 1, 1, 128, 128>}, {transform_indices = @transform_5, window_bounds = array<i64: 1, 16, 128>}]} {
    %c0_i32 = arith.constant 0 : i32
    %0 = arith.cmpi eq, %arg1, %c0_i32 : i32
    %1 = arith.extui %0 : i1 to i32
    %c0_i32_0 = arith.constant 0 : i32
    %2 = arith.cmpi ne, %1, %c0_i32_0 : i32
    scf.if %2 {
      %cst_230 = arith.constant 0.000000e+00 : bf16
      %277 = vector.broadcast %cst_230 : bf16 to vector<18x128xbf16>
      %c0_231 = arith.constant 0 : index
      %c0_232 = arith.constant 0 : index
      %278 = vector.load %arg9[%c0_231, %c0_232] : memref<18x128xbf16, #tpu.memory_space<vmem>>, vector<18x128xbf16>
      tpu.vector_store %arg9[%c0_231, %c0_232], %277 {strides = array<i32>} : memref<18x128xbf16, #tpu.memory_space<vmem>>, vector<18x128xbf16>,
    } else {
    }
    %c0 = arith.constant 0 : index
    %c0_1 = arith.constant 0 : index
    %c0_2 = arith.constant 0 : index
    %c0_3 = arith.constant 0 : index
    %3 = vector.load %arg2[%c0, %c0_1, %c0_2, %c0_3] : memref<1x1x144x64xbf16, #tpu.memory_space<vmem>>, vector<1x1x144x64xbf16>
    %4 = vector.shape_cast %3 : vector<1x1x144x64xbf16> to vector<144x64xbf16>
    %c0_4 = arith.constant 0 : index
    %c0_5 = arith.constant 0 : index
    %c0_6 = arith.constant 0 : index
    %5 = vector.load %arg3[%c0_4, %c0_5, %c0_6] : memref<3x64x256xbf16, #tpu.memory_space<vmem>>, vector<1x64x256xbf16>
    %6 = vector.shape_cast %5 : vector<1x64x256xbf16> to vector<64x256xbf16>
    %cst = arith.constant dense<0.000000e+00> : vector<144x256xf32>
    %7 = tpu.matmul %4, %6, %cst {dimension_numbers = #tpu.dot_dimension_numbers<[1], [0], [0], [1], [0, 0, 1, 1], [], []>} : vector<144x64xbf16>, vector<64x256xbf16>, vector<144x256xf32> -> vector<144x256xf32>
    %c0_7 = arith.constant 0 : index
    %c0_8 = arith.constant 0 : index
    %8 = vector.load %arg5[%c0_7, %c0_8] : memref<1x256xf32, #tpu.memory_space<vmem>>, vector<1x256xf32>
    %9 = vector.broadcast %8 : vector<1x256xf32> to vector<144x256xf32>
    %10 = arith.addf %7, %9 : vector<144x256xf32>
    %c0_9 = arith.constant 0 : index
    %c0_10 = arith.constant 0 : index
    %11 = vector.load %arg8[%c0_9, %c0_10] : memref<144x256xf32, #tpu.memory_space<vmem>>, vector<144x256xf32>
    tpu.vector_store %arg8[%c0_9, %c0_10], %10 {strides = array<i32>} : memref<144x256xf32, #tpu.memory_space<vmem>>, vector<144x256xf32>,
    %c1 = arith.constant 1 : index
    %c0_11 = arith.constant 0 : index
    %c0_12 = arith.constant 0 : index
    %12 = vector.load %arg3[%c1, %c0_11, %c0_12] : memref<3x64x256xbf16, #tpu.memory_space<vmem>>, vector<1x64x256xbf16>
    %13 = vector.shape_cast %12 : vector<1x64x256xbf16> to vector<64x256xbf16>
    %cst_13 = arith.constant dense<0.000000e+00> : vector<144x256xf32>
    %14 = tpu.matmul %4, %13, %cst_13 {dimension_numbers = #tpu.dot_dimension_numbers<[1], [0], [0], [1], [0, 0, 1, 1], [], []>} : vector<144x64xbf16>, vector<64x256xbf16>, vector<144x256xf32> -> vector<144x256xf32>
    %c0_14 = arith.constant 0 : index
    %c0_15 = arith.constant 0 : index
    %15 = vector.load %arg8[%c0_14, %c0_15] : memref<144x256xf32, #tpu.memory_space<vmem>>, vector<142x256xf32>
    %16 = vector.extract_strided_slice %14 {offsets = [1, 0], sizes = [142, 256], strides = [1, 1]} : vector<144x256xf32> to vector<142x256xf32>
    %17 = arith.addf %15, %16 : vector<142x256xf32>
    %c0_16 = arith.constant 0 : index
    %c0_17 = arith.constant 0 : index
    %18 = vector.load %arg8[%c0_16, %c0_17] : memref<144x256xf32, #tpu.memory_space<vmem>>, vector<142x256xf32>
    tpu.vector_store %arg8[%c0_16, %c0_17], %17 {strides = array<i32>} : memref<144x256xf32, #tpu.memory_space<vmem>>, vector<142x256xf32>,
    %c2 = arith.constant 2 : index
    %c0_18 = arith.constant 0 : index
    %c0_19 = arith.constant 0 : index
    %19 = vector.load %arg3[%c2, %c0_18, %c0_19] : memref<3x64x256xbf16, #tpu.memory_space<vmem>>, vector<1x64x256xbf16>
    %20 = vector.shape_cast %19 : vector<1x64x256xbf16> to vector<64x256xbf16>
    %cst_20 = arith.constant dense<0.000000e+00> : vector<144x256xf32>
    %21 = tpu.matmul %4, %20, %cst_20 {dimension_numbers = #tpu.dot_dimension_numbers<[1], [0], [0], [1], [0, 0, 1, 1], [], []>} : vector<144x64xbf16>, vector<64x256xbf16>, vector<144x256xf32> -> vector<144x256xf32>
    %c0_21 = arith.constant 0 : index
    %c0_22 = arith.constant 0 : index
    %22 = vector.load %arg8[%c0_21, %c0_22] : memref<144x256xf32, #tpu.memory_space<vmem>>, vector<142x256xf32>
    %23 = vector.extract_strided_slice %21 {offsets = [2, 0], sizes = [142, 256], strides = [1, 1]} : vector<144x256xf32> to vector<142x256xf32>
    %24 = arith.addf %22, %23 : vector<142x256xf32>
    %c0_23 = arith.constant 0 : index
    %c0_24 = arith.constant 0 : index
    %25 = vector.load %arg8[%c0_23, %c0_24] : memref<144x256xf32, #tpu.memory_space<vmem>>, vector<142x256xf32>
    tpu.vector_store %arg8[%c0_23, %c0_24], %24 {strides = array<i32>} : memref<144x256xf32, #tpu.memory_space<vmem>>, vector<142x256xf32>,
    %c0_25 = arith.constant 0 : index
    %c0_26 = arith.constant 0 : index
    %26 = vector.load %arg9[%c0_25, %c0_26] : memref<18x128xbf16, #tpu.memory_space<vmem>>, vector<16x128xbf16>
    %c0_27 = arith.constant 0 : index
    %c0_28 = arith.constant 0 : index
    %c0_29 = arith.constant 0 : index
    %27 = vector.load %arg4[%c0_27, %c0_28, %c0_29] : memref<3x128x128xbf16, #tpu.memory_space<vmem>>, vector<1x128x128xbf16>
    %28 = vector.shape_cast %27 : vector<1x128x128xbf16> to vector<128x128xbf16>
    %cst_30 = arith.constant dense<0.000000e+00> : vector<16x128xf32>
    %29 = tpu.matmul %26, %28, %cst_30 {dimension_numbers = #tpu.dot_dimension_numbers<[1], [0], [0], [1], [0, 0, 1, 1], [], []>} : vector<16x128xbf16>, vector<128x128xbf16>, vector<16x128xf32> -> vector<16x128xf32>
    %c1_31 = arith.constant 1 : index
    %c0_32 = arith.constant 0 : index
    %30 = vector.load %arg9[%c1_31, %c0_32] : memref<18x128xbf16, #tpu.memory_space<vmem>>, vector<16x128xbf16>
    %c1_33 = arith.constant 1 : index
    %c0_34 = arith.constant 0 : index
    %c0_35 = arith.constant 0 : index
    %31 = vector.load %arg4[%c1_33, %c0_34, %c0_35] : memref<3x128x128xbf16, #tpu.memory_space<vmem>>, vector<1x128x128xbf16>
    %32 = vector.shape_cast %31 : vector<1x128x128xbf16> to vector<128x128xbf16>
    %cst_36 = arith.constant dense<0.000000e+00> : vector<16x128xf32>
    %33 = tpu.matmul %30, %32, %cst_36 {dimension_numbers = #tpu.dot_dimension_numbers<[1], [0], [0], [1], [0, 0, 1, 1], [], []>} : vector<16x128xbf16>, vector<128x128xbf16>, vector<16x128xf32> -> vector<16x128xf32>
    %34 = arith.addf %29, %33 : vector<16x128xf32>
    %c2_37 = arith.constant 2 : index
    %c0_38 = arith.constant 0 : index
    %35 = vector.load %arg9[%c2_37, %c0_38] : memref<18x128xbf16, #tpu.memory_space<vmem>>, vector<16x128xbf16>
    %c2_39 = arith.constant 2 : index
    %c0_40 = arith.constant 0 : index
    %c0_41 = arith.constant 0 : index
    %36 = vector.load %arg4[%c2_39, %c0_40, %c0_41] : memref<3x128x128xbf16, #tpu.memory_space<vmem>>, vector<1x128x128xbf16>
    %37 = vector.shape_cast %36 : vector<1x128x128xbf16> to vector<128x128xbf16>
    %cst_42 = arith.constant dense<0.000000e+00> : vector<16x128xf32>
    %38 = tpu.matmul %35, %37, %cst_42 {dimension_numbers = #tpu.dot_dimension_numbers<[1], [0], [0], [1], [0, 0, 1, 1], [], []>} : vector<16x128xbf16>, vector<128x128xbf16>, vector<16x128xf32> -> vector<16x128xf32>
    %39 = arith.addf %34, %38 : vector<16x128xf32>
    %c0_43 = arith.constant 0 : index
    %c0_44 = arith.constant 0 : index
    %40 = vector.load %arg8[%c0_43, %c0_44] : memref<144x256xf32, #tpu.memory_space<vmem>>, vector<16x256xf32>
    %41 = vector.extract_strided_slice %40 {offsets = [0, 0], sizes = [16, 128], strides = [1, 1]} : vector<16x256xf32> to vector<16x128xf32>
    %42 = math.tanh %41 : vector<16x128xf32>
    %43 = vector.extract_strided_slice %40 {offsets = [0, 128], sizes = [16, 128], strides = [1, 1]} : vector<16x256xf32> to vector<16x128xf32>
    %44 = arith.addf %43, %39 : vector<16x128xf32>
    %45 = arith.negf %44 : vector<16x128xf32>
    %46 = math.exp %45 : vector<16x128xf32>
    %cst_45 = arith.constant 1.000000e+00 : f32
    %47 = vector.broadcast %cst_45 : f32 to vector<16x128xf32>
    %48 = arith.addf %47, %46 : vector<16x128xf32>
    %49 = arith.divf %47, %48 : vector<16x128xf32>
    %50 = arith.mulf %49, %42 : vector<16x128xf32>
    %51 = arith.truncf %50 : vector<16x128xf32> to vector<16x128xbf16>
    %c0_46 = arith.constant 0 : index
    %c0_47 = arith.constant 0 : index
    %c0_48 = arith.constant 0 : index
    %c0_49 = arith.constant 0 : index
    %52 = vector.load %arg6[%c0_46, %c0_47, %c0_48, %c0_49] : memref<1x1x128x128xbf16, #tpu.memory_space<vmem>>, vector<1x1x16x128xbf16>
    %53 = vector.shape_cast %52 : vector<1x1x16x128xbf16> to vector<16x128xbf16>
    %54 = vector.shape_cast %51 : vector<16x128xbf16> to vector<1x1x16x128xbf16>
    tpu.vector_store %arg6[%c0_46, %c0_47, %c0_48, %c0_49], %54 {strides = array<i32>} : memref<1x1x128x128xbf16, #tpu.memory_space<vmem>>, vector<1x1x16x128xbf16>,
    %55 = arith.truncf %49 : vector<16x128xf32> to vector<16x128xbf16>
    %c1_50 = arith.constant 1 : index
    %c0_51 = arith.constant 0 : index
    %56 = vector.load %arg9[%c1_50, %c0_51] : memref<18x128xbf16, #tpu.memory_space<vmem>>, vector<16x128xbf16>
    tpu.vector_store %arg9[%c1_50, %c0_51], %55 {strides = array<i32>} : memref<18x128xbf16, #tpu.memory_space<vmem>>, vector<16x128xbf16>,
    %c0_52 = arith.constant 0 : index
    %c0_53 = arith.constant 0 : index
    %57 = vector.load %arg9[%c0_52, %c0_53] : memref<18x128xbf16, #tpu.memory_space<vmem>>, vector<16x128xbf16>
    %c0_54 = arith.constant 0 : index
    %c0_55 = arith.constant 0 : index
    %c0_56 = arith.constant 0 : index
    %58 = vector.load %arg4[%c0_54, %c0_55, %c0_56] : memref<3x128x128xbf16, #tpu.memory_space<vmem>>, vector<1x128x128xbf16>
    %59 = vector.shape_cast %58 : vector<1x128x128xbf16> to vector<128x128xbf16>
    %cst_57 = arith.constant dense<0.000000e+00> : vector<16x128xf32>
    %60 = tpu.matmul %57, %59, %cst_57 {dimension_numbers = #tpu.dot_dimension_numbers<[1], [0], [0], [1], [0, 0, 1, 1], [], []>} : vector<16x128xbf16>, vector<128x128xbf16>, vector<16x128xf32> -> vector<16x128xf32>
    %c1_58 = arith.constant 1 : index
    %c0_59 = arith.constant 0 : index
    %61 = vector.load %arg9[%c1_58, %c0_59] : memref<18x128xbf16, #tpu.memory_space<vmem>>, vector<16x128xbf16>
    %c1_60 = arith.constant 1 : index
    %c0_61 = arith.constant 0 : index
    %c0_62 = arith.constant 0 : index
    %62 = vector.load %arg4[%c1_60, %c0_61, %c0_62] : memref<3x128x128xbf16, #tpu.memory_space<vmem>>, vector<1x128x128xbf16>
    %63 = vector.shape_cast %62 : vector<1x128x128xbf16> to vector<128x128xbf16>
    %cst_63 = arith.constant dense<0.000000e+00> : vector<16x128xf32>
    %64 = tpu.matmul %61, %63, %cst_63 {dimension_numbers = #tpu.dot_dimension_numbers<[1], [0], [0], [1], [0, 0, 1, 1], [], []>} : vector<16x128xbf16>, vector<128x128xbf16>, vector<16x128xf32> -> vector<16x128xf32>
    %65 = arith.addf %60, %64 : vector<16x128xf32>
    %c2_64 = arith.constant 2 : index
    %c0_65 = arith.constant 0 : index
    %66 = vector.load %arg9[%c2_64, %c0_65] : memref<18x128xbf16, #tpu.memory_space<vmem>>, vector<16x128xbf16>
    %c2_66 = arith.constant 2 : index
    %c0_67 = arith.constant 0 : index
    %c0_68 = arith.constant 0 : index
    %67 = vector.load %arg4[%c2_66, %c0_67, %c0_68] : memref<3x128x128xbf16, #tpu.memory_space<vmem>>, vector<1x128x128xbf16>
    %68 = vector.shape_cast %67 : vector<1x128x128xbf16> to vector<128x128xbf16>
    %cst_69 = arith.constant dense<0.000000e+00> : vector<16x128xf32>
    %69 = tpu.matmul %66, %68, %cst_69 {dimension_numbers = #tpu.dot_dimension_numbers<[1], [0], [0], [1], [0, 0, 1, 1], [], []>} : vector<16x128xbf16>, vector<128x128xbf16>, vector<16x128xf32> -> vector<16x128xf32>
    %70 = arith.addf %65, %69 : vector<16x128xf32>
    %c18 = arith.constant 18 : index
    %c0_70 = arith.constant 0 : index
    %71 = vector.load %arg8[%c18, %c0_70] : memref<144x256xf32, #tpu.memory_space<vmem>>, vector<16x256xf32>
    %72 = vector.extract_strided_slice %71 {offsets = [0, 0], sizes = [16, 128], strides = [1, 1]} : vector<16x256xf32> to vector<16x128xf32>
    %73 = math.tanh %72 : vector<16x128xf32>
    %74 = vector.extract_strided_slice %71 {offsets = [0, 128], sizes = [16, 128], strides = [1, 1]} : vector<16x256xf32> to vector<16x128xf32>
    %75 = arith.addf %74, %70 : vector<16x128xf32>
    %76 = arith.negf %75 : vector<16x128xf32>
    %77 = math.exp %76 : vector<16x128xf32>
    %cst_71 = arith.constant 1.000000e+00 : f32
    %78 = vector.broadcast %cst_71 : f32 to vector<16x128xf32>
    %79 = arith.addf %78, %77 : vector<16x128xf32>
    %80 = arith.divf %78, %79 : vector<16x128xf32>
    %81 = arith.mulf %80, %73 : vector<16x128xf32>
    %82 = arith.truncf %81 : vector<16x128xf32> to vector<16x128xbf16>
    %c0_72 = arith.constant 0 : index
    %c0_73 = arith.constant 0 : index
    %c16 = arith.constant 16 : index
    %c0_74 = arith.constant 0 : index
    %83 = vector.load %arg6[%c0_72, %c0_73, %c16, %c0_74] : memref<1x1x128x128xbf16, #tpu.memory_space<vmem>>, vector<1x1x16x128xbf16>
    %84 = vector.shape_cast %83 : vector<1x1x16x128xbf16> to vector<16x128xbf16>
    %85 = vector.shape_cast %82 : vector<16x128xbf16> to vector<1x1x16x128xbf16>
    tpu.vector_store %arg6[%c0_72, %c0_73, %c16, %c0_74], %85 {strides = array<i32>} : memref<1x1x128x128xbf16, #tpu.memory_space<vmem>>, vector<1x1x16x128xbf16>,
    %86 = arith.truncf %80 : vector<16x128xf32> to vector<16x128xbf16>
    %c1_75 = arith.constant 1 : index
    %c0_76 = arith.constant 0 : index
    %87 = vector.load %arg9[%c1_75, %c0_76] : memref<18x128xbf16, #tpu.memory_space<vmem>>, vector<16x128xbf16>
    tpu.vector_store %arg9[%c1_75, %c0_76], %86 {strides = array<i32>} : memref<18x128xbf16, #tpu.memory_space<vmem>>, vector<16x128xbf16>,
    %c0_77 = arith.constant 0 : index
    %c0_78 = arith.constant 0 : index
    %88 = vector.load %arg9[%c0_77, %c0_78] : memref<18x128xbf16, #tpu.memory_space<vmem>>, vector<16x128xbf16>
    %c0_79 = arith.constant 0 : index
    %c0_80 = arith.constant 0 : index
    %c0_81 = arith.constant 0 : index
    %89 = vector.load %arg4[%c0_79, %c0_80, %c0_81] : memref<3x128x128xbf16, #tpu.memory_space<vmem>>, vector<1x128x128xbf16>
    %90 = vector.shape_cast %89 : vector<1x128x128xbf16> to vector<128x128xbf16>
    %cst_82 = arith.constant dense<0.000000e+00> : vector<16x128xf32>
    %91 = tpu.matmul %88, %90, %cst_82 {dimension_numbers = #tpu.dot_dimension_numbers<[1], [0], [0], [1], [0, 0, 1, 1], [], []>} : vector<16x128xbf16>, vector<128x128xbf16>, vector<16x128xf32> -> vector<16x128xf32>
    %c1_83 = arith.constant 1 : index
    %c0_84 = arith.constant 0 : index
    %92 = vector.load %arg9[%c1_83, %c0_84] : memref<18x128xbf16, #tpu.memory_space<vmem>>, vector<16x128xbf16>
    %c1_85 = arith.constant 1 : index
    %c0_86 = arith.constant 0 : index
    %c0_87 = arith.constant 0 : index
    %93 = vector.load %arg4[%c1_85, %c0_86, %c0_87] : memref<3x128x128xbf16, #tpu.memory_space<vmem>>, vector<1x128x128xbf16>
    %94 = vector.shape_cast %93 : vector<1x128x128xbf16> to vector<128x128xbf16>
    %cst_88 = arith.constant dense<0.000000e+00> : vector<16x128xf32>
    %95 = tpu.matmul %92, %94, %cst_88 {dimension_numbers = #tpu.dot_dimension_numbers<[1], [0], [0], [1], [0, 0, 1, 1], [], []>} : vector<16x128xbf16>, vector<128x128xbf16>, vector<16x128xf32> -> vector<16x128xf32>
    %96 = arith.addf %91, %95 : vector<16x128xf32>
    %c2_89 = arith.constant 2 : index
    %c0_90 = arith.constant 0 : index
    %97 = vector.load %arg9[%c2_89, %c0_90] : memref<18x128xbf16, #tpu.memory_space<vmem>>, vector<16x128xbf16>
    %c2_91 = arith.constant 2 : index
    %c0_92 = arith.constant 0 : index
    %c0_93 = arith.constant 0 : index
    %98 = vector.load %arg4[%c2_91, %c0_92, %c0_93] : memref<3x128x128xbf16, #tpu.memory_space<vmem>>, vector<1x128x128xbf16>
    %99 = vector.shape_cast %98 : vector<1x128x128xbf16> to vector<128x128xbf16>
    %cst_94 = arith.constant dense<0.000000e+00> : vector<16x128xf32>
    %100 = tpu.matmul %97, %99, %cst_94 {dimension_numbers = #tpu.dot_dimension_numbers<[1], [0], [0], [1], [0, 0, 1, 1], [], []>} : vector<16x128xbf16>, vector<128x128xbf16>, vector<16x128xf32> -> vector<16x128xf32>
    %101 = arith.addf %96, %100 : vector<16x128xf32>
    %c36 = arith.constant 36 : index
    %c0_95 = arith.constant 0 : index
    %102 = vector.load %arg8[%c36, %c0_95] : memref<144x256xf32, #tpu.memory_space<vmem>>, vector<16x256xf32>
    %103 = vector.extract_strided_slice %102 {offsets = [0, 0], sizes = [16, 128], strides = [1, 1]} : vector<16x256xf32> to vector<16x128xf32>
    %104 = math.tanh %103 : vector<16x128xf32>
    %105 = vector.extract_strided_slice %102 {offsets = [0, 128], sizes = [16, 128], strides = [1, 1]} : vector<16x256xf32> to vector<16x128xf32>
    %106 = arith.addf %105, %101 : vector<16x128xf32>
    %107 = arith.negf %106 : vector<16x128xf32>
    %108 = math.exp %107 : vector<16x128xf32>
    %cst_96 = arith.constant 1.000000e+00 : f32
    %109 = vector.broadcast %cst_96 : f32 to vector<16x128xf32>
    %110 = arith.addf %109, %108 : vector<16x128xf32>
    %111 = arith.divf %109, %110 : vector<16x128xf32>
    %112 = arith.mulf %111, %104 : vector<16x128xf32>
    %113 = arith.truncf %112 : vector<16x128xf32> to vector<16x128xbf16>
    %c0_97 = arith.constant 0 : index
    %c0_98 = arith.constant 0 : index
    %c32 = arith.constant 32 : index
    %c0_99 = arith.constant 0 : index
    %114 = vector.load %arg6[%c0_97, %c0_98, %c32, %c0_99] : memref<1x1x128x128xbf16, #tpu.memory_space<vmem>>, vector<1x1x16x128xbf16>
    %115 = vector.shape_cast %114 : vector<1x1x16x128xbf16> to vector<16x128xbf16>
    %116 = vector.shape_cast %113 : vector<16x128xbf16> to vector<1x1x16x128xbf16>
    tpu.vector_store %arg6[%c0_97, %c0_98, %c32, %c0_99], %116 {strides = array<i32>} : memref<1x1x128x128xbf16, #tpu.memory_space<vmem>>, vector<1x1x16x128xbf16>,
    %117 = arith.truncf %111 : vector<16x128xf32> to vector<16x128xbf16>
    %c1_100 = arith.constant 1 : index
    %c0_101 = arith.constant 0 : index
    %118 = vector.load %arg9[%c1_100, %c0_101] : memref<18x128xbf16, #tpu.memory_space<vmem>>, vector<16x128xbf16>
    tpu.vector_store %arg9[%c1_100, %c0_101], %117 {strides = array<i32>} : memref<18x128xbf16, #tpu.memory_space<vmem>>, vector<16x128xbf16>,
    %c0_102 = arith.constant 0 : index
    %c0_103 = arith.constant 0 : index
    %119 = vector.load %arg9[%c0_102, %c0_103] : memref<18x128xbf16, #tpu.memory_space<vmem>>, vector<16x128xbf16>
    %c0_104 = arith.constant 0 : index
    %c0_105 = arith.constant 0 : index
    %c0_106 = arith.constant 0 : index
    %120 = vector.load %arg4[%c0_104, %c0_105, %c0_106] : memref<3x128x128xbf16, #tpu.memory_space<vmem>>, vector<1x128x128xbf16>
    %121 = vector.shape_cast %120 : vector<1x128x128xbf16> to vector<128x128xbf16>
    %cst_107 = arith.constant dense<0.000000e+00> : vector<16x128xf32>
    %122 = tpu.matmul %119, %121, %cst_107 {dimension_numbers = #tpu.dot_dimension_numbers<[1], [0], [0], [1], [0, 0, 1, 1], [], []>} : vector<16x128xbf16>, vector<128x128xbf16>, vector<16x128xf32> -> vector<16x128xf32>
    %c1_108 = arith.constant 1 : index
    %c0_109 = arith.constant 0 : index
    %123 = vector.load %arg9[%c1_108, %c0_109] : memref<18x128xbf16, #tpu.memory_space<vmem>>, vector<16x128xbf16>
    %c1_110 = arith.constant 1 : index
    %c0_111 = arith.constant 0 : index
    %c0_112 = arith.constant 0 : index
    %124 = vector.load %arg4[%c1_110, %c0_111, %c0_112] : memref<3x128x128xbf16, #tpu.memory_space<vmem>>, vector<1x128x128xbf16>
    %125 = vector.shape_cast %124 : vector<1x128x128xbf16> to vector<128x128xbf16>
    %cst_113 = arith.constant dense<0.000000e+00> : vector<16x128xf32>
    %126 = tpu.matmul %123, %125, %cst_113 {dimension_numbers = #tpu.dot_dimension_numbers<[1], [0], [0], [1], [0, 0, 1, 1], [], []>} : vector<16x128xbf16>, vector<128x128xbf16>, vector<16x128xf32> -> vector<16x128xf32>
    %127 = arith.addf %122, %126 : vector<16x128xf32>
    %c2_114 = arith.constant 2 : index
    %c0_115 = arith.constant 0 : index
    %128 = vector.load %arg9[%c2_114, %c0_115] : memref<18x128xbf16, #tpu.memory_space<vmem>>, vector<16x128xbf16>
    %c2_116 = arith.constant 2 : index
    %c0_117 = arith.constant 0 : index
    %c0_118 = arith.constant 0 : index
    %129 = vector.load %arg4[%c2_116, %c0_117, %c0_118] : memref<3x128x128xbf16, #tpu.memory_space<vmem>>, vector<1x128x128xbf16>
    %130 = vector.shape_cast %129 : vector<1x128x128xbf16> to vector<128x128xbf16>
    %cst_119 = arith.constant dense<0.000000e+00> : vector<16x128xf32>
    %131 = tpu.matmul %128, %130, %cst_119 {dimension_numbers = #tpu.dot_dimension_numbers<[1], [0], [0], [1], [0, 0, 1, 1], [], []>} : vector<16x128xbf16>, vector<128x128xbf16>, vector<16x128xf32> -> vector<16x128xf32>
    %132 = arith.addf %127, %131 : vector<16x128xf32>
    %c54 = arith.constant 54 : index
    %c0_120 = arith.constant 0 : index
    %133 = vector.load %arg8[%c54, %c0_120] : memref<144x256xf32, #tpu.memory_space<vmem>>, vector<16x256xf32>
    %134 = vector.extract_strided_slice %133 {offsets = [0, 0], sizes = [16, 128], strides = [1, 1]} : vector<16x256xf32> to vector<16x128xf32>
    %135 = math.tanh %134 : vector<16x128xf32>
    %136 = vector.extract_strided_slice %133 {offsets = [0, 128], sizes = [16, 128], strides = [1, 1]} : vector<16x256xf32> to vector<16x128xf32>
    %137 = arith.addf %136, %132 : vector<16x128xf32>
    %138 = arith.negf %137 : vector<16x128xf32>
    %139 = math.exp %138 : vector<16x128xf32>
    %cst_121 = arith.constant 1.000000e+00 : f32
    %140 = vector.broadcast %cst_121 : f32 to vector<16x128xf32>
    %141 = arith.addf %140, %139 : vector<16x128xf32>
    %142 = arith.divf %140, %141 : vector<16x128xf32>
    %143 = arith.mulf %142, %135 : vector<16x128xf32>
    %144 = arith.truncf %143 : vector<16x128xf32> to vector<16x128xbf16>
    %c0_122 = arith.constant 0 : index
    %c0_123 = arith.constant 0 : index
    %c48 = arith.constant 48 : index
    %c0_124 = arith.constant 0 : index
    %145 = vector.load %arg6[%c0_122, %c0_123, %c48, %c0_124] : memref<1x1x128x128xbf16, #tpu.memory_space<vmem>>, vector<1x1x16x128xbf16>
    %146 = vector.shape_cast %145 : vector<1x1x16x128xbf16> to vector<16x128xbf16>
    %147 = vector.shape_cast %144 : vector<16x128xbf16> to vector<1x1x16x128xbf16>
    tpu.vector_store %arg6[%c0_122, %c0_123, %c48, %c0_124], %147 {strides = array<i32>} : memref<1x1x128x128xbf16, #tpu.memory_space<vmem>>, vector<1x1x16x128xbf16>,
    %148 = arith.truncf %142 : vector<16x128xf32> to vector<16x128xbf16>
    %c1_125 = arith.constant 1 : index
    %c0_126 = arith.constant 0 : index
    %149 = vector.load %arg9[%c1_125, %c0_126] : memref<18x128xbf16, #tpu.memory_space<vmem>>, vector<16x128xbf16>
    tpu.vector_store %arg9[%c1_125, %c0_126], %148 {strides = array<i32>} : memref<18x128xbf16, #tpu.memory_space<vmem>>, vector<16x128xbf16>,
    %c0_127 = arith.constant 0 : index
    %c0_128 = arith.constant 0 : index
    %150 = vector.load %arg9[%c0_127, %c0_128] : memref<18x128xbf16, #tpu.memory_space<vmem>>, vector<16x128xbf16>
    %c0_129 = arith.constant 0 : index
    %c0_130 = arith.constant 0 : index
    %c0_131 = arith.constant 0 : index
    %151 = vector.load %arg4[%c0_129, %c0_130, %c0_131] : memref<3x128x128xbf16, #tpu.memory_space<vmem>>, vector<1x128x128xbf16>
    %152 = vector.shape_cast %151 : vector<1x128x128xbf16> to vector<128x128xbf16>
    %cst_132 = arith.constant dense<0.000000e+00> : vector<16x128xf32>
    %153 = tpu.matmul %150, %152, %cst_132 {dimension_numbers = #tpu.dot_dimension_numbers<[1], [0], [0], [1], [0, 0, 1, 1], [], []>} : vector<16x128xbf16>, vector<128x128xbf16>, vector<16x128xf32> -> vector<16x128xf32>
    %c1_133 = arith.constant 1 : index
    %c0_134 = arith.constant 0 : index
    %154 = vector.load %arg9[%c1_133, %c0_134] : memref<18x128xbf16, #tpu.memory_space<vmem>>, vector<16x128xbf16>
    %c1_135 = arith.constant 1 : index
    %c0_136 = arith.constant 0 : index
    %c0_137 = arith.constant 0 : index
    %155 = vector.load %arg4[%c1_135, %c0_136, %c0_137] : memref<3x128x128xbf16, #tpu.memory_space<vmem>>, vector<1x128x128xbf16>
    %156 = vector.shape_cast %155 : vector<1x128x128xbf16> to vector<128x128xbf16>
    %cst_138 = arith.constant dense<0.000000e+00> : vector<16x128xf32>
    %157 = tpu.matmul %154, %156, %cst_138 {dimension_numbers = #tpu.dot_dimension_numbers<[1], [0], [0], [1], [0, 0, 1, 1], [], []>} : vector<16x128xbf16>, vector<128x128xbf16>, vector<16x128xf32> -> vector<16x128xf32>
    %158 = arith.addf %153, %157 : vector<16x128xf32>
    %c2_139 = arith.constant 2 : index
    %c0_140 = arith.constant 0 : index
    %159 = vector.load %arg9[%c2_139, %c0_140] : memref<18x128xbf16, #tpu.memory_space<vmem>>, vector<16x128xbf16>
    %c2_141 = arith.constant 2 : index
    %c0_142 = arith.constant 0 : index
    %c0_143 = arith.constant 0 : index
    %160 = vector.load %arg4[%c2_141, %c0_142, %c0_143] : memref<3x128x128xbf16, #tpu.memory_space<vmem>>, vector<1x128x128xbf16>
    %161 = vector.shape_cast %160 : vector<1x128x128xbf16> to vector<128x128xbf16>
    %cst_144 = arith.constant dense<0.000000e+00> : vector<16x128xf32>
    %162 = tpu.matmul %159, %161, %cst_144 {dimension_numbers = #tpu.dot_dimension_numbers<[1], [0], [0], [1], [0, 0, 1, 1], [], []>} : vector<16x128xbf16>, vector<128x128xbf16>, vector<16x128xf32> -> vector<16x128xf32>
    %163 = arith.addf %158, %162 : vector<16x128xf32>
    %c72 = arith.constant 72 : index
    %c0_145 = arith.constant 0 : index
    %164 = vector.load %arg8[%c72, %c0_145] : memref<144x256xf32, #tpu.memory_space<vmem>>, vector<16x256xf32>
    %165 = vector.extract_strided_slice %164 {offsets = [0, 0], sizes = [16, 128], strides = [1, 1]} : vector<16x256xf32> to vector<16x128xf32>
    %166 = math.tanh %165 : vector<16x128xf32>
    %167 = vector.extract_strided_slice %164 {offsets = [0, 128], sizes = [16, 128], strides = [1, 1]} : vector<16x256xf32> to vector<16x128xf32>
    %168 = arith.addf %167, %163 : vector<16x128xf32>
    %169 = arith.negf %168 : vector<16x128xf32>
    %170 = math.exp %169 : vector<16x128xf32>
    %cst_146 = arith.constant 1.000000e+00 : f32
    %171 = vector.broadcast %cst_146 : f32 to vector<16x128xf32>
    %172 = arith.addf %171, %170 : vector<16x128xf32>
    %173 = arith.divf %171, %172 : vector<16x128xf32>
    %174 = arith.mulf %173, %166 : vector<16x128xf32>
    %175 = arith.truncf %174 : vector<16x128xf32> to vector<16x128xbf16>
    %c0_147 = arith.constant 0 : index
    %c0_148 = arith.constant 0 : index
    %c64 = arith.constant 64 : index
    %c0_149 = arith.constant 0 : index
    %176 = vector.load %arg6[%c0_147, %c0_148, %c64, %c0_149] : memref<1x1x128x128xbf16, #tpu.memory_space<vmem>>, vector<1x1x16x128xbf16>
    %177 = vector.shape_cast %176 : vector<1x1x16x128xbf16> to vector<16x128xbf16>
    %178 = vector.shape_cast %175 : vector<16x128xbf16> to vector<1x1x16x128xbf16>
    tpu.vector_store %arg6[%c0_147, %c0_148, %c64, %c0_149], %178 {strides = array<i32>} : memref<1x1x128x128xbf16, #tpu.memory_space<vmem>>, vector<1x1x16x128xbf16>,
    %179 = arith.truncf %173 : vector<16x128xf32> to vector<16x128xbf16>
    %c1_150 = arith.constant 1 : index
    %c0_151 = arith.constant 0 : index
    %180 = vector.load %arg9[%c1_150, %c0_151] : memref<18x128xbf16, #tpu.memory_space<vmem>>, vector<16x128xbf16>
    tpu.vector_store %arg9[%c1_150, %c0_151], %179 {strides = array<i32>} : memref<18x128xbf16, #tpu.memory_space<vmem>>, vector<16x128xbf16>,
    %c0_152 = arith.constant 0 : index
    %c0_153 = arith.constant 0 : index
    %181 = vector.load %arg9[%c0_152, %c0_153] : memref<18x128xbf16, #tpu.memory_space<vmem>>, vector<16x128xbf16>
    %c0_154 = arith.constant 0 : index
    %c0_155 = arith.constant 0 : index
    %c0_156 = arith.constant 0 : index
    %182 = vector.load %arg4[%c0_154, %c0_155, %c0_156] : memref<3x128x128xbf16, #tpu.memory_space<vmem>>, vector<1x128x128xbf16>
    %183 = vector.shape_cast %182 : vector<1x128x128xbf16> to vector<128x128xbf16>
    %cst_157 = arith.constant dense<0.000000e+00> : vector<16x128xf32>
    %184 = tpu.matmul %181, %183, %cst_157 {dimension_numbers = #tpu.dot_dimension_numbers<[1], [0], [0], [1], [0, 0, 1, 1], [], []>} : vector<16x128xbf16>, vector<128x128xbf16>, vector<16x128xf32> -> vector<16x128xf32>
    %c1_158 = arith.constant 1 : index
    %c0_159 = arith.constant 0 : index
    %185 = vector.load %arg9[%c1_158, %c0_159] : memref<18x128xbf16, #tpu.memory_space<vmem>>, vector<16x128xbf16>
    %c1_160 = arith.constant 1 : index
    %c0_161 = arith.constant 0 : index
    %c0_162 = arith.constant 0 : index
    %186 = vector.load %arg4[%c1_160, %c0_161, %c0_162] : memref<3x128x128xbf16, #tpu.memory_space<vmem>>, vector<1x128x128xbf16>
    %187 = vector.shape_cast %186 : vector<1x128x128xbf16> to vector<128x128xbf16>
    %cst_163 = arith.constant dense<0.000000e+00> : vector<16x128xf32>
    %188 = tpu.matmul %185, %187, %cst_163 {dimension_numbers = #tpu.dot_dimension_numbers<[1], [0], [0], [1], [0, 0, 1, 1], [], []>} : vector<16x128xbf16>, vector<128x128xbf16>, vector<16x128xf32> -> vector<16x128xf32>
    %189 = arith.addf %184, %188 : vector<16x128xf32>
    %c2_164 = arith.constant 2 : index
    %c0_165 = arith.constant 0 : index
    %190 = vector.load %arg9[%c2_164, %c0_165] : memref<18x128xbf16, #tpu.memory_space<vmem>>, vector<16x128xbf16>
    %c2_166 = arith.constant 2 : index
    %c0_167 = arith.constant 0 : index
    %c0_168 = arith.constant 0 : index
    %191 = vector.load %arg4[%c2_166, %c0_167, %c0_168] : memref<3x128x128xbf16, #tpu.memory_space<vmem>>, vector<1x128x128xbf16>
    %192 = vector.shape_cast %191 : vector<1x128x128xbf16> to vector<128x128xbf16>
    %cst_169 = arith.constant dense<0.000000e+00> : vector<16x128xf32>
    %193 = tpu.matmul %190, %192, %cst_169 {dimension_numbers = #tpu.dot_dimension_numbers<[1], [0], [0], [1], [0, 0, 1, 1], [], []>} : vector<16x128xbf16>, vector<128x128xbf16>, vector<16x128xf32> -> vector<16x128xf32>
    %194 = arith.addf %189, %193 : vector<16x128xf32>
    %c90 = arith.constant 90 : index
    %c0_170 = arith.constant 0 : index
    %195 = vector.load %arg8[%c90, %c0_170] : memref<144x256xf32, #tpu.memory_space<vmem>>, vector<16x256xf32>
    %196 = vector.extract_strided_slice %195 {offsets = [0, 0], sizes = [16, 128], strides = [1, 1]} : vector<16x256xf32> to vector<16x128xf32>
    %197 = math.tanh %196 : vector<16x128xf32>
    %198 = vector.extract_strided_slice %195 {offsets = [0, 128], sizes = [16, 128], strides = [1, 1]} : vector<16x256xf32> to vector<16x128xf32>
    %199 = arith.addf %198, %194 : vector<16x128xf32>
    %200 = arith.negf %199 : vector<16x128xf32>
    %201 = math.exp %200 : vector<16x128xf32>
    %cst_171 = arith.constant 1.000000e+00 : f32
    %202 = vector.broadcast %cst_171 : f32 to vector<16x128xf32>
    %203 = arith.addf %202, %201 : vector<16x128xf32>
    %204 = arith.divf %202, %203 : vector<16x128xf32>
    %205 = arith.mulf %204, %197 : vector<16x128xf32>
    %206 = arith.truncf %205 : vector<16x128xf32> to vector<16x128xbf16>
    %c0_172 = arith.constant 0 : index
    %c0_173 = arith.constant 0 : index
    %c80 = arith.constant 80 : index
    %c0_174 = arith.constant 0 : index
    %207 = vector.load %arg6[%c0_172, %c0_173, %c80, %c0_174] : memref<1x1x128x128xbf16, #tpu.memory_space<vmem>>, vector<1x1x16x128xbf16>
    %208 = vector.shape_cast %207 : vector<1x1x16x128xbf16> to vector<16x128xbf16>
    %209 = vector.shape_cast %206 : vector<16x128xbf16> to vector<1x1x16x128xbf16>
    tpu.vector_store %arg6[%c0_172, %c0_173, %c80, %c0_174], %209 {strides = array<i32>} : memref<1x1x128x128xbf16, #tpu.memory_space<vmem>>, vector<1x1x16x128xbf16>,
    %210 = arith.truncf %204 : vector<16x128xf32> to vector<16x128xbf16>
    %c1_175 = arith.constant 1 : index
    %c0_176 = arith.constant 0 : index
    %211 = vector.load %arg9[%c1_175, %c0_176] : memref<18x128xbf16, #tpu.memory_space<vmem>>, vector<16x128xbf16>
    tpu.vector_store %arg9[%c1_175, %c0_176], %210 {strides = array<i32>} : memref<18x128xbf16, #tpu.memory_space<vmem>>, vector<16x128xbf16>,
    %c0_177 = arith.constant 0 : index
    %c0_178 = arith.constant 0 : index
    %212 = vector.load %arg9[%c0_177, %c0_178] : memref<18x128xbf16, #tpu.memory_space<vmem>>, vector<16x128xbf16>
    %c0_179 = arith.constant 0 : index
    %c0_180 = arith.constant 0 : index
    %c0_181 = arith.constant 0 : index
    %213 = vector.load %arg4[%c0_179, %c0_180, %c0_181] : memref<3x128x128xbf16, #tpu.memory_space<vmem>>, vector<1x128x128xbf16>
    %214 = vector.shape_cast %213 : vector<1x128x128xbf16> to vector<128x128xbf16>
    %cst_182 = arith.constant dense<0.000000e+00> : vector<16x128xf32>
    %215 = tpu.matmul %212, %214, %cst_182 {dimension_numbers = #tpu.dot_dimension_numbers<[1], [0], [0], [1], [0, 0, 1, 1], [], []>} : vector<16x128xbf16>, vector<128x128xbf16>, vector<16x128xf32> -> vector<16x128xf32>
    %c1_183 = arith.constant 1 : index
    %c0_184 = arith.constant 0 : index
    %216 = vector.load %arg9[%c1_183, %c0_184] : memref<18x128xbf16, #tpu.memory_space<vmem>>, vector<16x128xbf16>
    %c1_185 = arith.constant 1 : index
    %c0_186 = arith.constant 0 : index
    %c0_187 = arith.constant 0 : index
    %217 = vector.load %arg4[%c1_185, %c0_186, %c0_187] : memref<3x128x128xbf16, #tpu.memory_space<vmem>>, vector<1x128x128xbf16>
    %218 = vector.shape_cast %217 : vector<1x128x128xbf16> to vector<128x128xbf16>
    %cst_188 = arith.constant dense<0.000000e+00> : vector<16x128xf32>
    %219 = tpu.matmul %216, %218, %cst_188 {dimension_numbers = #tpu.dot_dimension_numbers<[1], [0], [0], [1], [0, 0, 1, 1], [], []>} : vector<16x128xbf16>, vector<128x128xbf16>, vector<16x128xf32> -> vector<16x128xf32>
    %220 = arith.addf %215, %219 : vector<16x128xf32>
    %c2_189 = arith.constant 2 : index
    %c0_190 = arith.constant 0 : index
    %221 = vector.load %arg9[%c2_189, %c0_190] : memref<18x128xbf16, #tpu.memory_space<vmem>>, vector<16x128xbf16>
    %c2_191 = arith.constant 2 : index
    %c0_192 = arith.constant 0 : index
    %c0_193 = arith.constant 0 : index
    %222 = vector.load %arg4[%c2_191, %c0_192, %c0_193] : memref<3x128x128xbf16, #tpu.memory_space<vmem>>, vector<1x128x128xbf16>
    %223 = vector.shape_cast %222 : vector<1x128x128xbf16> to vector<128x128xbf16>
    %cst_194 = arith.constant dense<0.000000e+00> : vector<16x128xf32>
    %224 = tpu.matmul %221, %223, %cst_194 {dimension_numbers = #tpu.dot_dimension_numbers<[1], [0], [0], [1], [0, 0, 1, 1], [], []>} : vector<16x128xbf16>, vector<128x128xbf16>, vector<16x128xf32> -> vector<16x128xf32>
    %225 = arith.addf %220, %224 : vector<16x128xf32>
    %c108 = arith.constant 108 : index
    %c0_195 = arith.constant 0 : index
    %226 = vector.load %arg8[%c108, %c0_195] : memref<144x256xf32, #tpu.memory_space<vmem>>, vector<16x256xf32>
    %227 = vector.extract_strided_slice %226 {offsets = [0, 0], sizes = [16, 128], strides = [1, 1]} : vector<16x256xf32> to vector<16x128xf32>
    %228 = math.tanh %227 : vector<16x128xf32>
    %229 = vector.extract_strided_slice %226 {offsets = [0, 128], sizes = [16, 128], strides = [1, 1]} : vector<16x256xf32> to vector<16x128xf32>
    %230 = arith.addf %229, %225 : vector<16x128xf32>
    %231 = arith.negf %230 : vector<16x128xf32>
    %232 = math.exp %231 : vector<16x128xf32>
    %cst_196 = arith.constant 1.000000e+00 : f32
    %233 = vector.broadcast %cst_196 : f32 to vector<16x128xf32>
    %234 = arith.addf %233, %232 : vector<16x128xf32>
    %235 = arith.divf %233, %234 : vector<16x128xf32>
    %236 = arith.mulf %235, %228 : vector<16x128xf32>
    %237 = arith.truncf %236 : vector<16x128xf32> to vector<16x128xbf16>
    %c0_197 = arith.constant 0 : index
    %c0_198 = arith.constant 0 : index
    %c96 = arith.constant 96 : index
    %c0_199 = arith.constant 0 : index
    %238 = vector.load %arg6[%c0_197, %c0_198, %c96, %c0_199] : memref<1x1x128x128xbf16, #tpu.memory_space<vmem>>, vector<1x1x16x128xbf16>
    %239 = vector.shape_cast %238 : vector<1x1x16x128xbf16> to vector<16x128xbf16>
    %240 = vector.shape_cast %237 : vector<16x128xbf16> to vector<1x1x16x128xbf16>
    tpu.vector_store %arg6[%c0_197, %c0_198, %c96, %c0_199], %240 {strides = array<i32>} : memref<1x1x128x128xbf16, #tpu.memory_space<vmem>>, vector<1x1x16x128xbf16>,
    %241 = arith.truncf %235 : vector<16x128xf32> to vector<16x128xbf16>
    %c1_200 = arith.constant 1 : index
    %c0_201 = arith.constant 0 : index
    %242 = vector.load %arg9[%c1_200, %c0_201] : memref<18x128xbf16, #tpu.memory_space<vmem>>, vector<16x128xbf16>
    tpu.vector_store %arg9[%c1_200, %c0_201], %241 {strides = array<i32>} : memref<18x128xbf16, #tpu.memory_space<vmem>>, vector<16x128xbf16>,
    %c0_202 = arith.constant 0 : index
    %c0_203 = arith.constant 0 : index
    %243 = vector.load %arg9[%c0_202, %c0_203] : memref<18x128xbf16, #tpu.memory_space<vmem>>, vector<16x128xbf16>
    %c0_204 = arith.constant 0 : index
    %c0_205 = arith.constant 0 : index
    %c0_206 = arith.constant 0 : index
    %244 = vector.load %arg4[%c0_204, %c0_205, %c0_206] : memref<3x128x128xbf16, #tpu.memory_space<vmem>>, vector<1x128x128xbf16>
    %245 = vector.shape_cast %244 : vector<1x128x128xbf16> to vector<128x128xbf16>
    %cst_207 = arith.constant dense<0.000000e+00> : vector<16x128xf32>
    %246 = tpu.matmul %243, %245, %cst_207 {dimension_numbers = #tpu.dot_dimension_numbers<[1], [0], [0], [1], [0, 0, 1, 1], [], []>} : vector<16x128xbf16>, vector<128x128xbf16>, vector<16x128xf32> -> vector<16x128xf32>
    %c1_208 = arith.constant 1 : index
    %c0_209 = arith.constant 0 : index
    %247 = vector.load %arg9[%c1_208, %c0_209] : memref<18x128xbf16, #tpu.memory_space<vmem>>, vector<16x128xbf16>
    %c1_210 = arith.constant 1 : index
    %c0_211 = arith.constant 0 : index
    %c0_212 = arith.constant 0 : index
    %248 = vector.load %arg4[%c1_210, %c0_211, %c0_212] : memref<3x128x128xbf16, #tpu.memory_space<vmem>>, vector<1x128x128xbf16>
    %249 = vector.shape_cast %248 : vector<1x128x128xbf16> to vector<128x128xbf16>
    %cst_213 = arith.constant dense<0.000000e+00> : vector<16x128xf32>
    %250 = tpu.matmul %247, %249, %cst_213 {dimension_numbers = #tpu.dot_dimension_numbers<[1], [0], [0], [1], [0, 0, 1, 1], [], []>} : vector<16x128xbf16>, vector<128x128xbf16>, vector<16x128xf32> -> vector<16x128xf32>
    %251 = arith.addf %246, %250 : vector<16x128xf32>
    %c2_214 = arith.constant 2 : index
    %c0_215 = arith.constant 0 : index
    %252 = vector.load %arg9[%c2_214, %c0_215] : memref<18x128xbf16, #tpu.memory_space<vmem>>, vector<16x128xbf16>
    %c2_216 = arith.constant 2 : index
    %c0_217 = arith.constant 0 : index
    %c0_218 = arith.constant 0 : index
    %253 = vector.load %arg4[%c2_216, %c0_217, %c0_218] : memref<3x128x128xbf16, #tpu.memory_space<vmem>>, vector<1x128x128xbf16>
    %254 = vector.shape_cast %253 : vector<1x128x128xbf16> to vector<128x128xbf16>
    %cst_219 = arith.constant dense<0.000000e+00> : vector<16x128xf32>
    %255 = tpu.matmul %252, %254, %cst_219 {dimension_numbers = #tpu.dot_dimension_numbers<[1], [0], [0], [1], [0, 0, 1, 1], [], []>} : vector<16x128xbf16>, vector<128x128xbf16>, vector<16x128xf32> -> vector<16x128xf32>
    %256 = arith.addf %251, %255 : vector<16x128xf32>
    %c126 = arith.constant 126 : index
    %c0_220 = arith.constant 0 : index
    %257 = vector.load %arg8[%c126, %c0_220] : memref<144x256xf32, #tpu.memory_space<vmem>>, vector<16x256xf32>
    %258 = vector.extract_strided_slice %257 {offsets = [0, 0], sizes = [16, 128], strides = [1, 1]} : vector<16x256xf32> to vector<16x128xf32>
    %259 = math.tanh %258 : vector<16x128xf32>
    %260 = vector.extract_strided_slice %257 {offsets = [0, 128], sizes = [16, 128], strides = [1, 1]} : vector<16x256xf32> to vector<16x128xf32>
    %261 = arith.addf %260, %256 : vector<16x128xf32>
    %262 = arith.negf %261 : vector<16x128xf32>
    %263 = math.exp %262 : vector<16x128xf32>
    %cst_221 = arith.constant 1.000000e+00 : f32
    %264 = vector.broadcast %cst_221 : f32 to vector<16x128xf32>
    %265 = arith.addf %264, %263 : vector<16x128xf32>
    %266 = arith.divf %264, %265 : vector<16x128xf32>
    %267 = arith.mulf %266, %259 : vector<16x128xf32>
    %268 = arith.truncf %267 : vector<16x128xf32> to vector<16x128xbf16>
    %c0_222 = arith.constant 0 : index
    %c0_223 = arith.constant 0 : index
    %c112 = arith.constant 112 : index
    %c0_224 = arith.constant 0 : index
    %269 = vector.load %arg6[%c0_222, %c0_223, %c112, %c0_224] : memref<1x1x128x128xbf16, #tpu.memory_space<vmem>>, vector<1x1x16x128xbf16>
    %270 = vector.shape_cast %269 : vector<1x1x16x128xbf16> to vector<16x128xbf16>
    %271 = vector.shape_cast %268 : vector<16x128xbf16> to vector<1x1x16x128xbf16>
    tpu.vector_store %arg6[%c0_222, %c0_223, %c112, %c0_224], %271 {strides = array<i32>} : memref<1x1x128x128xbf16, #tpu.memory_space<vmem>>, vector<1x1x16x128xbf16>,
    %272 = arith.truncf %266 : vector<16x128xf32> to vector<16x128xbf16>
    %c1_225 = arith.constant 1 : index
    %c0_226 = arith.constant 0 : index
    %273 = vector.load %arg9[%c1_225, %c0_226] : memref<18x128xbf16, #tpu.memory_space<vmem>>, vector<16x128xbf16>
    tpu.vector_store %arg9[%c1_225, %c0_226], %272 {strides = array<i32>} : memref<18x128xbf16, #tpu.memory_space<vmem>>, vector<16x128xbf16>,
    %c0_227 = arith.constant 0 : index
    %c0_228 = arith.constant 0 : index
    %c0_229 = arith.constant 0 : index
    %274 = vector.load %arg7[%c0_227, %c0_228, %c0_229] : memref<1x16x128xf32, #tpu.memory_space<vmem>>, vector<1x16x128xf32>
    %275 = vector.shape_cast %274 : vector<1x16x128xf32> to vector<16x128xf32>
    %276 = vector.shape_cast %266 : vector<16x128xf32> to vector<1x16x128xf32>
    tpu.vector_store %arg7[%c0_227, %c0_228, %c0_229], %276 {strides = array<i32>} : memref<1x16x128xf32, #tpu.memory_space<vmem>>, vector<1x16x128xf32>,
    return
  }
  func.func @transform_0(%arg0: i32, %arg1: i32) -> (i32, i32, i32, i32) {
    %c0_i32 = arith.constant 0 : i32
    %c0_i32_0 = arith.constant 0 : i32
    %c0_i32_1 = arith.constant 0 : i32
    return %arg1, %arg0, %c0_i32, %c0_i32_0 : i32, i32, i32, i32
  }
  func.func @transform_1(%arg0: i32, %arg1: i32) -> (i32, i32, i32) {
    %c0_i32 = arith.constant 0 : i32
    %c0_i32_0 = arith.constant 0 : i32
    %c0_i32_1 = arith.constant 0 : i32
    %c0_i32_2 = arith.constant 0 : i32
    return %c0_i32, %c0_i32_0, %c0_i32_1 : i32, i32, i32
  }
  func.func @transform_2(%arg0: i32, %arg1: i32) -> (i32, i32, i32) {
    %c0_i32 = arith.constant 0 : i32
    %c0_i32_0 = arith.constant 0 : i32
    %c0_i32_1 = arith.constant 0 : i32
    %c0_i32_2 = arith.constant 0 : i32
    return %c0_i32, %c0_i32_0, %c0_i32_1 : i32, i32, i32
  }
  func.func @transform_3(%arg0: i32, %arg1: i32) -> (i32, i32) {
    %c0_i32 = arith.constant 0 : i32
    %c0_i32_0 = arith.constant 0 : i32
    %c0_i32_1 = arith.constant 0 : i32
    return %c0_i32, %c0_i32_0 : i32, i32
  }
  func.func @transform_4(%arg0: i32, %arg1: i32) -> (i32, i32, i32, i32) {
    %c0_i32 = arith.constant 0 : i32
    %c0_i32_0 = arith.constant 0 : i32
    %c0_i32_1 = arith.constant 0 : i32
    return %arg1, %arg0, %c0_i32, %c0_i32_0 : i32, i32, i32, i32
  }
  func.func @transform_5(%arg0: i32, %arg1: i32) -> (i32, i32, i32) {
    %c0_i32 = arith.constant 0 : i32
    %c0_i32_0 = arith.constant 0 : i32
    %c0_i32_1 = arith.constant 0 : i32
    return %arg0, %c0_i32, %c0_i32_0 : i32, i32, i32
  }
}

module attributes {stable_mosaic.version = 11 : i64} {
  func.func @rbm_layer_kernel(%arg0: i32, %arg1: i32, %arg2: memref<1x1x144x128xbf16, #tpu.memory_space<vmem>>, %arg3: memref<3x128x256xbf16, #tpu.memory_space<vmem>>, %arg4: memref<3x128x128xbf16, #tpu.memory_space<vmem>>, %arg5: memref<1x256xf32, #tpu.memory_space<vmem>>, %arg6: memref<1x1x128x128xf32, #tpu.memory_space<vmem>>, %arg7: memref<1x16x128xf32, #tpu.memory_space<vmem>>, %arg8: memref<144x256xf32, #tpu.memory_space<vmem>>, %arg9: memref<18x128xbf16, #tpu.memory_space<vmem>>) attributes {dimension_semantics = [#tpu.dimension_semantics<parallel>, #tpu.dimension_semantics<arbitrary>], iteration_bounds = array<i64: 2, 1>, scalar_prefetch = 0 : i64, scratch_operands = 2 : i64, tpu.core_type = #tpu.core_type<tc>, window_params = [{transform_indices = @transform_0, window_bounds = array<i64: 1, 1, 144, 128>}, {pipeline_mode = #tpu.pipeline_mode<synchronous>, transform_indices = @transform_1, window_bounds = array<i64: 3, 128, 256>}, {pipeline_mode = #tpu.pipeline_mode<synchronous>, transform_indices = @transform_2, window_bounds = array<i64: 3, 128, 128>}, {pipeline_mode = #tpu.pipeline_mode<synchronous>, transform_indices = @transform_3, window_bounds = array<i64: 1, 256>}, {transform_indices = @transform_4, window_bounds = array<i64: 1, 1, 128, 128>}, {transform_indices = @transform_5, window_bounds = array<i64: 1, 16, 128>}]} {
    %c0_i32 = arith.constant 0 : i32
    %0 = arith.cmpi eq, %arg1, %c0_i32 : i32
    %1 = arith.extui %0 : i1 to i32
    %c0_i32_0 = arith.constant 0 : i32
    %2 = arith.cmpi ne, %1, %c0_i32_0 : i32
    scf.if %2 {
      %cst_230 = arith.constant 0.000000e+00 : bf16
      %269 = vector.broadcast %cst_230 : bf16 to vector<18x128xbf16>
      %c0_231 = arith.constant 0 : index
      %c0_232 = arith.constant 0 : index
      %270 = vector.load %arg9[%c0_231, %c0_232] : memref<18x128xbf16, #tpu.memory_space<vmem>>, vector<18x128xbf16>
      tpu.vector_store %arg9[%c0_231, %c0_232], %269 {strides = array<i32>} : memref<18x128xbf16, #tpu.memory_space<vmem>>, vector<18x128xbf16>,
    } else {
    }
    %c0 = arith.constant 0 : index
    %c0_1 = arith.constant 0 : index
    %c0_2 = arith.constant 0 : index
    %c0_3 = arith.constant 0 : index
    %3 = vector.load %arg2[%c0, %c0_1, %c0_2, %c0_3] : memref<1x1x144x128xbf16, #tpu.memory_space<vmem>>, vector<1x1x144x128xbf16>
    %4 = vector.shape_cast %3 : vector<1x1x144x128xbf16> to vector<144x128xbf16>
    %c0_4 = arith.constant 0 : index
    %c0_5 = arith.constant 0 : index
    %c0_6 = arith.constant 0 : index
    %5 = vector.load %arg3[%c0_4, %c0_5, %c0_6] : memref<3x128x256xbf16, #tpu.memory_space<vmem>>, vector<1x128x256xbf16>
    %6 = vector.shape_cast %5 : vector<1x128x256xbf16> to vector<128x256xbf16>
    %cst = arith.constant dense<0.000000e+00> : vector<144x256xf32>
    %7 = tpu.matmul %4, %6, %cst {dimension_numbers = #tpu.dot_dimension_numbers<[1], [0], [0], [1], [0, 0, 1, 1], [], []>} : vector<144x128xbf16>, vector<128x256xbf16>, vector<144x256xf32> -> vector<144x256xf32>
    %c0_7 = arith.constant 0 : index
    %c0_8 = arith.constant 0 : index
    %8 = vector.load %arg5[%c0_7, %c0_8] : memref<1x256xf32, #tpu.memory_space<vmem>>, vector<1x256xf32>
    %9 = vector.broadcast %8 : vector<1x256xf32> to vector<144x256xf32>
    %10 = arith.addf %7, %9 : vector<144x256xf32>
    %c0_9 = arith.constant 0 : index
    %c0_10 = arith.constant 0 : index
    %11 = vector.load %arg8[%c0_9, %c0_10] : memref<144x256xf32, #tpu.memory_space<vmem>>, vector<144x256xf32>
    tpu.vector_store %arg8[%c0_9, %c0_10], %10 {strides = array<i32>} : memref<144x256xf32, #tpu.memory_space<vmem>>, vector<144x256xf32>,
    %c1 = arith.constant 1 : index
    %c0_11 = arith.constant 0 : index
    %c0_12 = arith.constant 0 : index
    %12 = vector.load %arg3[%c1, %c0_11, %c0_12] : memref<3x128x256xbf16, #tpu.memory_space<vmem>>, vector<1x128x256xbf16>
    %13 = vector.shape_cast %12 : vector<1x128x256xbf16> to vector<128x256xbf16>
    %cst_13 = arith.constant dense<0.000000e+00> : vector<144x256xf32>
    %14 = tpu.matmul %4, %13, %cst_13 {dimension_numbers = #tpu.dot_dimension_numbers<[1], [0], [0], [1], [0, 0, 1, 1], [], []>} : vector<144x128xbf16>, vector<128x256xbf16>, vector<144x256xf32> -> vector<144x256xf32>
    %c0_14 = arith.constant 0 : index
    %c0_15 = arith.constant 0 : index
    %15 = vector.load %arg8[%c0_14, %c0_15] : memref<144x256xf32, #tpu.memory_space<vmem>>, vector<142x256xf32>
    %16 = vector.extract_strided_slice %14 {offsets = [1, 0], sizes = [142, 256], strides = [1, 1]} : vector<144x256xf32> to vector<142x256xf32>
    %17 = arith.addf %15, %16 : vector<142x256xf32>
    %c0_16 = arith.constant 0 : index
    %c0_17 = arith.constant 0 : index
    %18 = vector.load %arg8[%c0_16, %c0_17] : memref<144x256xf32, #tpu.memory_space<vmem>>, vector<142x256xf32>
    tpu.vector_store %arg8[%c0_16, %c0_17], %17 {strides = array<i32>} : memref<144x256xf32, #tpu.memory_space<vmem>>, vector<142x256xf32>,
    %c2 = arith.constant 2 : index
    %c0_18 = arith.constant 0 : index
    %c0_19 = arith.constant 0 : index
    %19 = vector.load %arg3[%c2, %c0_18, %c0_19] : memref<3x128x256xbf16, #tpu.memory_space<vmem>>, vector<1x128x256xbf16>
    %20 = vector.shape_cast %19 : vector<1x128x256xbf16> to vector<128x256xbf16>
    %cst_20 = arith.constant dense<0.000000e+00> : vector<144x256xf32>
    %21 = tpu.matmul %4, %20, %cst_20 {dimension_numbers = #tpu.dot_dimension_numbers<[1], [0], [0], [1], [0, 0, 1, 1], [], []>} : vector<144x128xbf16>, vector<128x256xbf16>, vector<144x256xf32> -> vector<144x256xf32>
    %c0_21 = arith.constant 0 : index
    %c0_22 = arith.constant 0 : index
    %22 = vector.load %arg8[%c0_21, %c0_22] : memref<144x256xf32, #tpu.memory_space<vmem>>, vector<142x256xf32>
    %23 = vector.extract_strided_slice %21 {offsets = [2, 0], sizes = [142, 256], strides = [1, 1]} : vector<144x256xf32> to vector<142x256xf32>
    %24 = arith.addf %22, %23 : vector<142x256xf32>
    %c0_23 = arith.constant 0 : index
    %c0_24 = arith.constant 0 : index
    %25 = vector.load %arg8[%c0_23, %c0_24] : memref<144x256xf32, #tpu.memory_space<vmem>>, vector<142x256xf32>
    tpu.vector_store %arg8[%c0_23, %c0_24], %24 {strides = array<i32>} : memref<144x256xf32, #tpu.memory_space<vmem>>, vector<142x256xf32>,
    %c0_25 = arith.constant 0 : index
    %c0_26 = arith.constant 0 : index
    %26 = vector.load %arg9[%c0_25, %c0_26] : memref<18x128xbf16, #tpu.memory_space<vmem>>, vector<16x128xbf16>
    %c0_27 = arith.constant 0 : index
    %c0_28 = arith.constant 0 : index
    %c0_29 = arith.constant 0 : index
    %27 = vector.load %arg4[%c0_27, %c0_28, %c0_29] : memref<3x128x128xbf16, #tpu.memory_space<vmem>>, vector<1x128x128xbf16>
    %28 = vector.shape_cast %27 : vector<1x128x128xbf16> to vector<128x128xbf16>
    %cst_30 = arith.constant dense<0.000000e+00> : vector<16x128xf32>
    %29 = tpu.matmul %26, %28, %cst_30 {dimension_numbers = #tpu.dot_dimension_numbers<[1], [0], [0], [1], [0, 0, 1, 1], [], []>} : vector<16x128xbf16>, vector<128x128xbf16>, vector<16x128xf32> -> vector<16x128xf32>
    %c1_31 = arith.constant 1 : index
    %c0_32 = arith.constant 0 : index
    %30 = vector.load %arg9[%c1_31, %c0_32] : memref<18x128xbf16, #tpu.memory_space<vmem>>, vector<16x128xbf16>
    %c1_33 = arith.constant 1 : index
    %c0_34 = arith.constant 0 : index
    %c0_35 = arith.constant 0 : index
    %31 = vector.load %arg4[%c1_33, %c0_34, %c0_35] : memref<3x128x128xbf16, #tpu.memory_space<vmem>>, vector<1x128x128xbf16>
    %32 = vector.shape_cast %31 : vector<1x128x128xbf16> to vector<128x128xbf16>
    %cst_36 = arith.constant dense<0.000000e+00> : vector<16x128xf32>
    %33 = tpu.matmul %30, %32, %cst_36 {dimension_numbers = #tpu.dot_dimension_numbers<[1], [0], [0], [1], [0, 0, 1, 1], [], []>} : vector<16x128xbf16>, vector<128x128xbf16>, vector<16x128xf32> -> vector<16x128xf32>
    %34 = arith.addf %29, %33 : vector<16x128xf32>
    %c2_37 = arith.constant 2 : index
    %c0_38 = arith.constant 0 : index
    %35 = vector.load %arg9[%c2_37, %c0_38] : memref<18x128xbf16, #tpu.memory_space<vmem>>, vector<16x128xbf16>
    %c2_39 = arith.constant 2 : index
    %c0_40 = arith.constant 0 : index
    %c0_41 = arith.constant 0 : index
    %36 = vector.load %arg4[%c2_39, %c0_40, %c0_41] : memref<3x128x128xbf16, #tpu.memory_space<vmem>>, vector<1x128x128xbf16>
    %37 = vector.shape_cast %36 : vector<1x128x128xbf16> to vector<128x128xbf16>
    %cst_42 = arith.constant dense<0.000000e+00> : vector<16x128xf32>
    %38 = tpu.matmul %35, %37, %cst_42 {dimension_numbers = #tpu.dot_dimension_numbers<[1], [0], [0], [1], [0, 0, 1, 1], [], []>} : vector<16x128xbf16>, vector<128x128xbf16>, vector<16x128xf32> -> vector<16x128xf32>
    %39 = arith.addf %34, %38 : vector<16x128xf32>
    %c0_43 = arith.constant 0 : index
    %c0_44 = arith.constant 0 : index
    %40 = vector.load %arg8[%c0_43, %c0_44] : memref<144x256xf32, #tpu.memory_space<vmem>>, vector<16x256xf32>
    %41 = vector.extract_strided_slice %40 {offsets = [0, 0], sizes = [16, 128], strides = [1, 1]} : vector<16x256xf32> to vector<16x128xf32>
    %42 = math.tanh %41 : vector<16x128xf32>
    %43 = vector.extract_strided_slice %40 {offsets = [0, 128], sizes = [16, 128], strides = [1, 1]} : vector<16x256xf32> to vector<16x128xf32>
    %44 = arith.addf %43, %39 : vector<16x128xf32>
    %45 = arith.negf %44 : vector<16x128xf32>
    %46 = math.exp %45 : vector<16x128xf32>
    %cst_45 = arith.constant 1.000000e+00 : f32
    %47 = vector.broadcast %cst_45 : f32 to vector<16x128xf32>
    %48 = arith.addf %47, %46 : vector<16x128xf32>
    %49 = arith.divf %47, %48 : vector<16x128xf32>
    %50 = arith.mulf %49, %42 : vector<16x128xf32>
    %c0_46 = arith.constant 0 : index
    %c0_47 = arith.constant 0 : index
    %c0_48 = arith.constant 0 : index
    %c0_49 = arith.constant 0 : index
    %51 = vector.load %arg6[%c0_46, %c0_47, %c0_48, %c0_49] : memref<1x1x128x128xf32, #tpu.memory_space<vmem>>, vector<1x1x16x128xf32>
    %52 = vector.shape_cast %51 : vector<1x1x16x128xf32> to vector<16x128xf32>
    %53 = vector.shape_cast %50 : vector<16x128xf32> to vector<1x1x16x128xf32>
    tpu.vector_store %arg6[%c0_46, %c0_47, %c0_48, %c0_49], %53 {strides = array<i32>} : memref<1x1x128x128xf32, #tpu.memory_space<vmem>>, vector<1x1x16x128xf32>,
    %54 = arith.truncf %49 : vector<16x128xf32> to vector<16x128xbf16>
    %c1_50 = arith.constant 1 : index
    %c0_51 = arith.constant 0 : index
    %55 = vector.load %arg9[%c1_50, %c0_51] : memref<18x128xbf16, #tpu.memory_space<vmem>>, vector<16x128xbf16>
    tpu.vector_store %arg9[%c1_50, %c0_51], %54 {strides = array<i32>} : memref<18x128xbf16, #tpu.memory_space<vmem>>, vector<16x128xbf16>,
    %c0_52 = arith.constant 0 : index
    %c0_53 = arith.constant 0 : index
    %56 = vector.load %arg9[%c0_52, %c0_53] : memref<18x128xbf16, #tpu.memory_space<vmem>>, vector<16x128xbf16>
    %c0_54 = arith.constant 0 : index
    %c0_55 = arith.constant 0 : index
    %c0_56 = arith.constant 0 : index
    %57 = vector.load %arg4[%c0_54, %c0_55, %c0_56] : memref<3x128x128xbf16, #tpu.memory_space<vmem>>, vector<1x128x128xbf16>
    %58 = vector.shape_cast %57 : vector<1x128x128xbf16> to vector<128x128xbf16>
    %cst_57 = arith.constant dense<0.000000e+00> : vector<16x128xf32>
    %59 = tpu.matmul %56, %58, %cst_57 {dimension_numbers = #tpu.dot_dimension_numbers<[1], [0], [0], [1], [0, 0, 1, 1], [], []>} : vector<16x128xbf16>, vector<128x128xbf16>, vector<16x128xf32> -> vector<16x128xf32>
    %c1_58 = arith.constant 1 : index
    %c0_59 = arith.constant 0 : index
    %60 = vector.load %arg9[%c1_58, %c0_59] : memref<18x128xbf16, #tpu.memory_space<vmem>>, vector<16x128xbf16>
    %c1_60 = arith.constant 1 : index
    %c0_61 = arith.constant 0 : index
    %c0_62 = arith.constant 0 : index
    %61 = vector.load %arg4[%c1_60, %c0_61, %c0_62] : memref<3x128x128xbf16, #tpu.memory_space<vmem>>, vector<1x128x128xbf16>
    %62 = vector.shape_cast %61 : vector<1x128x128xbf16> to vector<128x128xbf16>
    %cst_63 = arith.constant dense<0.000000e+00> : vector<16x128xf32>
    %63 = tpu.matmul %60, %62, %cst_63 {dimension_numbers = #tpu.dot_dimension_numbers<[1], [0], [0], [1], [0, 0, 1, 1], [], []>} : vector<16x128xbf16>, vector<128x128xbf16>, vector<16x128xf32> -> vector<16x128xf32>
    %64 = arith.addf %59, %63 : vector<16x128xf32>
    %c2_64 = arith.constant 2 : index
    %c0_65 = arith.constant 0 : index
    %65 = vector.load %arg9[%c2_64, %c0_65] : memref<18x128xbf16, #tpu.memory_space<vmem>>, vector<16x128xbf16>
    %c2_66 = arith.constant 2 : index
    %c0_67 = arith.constant 0 : index
    %c0_68 = arith.constant 0 : index
    %66 = vector.load %arg4[%c2_66, %c0_67, %c0_68] : memref<3x128x128xbf16, #tpu.memory_space<vmem>>, vector<1x128x128xbf16>
    %67 = vector.shape_cast %66 : vector<1x128x128xbf16> to vector<128x128xbf16>
    %cst_69 = arith.constant dense<0.000000e+00> : vector<16x128xf32>
    %68 = tpu.matmul %65, %67, %cst_69 {dimension_numbers = #tpu.dot_dimension_numbers<[1], [0], [0], [1], [0, 0, 1, 1], [], []>} : vector<16x128xbf16>, vector<128x128xbf16>, vector<16x128xf32> -> vector<16x128xf32>
    %69 = arith.addf %64, %68 : vector<16x128xf32>
    %c18 = arith.constant 18 : index
    %c0_70 = arith.constant 0 : index
    %70 = vector.load %arg8[%c18, %c0_70] : memref<144x256xf32, #tpu.memory_space<vmem>>, vector<16x256xf32>
    %71 = vector.extract_strided_slice %70 {offsets = [0, 0], sizes = [16, 128], strides = [1, 1]} : vector<16x256xf32> to vector<16x128xf32>
    %72 = math.tanh %71 : vector<16x128xf32>
    %73 = vector.extract_strided_slice %70 {offsets = [0, 128], sizes = [16, 128], strides = [1, 1]} : vector<16x256xf32> to vector<16x128xf32>
    %74 = arith.addf %73, %69 : vector<16x128xf32>
    %75 = arith.negf %74 : vector<16x128xf32>
    %76 = math.exp %75 : vector<16x128xf32>
    %cst_71 = arith.constant 1.000000e+00 : f32
    %77 = vector.broadcast %cst_71 : f32 to vector<16x128xf32>
    %78 = arith.addf %77, %76 : vector<16x128xf32>
    %79 = arith.divf %77, %78 : vector<16x128xf32>
    %80 = arith.mulf %79, %72 : vector<16x128xf32>
    %c0_72 = arith.constant 0 : index
    %c0_73 = arith.constant 0 : index
    %c16 = arith.constant 16 : index
    %c0_74 = arith.constant 0 : index
    %81 = vector.load %arg6[%c0_72, %c0_73, %c16, %c0_74] : memref<1x1x128x128xf32, #tpu.memory_space<vmem>>, vector<1x1x16x128xf32>
    %82 = vector.shape_cast %81 : vector<1x1x16x128xf32> to vector<16x128xf32>
    %83 = vector.shape_cast %80 : vector<16x128xf32> to vector<1x1x16x128xf32>
    tpu.vector_store %arg6[%c0_72, %c0_73, %c16, %c0_74], %83 {strides = array<i32>} : memref<1x1x128x128xf32, #tpu.memory_space<vmem>>, vector<1x1x16x128xf32>,
    %84 = arith.truncf %79 : vector<16x128xf32> to vector<16x128xbf16>
    %c1_75 = arith.constant 1 : index
    %c0_76 = arith.constant 0 : index
    %85 = vector.load %arg9[%c1_75, %c0_76] : memref<18x128xbf16, #tpu.memory_space<vmem>>, vector<16x128xbf16>
    tpu.vector_store %arg9[%c1_75, %c0_76], %84 {strides = array<i32>} : memref<18x128xbf16, #tpu.memory_space<vmem>>, vector<16x128xbf16>,
    %c0_77 = arith.constant 0 : index
    %c0_78 = arith.constant 0 : index
    %86 = vector.load %arg9[%c0_77, %c0_78] : memref<18x128xbf16, #tpu.memory_space<vmem>>, vector<16x128xbf16>
    %c0_79 = arith.constant 0 : index
    %c0_80 = arith.constant 0 : index
    %c0_81 = arith.constant 0 : index
    %87 = vector.load %arg4[%c0_79, %c0_80, %c0_81] : memref<3x128x128xbf16, #tpu.memory_space<vmem>>, vector<1x128x128xbf16>
    %88 = vector.shape_cast %87 : vector<1x128x128xbf16> to vector<128x128xbf16>
    %cst_82 = arith.constant dense<0.000000e+00> : vector<16x128xf32>
    %89 = tpu.matmul %86, %88, %cst_82 {dimension_numbers = #tpu.dot_dimension_numbers<[1], [0], [0], [1], [0, 0, 1, 1], [], []>} : vector<16x128xbf16>, vector<128x128xbf16>, vector<16x128xf32> -> vector<16x128xf32>
    %c1_83 = arith.constant 1 : index
    %c0_84 = arith.constant 0 : index
    %90 = vector.load %arg9[%c1_83, %c0_84] : memref<18x128xbf16, #tpu.memory_space<vmem>>, vector<16x128xbf16>
    %c1_85 = arith.constant 1 : index
    %c0_86 = arith.constant 0 : index
    %c0_87 = arith.constant 0 : index
    %91 = vector.load %arg4[%c1_85, %c0_86, %c0_87] : memref<3x128x128xbf16, #tpu.memory_space<vmem>>, vector<1x128x128xbf16>
    %92 = vector.shape_cast %91 : vector<1x128x128xbf16> to vector<128x128xbf16>
    %cst_88 = arith.constant dense<0.000000e+00> : vector<16x128xf32>
    %93 = tpu.matmul %90, %92, %cst_88 {dimension_numbers = #tpu.dot_dimension_numbers<[1], [0], [0], [1], [0, 0, 1, 1], [], []>} : vector<16x128xbf16>, vector<128x128xbf16>, vector<16x128xf32> -> vector<16x128xf32>
    %94 = arith.addf %89, %93 : vector<16x128xf32>
    %c2_89 = arith.constant 2 : index
    %c0_90 = arith.constant 0 : index
    %95 = vector.load %arg9[%c2_89, %c0_90] : memref<18x128xbf16, #tpu.memory_space<vmem>>, vector<16x128xbf16>
    %c2_91 = arith.constant 2 : index
    %c0_92 = arith.constant 0 : index
    %c0_93 = arith.constant 0 : index
    %96 = vector.load %arg4[%c2_91, %c0_92, %c0_93] : memref<3x128x128xbf16, #tpu.memory_space<vmem>>, vector<1x128x128xbf16>
    %97 = vector.shape_cast %96 : vector<1x128x128xbf16> to vector<128x128xbf16>
    %cst_94 = arith.constant dense<0.000000e+00> : vector<16x128xf32>
    %98 = tpu.matmul %95, %97, %cst_94 {dimension_numbers = #tpu.dot_dimension_numbers<[1], [0], [0], [1], [0, 0, 1, 1], [], []>} : vector<16x128xbf16>, vector<128x128xbf16>, vector<16x128xf32> -> vector<16x128xf32>
    %99 = arith.addf %94, %98 : vector<16x128xf32>
    %c36 = arith.constant 36 : index
    %c0_95 = arith.constant 0 : index
    %100 = vector.load %arg8[%c36, %c0_95] : memref<144x256xf32, #tpu.memory_space<vmem>>, vector<16x256xf32>
    %101 = vector.extract_strided_slice %100 {offsets = [0, 0], sizes = [16, 128], strides = [1, 1]} : vector<16x256xf32> to vector<16x128xf32>
    %102 = math.tanh %101 : vector<16x128xf32>
    %103 = vector.extract_strided_slice %100 {offsets = [0, 128], sizes = [16, 128], strides = [1, 1]} : vector<16x256xf32> to vector<16x128xf32>
    %104 = arith.addf %103, %99 : vector<16x128xf32>
    %105 = arith.negf %104 : vector<16x128xf32>
    %106 = math.exp %105 : vector<16x128xf32>
    %cst_96 = arith.constant 1.000000e+00 : f32
    %107 = vector.broadcast %cst_96 : f32 to vector<16x128xf32>
    %108 = arith.addf %107, %106 : vector<16x128xf32>
    %109 = arith.divf %107, %108 : vector<16x128xf32>
    %110 = arith.mulf %109, %102 : vector<16x128xf32>
    %c0_97 = arith.constant 0 : index
    %c0_98 = arith.constant 0 : index
    %c32 = arith.constant 32 : index
    %c0_99 = arith.constant 0 : index
    %111 = vector.load %arg6[%c0_97, %c0_98, %c32, %c0_99] : memref<1x1x128x128xf32, #tpu.memory_space<vmem>>, vector<1x1x16x128xf32>
    %112 = vector.shape_cast %111 : vector<1x1x16x128xf32> to vector<16x128xf32>
    %113 = vector.shape_cast %110 : vector<16x128xf32> to vector<1x1x16x128xf32>
    tpu.vector_store %arg6[%c0_97, %c0_98, %c32, %c0_99], %113 {strides = array<i32>} : memref<1x1x128x128xf32, #tpu.memory_space<vmem>>, vector<1x1x16x128xf32>,
    %114 = arith.truncf %109 : vector<16x128xf32> to vector<16x128xbf16>
    %c1_100 = arith.constant 1 : index
    %c0_101 = arith.constant 0 : index
    %115 = vector.load %arg9[%c1_100, %c0_101] : memref<18x128xbf16, #tpu.memory_space<vmem>>, vector<16x128xbf16>
    tpu.vector_store %arg9[%c1_100, %c0_101], %114 {strides = array<i32>} : memref<18x128xbf16, #tpu.memory_space<vmem>>, vector<16x128xbf16>,
    %c0_102 = arith.constant 0 : index
    %c0_103 = arith.constant 0 : index
    %116 = vector.load %arg9[%c0_102, %c0_103] : memref<18x128xbf16, #tpu.memory_space<vmem>>, vector<16x128xbf16>
    %c0_104 = arith.constant 0 : index
    %c0_105 = arith.constant 0 : index
    %c0_106 = arith.constant 0 : index
    %117 = vector.load %arg4[%c0_104, %c0_105, %c0_106] : memref<3x128x128xbf16, #tpu.memory_space<vmem>>, vector<1x128x128xbf16>
    %118 = vector.shape_cast %117 : vector<1x128x128xbf16> to vector<128x128xbf16>
    %cst_107 = arith.constant dense<0.000000e+00> : vector<16x128xf32>
    %119 = tpu.matmul %116, %118, %cst_107 {dimension_numbers = #tpu.dot_dimension_numbers<[1], [0], [0], [1], [0, 0, 1, 1], [], []>} : vector<16x128xbf16>, vector<128x128xbf16>, vector<16x128xf32> -> vector<16x128xf32>
    %c1_108 = arith.constant 1 : index
    %c0_109 = arith.constant 0 : index
    %120 = vector.load %arg9[%c1_108, %c0_109] : memref<18x128xbf16, #tpu.memory_space<vmem>>, vector<16x128xbf16>
    %c1_110 = arith.constant 1 : index
    %c0_111 = arith.constant 0 : index
    %c0_112 = arith.constant 0 : index
    %121 = vector.load %arg4[%c1_110, %c0_111, %c0_112] : memref<3x128x128xbf16, #tpu.memory_space<vmem>>, vector<1x128x128xbf16>
    %122 = vector.shape_cast %121 : vector<1x128x128xbf16> to vector<128x128xbf16>
    %cst_113 = arith.constant dense<0.000000e+00> : vector<16x128xf32>
    %123 = tpu.matmul %120, %122, %cst_113 {dimension_numbers = #tpu.dot_dimension_numbers<[1], [0], [0], [1], [0, 0, 1, 1], [], []>} : vector<16x128xbf16>, vector<128x128xbf16>, vector<16x128xf32> -> vector<16x128xf32>
    %124 = arith.addf %119, %123 : vector<16x128xf32>
    %c2_114 = arith.constant 2 : index
    %c0_115 = arith.constant 0 : index
    %125 = vector.load %arg9[%c2_114, %c0_115] : memref<18x128xbf16, #tpu.memory_space<vmem>>, vector<16x128xbf16>
    %c2_116 = arith.constant 2 : index
    %c0_117 = arith.constant 0 : index
    %c0_118 = arith.constant 0 : index
    %126 = vector.load %arg4[%c2_116, %c0_117, %c0_118] : memref<3x128x128xbf16, #tpu.memory_space<vmem>>, vector<1x128x128xbf16>
    %127 = vector.shape_cast %126 : vector<1x128x128xbf16> to vector<128x128xbf16>
    %cst_119 = arith.constant dense<0.000000e+00> : vector<16x128xf32>
    %128 = tpu.matmul %125, %127, %cst_119 {dimension_numbers = #tpu.dot_dimension_numbers<[1], [0], [0], [1], [0, 0, 1, 1], [], []>} : vector<16x128xbf16>, vector<128x128xbf16>, vector<16x128xf32> -> vector<16x128xf32>
    %129 = arith.addf %124, %128 : vector<16x128xf32>
    %c54 = arith.constant 54 : index
    %c0_120 = arith.constant 0 : index
    %130 = vector.load %arg8[%c54, %c0_120] : memref<144x256xf32, #tpu.memory_space<vmem>>, vector<16x256xf32>
    %131 = vector.extract_strided_slice %130 {offsets = [0, 0], sizes = [16, 128], strides = [1, 1]} : vector<16x256xf32> to vector<16x128xf32>
    %132 = math.tanh %131 : vector<16x128xf32>
    %133 = vector.extract_strided_slice %130 {offsets = [0, 128], sizes = [16, 128], strides = [1, 1]} : vector<16x256xf32> to vector<16x128xf32>
    %134 = arith.addf %133, %129 : vector<16x128xf32>
    %135 = arith.negf %134 : vector<16x128xf32>
    %136 = math.exp %135 : vector<16x128xf32>
    %cst_121 = arith.constant 1.000000e+00 : f32
    %137 = vector.broadcast %cst_121 : f32 to vector<16x128xf32>
    %138 = arith.addf %137, %136 : vector<16x128xf32>
    %139 = arith.divf %137, %138 : vector<16x128xf32>
    %140 = arith.mulf %139, %132 : vector<16x128xf32>
    %c0_122 = arith.constant 0 : index
    %c0_123 = arith.constant 0 : index
    %c48 = arith.constant 48 : index
    %c0_124 = arith.constant 0 : index
    %141 = vector.load %arg6[%c0_122, %c0_123, %c48, %c0_124] : memref<1x1x128x128xf32, #tpu.memory_space<vmem>>, vector<1x1x16x128xf32>
    %142 = vector.shape_cast %141 : vector<1x1x16x128xf32> to vector<16x128xf32>
    %143 = vector.shape_cast %140 : vector<16x128xf32> to vector<1x1x16x128xf32>
    tpu.vector_store %arg6[%c0_122, %c0_123, %c48, %c0_124], %143 {strides = array<i32>} : memref<1x1x128x128xf32, #tpu.memory_space<vmem>>, vector<1x1x16x128xf32>,
    %144 = arith.truncf %139 : vector<16x128xf32> to vector<16x128xbf16>
    %c1_125 = arith.constant 1 : index
    %c0_126 = arith.constant 0 : index
    %145 = vector.load %arg9[%c1_125, %c0_126] : memref<18x128xbf16, #tpu.memory_space<vmem>>, vector<16x128xbf16>
    tpu.vector_store %arg9[%c1_125, %c0_126], %144 {strides = array<i32>} : memref<18x128xbf16, #tpu.memory_space<vmem>>, vector<16x128xbf16>,
    %c0_127 = arith.constant 0 : index
    %c0_128 = arith.constant 0 : index
    %146 = vector.load %arg9[%c0_127, %c0_128] : memref<18x128xbf16, #tpu.memory_space<vmem>>, vector<16x128xbf16>
    %c0_129 = arith.constant 0 : index
    %c0_130 = arith.constant 0 : index
    %c0_131 = arith.constant 0 : index
    %147 = vector.load %arg4[%c0_129, %c0_130, %c0_131] : memref<3x128x128xbf16, #tpu.memory_space<vmem>>, vector<1x128x128xbf16>
    %148 = vector.shape_cast %147 : vector<1x128x128xbf16> to vector<128x128xbf16>
    %cst_132 = arith.constant dense<0.000000e+00> : vector<16x128xf32>
    %149 = tpu.matmul %146, %148, %cst_132 {dimension_numbers = #tpu.dot_dimension_numbers<[1], [0], [0], [1], [0, 0, 1, 1], [], []>} : vector<16x128xbf16>, vector<128x128xbf16>, vector<16x128xf32> -> vector<16x128xf32>
    %c1_133 = arith.constant 1 : index
    %c0_134 = arith.constant 0 : index
    %150 = vector.load %arg9[%c1_133, %c0_134] : memref<18x128xbf16, #tpu.memory_space<vmem>>, vector<16x128xbf16>
    %c1_135 = arith.constant 1 : index
    %c0_136 = arith.constant 0 : index
    %c0_137 = arith.constant 0 : index
    %151 = vector.load %arg4[%c1_135, %c0_136, %c0_137] : memref<3x128x128xbf16, #tpu.memory_space<vmem>>, vector<1x128x128xbf16>
    %152 = vector.shape_cast %151 : vector<1x128x128xbf16> to vector<128x128xbf16>
    %cst_138 = arith.constant dense<0.000000e+00> : vector<16x128xf32>
    %153 = tpu.matmul %150, %152, %cst_138 {dimension_numbers = #tpu.dot_dimension_numbers<[1], [0], [0], [1], [0, 0, 1, 1], [], []>} : vector<16x128xbf16>, vector<128x128xbf16>, vector<16x128xf32> -> vector<16x128xf32>
    %154 = arith.addf %149, %153 : vector<16x128xf32>
    %c2_139 = arith.constant 2 : index
    %c0_140 = arith.constant 0 : index
    %155 = vector.load %arg9[%c2_139, %c0_140] : memref<18x128xbf16, #tpu.memory_space<vmem>>, vector<16x128xbf16>
    %c2_141 = arith.constant 2 : index
    %c0_142 = arith.constant 0 : index
    %c0_143 = arith.constant 0 : index
    %156 = vector.load %arg4[%c2_141, %c0_142, %c0_143] : memref<3x128x128xbf16, #tpu.memory_space<vmem>>, vector<1x128x128xbf16>
    %157 = vector.shape_cast %156 : vector<1x128x128xbf16> to vector<128x128xbf16>
    %cst_144 = arith.constant dense<0.000000e+00> : vector<16x128xf32>
    %158 = tpu.matmul %155, %157, %cst_144 {dimension_numbers = #tpu.dot_dimension_numbers<[1], [0], [0], [1], [0, 0, 1, 1], [], []>} : vector<16x128xbf16>, vector<128x128xbf16>, vector<16x128xf32> -> vector<16x128xf32>
    %159 = arith.addf %154, %158 : vector<16x128xf32>
    %c72 = arith.constant 72 : index
    %c0_145 = arith.constant 0 : index
    %160 = vector.load %arg8[%c72, %c0_145] : memref<144x256xf32, #tpu.memory_space<vmem>>, vector<16x256xf32>
    %161 = vector.extract_strided_slice %160 {offsets = [0, 0], sizes = [16, 128], strides = [1, 1]} : vector<16x256xf32> to vector<16x128xf32>
    %162 = math.tanh %161 : vector<16x128xf32>
    %163 = vector.extract_strided_slice %160 {offsets = [0, 128], sizes = [16, 128], strides = [1, 1]} : vector<16x256xf32> to vector<16x128xf32>
    %164 = arith.addf %163, %159 : vector<16x128xf32>
    %165 = arith.negf %164 : vector<16x128xf32>
    %166 = math.exp %165 : vector<16x128xf32>
    %cst_146 = arith.constant 1.000000e+00 : f32
    %167 = vector.broadcast %cst_146 : f32 to vector<16x128xf32>
    %168 = arith.addf %167, %166 : vector<16x128xf32>
    %169 = arith.divf %167, %168 : vector<16x128xf32>
    %170 = arith.mulf %169, %162 : vector<16x128xf32>
    %c0_147 = arith.constant 0 : index
    %c0_148 = arith.constant 0 : index
    %c64 = arith.constant 64 : index
    %c0_149 = arith.constant 0 : index
    %171 = vector.load %arg6[%c0_147, %c0_148, %c64, %c0_149] : memref<1x1x128x128xf32, #tpu.memory_space<vmem>>, vector<1x1x16x128xf32>
    %172 = vector.shape_cast %171 : vector<1x1x16x128xf32> to vector<16x128xf32>
    %173 = vector.shape_cast %170 : vector<16x128xf32> to vector<1x1x16x128xf32>
    tpu.vector_store %arg6[%c0_147, %c0_148, %c64, %c0_149], %173 {strides = array<i32>} : memref<1x1x128x128xf32, #tpu.memory_space<vmem>>, vector<1x1x16x128xf32>,
    %174 = arith.truncf %169 : vector<16x128xf32> to vector<16x128xbf16>
    %c1_150 = arith.constant 1 : index
    %c0_151 = arith.constant 0 : index
    %175 = vector.load %arg9[%c1_150, %c0_151] : memref<18x128xbf16, #tpu.memory_space<vmem>>, vector<16x128xbf16>
    tpu.vector_store %arg9[%c1_150, %c0_151], %174 {strides = array<i32>} : memref<18x128xbf16, #tpu.memory_space<vmem>>, vector<16x128xbf16>,
    %c0_152 = arith.constant 0 : index
    %c0_153 = arith.constant 0 : index
    %176 = vector.load %arg9[%c0_152, %c0_153] : memref<18x128xbf16, #tpu.memory_space<vmem>>, vector<16x128xbf16>
    %c0_154 = arith.constant 0 : index
    %c0_155 = arith.constant 0 : index
    %c0_156 = arith.constant 0 : index
    %177 = vector.load %arg4[%c0_154, %c0_155, %c0_156] : memref<3x128x128xbf16, #tpu.memory_space<vmem>>, vector<1x128x128xbf16>
    %178 = vector.shape_cast %177 : vector<1x128x128xbf16> to vector<128x128xbf16>
    %cst_157 = arith.constant dense<0.000000e+00> : vector<16x128xf32>
    %179 = tpu.matmul %176, %178, %cst_157 {dimension_numbers = #tpu.dot_dimension_numbers<[1], [0], [0], [1], [0, 0, 1, 1], [], []>} : vector<16x128xbf16>, vector<128x128xbf16>, vector<16x128xf32> -> vector<16x128xf32>
    %c1_158 = arith.constant 1 : index
    %c0_159 = arith.constant 0 : index
    %180 = vector.load %arg9[%c1_158, %c0_159] : memref<18x128xbf16, #tpu.memory_space<vmem>>, vector<16x128xbf16>
    %c1_160 = arith.constant 1 : index
    %c0_161 = arith.constant 0 : index
    %c0_162 = arith.constant 0 : index
    %181 = vector.load %arg4[%c1_160, %c0_161, %c0_162] : memref<3x128x128xbf16, #tpu.memory_space<vmem>>, vector<1x128x128xbf16>
    %182 = vector.shape_cast %181 : vector<1x128x128xbf16> to vector<128x128xbf16>
    %cst_163 = arith.constant dense<0.000000e+00> : vector<16x128xf32>
    %183 = tpu.matmul %180, %182, %cst_163 {dimension_numbers = #tpu.dot_dimension_numbers<[1], [0], [0], [1], [0, 0, 1, 1], [], []>} : vector<16x128xbf16>, vector<128x128xbf16>, vector<16x128xf32> -> vector<16x128xf32>
    %184 = arith.addf %179, %183 : vector<16x128xf32>
    %c2_164 = arith.constant 2 : index
    %c0_165 = arith.constant 0 : index
    %185 = vector.load %arg9[%c2_164, %c0_165] : memref<18x128xbf16, #tpu.memory_space<vmem>>, vector<16x128xbf16>
    %c2_166 = arith.constant 2 : index
    %c0_167 = arith.constant 0 : index
    %c0_168 = arith.constant 0 : index
    %186 = vector.load %arg4[%c2_166, %c0_167, %c0_168] : memref<3x128x128xbf16, #tpu.memory_space<vmem>>, vector<1x128x128xbf16>
    %187 = vector.shape_cast %186 : vector<1x128x128xbf16> to vector<128x128xbf16>
    %cst_169 = arith.constant dense<0.000000e+00> : vector<16x128xf32>
    %188 = tpu.matmul %185, %187, %cst_169 {dimension_numbers = #tpu.dot_dimension_numbers<[1], [0], [0], [1], [0, 0, 1, 1], [], []>} : vector<16x128xbf16>, vector<128x128xbf16>, vector<16x128xf32> -> vector<16x128xf32>
    %189 = arith.addf %184, %188 : vector<16x128xf32>
    %c90 = arith.constant 90 : index
    %c0_170 = arith.constant 0 : index
    %190 = vector.load %arg8[%c90, %c0_170] : memref<144x256xf32, #tpu.memory_space<vmem>>, vector<16x256xf32>
    %191 = vector.extract_strided_slice %190 {offsets = [0, 0], sizes = [16, 128], strides = [1, 1]} : vector<16x256xf32> to vector<16x128xf32>
    %192 = math.tanh %191 : vector<16x128xf32>
    %193 = vector.extract_strided_slice %190 {offsets = [0, 128], sizes = [16, 128], strides = [1, 1]} : vector<16x256xf32> to vector<16x128xf32>
    %194 = arith.addf %193, %189 : vector<16x128xf32>
    %195 = arith.negf %194 : vector<16x128xf32>
    %196 = math.exp %195 : vector<16x128xf32>
    %cst_171 = arith.constant 1.000000e+00 : f32
    %197 = vector.broadcast %cst_171 : f32 to vector<16x128xf32>
    %198 = arith.addf %197, %196 : vector<16x128xf32>
    %199 = arith.divf %197, %198 : vector<16x128xf32>
    %200 = arith.mulf %199, %192 : vector<16x128xf32>
    %c0_172 = arith.constant 0 : index
    %c0_173 = arith.constant 0 : index
    %c80 = arith.constant 80 : index
    %c0_174 = arith.constant 0 : index
    %201 = vector.load %arg6[%c0_172, %c0_173, %c80, %c0_174] : memref<1x1x128x128xf32, #tpu.memory_space<vmem>>, vector<1x1x16x128xf32>
    %202 = vector.shape_cast %201 : vector<1x1x16x128xf32> to vector<16x128xf32>
    %203 = vector.shape_cast %200 : vector<16x128xf32> to vector<1x1x16x128xf32>
    tpu.vector_store %arg6[%c0_172, %c0_173, %c80, %c0_174], %203 {strides = array<i32>} : memref<1x1x128x128xf32, #tpu.memory_space<vmem>>, vector<1x1x16x128xf32>,
    %204 = arith.truncf %199 : vector<16x128xf32> to vector<16x128xbf16>
    %c1_175 = arith.constant 1 : index
    %c0_176 = arith.constant 0 : index
    %205 = vector.load %arg9[%c1_175, %c0_176] : memref<18x128xbf16, #tpu.memory_space<vmem>>, vector<16x128xbf16>
    tpu.vector_store %arg9[%c1_175, %c0_176], %204 {strides = array<i32>} : memref<18x128xbf16, #tpu.memory_space<vmem>>, vector<16x128xbf16>,
    %c0_177 = arith.constant 0 : index
    %c0_178 = arith.constant 0 : index
    %206 = vector.load %arg9[%c0_177, %c0_178] : memref<18x128xbf16, #tpu.memory_space<vmem>>, vector<16x128xbf16>
    %c0_179 = arith.constant 0 : index
    %c0_180 = arith.constant 0 : index
    %c0_181 = arith.constant 0 : index
    %207 = vector.load %arg4[%c0_179, %c0_180, %c0_181] : memref<3x128x128xbf16, #tpu.memory_space<vmem>>, vector<1x128x128xbf16>
    %208 = vector.shape_cast %207 : vector<1x128x128xbf16> to vector<128x128xbf16>
    %cst_182 = arith.constant dense<0.000000e+00> : vector<16x128xf32>
    %209 = tpu.matmul %206, %208, %cst_182 {dimension_numbers = #tpu.dot_dimension_numbers<[1], [0], [0], [1], [0, 0, 1, 1], [], []>} : vector<16x128xbf16>, vector<128x128xbf16>, vector<16x128xf32> -> vector<16x128xf32>
    %c1_183 = arith.constant 1 : index
    %c0_184 = arith.constant 0 : index
    %210 = vector.load %arg9[%c1_183, %c0_184] : memref<18x128xbf16, #tpu.memory_space<vmem>>, vector<16x128xbf16>
    %c1_185 = arith.constant 1 : index
    %c0_186 = arith.constant 0 : index
    %c0_187 = arith.constant 0 : index
    %211 = vector.load %arg4[%c1_185, %c0_186, %c0_187] : memref<3x128x128xbf16, #tpu.memory_space<vmem>>, vector<1x128x128xbf16>
    %212 = vector.shape_cast %211 : vector<1x128x128xbf16> to vector<128x128xbf16>
    %cst_188 = arith.constant dense<0.000000e+00> : vector<16x128xf32>
    %213 = tpu.matmul %210, %212, %cst_188 {dimension_numbers = #tpu.dot_dimension_numbers<[1], [0], [0], [1], [0, 0, 1, 1], [], []>} : vector<16x128xbf16>, vector<128x128xbf16>, vector<16x128xf32> -> vector<16x128xf32>
    %214 = arith.addf %209, %213 : vector<16x128xf32>
    %c2_189 = arith.constant 2 : index
    %c0_190 = arith.constant 0 : index
    %215 = vector.load %arg9[%c2_189, %c0_190] : memref<18x128xbf16, #tpu.memory_space<vmem>>, vector<16x128xbf16>
    %c2_191 = arith.constant 2 : index
    %c0_192 = arith.constant 0 : index
    %c0_193 = arith.constant 0 : index
    %216 = vector.load %arg4[%c2_191, %c0_192, %c0_193] : memref<3x128x128xbf16, #tpu.memory_space<vmem>>, vector<1x128x128xbf16>
    %217 = vector.shape_cast %216 : vector<1x128x128xbf16> to vector<128x128xbf16>
    %cst_194 = arith.constant dense<0.000000e+00> : vector<16x128xf32>
    %218 = tpu.matmul %215, %217, %cst_194 {dimension_numbers = #tpu.dot_dimension_numbers<[1], [0], [0], [1], [0, 0, 1, 1], [], []>} : vector<16x128xbf16>, vector<128x128xbf16>, vector<16x128xf32> -> vector<16x128xf32>
    %219 = arith.addf %214, %218 : vector<16x128xf32>
    %c108 = arith.constant 108 : index
    %c0_195 = arith.constant 0 : index
    %220 = vector.load %arg8[%c108, %c0_195] : memref<144x256xf32, #tpu.memory_space<vmem>>, vector<16x256xf32>
    %221 = vector.extract_strided_slice %220 {offsets = [0, 0], sizes = [16, 128], strides = [1, 1]} : vector<16x256xf32> to vector<16x128xf32>
    %222 = math.tanh %221 : vector<16x128xf32>
    %223 = vector.extract_strided_slice %220 {offsets = [0, 128], sizes = [16, 128], strides = [1, 1]} : vector<16x256xf32> to vector<16x128xf32>
    %224 = arith.addf %223, %219 : vector<16x128xf32>
    %225 = arith.negf %224 : vector<16x128xf32>
    %226 = math.exp %225 : vector<16x128xf32>
    %cst_196 = arith.constant 1.000000e+00 : f32
    %227 = vector.broadcast %cst_196 : f32 to vector<16x128xf32>
    %228 = arith.addf %227, %226 : vector<16x128xf32>
    %229 = arith.divf %227, %228 : vector<16x128xf32>
    %230 = arith.mulf %229, %222 : vector<16x128xf32>
    %c0_197 = arith.constant 0 : index
    %c0_198 = arith.constant 0 : index
    %c96 = arith.constant 96 : index
    %c0_199 = arith.constant 0 : index
    %231 = vector.load %arg6[%c0_197, %c0_198, %c96, %c0_199] : memref<1x1x128x128xf32, #tpu.memory_space<vmem>>, vector<1x1x16x128xf32>
    %232 = vector.shape_cast %231 : vector<1x1x16x128xf32> to vector<16x128xf32>
    %233 = vector.shape_cast %230 : vector<16x128xf32> to vector<1x1x16x128xf32>
    tpu.vector_store %arg6[%c0_197, %c0_198, %c96, %c0_199], %233 {strides = array<i32>} : memref<1x1x128x128xf32, #tpu.memory_space<vmem>>, vector<1x1x16x128xf32>,
    %234 = arith.truncf %229 : vector<16x128xf32> to vector<16x128xbf16>
    %c1_200 = arith.constant 1 : index
    %c0_201 = arith.constant 0 : index
    %235 = vector.load %arg9[%c1_200, %c0_201] : memref<18x128xbf16, #tpu.memory_space<vmem>>, vector<16x128xbf16>
    tpu.vector_store %arg9[%c1_200, %c0_201], %234 {strides = array<i32>} : memref<18x128xbf16, #tpu.memory_space<vmem>>, vector<16x128xbf16>,
    %c0_202 = arith.constant 0 : index
    %c0_203 = arith.constant 0 : index
    %236 = vector.load %arg9[%c0_202, %c0_203] : memref<18x128xbf16, #tpu.memory_space<vmem>>, vector<16x128xbf16>
    %c0_204 = arith.constant 0 : index
    %c0_205 = arith.constant 0 : index
    %c0_206 = arith.constant 0 : index
    %237 = vector.load %arg4[%c0_204, %c0_205, %c0_206] : memref<3x128x128xbf16, #tpu.memory_space<vmem>>, vector<1x128x128xbf16>
    %238 = vector.shape_cast %237 : vector<1x128x128xbf16> to vector<128x128xbf16>
    %cst_207 = arith.constant dense<0.000000e+00> : vector<16x128xf32>
    %239 = tpu.matmul %236, %238, %cst_207 {dimension_numbers = #tpu.dot_dimension_numbers<[1], [0], [0], [1], [0, 0, 1, 1], [], []>} : vector<16x128xbf16>, vector<128x128xbf16>, vector<16x128xf32> -> vector<16x128xf32>
    %c1_208 = arith.constant 1 : index
    %c0_209 = arith.constant 0 : index
    %240 = vector.load %arg9[%c1_208, %c0_209] : memref<18x128xbf16, #tpu.memory_space<vmem>>, vector<16x128xbf16>
    %c1_210 = arith.constant 1 : index
    %c0_211 = arith.constant 0 : index
    %c0_212 = arith.constant 0 : index
    %241 = vector.load %arg4[%c1_210, %c0_211, %c0_212] : memref<3x128x128xbf16, #tpu.memory_space<vmem>>, vector<1x128x128xbf16>
    %242 = vector.shape_cast %241 : vector<1x128x128xbf16> to vector<128x128xbf16>
    %cst_213 = arith.constant dense<0.000000e+00> : vector<16x128xf32>
    %243 = tpu.matmul %240, %242, %cst_213 {dimension_numbers = #tpu.dot_dimension_numbers<[1], [0], [0], [1], [0, 0, 1, 1], [], []>} : vector<16x128xbf16>, vector<128x128xbf16>, vector<16x128xf32> -> vector<16x128xf32>
    %244 = arith.addf %239, %243 : vector<16x128xf32>
    %c2_214 = arith.constant 2 : index
    %c0_215 = arith.constant 0 : index
    %245 = vector.load %arg9[%c2_214, %c0_215] : memref<18x128xbf16, #tpu.memory_space<vmem>>, vector<16x128xbf16>
    %c2_216 = arith.constant 2 : index
    %c0_217 = arith.constant 0 : index
    %c0_218 = arith.constant 0 : index
    %246 = vector.load %arg4[%c2_216, %c0_217, %c0_218] : memref<3x128x128xbf16, #tpu.memory_space<vmem>>, vector<1x128x128xbf16>
    %247 = vector.shape_cast %246 : vector<1x128x128xbf16> to vector<128x128xbf16>
    %cst_219 = arith.constant dense<0.000000e+00> : vector<16x128xf32>
    %248 = tpu.matmul %245, %247, %cst_219 {dimension_numbers = #tpu.dot_dimension_numbers<[1], [0], [0], [1], [0, 0, 1, 1], [], []>} : vector<16x128xbf16>, vector<128x128xbf16>, vector<16x128xf32> -> vector<16x128xf32>
    %249 = arith.addf %244, %248 : vector<16x128xf32>
    %c126 = arith.constant 126 : index
    %c0_220 = arith.constant 0 : index
    %250 = vector.load %arg8[%c126, %c0_220] : memref<144x256xf32, #tpu.memory_space<vmem>>, vector<16x256xf32>
    %251 = vector.extract_strided_slice %250 {offsets = [0, 0], sizes = [16, 128], strides = [1, 1]} : vector<16x256xf32> to vector<16x128xf32>
    %252 = math.tanh %251 : vector<16x128xf32>
    %253 = vector.extract_strided_slice %250 {offsets = [0, 128], sizes = [16, 128], strides = [1, 1]} : vector<16x256xf32> to vector<16x128xf32>
    %254 = arith.addf %253, %249 : vector<16x128xf32>
    %255 = arith.negf %254 : vector<16x128xf32>
    %256 = math.exp %255 : vector<16x128xf32>
    %cst_221 = arith.constant 1.000000e+00 : f32
    %257 = vector.broadcast %cst_221 : f32 to vector<16x128xf32>
    %258 = arith.addf %257, %256 : vector<16x128xf32>
    %259 = arith.divf %257, %258 : vector<16x128xf32>
    %260 = arith.mulf %259, %252 : vector<16x128xf32>
    %c0_222 = arith.constant 0 : index
    %c0_223 = arith.constant 0 : index
    %c112 = arith.constant 112 : index
    %c0_224 = arith.constant 0 : index
    %261 = vector.load %arg6[%c0_222, %c0_223, %c112, %c0_224] : memref<1x1x128x128xf32, #tpu.memory_space<vmem>>, vector<1x1x16x128xf32>
    %262 = vector.shape_cast %261 : vector<1x1x16x128xf32> to vector<16x128xf32>
    %263 = vector.shape_cast %260 : vector<16x128xf32> to vector<1x1x16x128xf32>
    tpu.vector_store %arg6[%c0_222, %c0_223, %c112, %c0_224], %263 {strides = array<i32>} : memref<1x1x128x128xf32, #tpu.memory_space<vmem>>, vector<1x1x16x128xf32>,
    %264 = arith.truncf %259 : vector<16x128xf32> to vector<16x128xbf16>
    %c1_225 = arith.constant 1 : index
    %c0_226 = arith.constant 0 : index
    %265 = vector.load %arg9[%c1_225, %c0_226] : memref<18x128xbf16, #tpu.memory_space<vmem>>, vector<16x128xbf16>
    tpu.vector_store %arg9[%c1_225, %c0_226], %264 {strides = array<i32>} : memref<18x128xbf16, #tpu.memory_space<vmem>>, vector<16x128xbf16>,
    %c0_227 = arith.constant 0 : index
    %c0_228 = arith.constant 0 : index
    %c0_229 = arith.constant 0 : index
    %266 = vector.load %arg7[%c0_227, %c0_228, %c0_229] : memref<1x16x128xf32, #tpu.memory_space<vmem>>, vector<1x16x128xf32>
    %267 = vector.shape_cast %266 : vector<1x16x128xf32> to vector<16x128xf32>
    %268 = vector.shape_cast %259 : vector<16x128xf32> to vector<1x16x128xf32>
    tpu.vector_store %arg7[%c0_227, %c0_228, %c0_229], %268 {strides = array<i32>} : memref<1x16x128xf32, #tpu.memory_space<vmem>>, vector<1x16x128xf32>,
    return
  }
  func.func @transform_0(%arg0: i32, %arg1: i32) -> (i32, i32, i32, i32) {
    %c0_i32 = arith.constant 0 : i32
    %c0_i32_0 = arith.constant 0 : i32
    %c0_i32_1 = arith.constant 0 : i32
    return %arg1, %arg0, %c0_i32, %c0_i32_0 : i32, i32, i32, i32
  }
  func.func @transform_1(%arg0: i32, %arg1: i32) -> (i32, i32, i32) {
    %c0_i32 = arith.constant 0 : i32
    %c0_i32_0 = arith.constant 0 : i32
    %c0_i32_1 = arith.constant 0 : i32
    %c0_i32_2 = arith.constant 0 : i32
    return %c0_i32, %c0_i32_0, %c0_i32_1 : i32, i32, i32
  }
  func.func @transform_2(%arg0: i32, %arg1: i32) -> (i32, i32, i32) {
    %c0_i32 = arith.constant 0 : i32
    %c0_i32_0 = arith.constant 0 : i32
    %c0_i32_1 = arith.constant 0 : i32
    %c0_i32_2 = arith.constant 0 : i32
    return %c0_i32, %c0_i32_0, %c0_i32_1 : i32, i32, i32
  }
  func.func @transform_3(%arg0: i32, %arg1: i32) -> (i32, i32) {
    %c0_i32 = arith.constant 0 : i32
    %c0_i32_0 = arith.constant 0 : i32
    %c0_i32_1 = arith.constant 0 : i32
    return %c0_i32, %c0_i32_0 : i32, i32
  }
  func.func @transform_4(%arg0: i32, %arg1: i32) -> (i32, i32, i32, i32) {
    %c0_i32 = arith.constant 0 : i32
    %c0_i32_0 = arith.constant 0 : i32
    %c0_i32_1 = arith.constant 0 : i32
    return %arg1, %arg0, %c0_i32, %c0_i32_0 : i32, i32, i32, i32
  }
  func.func @transform_5(%arg0: i32, %arg1: i32) -> (i32, i32, i32) {
    %c0_i32 = arith.constant 0 : i32
    %c0_i32_0 = arith.constant 0 : i32
    %c0_i32_1 = arith.constant 0 : i32
    return %arg0, %c0_i32, %c0_i32_0 : i32, i32, i32
  }
}

</mosaic_0001>

<bundles_post_ra>
// kernel: _lambda_.2
= control target key start
LH: loop header
LB: loop body
LE: loop exit
PB: predicated region body
PF: predicated region fallthrough
CT: control target
= control target key end

     0   :  { %11 = vsyncpa [#allocation5], 0  ;;  %s8779_s0 = inlined_call_operand.vmem [shape: bf16[1,2,144,64], index: 0, kind: input, shape index: {}]   ;;  %s8780_s1 = inlined_call_operand.vmem [shape: bf16[3,64,256], index: 1, kind: input, shape index: {}]   ;;  %s8781_s2 = inlined_call_operand.vmem [shape: bf16[3,128,128], index: 2, kind: input, shape index: {}]   ;;  %s8782_s3 = inlined_call_operand.vmem [shape: f32[1,256], index: 3, kind: input, shape index: {}]   ;;  %s8783_s4 = inlined_call_operand.vmem [shape: bf16[1,2,128,128], index: 4, kind: output, shape index: {0}]   ;;  %s8784_s5 = inlined_call_operand.hbm [shape: f32[2,16,128], index: 5, kind: output, shape index: {1}]  }
   0x1   :  { %13 = vsyncpa [#allocation5 + $0x1], 0  ;;  %s7242_s18 = smov 0   ;;  %s7244_s19 = smov 0  }
   0x2   :  { %s7246_s20 = smov 0   ;;  %s7248_s21 = smov 0  }
   0x3   :  { %s7250_s22 = smov 0   ;;  %s7252_s23 = smov 0  }
   0x4 LB: > { %s5210_s24 = sadd.s32 4294967295, %s7204_s23   ;;  %s5211_s25 = sadd.s32 4294967294, %s7204_s23   ;;  %s7204_s23 = sphi %s7252_s23, %s19_s23   ;;  %s7200_s22 = sphi %s7250_s22, %s8815_s22   ;;  %s7196_s21 = sphi %s7248_s21, %s8814_s21   ;;  %s7192_s20 = sphi %s7246_s20, %s8813_s20   ;;  %s7188_s19 = sphi %s7244_s19, %s8812_s19   ;;  %s7184_s18 = sphi %s7242_s18, %s8811_s18  }
   0x5   : > { %s31_s26 = sadd.s32 1, %s7200_s22  ;;  %s157_s27 = sadd.s32 1, %s7192_s20 }
   0x6   : > { %p33_p0 = scmp.ge.s32.totalorder %s31_s26, 2  ;;  %p167_p1 = scmp.ne.s32.totalorder %s7192_s20, %s7188_s19 }
   0x7   : > { %p168_p2 = scmp.eq.s32.totalorder %s5210_s24, 1  ;;  %p173_p3 = scmp.ne.s32.totalorder %s7188_s19, %s7184_s18 }
   0x8   : > { %s8817_s26 = smov (%p33_p0, %s31_s26), 0  ;;  %p174_p5 = scmp.eq.s32.totalorder %s5211_s25, 1 }
   0x9   : > { %p7282_p4 = por %p168_p2, %p167_p1  ;;  %s154_s29 = ssub.s32 %s7200_s22, %s8817_s26 }
   0xa   : > { %p5214_p6 = scmp.ge.s32.totalorder %s7204_s23, 1  ;;  %p155_p7 = scmp.eq.s32.totalorder %s154_s29, 0 }
   0xb   : > { %p7289_p8 = por %p174_p5, %p173_p3  ;;  %p213_p9 = scmp.lt.s32.totalorder %s7204_s23, 3 }
   0xc   : > { %s7295_s6 = scalar_select %p155_p7, %s7192_s20, %s157_s27  }
   0xd   : > { %p214_p10 = pnand %p5214_p6, %p213_p9 }
   0xe   : > { %v6732_v0 = vld [vmem:[%s8780_s1 + $0x4] ss:$8 sps:$4 sm:$0xff] (!%p214_p10)   ;;  %p256_p11 = scmp.lt.s32.totalorder (!%p214_p10), %s7196_s21, 1  ;;  %v6734_v1 = vld [vmem:[%s8780_s1] ss:$8 sps:$4 sm:$0xff] (!%p214_p10)   ;;  %v7206_v2 = vmov (!%p214_p10), 0  }
   0xf   : > { %217 = sbr.rel (%p214_p10) target bundleno = 2818 (0xb02), region = 36  ;;  %513 = vmatprep.mubr.bf16.mxu1 (!%p214_p10), %v7206_v2  ;;  %277 = vst [vmem:[#allocation3] sm:$0xf] (!%p214_p10), %v7206_v2  ;;  %278 = vst [vmem:[#allocation3 + $0x4] sm:$0xf] (!%p214_p10), %v7206_v2  ;;  %463 = vmatprep.mubr.bf16.mxu0 (!%p214_p10), %v7206_v2  ;;  %vm403_vm0 = vcmask (!%p214_p10), 523264  }
  0x10   : > { %279 = vst [vmem:[#allocation3 + $0x8] sm:$0x1] (!%p214_p10), %v7206_v2  ;;  %6599 = vmatprep.subr.bf16.mxu1 (!%p214_p10), %v6732_v0  ;;  %431 = vmatprep.subr.bf16.mxu0 (!%p214_p10), %v6732_v0  ;;  %v6735_v3 = vld [vmem:[%s8780_s1 + $0x14] ss:$8 sps:$4 sm:$0xff] (!%p214_p10)   ;;  %v6737_v4 = vld [vmem:[%s8780_s1 + $0x10] ss:$8 sps:$4 sm:$0xff] (!%p214_p10)  }
  0x11   : > { %6603 = vmatpush1.bf16.msra.mxu1 (!%p214_p10), %v6734_v1  ;;  %432 = vmatpush1.bf16.msra.mxu0 (!%p214_p10), %v6734_v1  ;;  %v6738_v5 = vld [vmem:[%s8780_s1 + $0x24] ss:$8 sps:$4 sm:$0xff] (!%p214_p10)   ;;  %v6740_v6 = vld [vmem:[%s8780_s1 + $0x20] ss:$8 sps:$4 sm:$0xff] (!%p214_p10)   ;;  %v6741_v7 = vld [vmem:[%s8780_s1 + $0x34] ss:$8 sps:$4 sm:$0xff] (!%p214_p10)  }
  0x12   : > { %6600 = vmatprep.subr.bf16.mxu1 (!%p214_p10), %v6735_v3  ;;  %433 = vmatprep.subr.bf16.mxu0 (!%p214_p10), %v6735_v3  ;;  %v6743_v8 = vld [vmem:[%s8780_s1 + $0x30] ss:$8 sps:$4 sm:$0xff] (!%p214_p10)   ;;  %v6747_v9 = vld [vmem:[%s8780_s1 + $0x44] ss:$8 sps:$4 sm:$0xff] (!%p214_p10)   ;;  %v6745_v12 = vld [vmem:[%s8780_s1 + $0x40] ss:$8 sps:$4 sm:$0xff] (!%p214_p10)  }
  0x13   : > { %v6752_v13 = vld [vmem:[%s8780_s1 + $0x54] ss:$8 sps:$4 sm:$0xff] (!%p214_p10)   ;;  %v6750_v14 = vld [vmem:[%s8780_s1 + $0x50] ss:$8 sps:$4 sm:$0xff] (!%p214_p10)   ;;  %v6764_v15 = vld [vmem:[%s8780_s1 + $0x80] ss:$8 sps:$4 sm:$0xff] (!%p214_p10)  }
  0x14   : > { %v6766_v16 = vld [vmem:[%s8780_s1 + $0x84] ss:$8 sps:$4 sm:$0xff] (!%p214_p10)   ;;  %v6769_v19 = vld [vmem:[%s8780_s1 + $0x94] ss:$8 sps:$4 sm:$0xff] (!%p214_p10)   ;;  %v6755_v21 = vld [vmem:[%s8780_s1 + $0x60] ss:$8 sps:$4 sm:$0xff] (!%p214_p10)  }
  0x15   : > { %6604 = vmatpush1.bf16.msra.mxu1 (!%p214_p10), %v6737_v4  ;;  %434 = vmatpush1.bf16.msra.mxu0 (!%p214_p10), %v6737_v4  ;;  %v6757_v18 = vld [vmem:[%s8780_s1 + $0x64] ss:$8 sps:$4 sm:$0xff] (!%p214_p10)   ;;  %v6767_v22 = vld [vmem:[%s8780_s1 + $0x90] ss:$8 sps:$4 sm:$0xff] (!%p214_p10)   ;;  %v6762_v23 = vld [vmem:[%s8780_s1 + $0x74] ss:$8 sps:$4 sm:$0xff] (!%p214_p10)  }
  0x16   : > { %s7313_s13 = scalar_select %p256_p11, %s7196_s21, 1  ;;  %6601 = vmatprep.subr.bf16.mxu1 %v6738_v5  ;;  %435 = vmatprep.subr.bf16.mxu0 %v6738_v5  ;;  %v6774_v24 = vld [vmem:[%s8780_s1 + $0xa4] ss:$8 sps:$4 sm:$0xff]   ;;  %v6760_v25 = vld [vmem:[%s8780_s1 + $0x70] ss:$8 sps:$4 sm:$0xff]   ;;  %v7207_v31 = vmov 0.0  }
  0x17   : > { %v6772_v27 = vld [vmem:[%s8780_s1 + $0xa0] ss:$8 sps:$4 sm:$0xff]   ;;  %v6777_v28 = vld [vmem:[%s8780_s1 + $0xb4] ss:$8 sps:$4 sm:$0xff]   ;;  %v6775_v30 = vld [vmem:[%s8780_s1 + $0xb0] ss:$8 sps:$4 sm:$0xff]  }
  0x18   : > { %s6671_s24 = smul.u32 72, %s7313_s13  ;;  %v6770_v35 = vld [vmem:[%s8781_s2 + $0x40] sm:$0xff]   ;;  %v6778_v36 = vld [vmem:[%s8781_s2 + $0x48] sm:$0xff]   ;;  %v6779_v37 = vld [vmem:[%s8781_s2 + $0x50] sm:$0xff]   ;;  %vm1480_vm1 = vsmask.f32 7424 }
  0x19   : > { %6605 = vmatpush1.bf16.msra.mxu1 %v6740_v6  ;;  %436 = vmatpush1.bf16.msra.mxu0 %v6740_v6  ;;  %v1436_v38 = vld [vmem:[#allocation3] sm:$0xf]  ;;  %v7444_v39 = vld [vmem:[#allocation3 + $0x4] sm:$0xf]  ;;  %v6780_v42 = vld [vmem:[%s8781_s2 + $0x58] sm:$0xff]   ;;  %vm7208_vm2 = vmmov 0  }
  0x1a   : > { %s7325_s29 = scalar_lea.vmem %s8779_s0, %s6671_s24  ;;  %6602 = vmatprep.subr.bf16.mxu1 %v6741_v7  ;;  %437 = vmatprep.subr.bf16.mxu0 %v6741_v7  ;;  %v7447_v40 = vld [vmem:[#allocation3 + $0x8] ss:$0 sps:$4 sm:$0x11]   ;;  %v7454_v41 = vcombine.low %v1436_v38, %v7444_v39  ;;  %v6781_v44 = vld [vmem:[%s8781_s2 + $0x60] sm:$0xff]   ;;  %v6783_v48 = vld [vmem:[%s8781_s2 + $0x70] sm:$0xff]   ;;  %vm834_vm3 = vcmask 1046528  }
  0x1b   : > { %v7340_v10 = vld [vmem:[%s7325_s29 + $0x28] sm:$0xff]   ;;  %v7343_v11 = vld [vmem:[%s7325_s29] sm:$0xff]   ;;  %v7366_v17 = vld [vmem:[%s7325_s29 + $0x30] sm:$0xff]   ;;  %v1489_v46 = vshll.u32 %v7447_v40, 16  ;;  %vm8786_vm4 = vcmask 1045504   ;;  %s5846_s16 = sshll.u32 %s7313_s13, 6 }
  0x1c   : > { %v7376_v20 = vld [vmem:[%s7325_s29 + $0x8] sm:$0xff]   ;;  %v7400_v26 = vld [vmem:[%s7325_s29 + $0x38] sm:$0xff]   ;;  %v6758_v29 = vld [vmem:[%s7325_s29 + $0x10] sm:$0xff]   ;;  %v1482_v43 = vshrl.u32 %v7454_v41, 16  ;;  %v1484_v45 = vshll.u32 %v7454_v41, 16  ;;  %vm8785_vm5 = vcmask 1043456   ;;  %s7853_s25 = scalar_lea.vmem %s8783_s4, %s5846_s16 }
  0x1d   : > { %6606 = vmatpush1.bf16.msra.mxu1 %v6743_v8  ;;  %438 = vmatpush1.bf16.msra.mxu0 %v6743_v8  ;;  %v7420_v32 = vld [vmem:[%s7325_s29 + $0x40] sm:$0xff]   ;;  %v6763_v33 = vld [vmem:[%s7325_s29 + $0x18] sm:$0xff]   ;;  %v6782_v47 = vld [vmem:[%s8781_s2 + $0x68] sm:$0xff]   ;;  %v1491_v51 = vrot.slane %v1489_v46, 1  ;;  %vm1852_vm6 = vsmask.f32 7938 }
  0x1e   : > { %639 = vmatprep.subr.bf16.mxu1 %v6747_v9  ;;  %1062 = vmatprep.subr.bf16.mxu0 %v6766_v16  ;;  %v6771_v34 = vld [vmem:[%s7325_s29 + $0x20] sm:$0xff]   ;;  %v6784_v49 = vld [vmem:[%s8781_s2 + $0x78] sm:$0xff]   ;;  %v1486_v50 = vrot.slane %v1484_v45, 1  ;;  %v6788_v55 = vld [vmem:[%s8781_s2 + $0x8] sm:$0xff]   ;;  %v1696_v9 = vrot.slane %v7447_v40, 1  ;;  %vm1858_vm9 = vcmask 1040384  }
  0x1f   : > { %v6787_v53 = vld [vmem:[%s8781_s2] sm:$0xff]   ;;  %v6789_v56 = vld [vmem:[%s8781_s2 + $0x10] sm:$0xff]   ;;  %v6790_v57 = vld [vmem:[%s8781_s2 + $0x18] sm:$0xff]   ;;  %vm1828_vm7 = vsmask.f32 256  ;;  %vm8787_vm13 = vcmask 1041408  }
  0x20   : > { %5241 = vmatmul.mubr.msk.bf16.vlgmr.msra.gmra.mrb[0].mxu1 %vm403_vm0, %v7340_v10  ;;  %5236 = vmatmul.mubr.msk.bf16.vlgmr.msra.gmra.mrb[0].mxu0 %vm403_vm0, %v7343_v11  ;;  %v1487_v52 = vor.u32 %v1486_v50, %v1482_v43  ;;  %v6791_v58 = vld [vmem:[%s8781_s2 + $0x20] sm:$0xff]   ;;  %v6792_v59 = vld [vmem:[%s8781_s2 + $0x28] sm:$0xff]   ;;  %v6793_v60 = vld [vmem:[%s8781_s2 + $0x30] sm:$0xff]   ;;  %vm1829_vm8 = vsmask.f32 4368  ;;  %vm2265_vm14 = vcmask 1042432  }
  0x21   : > { %640 = vmatpush1.bf16.msra.mxu1 %v6745_v12  ;;  %523 = vmatprep.mubr.bf16.mxu1 %v7206_v2  ;;  %v6794_v61 = vld [vmem:[%s8781_s2 + $0x38] sm:$0xff]   ;;  %v6795_v62 = vld [vmem:[%s8781_s2 + $0x80] sm:$0xff]   ;;  %v6796_v63 = vld [vmem:[%s8781_s2 + $0x88] sm:$0xff]   ;;  %v308_v12 = vlaneseq  ;;  %vm2266_vm15 = vcmask 1046532   ;;  %s251_s17 = sand.u32 1, %s7188_s19   ;;  %s5891_s13 = sshll.u32 %s7196_s21, 8 }
  0x22   : > { %641 = vmatprep.subr.bf16.mxu1 %v6752_v13  ;;  %473 = vmatprep.mubr.bf16.mxu0 %v7206_v2  ;;  %v1492_v54 = vsel %vm1480_vm1, %v1487_v52, %v1491_v51  ;;  %v6797_v0 = vld [vmem:[%s8781_s2 + $0x90] sm:$0xff]   ;;  %v6798_v1 = vld [vmem:[%s8781_s2 + $0x98] sm:$0xff]   ;;  %v6800_v3 = vld [vmem:[%s8781_s2 + $0xa8] sm:$0xff]   ;;  %s5215_s24 = sshll.u32 %s251_s17, 4  ;;  %s8715_s29 = scalar_lea.hbm %s8784_s5, %s5891_s13 }
  0x23   : > { %1063 = vmatpush1.bf16.msra.mxu0 %v6764_v15  ;;  %v1673_v4 = vld [vmem:[#allocation3] sm:$0xe]  ;;  %v6801_v5 = vld [vmem:[%s8781_s2 + $0xb0] sm:$0xff]   ;;  %v6802_v7 = vld [vmem:[%s8781_s2 + $0xb8] sm:$0xff]   ;;  %s253_s27 = scalar_lea.vmem [#allocation4], %s5215_s24  ;;  %s8719_s21 = scalar_lea.sflag [#allocation5], %s251_s17 }
  0x24   : > { %1064 = vmatprep.subr.bf16.mxu0 %v6769_v19  ;;  %v5345_v6 = vcombine.low %v1673_v4, %v7444_v39  ;;  %v6805_v13 = vld [vmem:[%s8781_s2 + $0x48] sm:$0xff]   ;;  %vm7856_vm10 = vmand %vm8785_vm5, %vm1852_vm6  ;;  %vm2290_vm6 = vsmask.f32 7440  ;;  %s5090_s7 = sshll.u32 %s253_s27, 4  ;;  %s7209_s11 = smov [#allocation4]   ;;  %s8717_s7 = int_to_ptr.vmem [resolvable:$true] %s5090_s7 }
  0x25   : > { %642 = vmatpush1.bf16.msra.mxu1 %v6750_v14  ;;  %v309_v14 = vshrl.u32 %v308_v12, 7  ;;  %vm7861_vm11 = vmor %vm1828_vm7, %vm1829_vm8  ;;  %s7126_s10 = scalar_lea.vmem %s8717_s7, 256  ;;  %s7130_s12 = sshll.u32 %s7209_s11, 4  ;;  %s7131_s12 = int_to_ptr.vmem [resolvable:$false] %s7130_s12 }
  0x26   : > { %643 = vmatprep.subr.bf16.mxu1 %v6757_v18  ;;  %v1695_v8 = vrot.slane %v5345_v6, 1  ;;  %vm7866_vm12 = vmand %vm1858_vm9, %vm1828_vm7  ;;  %p7127_p12 = scmp.ne.s32.totalorder %s8717_s7, %s7126_s10  ;;  %s7132_s14 = scalar_lea.vmem %s7131_s12, 512 }
  0x27   : > { %1065 = vmatpush1.bf16.msra.mxu0 %v6767_v22  ;;  %vm7986_vm7 = vmor %vm2265_vm14, %vm2266_vm15  ;;  %vm2733_vm14 = vcmask 1045508   ;;  %vm2756_vm15 = vsmask.f32 2304  ;;  %p7133_p1 = scmp.lt.s32.totalorder %s8717_s7, %s7131_s12  ;;  %p7134_p2 = scmp.lt.s32.totalorder %s7132_s14, %s7126_s10 }
  0x28   : > { %5242 = vmatmul.mubr.msk.bf16.gmra.mrb[4].mxu1 %vm403_vm0, %v7366_v17  ;;  %5237 = vmatmul.mubr.msk.bf16.gmra.mrb[4].mxu0 %vm403_vm0, %v7376_v20  ;;  %p7128_p13 = pnand %p7127_p12, %p7282_p4 }
  0x29   : > { %533 = vmatprep.mubr.bf16.mxu1 %v7206_v2  ;;  %483 = vmatprep.mubr.bf16.mxu0 %v7206_v2  ;;  %p7135_p3 = por %p7134_p2, %p7133_p1 }
  0x2a   : > { %644 = vmatpush1.bf16.msra.mxu1 %v6755_v21  ;;  %1066 = vmatprep.subr.bf16.mxu0 %v6774_v24  ;;  %v310_v21 = vsub.s32 0, %v309_v14  ;;  %v306_v24 = vld [vmem:[%s8782_s3] sm:$0x3]  ;;  %p7129_p0 = pneg %p7128_p13 }
  0x2b   : > { %645 = vmatprep.subr.bf16.mxu1 %v6762_v23  ;;  %1067 = vmatpush1.bf16.msra.mxu0 %v6772_v27 }
  0x2c   : > { %1068 = vmatprep.subr.bf16.mxu0 %v6777_v28  ;;  %p7136_p5 = pnand %p7135_p3, %p7129_p0 }
  0x2e   : > { %646 = vmatpush1.bf16.msra.mxu1 %v6760_v25  ;;  %v314_v25 = vsub.s32 1, %v309_v14 }
  0x2f   : > { %6119 = vmatprep.subr.bf16.mxu1 %v7207_v31  ;;  %1069 = vmatpush1.bf16.msra.mxu0 %v6775_v30 }
  0x30   : > { %5243 = vmatmul.mubr.msk.bf16.gmra.mrb[8].mxu1 %vm403_vm0, %v7400_v26  ;;  %5238 = vmatmul.mubr.msk.bf16.gmra.mrb[8].mxu0 %vm403_vm0, %v6758_v29  ;;  %v7623_v27 = vrot.slane %v306_v24, %v314_v25 }
  0x31   : > { %543 = vmatprep.mubr.bf16.mxu1 %v7206_v2  ;;  %493 = vmatprep.mubr.bf16.mxu0 %v7206_v2 }
  0x32   : > { %6179 = vmatprep.subr.bf16.mxu0 %v7207_v31 }
  0x38   : > { %5244 = vmatmul.mubr.msk.bf16.gmra.mrb[12].mxu1 %vm403_vm0, %v7420_v32  ;;  %5239 = vmatmul.mubr.msk.bf16.gmra.mrb[12].mxu0 %vm403_vm0, %v6763_v33 }
  0x39   : > { %671 = vmatprep.mubr.bf16.mxu1 %v7206_v2  ;;  %503 = vmatprep.mubr.bf16.mxu0 %v7206_v2 }
  0x40   : > { %5261 = vmatmul.mubr.msk.bf16.vlgmr.msra.gmra.mrb[16].mxu1 %vm403_vm0, %v7343_v11  ;;  %5240 = vmatmul.mubr.msk.bf16.gmra.mrb[16].mxu0 %vm403_vm0, %v6771_v34 }
  0x41   : > { %6120 = vmatpush3.bf16.msra.mxu1 %v6770_v35  ;;  %681 = vmatprep.mubr.bf16.mxu1 %v7206_v2 }
  0x42   : > { %1094 = vmatprep.mubr.bf16.mxu0 %v7206_v2  ;;  %6121 = vmatprep.subr.bf16.mxu1 %v7207_v31 }
  0x45   : > { %6122 = vmatpush3.bf16.msra.mxu1 %v6778_v36 }
  0x46   : > { %6123 = vmatprep.subr.bf16.mxu1 %v7207_v31 }
  0x48   : > { %5262 = vmatmul.mubr.msk.bf16.gmra.mrb[20].mxu1 %vm403_vm0, %v7376_v20  ;;  %5286 = vmatmul.mubr.msk.bf16.vlgmr.msra.gmra.mrb[20].mxu0 %vm403_vm0, %v7343_v11  ;;  %v6804_v11 = vld [vmem:[%s8781_s2 + $0x40] sm:$0xff]  }
  0x49   : > { %691 = vmatprep.mubr.bf16.mxu1 %v7206_v2  ;;  %1104 = vmatprep.mubr.bf16.mxu0 %v7206_v2 }
  0x4a   : > { %6124 = vmatpush3.bf16.msra.mxu1 %v6779_v37  ;;  %6180 = vmatpush3.bf16.msra.mxu0 %v6804_v11 }
  0x4b   : > { %6125 = vmatprep.subr.bf16.mxu1 %v7207_v31  ;;  %6181 = vmatprep.subr.bf16.mxu0 %v7207_v31 }
  0x4e   : > { %6126 = vmatpush3.bf16.msra.mxu1 %v6780_v42  ;;  %6182 = vmatpush3.bf16.msra.mxu0 %v6805_v13 }
  0x4f   : > { %6127 = vmatprep.subr.bf16.mxu1 %v7207_v31  ;;  %6183 = vmatprep.subr.bf16.mxu0 %v7207_v31 }
  0x50   : > { %5263 = vmatmul.mubr.msk.bf16.gmra.mrb[24].mxu1 %vm403_vm0, %v6758_v29  ;;  %5287 = vmatmul.mubr.msk.bf16.gmra.mrb[24].mxu0 %vm403_vm0, %v7376_v20 }
  0x51   : > { %701 = vmatprep.mubr.bf16.mxu1 %v7206_v2  ;;  %1114 = vmatprep.mubr.bf16.mxu0 %v7206_v2 }
  0x52   : > { %6128 = vmatpush3.bf16.msra.mxu1 %v6781_v44 }
  0x53   : > { %6129 = vmatprep.subr.bf16.mxu1 %v7207_v31 }
  0x56   : > { %6130 = vmatpush3.bf16.msra.mxu1 %v6782_v47 }
  0x57   : > { %6131 = vmatprep.subr.bf16.mxu1 %v7207_v31 }
  0x58   : > { %5264 = vmatmul.mubr.msk.bf16.gmra.mrb[28].mxu1 %vm403_vm0, %v6763_v33  ;;  %5288 = vmatmul.mubr.msk.bf16.gmra.mrb[28].mxu0 %vm403_vm0, %v6758_v29 }
  0x59   : > { %711 = vmatprep.mubr.bf16.mxu1 %v7206_v2  ;;  %1124 = vmatprep.mubr.bf16.mxu0 %v7206_v2 }
  0x5a   : > { %6132 = vmatpush3.bf16.msra.mxu1 %v6783_v48 }
  0x5b   : > { %6133 = vmatprep.subr.bf16.mxu1 %v7207_v31 }
  0x5e   : > { %6134 = vmatpush3.bf16.msra.mxu1 %v6784_v49 }
  0x5f   : > { %6139 = vmatprep.subr.bf16.mxu1 %v7207_v31 }
  0x60   : > { %5265 = vmatmul.mubr.msk.bf16.gmra.mrb[32].mxu1 %vm403_vm0, %v6771_v34  ;;  %5289 = vmatmul.mubr.msk.bf16.gmra.mrb[32].mxu0 %vm403_vm0, %v6763_v33 }
  0x61   : > { %721 = vmatprep.mubr.bf16.mxu1 %v7206_v2  ;;  %1134 = vmatprep.mubr.bf16.mxu0 %v7206_v2 }
  0x68   : > { %5266 = vmatmul.mubr.msk.bf16.gmra.mrb[36].mxu1 %vm403_vm0, %v7340_v10  ;;  %5290 = vmatmul.mubr.msk.bf16.gmra.mrb[36].mxu0 %vm403_vm0, %v6771_v34 }
  0x69   : > { %731 = vmatprep.mubr.bf16.mxu1 %v7206_v2  ;;  %1144 = vmatprep.mubr.bf16.mxu0 %v7206_v2 }
  0x70   : > { %5267 = vmatmul.mubr.msk.bf16.gmra.mrb[40].mxu1 %vm403_vm0, %v7366_v17  ;;  %5291 = vmatmul.mubr.msk.bf16.gmra.mrb[40].mxu0 %vm403_vm0, %v7340_v10  ;;  %v1697_v10 = vsel %vm834_vm3, %v1695_v8, %v1696_v9 }
  0x71   : > { %741 = vmatprep.mubr.bf16.mxu1 %v7206_v2  ;;  %1154 = vmatprep.mubr.bf16.mxu0 %v7206_v2 }
  0x78   : > { %5268 = vmatmul.mubr.msk.bf16.gmra.mrb[44].mxu1 %vm403_vm0, %v7400_v26  ;;  %5292 = vmatmul.mubr.msk.bf16.gmra.mrb[44].mxu0 %vm403_vm0, %v7366_v17 }
  0x79   : > { %751 = vmatprep.mubr.bf16.mxu1 %v7206_v2  ;;  %1164 = vmatprep.mubr.bf16.mxu0 %v7206_v2 }
  0x80   : > { %5269 = vmatmul.mubr.msk.bf16.gmra.mrb[48].mxu1 %vm403_vm0, %v7420_v32  ;;  %5293 = vmatmul.mubr.msk.bf16.gmra.mrb[48].mxu0 %vm403_vm0, %v7400_v26  ;;  %v7621_v26 = vrot.slane %v306_v24, %v310_v21 }
  0x81   : > { %6135 = vmatprep.mubr.msk.bf16.mxu1 %vm7208_vm2, %v7207_v31  ;;  %1174 = vmatprep.mubr.bf16.mxu0 %v7206_v2  ;;  %v6799_v2 = vld [vmem:[%s8781_s2 + $0xa0] sm:$0xff]  }
  0x88   : > { %6136 = vmatmul.mubr.bf16.vlgmr.msra.gmra.mrb[52].mxu1 %v1492_v54  ;;  %5294 = vmatmul.mubr.msk.bf16.gmra.mrb[52].mxu0 %vm403_vm0, %v7420_v32  ;;  %vm2289_vm0 = vsmask.f32 3328 }
  0x89   : > { %6140 = vmatpush3.bf16.msra.mxu1 %v6787_v53  ;;  %6155 = vmatprep.mubr.msk.bf16.mxu1 %vm7208_vm2, %v7207_v31  ;;  %vm7990_vm8 = vmor %vm2289_vm0, %vm2290_vm6  ;;  %vm2757_vm0 = vsmask.f32 6416 }
  0x8a   : > { %6141 = vmatprep.subr.bf16.mxu1 %v7207_v31  ;;  %6195 = vmatprep.mubr.msk.bf16.mxu0 %vm7208_vm2, %v7207_v31  ;;  %vm8119_vm6 = vmor %vm8787_vm13, %vm2733_vm14  ;;  %vm3199_vm14 = vcmask 1044484  }
  0x8d   : > { %6142 = vmatpush3.bf16.msra.mxu1 %v6788_v55 }
  0x8e   : > { %6143 = vmatprep.subr.bf16.mxu1 %v7207_v31 }
  0x91   : > { %6144 = vmatpush3.bf16.msra.mxu1 %v6789_v56 }
  0x92   : > { %6145 = vmatprep.subr.bf16.mxu1 %v7207_v31 }
  0x95   : > { %6146 = vmatpush3.bf16.msra.mxu1 %v6790_v57 }
  0x96   : > { %6147 = vmatprep.subr.bf16.mxu1 %v7207_v31 }
  0x99   : > { %6148 = vmatpush3.bf16.msra.mxu1 %v6791_v58 }
  0x9a   : > { %6149 = vmatprep.subr.bf16.mxu1 %v7207_v31 }
  0x9d   : > { %6150 = vmatpush3.bf16.msra.mxu1 %v6792_v59 }
  0x9e   : > { %6151 = vmatprep.subr.bf16.mxu1 %v7207_v31 }
  0xa1   : > { %6152 = vmatpush3.bf16.msra.mxu1 %v6793_v60 }
  0xa2   : > { %6153 = vmatprep.subr.bf16.mxu1 %v7207_v31 }
  0xa5   : > { %6154 = vmatpush3.bf16.msra.mxu1 %v6794_v61 }
  0xa6   : > { %6159 = vmatprep.subr.bf16.mxu1 %v7207_v31 }
  0xa8   : > { %6156 = vmatmul.mubr.bf16.vlgmr.msra.gmra.mrb[52].mxu1 %v7454_v41 }
  0xa9   : > { %6160 = vmatpush3.bf16.msra.mxu1 %v6795_v62  ;;  %6175 = vmatprep.mubr.msk.bf16.mxu1 %vm7208_vm2, %v7207_v31 }
  0xaa   : > { %6161 = vmatprep.subr.bf16.mxu1 %v7207_v31 }
  0xad   : > { %6162 = vmatpush3.bf16.msra.mxu1 %v6796_v63 }
  0xae   : > { %6163 = vmatprep.subr.bf16.mxu1 %v7207_v31 }
  0xb1   : > { %6164 = vmatpush3.bf16.msra.mxu1 %v6797_v0 }
  0xb2   : > { %6165 = vmatprep.subr.bf16.mxu1 %v7207_v31 }
  0xb5   : > { %6166 = vmatpush3.bf16.msra.mxu1 %v6798_v1 }
  0xb6   : > { %6167 = vmatprep.subr.bf16.mxu1 %v7207_v31 }
  0xb9   : > { %6168 = vmatpush3.bf16.msra.mxu1 %v6799_v2 }
  0xba   : > { %6169 = vmatprep.subr.bf16.mxu1 %v7207_v31 }
  0xbd   : > { %6170 = vmatpush3.bf16.msra.mxu1 %v6800_v3 }
  0xbe   : > { %6171 = vmatprep.subr.bf16.mxu1 %v7207_v31 }
  0xc1   : > { %6172 = vmatpush3.bf16.msra.mxu1 %v6801_v5 }
  0xc2   : > { %6173 = vmatprep.subr.bf16.mxu1 %v7207_v31 }
  0xc5   : > { %6174 = vmatpush3.bf16.msra.mxu1 %v6802_v7 }
  0xc6   : > { %6239 = vmatprep.subr.bf16.mxu1 %v7207_v31 }
  0xc8   : > { %6176 = vmatmul.mubr.bf16.vlgmr.msra.gmra.mrb[52].mxu1 %v1697_v10 }
  0xc9   : > { %6255 = vmatprep.mubr.msk.bf16.mxu1 %vm7208_vm2, %v7207_v31 }
  0xf3   : > { %v7605_v15 = vpop.f32.mrb[0].mxu1  ;;  %v465_v16 = vpop.f32.mrb[0].mxu0 }
  0xf4   : > { %v7608_v17 = vpop.f32.mrb[1].mxu1  ;;  %v467_v18 = vpop.f32.mrb[1].mxu0  ;;  %v466_v5 = vadd.f32 %v465_v16, %v7621_v26 }
  0xf5   : > { %v7610_v19 = vpop.f32.mrb[2].mxu1  ;;  %v7612_v20 = vpop.f32.mrb[2].mxu0  ;;  %v468_v8 = vadd.f32 %v467_v18, %v7623_v27 }
  0xf6   : > { %v7614_v22 = vpop.f32.mrb[3].mxu1  ;;  %v7616_v23 = vpop.f32.mrb[3].mxu0  ;;  %v470_v16 = vadd.f32 %v7612_v20, %v7621_v26 }
  0xf7   : > { %v472_v18 = vadd.f32 %v7616_v23, %v7623_v27 }
  0xfb   : > { %v525_v28 = vpop.f32.mrb[4].mxu1  ;;  %v7625_v29 = vpop.f32.mrb[4].mxu0 }
  0xfc   : > { %v7628_v30 = vadd.f32 %v525_v28, %v7621_v26  ;;  %v527_v32 = vpop.f32.mrb[5].mxu1  ;;  %v7630_v33 = vpop.f32.mrb[5].mxu0 }
  0xfd   : > { %v7633_v34 = vadd.f32 %v527_v32, %v7623_v27  ;;  %v529_v35 = vpop.f32.mrb[6].mxu1  ;;  %v7635_v36 = vpop.f32.mrb[6].mxu0  ;;  %v478_v20 = vadd.f32 %v7630_v33, %v7623_v27 }
  0xfe   : > { %v7638_v37 = vadd.f32 %v529_v35, %v7621_v26  ;;  %v531_v38 = vpop.f32.mrb[7].mxu1  ;;  %v7640_v39 = vpop.f32.mrb[7].mxu0 }
  0xff   : > { %v7643_v40 = vadd.f32 %v531_v38, %v7623_v27 }
 0x103   : > { %v535_v41 = vpop.f32.mrb[8].mxu1  ;;  %v7645_v42 = vpop.f32.mrb[8].mxu0 }
 0x104   : > { %v7648_v43 = vadd.f32 %v535_v41, %v7621_v26  ;;  %v537_v44 = vpop.f32.mrb[9].mxu1  ;;  %v7650_v45 = vpop.f32.mrb[9].mxu0 }
 0x105   : > { %v7653_v46 = vadd.f32 %v537_v44, %v7623_v27  ;;  %v539_v47 = vpop.f32.mrb[10].mxu1  ;;  %v7655_v48 = vpop.f32.mrb[10].mxu0 }
 0x106   : > { %v7658_v49 = vadd.f32 %v539_v47, %v7621_v26  ;;  %v541_v50 = vpop.f32.mrb[11].mxu1  ;;  %v7660_v51 = vpop.f32.mrb[11].mxu0 }
 0x107   : > { %v7663_v52 = vadd.f32 %v541_v50, %v7623_v27  ;;  %v476_v50 = vadd.f32 %v7625_v29, %v7621_v26 }
 0x10b   : > { %v545_v53 = vpop.f32.mrb[12].mxu1  ;;  %v7665_v54 = vpop.f32.mrb[12].mxu0 }
 0x10c   : > { %v7668_v55 = vadd.f32 %v545_v53, %v7621_v26  ;;  %v547_v56 = vpop.f32.mrb[13].mxu1  ;;  %v7670_v57 = vpop.f32.mrb[13].mxu0 }
 0x10d   : > { %v7673_v58 = vadd.f32 %v547_v56, %v7623_v27  ;;  %v549_v59 = vpop.f32.mrb[14].mxu1  ;;  %v7675_v60 = vpop.f32.mrb[14].mxu0 }
 0x10e   : > { %v550_v61 = vadd.f32 %v549_v59, %v7621_v26  ;;  %v551_v62 = vpop.f32.mrb[15].mxu1  ;;  %v7678_v63 = vpop.f32.mrb[15].mxu0 }
 0x10f   : > { %v552_v0 = vadd.f32 %v551_v62, %v7623_v27 }
 0x110   : > { %588 = vst [vmem:[#allocation2 + $0x110] sm:$0xff] %v550_v61 }
 0x111   : > { %589 = vst [vmem:[#allocation2 + $0x118] sm:$0xff] %v552_v0 }
 0x113   : > { %v673_v1 = vpop.f32.mrb[16].mxu1  ;;  %v7681_v2 = vpop.f32.mrb[16].mxu0 }
 0x114   : > { %v675_v3 = vpop.f32.mrb[17].mxu1  ;;  %v7683_v4 = vpop.f32.mrb[17].mxu0  ;;  %v835_v9 = vrot.slane %v673_v1, 1 }
 0x115   : > { %v677_v6 = vpop.f32.mrb[18].mxu1  ;;  %v7686_v7 = vpop.f32.mrb[18].mxu0  ;;  %v838_v13 = vrot.slane %v675_v3, 1 }
 0x116   : > { %v836_v10 = vrot.slane %v677_v6, 1  ;;  %v679_v11 = vpop.f32.mrb[19].mxu1  ;;  %v7689_v12 = vpop.f32.mrb[19].mxu0 }
 0x117   : > { %v839_v14 = vrot.slane %v679_v11, 1 }
 0x118   : > { %v837_v21 = vsel %vm834_vm3, %v835_v9, %v836_v10 }
 0x119   : > { %v941_v24 = vadd.f32 %v837_v21, %v466_v5  ;;  %v840_v25 = vsel %vm834_vm3, %v838_v13, %v839_v14 }
 0x11a   : > { %v942_v28 = vadd.f32 %v840_v25, %v468_v8 }
 0x11b   : > { %v683_v32 = vpop.f32.mrb[20].mxu1  ;;  %v1096_v35 = vpop.f32.mrb[20].mxu0 }
 0x11c   : > { %v841_v38 = vrot.slane %v683_v32, 1  ;;  %v685_v41 = vpop.f32.mrb[21].mxu1  ;;  %v1258_v44 = vrot.slane %v1096_v35, 2  ;;  %v1098_v47 = vpop.f32.mrb[21].mxu0 }
 0x11d   : > { %v843_v53 = vrot.slane %v685_v41, 1  ;;  %v687_v56 = vpop.f32.mrb[22].mxu1  ;;  %v1261_v59 = vrot.slane %v1098_v47, 2  ;;  %v1100_v61 = vpop.f32.mrb[22].mxu0 }
 0x11e   : > { %v842_v62 = vsel %vm834_vm3, %v836_v10, %v841_v38  ;;  %v845_v0 = vrot.slane %v687_v56, 1  ;;  %v689_v1 = vpop.f32.mrb[23].mxu1  ;;  %v1259_v23 = vrot.slane %v1100_v61, 2  ;;  %v1102_v3 = vpop.f32.mrb[23].mxu0 }
 0x11f   : > { %v943_v5 = vadd.f32 %v842_v62, %v470_v16  ;;  %v844_v6 = vsel %vm834_vm3, %v839_v14, %v843_v53  ;;  %v847_v8 = vrot.slane %v689_v1, 1  ;;  %v1262_v9 = vrot.slane %v1102_v3, 2 }
 0x120   : > { %v944_v29 = vadd.f32 %v844_v6, %v472_v18  ;;  %v846_v11 = vsel %vm834_vm3, %v841_v38, %v845_v0  ;;  %v1260_v13 = vsel %vm8786_vm4, %v1258_v44, %v1259_v23  ;;  %v480_v14 = vadd.f32 %v7635_v36, %v7621_v26 }
 0x121   : > { %v945_v21 = vadd.f32 %v846_v11, %v476_v50  ;;  %v848_v25 = vsel %vm834_vm3, %v843_v53, %v847_v8  ;;  %v7706_v33 = vadd.f32 %v1260_v13, %v941_v24  ;;  %v1263_v10 = vsel %vm8786_vm4, %v1261_v59, %v1262_v9 }
 0x122   : > { %v946_v32 = vadd.f32 %v848_v25, %v478_v20  ;;  %v7709_v35 = vadd.f32 %v1263_v10, %v942_v28  ;;  %v482_v18 = vadd.f32 %v7640_v39, %v7623_v27  ;;  %v486_v24 = vadd.f32 %v7645_v42, %v7621_v26 }
 0x123   : > { %v693_v16 = vpop.f32.mrb[24].mxu1  ;;  %v1106_v41 = vpop.f32.mrb[24].mxu0  ;;  %v488_v53 = vadd.f32 %v7650_v45, %v7623_v27 }
 0x124   : > { %v849_v38 = vrot.slane %v693_v16, 1  ;;  %v695_v44 = vpop.f32.mrb[25].mxu1  ;;  %v1264_v47 = vrot.slane %v1106_v41, 2  ;;  %v1108_v50 = vpop.f32.mrb[25].mxu0 }
 0x125   : > { %v851_v28 = vrot.slane %v695_v44, 1  ;;  %v697_v56 = vpop.f32.mrb[26].mxu1  ;;  %v1266_v59 = vrot.slane %v1108_v50, 2  ;;  %v1110_v61 = vpop.f32.mrb[26].mxu0 }
 0x126   : > { %v850_v36 = vsel %vm834_vm3, %v845_v0, %v849_v38  ;;  %v853_v20 = vrot.slane %v697_v56, 1  ;;  %v1265_v62 = vsel %vm8786_vm4, %v1259_v23, %v1264_v47  ;;  %v699_v39 = vpop.f32.mrb[27].mxu1  ;;  %v1268_v1 = vrot.slane %v1110_v61, 2  ;;  %v1112_v3 = vpop.f32.mrb[27].mxu0 }
 0x127   : > { %v947_v6 = vadd.f32 %v850_v36, %v480_v14  ;;  %v852_v11 = vsel %vm834_vm3, %v847_v8, %v851_v28  ;;  %v7722_v13 = vadd.f32 %v1265_v62, %v943_v5  ;;  %v855_v42 = vrot.slane %v699_v39, 1 }
 0x128   : > { %v948_v25 = vadd.f32 %v852_v11, %v482_v18  ;;  %v854_v45 = vsel %vm834_vm3, %v849_v38, %v853_v20  ;;  %v1267_v10 = vsel %vm8786_vm4, %v1262_v9, %v1266_v59  ;;  %v1269_v16 = vsel %vm8786_vm4, %v1264_v47, %v1268_v1 }
 0x129   : > { %v949_v0 = vadd.f32 %v854_v45, %v486_v24  ;;  %v856_v41 = vsel %vm834_vm3, %v851_v28, %v855_v42  ;;  %v7728_v23 = vadd.f32 %v1267_v10, %v944_v29  ;;  %v1368_v44 = vadd.f32 %v1269_v16, %v945_v21 }
 0x12a   : > { %v950_v50 = vadd.f32 %v856_v41, %v488_v53  ;;  %v1270_v14 = vrot.slane %v1112_v3, 2  ;;  %v490_v5 = vadd.f32 %v7655_v48, %v7621_v26  ;;  %v492_v8 = vadd.f32 %v7660_v51, %v7623_v27 }
 0x12b   : > { %1404 = vst [vmem:[#allocation2 + $0x20] sm:$0xff] %v1368_v44  ;;  %v703_v18 = vpop.f32.mrb[28].mxu1  ;;  %v1116_v38 = vpop.f32.mrb[28].mxu0  ;;  %v496_v9 = vadd.f32 %v7665_v54, %v7621_v26  ;;  %v498_v53 = vadd.f32 %v7670_v57, %v7623_v27 }
 0x12c   : > { %v1271_v47 = vsel %vm8786_vm4, %v1266_v59, %v1270_v14  ;;  %v857_v24 = vrot.slane %v703_v18, 1  ;;  %v705_v29 = vpop.f32.mrb[29].mxu1  ;;  %v1272_v28 = vrot.slane %v1116_v38, 2  ;;  %v1118_v21 = vpop.f32.mrb[29].mxu0 }
 0x12d   : > { %v1369_v56 = vadd.f32 %v1271_v47, %v946_v32  ;;  %v859_v48 = vrot.slane %v705_v29, 1  ;;  %v707_v61 = vpop.f32.mrb[30].mxu1  ;;  %v1274_v36 = vrot.slane %v1118_v21, 2  ;;  %v1120_v51 = vpop.f32.mrb[30].mxu0 }
 0x12e   : > { %v858_v62 = vsel %vm834_vm3, %v853_v20, %v857_v24  ;;  %v861_v39 = vrot.slane %v707_v61, 1  ;;  %v1273_v3 = vsel %vm8786_vm4, %v1268_v1, %v1272_v28  ;;  %v709_v54 = vpop.f32.mrb[31].mxu1  ;;  %v1276_v11 = vrot.slane %v1120_v51, 2  ;;  %v1122_v59 = vpop.f32.mrb[31].mxu0 }
 0x12f   : > { %1405 = vst [vmem:[#allocation2 + $0x28] sm:$0xff] %v1369_v56  ;;  %v951_v45 = vadd.f32 %v858_v62, %v490_v5  ;;  %v860_v10 = vsel %vm834_vm3, %v855_v42, %v859_v48  ;;  %v1370_v16 = vadd.f32 %v1273_v3, %v947_v6  ;;  %v863_v41 = vrot.slane %v709_v54, 1 }
 0x130   : > { %v952_v57 = vadd.f32 %v860_v10, %v492_v8  ;;  %v862_v32 = vsel %vm834_vm3, %v857_v24, %v861_v39  ;;  %v1275_v44 = vsel %vm8786_vm4, %v1270_v14, %v1274_v36  ;;  %v1277_v18 = vsel %vm8786_vm4, %v1272_v28, %v1276_v11 }
 0x131   : > { %v953_v20 = vadd.f32 %v862_v32, %v496_v9  ;;  %1406 = vst [vmem:[#allocation2 + $0x30] sm:$0xff] %v1370_v16  ;;  %v864_v1 = vsel %vm834_vm3, %v859_v48, %v863_v41  ;;  %v1371_v38 = vadd.f32 %v1275_v44, %v948_v25  ;;  %v1372_v47 = vadd.f32 %v1277_v18, %v949_v0 }
 0x132   : > { %v954_v29 = vadd.f32 %v864_v1, %v498_v53  ;;  %v1278_v21 = vrot.slane %v1122_v59, 2  ;;  %v500_v42 = vadd.f32 %v7675_v60, %v7621_v26  ;;  %v502_v6 = vadd.f32 %v7678_v63, %v7623_v27 }
 0x133   : > { %1407 = vst [vmem:[#allocation2 + $0x38] sm:$0xff] %v1371_v38  ;;  %1408 = vst [vmem:[#allocation2 + $0x40] sm:$0xff] %v1372_v47  ;;  %v713_v5 = vpop.f32.mrb[32].mxu1  ;;  %v1126_v14 = vpop.f32.mrb[32].mxu0  ;;  %v506_v8 = vadd.f32 %v7681_v2, %v7621_v26  ;;  %v508_v53 = vadd.f32 %v7683_v4, %v7623_v27 }
 0x134   : > { %v1279_v9 = vsel %vm8786_vm4, %v1274_v36, %v1278_v21  ;;  %v865_v24 = vrot.slane %v713_v5, 1  ;;  %v715_v25 = vpop.f32.mrb[33].mxu1  ;;  %v1280_v0 = vrot.slane %v1126_v14, 2  ;;  %v1128_v28 = vpop.f32.mrb[33].mxu0 }
 0x135   : > { %v1373_v60 = vadd.f32 %v1279_v9, %v950_v50  ;;  %v867_v56 = vrot.slane %v715_v25, 1  ;;  %v717_v48 = vpop.f32.mrb[34].mxu1  ;;  %v1282_v63 = vrot.slane %v1128_v28, 2  ;;  %v1130_v61 = vpop.f32.mrb[34].mxu0 }
 0x136   : > { %v866_v51 = vsel %vm834_vm3, %v861_v39, %v865_v24  ;;  %v869_v62 = vrot.slane %v717_v48, 1  ;;  %v1281_v3 = vsel %vm8786_vm4, %v1276_v11, %v1280_v0  ;;  %v719_v2 = vpop.f32.mrb[35].mxu1  ;;  %v1284_v54 = vrot.slane %v1130_v61, 2  ;;  %v1132_v36 = vpop.f32.mrb[35].mxu0 }
 0x137   : > { %1409 = vst [vmem:[#allocation2 + $0x48] sm:$0xff] %v1373_v60  ;;  %v955_v59 = vadd.f32 %v866_v51, %v500_v42  ;;  %v868_v10 = vsel %vm834_vm3, %v863_v41, %v867_v56  ;;  %v1374_v16 = vadd.f32 %v1281_v3, %v951_v45  ;;  %v871_v32 = vrot.slane %v719_v2, 1 }
 0x138   : > { %v956_v4 = vadd.f32 %v868_v10, %v502_v6  ;;  %v870_v50 = vsel %vm834_vm3, %v865_v24, %v869_v62  ;;  %v1283_v44 = vsel %vm8786_vm4, %v1278_v21, %v1282_v63  ;;  %v1285_v18 = vsel %vm8786_vm4, %v1280_v0, %v1284_v54 }
 0x139   : > { %v957_v39 = vadd.f32 %v870_v50, %v506_v8  ;;  %1410 = vst [vmem:[#allocation2 + $0x50] sm:$0xff] %v1374_v16  ;;  %v872_v11 = vsel %vm834_vm3, %v867_v56, %v871_v32  ;;  %v1375_v1 = vadd.f32 %v1283_v44, %v952_v57  ;;  %v1376_v38 = vadd.f32 %v1285_v18, %v953_v20 }
 0x13a   : > { %v958_v47 = vadd.f32 %v872_v11, %v508_v53  ;;  %v1286_v5 = vrot.slane %v1132_v36, 2  ;;  %v516_v41 = vadd.f32 %v7605_v15, %v7621_v26  ;;  %v510_v45 = vadd.f32 %v7686_v7, %v7621_v26  ;;  %v6806_v15 = vld [vmem:[%s8781_s2 + $0x50] sm:$0xff]  }
 0x13b   : > { %1411 = vst [vmem:[#allocation2 + $0x58] sm:$0xff] %v1375_v1  ;;  %1412 = vst [vmem:[#allocation2 + $0x60] sm:$0xff] %v1376_v38  ;;  %v723_v42 = vpop.f32.mrb[36].mxu1  ;;  %v1136_v21 = vpop.f32.mrb[36].mxu0  ;;  %v512_v6 = vadd.f32 %v7689_v12, %v7623_v27  ;;  %v518_v7 = vadd.f32 %v7608_v17, %v7623_v27  ;;  %6184 = vmatpush3.bf16.msra.mxu0 %v6806_v15  ;;  %v520_v38 = vadd.f32 %v7610_v19, %v7621_v26 }
 0x13c   : > { %v1287_v14 = vsel %vm8786_vm4, %v1282_v63, %v1286_v5  ;;  %v873_v8 = vrot.slane %v723_v42, 1  ;;  %v725_v57 = vpop.f32.mrb[37].mxu1  ;;  %v1288_v20 = vrot.slane %v1136_v21, 2  ;;  %v1138_v9 = vpop.f32.mrb[37].mxu0  ;;  %6185 = vmatprep.subr.bf16.mxu0 %v7207_v31 }
 0x13d   : > { %v1377_v24 = vadd.f32 %v1287_v14, %v954_v29  ;;  %v875_v25 = vrot.slane %v725_v57, 1  ;;  %v727_v0 = vpop.f32.mrb[38].mxu1  ;;  %v1290_v28 = vrot.slane %v1138_v9, 2  ;;  %v1140_v53 = vpop.f32.mrb[38].mxu0 }
 0x13e   : > { %v874_v12 = vsel %vm834_vm3, %v869_v62, %v873_v8  ;;  %v877_v60 = vrot.slane %v727_v0, 1  ;;  %v1289_v56 = vsel %vm8786_vm4, %v1284_v54, %v1288_v20  ;;  %v729_v48 = vpop.f32.mrb[39].mxu1  ;;  %v1292_v63 = vrot.slane %v1140_v53, 2  ;;  %v1142_v61 = vpop.f32.mrb[39].mxu0  ;;  %v6807_v54 = vld [vmem:[%s8781_s2 + $0x58] sm:$0xff]  }
 0x13f   : > { %1413 = vst [vmem:[#allocation2 + $0x68] sm:$0xff] %v1377_v24  ;;  %v959_v51 = vadd.f32 %v874_v12, %v510_v45  ;;  %v876_v3 = vsel %vm834_vm3, %v871_v32, %v875_v25  ;;  %v1378_v2 = vadd.f32 %v1289_v56, %v955_v59  ;;  %v879_v17 = vrot.slane %v729_v48, 1  ;;  %6186 = vmatpush3.bf16.msra.mxu0 %v6807_v54 }
 0x140   : > { %v960_v29 = vadd.f32 %v876_v3, %v512_v6  ;;  %v878_v36 = vsel %vm834_vm3, %v873_v8, %v877_v60  ;;  %v1291_v62 = vsel %vm8786_vm4, %v1286_v5, %v1290_v28  ;;  %v1293_v10 = vsel %vm8786_vm4, %v1288_v20, %v1292_v63  ;;  %6187 = vmatprep.subr.bf16.mxu0 %v7207_v31 }
 0x141   : > { %v961_v16 = vadd.f32 %v878_v36, %v516_v41  ;;  %1414 = vst [vmem:[#allocation2 + $0x70] sm:$0xff] %v1378_v2  ;;  %v880_v50 = vsel %vm834_vm3, %v875_v25, %v879_v17  ;;  %v1379_v32 = vadd.f32 %v1291_v62, %v956_v4  ;;  %v1380_v59 = vadd.f32 %v1293_v10, %v957_v39  ;;  %v6808_v4 = vld [vmem:[%s8781_s2 + $0x60] sm:$0xff]   ;;  %v6809_v25 = vld [vmem:[%s8781_s2 + $0x68] sm:$0xff]   ;;  %v6810_v2 = vld [vmem:[%s8781_s2 + $0x70] sm:$0xff]  }
 0x142   : > { %v962_v44 = vadd.f32 %v880_v50, %v518_v7  ;;  %v1294_v18 = vrot.slane %v1142_v61, 2  ;;  %v522_v39 = vadd.f32 %v7614_v22, %v7623_v27 }
 0x143   : > { %1415 = vst [vmem:[#allocation2 + $0x78] sm:$0xff] %v1379_v32  ;;  %1416 = vst [vmem:[#allocation2 + $0x80] sm:$0xff] %v1380_v59  ;;  %v733_v11 = vpop.f32.mrb[40].mxu1  ;;  %v1146_v1 = vpop.f32.mrb[40].mxu0  ;;  %6188 = vmatpush3.bf16.msra.mxu0 %v6808_v4 }
 0x144   : > { %v1295_v5 = vsel %vm8786_vm4, %v1290_v28, %v1294_v18  ;;  %v881_v41 = vrot.slane %v733_v11, 1  ;;  %v735_v45 = vpop.f32.mrb[41].mxu1  ;;  %v1296_v42 = vrot.slane %v1146_v1, 2  ;;  %v1148_v21 = vpop.f32.mrb[41].mxu0  ;;  %6189 = vmatprep.subr.bf16.mxu0 %v7207_v31 }
 0x145   : > { %v1381_v6 = vadd.f32 %v1295_v5, %v958_v47  ;;  %v883_v14 = vrot.slane %v735_v45, 1  ;;  %v737_v8 = vpop.f32.mrb[42].mxu1  ;;  %v1298_v57 = vrot.slane %v1148_v21, 2  ;;  %v1150_v20 = vpop.f32.mrb[42].mxu0  ;;  %v6811_v45 = vld [vmem:[%s8781_s2 + $0x78] sm:$0xff]  }
 0x146   : > { %v882_v19 = vsel %vm834_vm3, %v877_v60, %v881_v41  ;;  %v885_v26 = vrot.slane %v737_v8, 1  ;;  %v1297_v9 = vsel %vm8786_vm4, %v1292_v63, %v1296_v42  ;;  %v739_v15 = vpop.f32.mrb[43].mxu1  ;;  %v1300_v7 = vrot.slane %v1150_v20, 2  ;;  %v1152_v24 = vpop.f32.mrb[43].mxu0 }
 0x147   : > { %1417 = vst [vmem:[#allocation2 + $0x88] sm:$0xff] %v1381_v6  ;;  %v963_v22 = vadd.f32 %v882_v19, %v520_v38  ;;  %v884_v27 = vsel %vm834_vm3, %v879_v17, %v883_v14  ;;  %v1382_v47 = vadd.f32 %v1297_v9, %v959_v51  ;;  %v887_v0 = vrot.slane %v739_v15, 1  ;;  %6190 = vmatpush3.bf16.msra.mxu0 %v6809_v25 }
 0x148   : > { %v964_v28 = vadd.f32 %v884_v27, %v522_v39  ;;  %v886_v53 = vsel %vm834_vm3, %v881_v41, %v885_v26  ;;  %v1299_v12 = vsel %vm8786_vm4, %v1294_v18, %v1298_v57  ;;  %v1301_v60 = vsel %vm8786_vm4, %v1296_v42, %v1300_v7  ;;  %6191 = vmatprep.subr.bf16.mxu0 %v7207_v31 }
 0x149   : > { %v965_v56 = vadd.f32 %v886_v53, %v7628_v30  ;;  %1418 = vst [vmem:[#allocation2 + $0x90] sm:$0xff] %v1382_v47  ;;  %v888_v48 = vsel %vm834_vm3, %v883_v14, %v887_v0  ;;  %v1383_v63 = vadd.f32 %v1299_v12, %v960_v29  ;;  %v1384_v61 = vadd.f32 %v1301_v60, %v961_v16 }
 0x14a   : > { %v966_v3 = vadd.f32 %v888_v48, %v7633_v34  ;;  %v1302_v51 = vrot.slane %v1152_v24, 2 }
 0x14b   : > { %1419 = vst [vmem:[#allocation2 + $0x98] sm:$0xff] %v1383_v63  ;;  %1420 = vst [vmem:[#allocation2 + $0xa0] sm:$0xff] %v1384_v61  ;;  %v743_v17 = vpop.f32.mrb[44].mxu1  ;;  %v1156_v36 = vpop.f32.mrb[44].mxu0  ;;  %6192 = vmatpush3.bf16.msra.mxu0 %v6810_v2  ;;  %v796_v2 = vld [vmem:[#allocation2 + $0x110] sm:$0x3f] }
 0x14c   : > { %v1303_v30 = vsel %vm8786_vm4, %v1298_v57, %v1302_v51  ;;  %v889_v62 = vrot.slane %v743_v17, 1  ;;  %v745_v10 = vpop.f32.mrb[45].mxu1  ;;  %v1304_v29 = vrot.slane %v1156_v36, 2  ;;  %v1158_v54 = vpop.f32.mrb[45].mxu0  ;;  %6193 = vmatprep.subr.bf16.mxu0 %v7207_v31 }
 0x14d   : > { %v1385_v16 = vadd.f32 %v1303_v30, %v962_v44  ;;  %v891_v34 = vrot.slane %v745_v10, 1  ;;  %v747_v50 = vpop.f32.mrb[46].mxu1  ;;  %v1306_v32 = vrot.slane %v1158_v54, 2  ;;  %v1160_v59 = vpop.f32.mrb[46].mxu0  ;;  %v797_v10 = vld [vmem:[#allocation2 + $0x118] sm:$0x3f] }
 0x14e   : > { %v890_v18 = vsel %vm834_vm3, %v885_v26, %v889_v62  ;;  %v893_v11 = vrot.slane %v747_v50, 1  ;;  %v1305_v1 = vsel %vm8786_vm4, %v1300_v7, %v1304_v29  ;;  %v749_v38 = vpop.f32.mrb[47].mxu1  ;;  %v1308_v5 = vrot.slane %v1160_v59, 2  ;;  %v1162_v41 = vpop.f32.mrb[47].mxu0 }
 0x14f   : > { %1421 = vst [vmem:[#allocation2 + $0xa8] sm:$0xff] %v1385_v16  ;;  %v967_v44 = vadd.f32 %v890_v18, %v7638_v37  ;;  %v892_v42 = vsel %vm834_vm3, %v887_v0, %v891_v34  ;;  %v1386_v21 = vadd.f32 %v1305_v1, %v963_v22  ;;  %v895_v4 = vrot.slane %v749_v38, 1  ;;  %6194 = vmatpush3.bf16.msra.mxu0 %v6811_v45 }
 0x150   : > { %v968_v39 = vadd.f32 %v892_v42, %v7643_v40  ;;  %v894_v6 = vsel %vm834_vm3, %v889_v62, %v893_v11  ;;  %v1307_v14 = vsel %vm8786_vm4, %v1302_v51, %v1306_v32  ;;  %v1309_v8 = vsel %vm8786_vm4, %v1304_v29, %v1308_v5  ;;  %6199 = vmatprep.subr.bf16.mxu0 %v7207_v31 }
 0x151   : > { %v969_v57 = vadd.f32 %v894_v6, %v7648_v43  ;;  %1422 = vst [vmem:[#allocation2 + $0xb0] sm:$0xff] %v1386_v21  ;;  %v896_v20 = vsel %vm834_vm3, %v891_v34, %v895_v4  ;;  %v1387_v37 = vadd.f32 %v1307_v14, %v964_v28  ;;  %v1388_v19 = vadd.f32 %v1309_v8, %v965_v56 }
 0x152   : > { %v970_v26 = vadd.f32 %v896_v20, %v7653_v46  ;;  %v1310_v9 = vrot.slane %v1162_v41, 2 }
 0x153   : > { %1423 = vst [vmem:[#allocation2 + $0xb8] sm:$0xff] %v1387_v37  ;;  %1424 = vst [vmem:[#allocation2 + $0xc0] sm:$0xff] %v1388_v19  ;;  %v753_v40 = vpop.f32.mrb[48].mxu1  ;;  %v1166_v15 = vpop.f32.mrb[48].mxu0 }
 0x154   : > { %v1311_v7 = vsel %vm8786_vm4, %v1306_v32, %v1310_v9  ;;  %v897_v24 = vrot.slane %v753_v40, 1  ;;  %v755_v25 = vpop.f32.mrb[49].mxu1  ;;  %v1312_v43 = vrot.slane %v1166_v15, 2  ;;  %v1168_v22 = vpop.f32.mrb[49].mxu0 }
 0x155   : > { %v1389_v27 = vadd.f32 %v1311_v7, %v966_v3  ;;  %v899_v47 = vrot.slane %v755_v25, 1  ;;  %v757_v0 = vpop.f32.mrb[50].mxu1  ;;  %v1314_v28 = vrot.slane %v1168_v22, 2  ;;  %v1170_v53 = vpop.f32.mrb[50].mxu0 }
 0x156   : > { %v898_v46 = vsel %vm834_vm3, %v893_v11, %v897_v24  ;;  %v901_v12 = vrot.slane %v757_v0, 1  ;;  %v1313_v60 = vsel %vm8786_vm4, %v1308_v5, %v1312_v43  ;;  %v759_v56 = vpop.f32.mrb[51].mxu1  ;;  %v1316_v48 = vrot.slane %v1170_v53, 2  ;;  %v1172_v63 = vpop.f32.mrb[51].mxu0 }
 0x157   : > { %1425 = vst [vmem:[#allocation2 + $0xc8] sm:$0xff] %v1389_v27  ;;  %v971_v61 = vadd.f32 %v898_v46, %v7658_v49  ;;  %v900_v51 = vsel %vm834_vm3, %v895_v4, %v899_v47  ;;  %v1390_v17 = vadd.f32 %v1313_v60, %v967_v44  ;;  %v903_v3 = vrot.slane %v759_v56, 1 }
 0x158   : > { %v972_v36 = vadd.f32 %v900_v51, %v7663_v52  ;;  %v902_v30 = vsel %vm834_vm3, %v897_v24, %v901_v12  ;;  %v975_v62 = vadd.f32 %v901_v12, %v796_v2  ;;  %v1315_v29 = vsel %vm8786_vm4, %v1310_v9, %v1314_v28 }
 0x159   : > { %v973_v54 = vadd.f32 %v902_v30, %v7668_v55  ;;  %1426 = vst [vmem:[#allocation2 + $0xd0] sm:$0xff] %v1390_v17  ;;  %v904_v16 = vsel %vm834_vm3, %v899_v47, %v903_v3  ;;  %v976_v34 = vadd.f32 %v903_v3, %v797_v10  ;;  %v1391_v49 = vadd.f32 %v1315_v29, %v968_v39  ;;  %v1854_v17 = vld [vmem:[#allocation3] sm:$0xf]  ;;  %v1860_v29 = vld [vmem:[#allocation3 + $0x8] sm:$0x1] }
 0x15a   : > { %1011 = vst [vmem:[#allocation2 + $0x110] sm:$0x3f] %v975_v62  ;;  %v974_v50 = vadd.f32 %v904_v16, %v7673_v58  ;;  %v1317_v32 = vsel %vm8786_vm4, %v1312_v43, %v1316_v48  ;;  %v1318_v59 = vrot.slane %v1172_v63, 2 }
 0x15b   : > { %1012 = vst [vmem:[#allocation2 + $0x118] sm:$0x3f] %v976_v34  ;;  %1427 = vst [vmem:[#allocation2 + $0xd8] sm:$0xff] %v1391_v49  ;;  %v1392_v52 = vadd.f32 %v1317_v32, %v969_v57  ;;  %v1176_v18 = vpop.f32.mrb[52].mxu0 }
 0x15c   : > { %v1319_v11 = vsel %vm8786_vm4, %v1314_v28, %v1318_v59  ;;  %v1320_v1 = vrot.slane %v1176_v18, 2  ;;  %v1178_v38 = vpop.f32.mrb[53].mxu0 }
 0x15d   : > { %1428 = vst [vmem:[#allocation2 + $0xe0] sm:$0xff] %v1392_v52  ;;  %v1393_v55 = vadd.f32 %v1319_v11, %v970_v26  ;;  %v1322_v5 = vrot.slane %v1178_v38, 2  ;;  %v1180_v41 = vpop.f32.mrb[54].mxu0 }
 0x15e   : > { %v1321_v45 = vsel %vm8786_vm4, %v1316_v48, %v1320_v1  ;;  %v1324_v44 = vrot.slane %v1180_v41, 2  ;;  %v1182_v42 = vpop.f32.mrb[55].mxu0 }
 0x15f   : > { %1429 = vst [vmem:[#allocation2 + $0xe8] sm:$0xff] %v1393_v55  ;;  %v1394_v58 = vadd.f32 %v1321_v45, %v971_v61  ;;  %v1323_v21 = vsel %vm8786_vm4, %v1318_v59, %v1322_v5  ;;  %v1326_v4 = vrot.slane %v1182_v42, 2 }
 0x160   : > { %v1395_v39 = vadd.f32 %v1323_v21, %v972_v36  ;;  %v1325_v6 = vsel %vm8786_vm4, %v1320_v1, %v1324_v44  ;;  %v6816_v21 = vld [vmem:[%s8781_s2 + $0x10] sm:$0xff]   ;;  %v6922_v36 = vld [vmem:[%s8781_s2] sm:$0xff]  }
 0x161   : > { %1430 = vst [vmem:[#allocation2 + $0xf0] sm:$0xff] %v1394_v58  ;;  %v1219_v14 = vld [vmem:[#allocation2 + $0x110] sm:$0x3f]  ;;  %v1396_v8 = vadd.f32 %v1325_v6, %v973_v54  ;;  %v1327_v57 = vsel %vm8786_vm4, %v1322_v5, %v1326_v4  ;;  %v6815_v58 = vld [vmem:[%s8781_s2 + $0x8] sm:$0xff]  }
 0x162   : > { %1431 = vst [vmem:[#allocation2 + $0xf8] sm:$0xff] %v1395_v39  ;;  %v1398_v20 = vadd.f32 %v1324_v44, %v1219_v14  ;;  %v1220_v37 = vld [vmem:[#allocation2 + $0x118] sm:$0x3f]  ;;  %v1397_v19 = vadd.f32 %v1327_v57, %v974_v50  ;;  %v6814_v44 = vld [vmem:[%s8781_s2] sm:$0xff]   ;;  %v6819_v6 = vld [vmem:[%s8781_s2 + $0x28] sm:$0xff]  }
 0x163   : > { %1432 = vst [vmem:[#allocation2 + $0x100] sm:$0xff] %v1396_v8  ;;  %v1399_v26 = vadd.f32 %v1326_v4, %v1220_v37  ;;  %v6817_v4 = vld [vmem:[%s8781_s2 + $0x18] sm:$0xff]   ;;  %v6818_v39 = vld [vmem:[%s8781_s2 + $0x20] sm:$0xff]   ;;  %v6820_v14 = vld [vmem:[%s8781_s2 + $0x30] sm:$0xff]  }
 0x164   : > { %1434 = vst [vmem:[#allocation2 + $0x110] sm:$0x3f] %v1398_v20  ;;  %1433 = vst [vmem:[#allocation2 + $0x108] sm:$0xff] %v1397_v19  ;;  %v6821_v8 = vld [vmem:[%s8781_s2 + $0x38] sm:$0xff]   ;;  %v6822_v57 = vld [vmem:[%s8781_s2 + $0x80] sm:$0xff]  }
 0x165   : > { %1435 = vst [vmem:[#allocation2 + $0x118] sm:$0x3f] %v1399_v26  ;;  %v6823_v20 = vld [vmem:[%s8781_s2 + $0x88] sm:$0xff]   ;;  %v6824_v37 = vld [vmem:[%s8781_s2 + $0x90] sm:$0xff]   ;;  %v6825_v19 = vld [vmem:[%s8781_s2 + $0x98] sm:$0xff]  }
 0x166   : > { %v6826_v26 = vld [vmem:[%s8781_s2 + $0xa0] sm:$0xff]  }
 0x19b   : > { %v1781_v9 = vpop.f32.mrb[52].mxu1 }
 0x19c   : > { %v1796_v40 = vadd.f32 %v1781_v9, %v7709_v35  ;;  %v6177_v15 = vpop.f32.mrb[53].mxu1  ;;  %v6827_v9 = vld [vmem:[%s8781_s2 + $0xa8] sm:$0xff]  }
 0x19d   : > { %v1784_v7 = vpop.f32.mrb[54].mxu1 }
 0x19e   : > { %v5354_v24 = vmul.f32 -1.442695, %v1796_v40  ;;  %v1797_v25 = vadd.f32 %v1784_v7, %v7728_v23  ;;  %v6178_v43 = vpop.f32.mrb[55].mxu1  ;;  %v6828_v40 = vld [vmem:[%s8781_s2 + $0xb0] sm:$0xff]  }
 0x1a0   : > { %6993 = vpow2.f32 %v5354_v24  ;;  %v5355_v22 = vmul.f32 -1.442695, %v1797_v25  ;;  %v6829_v24 = vld [vmem:[%s8781_s2 + $0xb8] sm:$0xff]  }
 0x1a2   : > { %6995 = vpow2.f32 %v5355_v22 }
 0x1a3   : > { %6997 = vtanh.f32 %v7706_v33 }
 0x1aa   : > { %v6994_v27 = vpop.eup %6993 }
 0x1ab   : > { %v1804_v47 = vadd.f32 1.0, %v6994_v27  ;;  %v6831_v27 = vld [vmem:[%s8781_s2 + $0x40] sm:$0xff]  }
 0x1ac   : > { %v6996_v0 = vpop.eup %6995  ;;  %6240 = vmatpush3.bf16.msra.mxu1 %v6831_v27 }
 0x1ad   : > { %6999 = vrcp.f32 %v1804_v47  ;;  %v1805_v28 = vadd.f32 1.0, %v6996_v0  ;;  %v6998_v35 = vpop.eup %6997  ;;  %6241 = vmatprep.subr.bf16.mxu1 %v7207_v31  ;;  %v6832_v47 = vld [vmem:[%s8781_s2 + $0x48] sm:$0xff]   ;;  %v6833_v0 = vld [vmem:[%s8781_s2 + $0x50] sm:$0xff]  }
 0x1ae   : > { %7001 = vtanh.f32 %v7722_v13 }
 0x1af   : > { %7003 = vrcp.f32 %v1805_v28  ;;  %v6834_v28 = vld [vmem:[%s8781_s2 + $0x58] sm:$0xff]  }
 0x1b0   : > { %6242 = vmatpush3.bf16.msra.mxu1 %v6832_v47 }
 0x1b1   : > { %6243 = vmatprep.subr.bf16.mxu1 %v7207_v31 }
 0x1b4   : > { %6244 = vmatpush3.bf16.msra.mxu1 %v6833_v0 }
 0x1b5   : > { %6245 = vmatprep.subr.bf16.mxu1 %v7207_v31 }
 0x1b7   : > { %v7000_v53 = vpop.eup %6999 }
 0x1b8   : > { %v7002_v46 = vpop.eup %7001  ;;  %v1810_v12 = vmul.f32 %v7000_v53, %v6998_v35  ;;  %v5849_v23 = vpack.c.bf16 %v7000_v53, %v7000_v53  ;;  %6246 = vmatpush3.bf16.msra.mxu1 %v6834_v28  ;;  %v6835_v35 = vld [vmem:[%s8781_s2 + $0x60] sm:$0xff]   ;;  %v6836_v53 = vld [vmem:[%s8781_s2 + $0x68] sm:$0xff]  }
 0x1b9   : > { %v7004_v60 = vpop.eup %7003  ;;  %6247 = vmatprep.subr.bf16.mxu1 %v7207_v31 }
 0x1ba   : > { %v1832_v56 = vshrl.u32 %v5849_v23, 16  ;;  %v1811_v48 = vmul.f32 %v7004_v60, %v7002_v46  ;;  %v5850_v63 = vpack.c.bf16 %v7004_v60, %v7004_v60  ;;  %v1835_v13 = vshll.u32 %v5849_v23, 16  ;;  %v6837_v46 = vld [vmem:[%s8781_s2 + $0x70] sm:$0xff]  }
 0x1bc   : > { %v1834_v33 = vrot.slane %v1832_v56, 7  ;;  %v5895_v61 = vpack.c.bf16 %v1811_v48, %v1810_v12  ;;  %v1840_v51 = vshrl.u32 %v5850_v63, 16  ;;  %v1843_v62 = vshll.u32 %v5850_v63, 16  ;;  %6248 = vmatpush3.bf16.msra.mxu1 %v6835_v35  ;;  %v6838_v12 = vld [vmem:[%s8781_s2 + $0x78] sm:$0xff]   ;;  %v2214_v48 = vld [vmem:[#allocation2 + $0x28] sm:$0xfc] }
 0x1bd   : > { %6249 = vmatprep.subr.bf16.mxu1 %v7207_v31 }
 0x1be   : > { %v1837_v3 = vor.u32 %v1835_v13, %v1834_v33  ;;  %5896 = vst [vmem:[%s7853_s25] sm:$0xff] %v5895_v61   ;;  %v1842_v30 = vrot.slane %v1840_v51, 7  ;;  %v1838_v54 = vrot.slane %v1834_v33, 4  ;;  %v2218_v51 = vld [vmem:[#allocation2 + $0x48] sm:$0x3] }
 0x1c0   : > { %v1855_v16 = vsel %vm7856_vm10, %v1837_v3, %v1854_v17  ;;  %v1845_v34 = vor.u32 %v1843_v62, %v1842_v30  ;;  %v1847_v49 = vrot.slane %v1842_v30, 4  ;;  %6250 = vmatpush3.bf16.msra.mxu1 %v6836_v53  ;;  %v2216_v3 = vld [vmem:[#allocation2 + $0x38] sm:$0xff] }
 0x1c1   : > { %1856 = vst [vmem:[#allocation3] sm:$0xf] %v1855_v16  ;;  %6251 = vmatprep.subr.bf16.mxu1 %v7207_v31 }
 0x1c2   : > { %v1846_v50 = vsel %vm7861_vm11, %v1838_v54, %v1845_v34  ;;  %v1861_v32 = vsel %vm7866_vm12, %v1847_v49, %v1860_v29  ;;  %v2213_v34 = vld [vmem:[#allocation2 + $0x20] sm:$0xfc]  ;;  %v2215_v49 = vld [vmem:[#allocation2 + $0x30] sm:$0xff] }
 0x1c3   : > { %1857 = vst [vmem:[#allocation3 + $0x4] sm:$0xf] %v1846_v50  ;;  %1862 = vst [vmem:[#allocation3 + $0x8] sm:$0x1] %v1861_v32 }
 0x1c4   : > { %6252 = vmatpush3.bf16.msra.mxu1 %v6837_v46 }
 0x1c5   : > { %6253 = vmatprep.subr.bf16.mxu1 %v7207_v31 }
 0x1c8   : > { %v1863_v59 = vld [vmem:[#allocation3] sm:$0xf]  ;;  %6254 = vmatpush3.bf16.msra.mxu1 %v6838_v12 }
 0x1c9   : > { %v2098_v15 = vld [vmem:[#allocation3] sm:$0xe]  ;;  %6259 = vmatprep.subr.bf16.mxu1 %v7207_v31 }
 0x1ca   : > { %v1864_v52 = vld [vmem:[#allocation3 + $0x4] sm:$0xf]  ;;  %v7876_v11 = vld [vmem:[#allocation3 + $0x8] ss:$0 sps:$4 sm:$0x11]  }
 0x1cb   : > { %v5376_v18 = vcombine.low %v1863_v59, %v1864_v52  ;;  %v1914_v38 = vshll.u32 %v7876_v11, 16  ;;  %v5410_v7 = vcombine.low %v2098_v15, %v1864_v52  ;;  %v2119_v43 = vrot.slane %v7876_v11, 1  ;;  %v2217_v59 = vld [vmem:[#allocation2 + $0x40] sm:$0x3]  ;;  %v2327_v28 = vld [vmem:[#allocation3 + $0x8] sm:$0x1] }
 0x1cd   : > { %v1909_v1 = vshll.u32 %v5376_v18, 16  ;;  %v1907_v55 = vshrl.u32 %v5376_v18, 16  ;;  %v1916_v45 = vrot.slane %v1914_v38, 1  ;;  %v2118_v25 = vrot.slane %v5410_v7, 1 }
 0x1cf   : > { %v1911_v5 = vrot.slane %v1909_v1, 1  ;;  %v2120_v22 = vsel %vm834_vm3, %v2118_v25, %v2119_v43 }
 0x1d1   : > { %v1912_v41 = vor.u32 %v1911_v5, %v1907_v55 }
 0x1d3   : > { %v1917_v42 = vsel %vm1480_vm1, %v1912_v41, %v1916_v45 }
 0x1d4   : > { %6196 = vmatmul.mubr.bf16.vlgmr.msra.gmra.mrb[56].mxu0 %v1917_v42 }
 0x1d5   : > { %6200 = vmatpush3.bf16.msra.mxu0 %v6814_v44  ;;  %6215 = vmatprep.mubr.msk.bf16.mxu0 %vm7208_vm2, %v7207_v31 }
 0x1d6   : > { %6201 = vmatprep.subr.bf16.mxu0 %v7207_v31 }
 0x1d9   : > { %6202 = vmatpush3.bf16.msra.mxu0 %v6815_v58 }
 0x1da   : > { %6203 = vmatprep.subr.bf16.mxu0 %v7207_v31 }
 0x1dd   : > { %6204 = vmatpush3.bf16.msra.mxu0 %v6816_v21 }
 0x1de   : > { %6205 = vmatprep.subr.bf16.mxu0 %v7207_v31 }
 0x1e1   : > { %6206 = vmatpush3.bf16.msra.mxu0 %v6817_v4 }
 0x1e2   : > { %6207 = vmatprep.subr.bf16.mxu0 %v7207_v31 }
 0x1e5   : > { %6208 = vmatpush3.bf16.msra.mxu0 %v6818_v39 }
 0x1e6   : > { %6209 = vmatprep.subr.bf16.mxu0 %v7207_v31 }
 0x1e9   : > { %6210 = vmatpush3.bf16.msra.mxu0 %v6819_v6 }
 0x1ea   : > { %6211 = vmatprep.subr.bf16.mxu0 %v7207_v31 }
 0x1ed   : > { %6212 = vmatpush3.bf16.msra.mxu0 %v6820_v14 }
 0x1ee   : > { %6213 = vmatprep.subr.bf16.mxu0 %v7207_v31 }
 0x1f1   : > { %6214 = vmatpush3.bf16.msra.mxu0 %v6821_v8 }
 0x1f2   : > { %6219 = vmatprep.subr.bf16.mxu0 %v7207_v31 }
 0x1f4   : > { %6216 = vmatmul.mubr.bf16.vlgmr.msra.gmra.mrb[56].mxu0 %v5376_v18 }
 0x1f5   : > { %6220 = vmatpush3.bf16.msra.mxu0 %v6822_v57  ;;  %6235 = vmatprep.mubr.msk.bf16.mxu0 %vm7208_vm2, %v7207_v31 }
 0x1f6   : > { %6221 = vmatprep.subr.bf16.mxu0 %v7207_v31 }
 0x1f9   : > { %6222 = vmatpush3.bf16.msra.mxu0 %v6823_v20 }
 0x1fa   : > { %6223 = vmatprep.subr.bf16.mxu0 %v7207_v31 }
 0x1fd   : > { %6224 = vmatpush3.bf16.msra.mxu0 %v6824_v37 }
 0x1fe   : > { %6225 = vmatprep.subr.bf16.mxu0 %v7207_v31 }
 0x201   : > { %6226 = vmatpush3.bf16.msra.mxu0 %v6825_v19 }
 0x202   : > { %6227 = vmatprep.subr.bf16.mxu0 %v7207_v31 }
 0x205   : > { %6228 = vmatpush3.bf16.msra.mxu0 %v6826_v26 }
 0x206   : > { %6229 = vmatprep.subr.bf16.mxu0 %v7207_v31 }
 0x209   : > { %6230 = vmatpush3.bf16.msra.mxu0 %v6827_v9 }
 0x20a   : > { %6231 = vmatprep.subr.bf16.mxu0 %v7207_v31 }
 0x20d   : > { %6232 = vmatpush3.bf16.msra.mxu0 %v6828_v40 }
 0x20e   : > { %6233 = vmatprep.subr.bf16.mxu0 %v7207_v31 }
 0x211   : > { %6234 = vmatpush3.bf16.msra.mxu0 %v6829_v24 }
 0x212   : > { %6299 = vmatprep.subr.bf16.mxu0 %v7207_v31 }
 0x214   : > { %6236 = vmatmul.mubr.bf16.vlgmr.msra.gmra.mrb[56].mxu0 %v2120_v22 }
 0x215   : > { %6315 = vmatprep.mubr.msk.bf16.mxu0 %vm7208_vm2, %v7207_v31 }
 0x2e7   : > { %v2204_v23 = vpop.f32.mrb[56].mxu0 }
 0x2e8   : > { %v2225_v60 = vrot.slane %v2204_v23, 6  ;;  %v6237_v56 = vpop.f32.mrb[57].mxu0 }
 0x2e9   : > { %v2207_v63 = vpop.f32.mrb[58].mxu0 }
 0x2ea   : > { %v2231_v33 = vadd.f32 %v2225_v60, %v2214_v48  ;;  %v2226_v13 = vrot.slane %v2207_v63, 6  ;;  %v6238_v61 = vpop.f32.mrb[59].mxu0  ;;  %v2323_v48 = vld [vmem:[#allocation3] sm:$0xf] }
 0x2ec   : > { %v5419_v17 = vmul.f32 -1.442695, %v2231_v33  ;;  %v2227_v30 = vsel %vm8787_vm13, %v2225_v60, %v2226_v13  ;;  %v2233_v62 = vadd.f32 %v2226_v13, %v2218_v51 }
 0x2ed   : > { %v2232_v29 = vadd.f32 %v2227_v30, %v2216_v3 }
 0x2ee   : > { %7005 = vpow2.f32 %v5419_v17  ;;  %v5421_v54 = vmul.f32 -1.442695, %v2233_v62 }
 0x2ef   : > { %v5420_v16 = vmul.f32 -1.442695, %v2232_v29 }
 0x2f0   : > { %7007 = vpow2.f32 %v5421_v54 }
 0x2f1   : > { %7009 = vpow2.f32 %v5420_v16 }
 0x2f2   : > { %7011 = vtanh.f32 %v2213_v34 }
 0x2f3   : > { %7013 = vtanh.f32 %v2215_v49 }
 0x2f8   : > { %v7006_v50 = vpop.eup %7005 }
 0x2f9   : > { %v2243_v32 = vadd.f32 1.0, %v7006_v50 }
 0x2fa   : > { %v7008_v52 = vpop.eup %7007 }
 0x2fb   : > { %v7010_v18 = vpop.eup %7009  ;;  %7015 = vrcp.f32 %v2243_v32  ;;  %v2245_v11 = vadd.f32 1.0, %v7008_v52  ;;  %v6841_v32 = vld [vmem:[%s8781_s2] sm:$0xff]   ;;  %v6842_v52 = vld [vmem:[%s8781_s2 + $0x8] sm:$0xff]  }
 0x2fc   : > { %7017 = vtanh.f32 %v2217_v59  ;;  %v2244_v1 = vadd.f32 1.0, %v7010_v18  ;;  %v7012_v38 = vpop.eup %7011  ;;  %v6843_v18 = vld [vmem:[%s8781_s2 + $0x10] sm:$0xff]  }
 0x2fd   : > { %7019 = vrcp.f32 %v2245_v11  ;;  %v7014_v55 = vpop.eup %7013  ;;  %v6844_v11 = vld [vmem:[%s8781_s2 + $0x18] sm:$0xff]  }
 0x2fe   : > { %7021 = vrcp.f32 %v2244_v1  ;;  %v6845_v1 = vld [vmem:[%s8781_s2 + $0x20] sm:$0xff]  }
 0x305   : > { %v7016_v5 = vpop.eup %7015 }
 0x306   : > { %v7018_v41 = vpop.eup %7017  ;;  %v2252_v45 = vmul.f32 %v7016_v5, %v7012_v38  ;;  %v5854_v44 = vpack.c.bf16 %v7016_v5, %v7016_v5  ;;  %v6846_v38 = vld [vmem:[%s8781_s2 + $0x28] sm:$0xff]   ;;  %v6848_v5 = vld [vmem:[%s8781_s2 + $0x38] sm:$0xff]  }
 0x307   : > { %v7020_v42 = vpop.eup %7019 }
 0x308   : > { %v7022_v58 = vpop.eup %7021  ;;  %v5851_v21 = vpack.c.bf16 %v2252_v45, %v2252_v45  ;;  %v2293_v4 = vshrl.u32 %v5854_v44, 16  ;;  %v2296_v39 = vshll.u32 %v5854_v44, 16  ;;  %v2254_v6 = vmul.f32 %v7020_v42, %v7018_v41  ;;  %v6849_v41 = vld [vmem:[%s8781_s2 + $0x80] sm:$0xff]   ;;  %v6850_v45 = vld [vmem:[%s8781_s2 + $0x88] sm:$0xff]   ;;  %v6851_v44 = vld [vmem:[%s8781_s2 + $0x90] sm:$0xff]  }
 0x309   : > { %v2253_v14 = vmul.f32 %v7022_v58, %v7014_v55  ;;  %v5855_v8 = vpack.c.bf16 %v7022_v58, %v7022_v58  ;;  %v5856_v57 = vpack.c.bf16 %v7020_v42, %v7020_v42  ;;  %v6847_v55 = vld [vmem:[%s8781_s2 + $0x30] sm:$0xff]   ;;  %v6852_v42 = vld [vmem:[%s8781_s2 + $0x98] sm:$0xff]   ;;  %v6853_v58 = vld [vmem:[%s8781_s2 + $0xa0] sm:$0xff]  }
 0x30a   : > { %v2295_v20 = vrot.slane %v2293_v4, 4  ;;  %v2298_v37 = vrot.slane %v2296_v39, 5  ;;  %v5853_v26 = vpack.c.bf16 %v2254_v6, %v2254_v6  ;;  %v5425_v15 = vrot.slane %v5851_v21, 9  ;;  %v6854_v21 = vld [vmem:[%s8781_s2 + $0xa8] sm:$0xff]   ;;  %v6855_v4 = vld [vmem:[%s8781_s2 + $0xb0] sm:$0xff]  }
 0x30b   : > { %v5852_v19 = vpack.c.bf16 %v2253_v14, %v2253_v14  ;;  %v2302_v9 = vshll.u32 %v5855_v8, 16  ;;  %v2306_v40 = vshrl.u32 %v5855_v8, 16  ;;  %v2316_v25 = vshrl.u32 %v5856_v57, 16  ;;  %v6856_v14 = vld [vmem:[%s8781_s2 + $0xb8] sm:$0xff]  }
 0x30c   : > { %v2299_v7 = vor.u32 %v2298_v37, %v2295_v20  ;;  %v2312_v0 = vshll.u32 %v5856_v57, 16  ;;  %v2273_v23 = vrot.slane %v5853_v26, 5  ;;  %v6858_v37 = vld [vmem:[%s8781_s2 + $0x40] sm:$0xff]   ;;  %v6860_v26 = vld [vmem:[%s8781_s2 + $0x50] sm:$0xff]  }
 0x30d   : > { %v2270_v43 = vrot.slane %v5852_v19, 5  ;;  %v2304_v27 = vrot.slane %v2302_v9, 5  ;;  %v2308_v47 = vrot.slane %v2306_v40, 4  ;;  %v2328_v53 = vsel %vm7866_vm12, %v2316_v25, %v2327_v28  ;;  %6300 = vmatpush3.bf16.msra.mxu0 %v6858_v37  ;;  %v6859_v19 = vld [vmem:[%s8781_s2 + $0x48] sm:$0xff]   ;;  %v6861_v9 = vld [vmem:[%s8781_s2 + $0x58] sm:$0xff]   ;;  %v6862_v40 = vld [vmem:[%s8781_s2 + $0x60] sm:$0xff]  }
 0x30e   : > { %v2300_v35 = vrot.slane %v2299_v7, 4  ;;  %2329 = vst [vmem:[#allocation3 + $0x8] sm:$0x1] %v2328_v53  ;;  %v2314_v13 = vrot.slane %v2312_v0, 5  ;;  %6301 = vmatprep.subr.bf16.mxu0 %v7207_v31  ;;  %v6864_v7 = vld [vmem:[%s8781_s2 + $0x70] sm:$0xff]   ;;  %v6865_v25 = vld [vmem:[%s8781_s2 + $0x78] sm:$0xff]  }
 0x30f   : > { %v2271_v46 = vsel %vm7986_vm7, %v5425_v15, %v2270_v43  ;;  %v2272_v12 = vrot.slane %v2270_v43, 4  ;;  %v2309_v60 = vor.u32 %v2308_v47, %v2304_v27  ;;  %v6863_v15 = vld [vmem:[%s8781_s2 + $0x68] sm:$0xff]  }
 0x310   : > { %2277 = vst [vmem:[%s7853_s25 + $0x8] sm:$0xf] %v2271_v46  ;;  %v2305_v56 = vsel %vm7990_vm8, %v2300_v35, %v2304_v27  ;;  %v2681_v0 = vld [vmem:[#allocation2 + $0x48] sm:$0xf0] }
 0x311   : > { %v2274_v63 = vsel %vm7986_vm7, %v2272_v12, %v2273_v23  ;;  %v2310_v33 = vrot.slane %v2309_v60, 4  ;;  %v2324_v61 = vsel %vm7856_vm10, %v2305_v56, %v2323_v48  ;;  %6302 = vmatpush3.bf16.msra.mxu0 %v6859_v19  ;;  %v2685_v12 = vld [vmem:[#allocation2 + $0x68] sm:$0xf]  ;;  %v2683_v60 = vld [vmem:[#allocation2 + $0x58] sm:$0xff] }
 0x312   : > { %2278 = vst [vmem:[%s7853_s25 + $0xc] sm:$0xf] %v2274_v63  ;;  %2325 = vst [vmem:[#allocation3] sm:$0xf] %v2324_v61  ;;  %6303 = vmatprep.subr.bf16.mxu0 %v7207_v31  ;;  %v2680_v61 = vld [vmem:[#allocation2 + $0x40] sm:$0xf0] }
 0x313   : > { %v2315_v51 = vsel %vm7990_vm8, %v2310_v33, %v2314_v13 }
 0x314   : > { %2326 = vst [vmem:[#allocation3 + $0x4] sm:$0xf] %v2315_v51  ;;  %v2682_v51 = vld [vmem:[#allocation2 + $0x50] sm:$0xff] }
 0x315   : > { %v8008_v17 = vld [vmem:[#allocation3 + $0x8] ss:$0 sps:$4 sm:$0x11]   ;;  %6304 = vmatpush3.bf16.msra.mxu0 %v6860_v26 }
 0x316   : > { %v2381_v54 = vshll.u32 %v8008_v17, 16  ;;  %v2586_v57 = vrot.slane %v8008_v17, 1  ;;  %6305 = vmatprep.subr.bf16.mxu0 %v7207_v31 }
 0x318   : > { %v2383_v50 = vrot.slane %v2381_v54, 1 }
 0x319   : > { %v2330_v3 = vld [vmem:[#allocation3] sm:$0xf]  ;;  %6306 = vmatpush3.bf16.msra.mxu0 %v6861_v9 }
 0x31a   : > { %v2565_v39 = vld [vmem:[#allocation3] sm:$0xe]  ;;  %6307 = vmatprep.subr.bf16.mxu0 %v7207_v31 }
 0x31b   : > { %v2331_v30 = vld [vmem:[#allocation3 + $0x4] sm:$0xf] }
 0x31c   : > { %v5446_v62 = vcombine.low %v2330_v3, %v2331_v30  ;;  %v5480_v6 = vcombine.low %v2565_v39, %v2331_v30  ;;  %v2684_v30 = vld [vmem:[#allocation2 + $0x60] sm:$0xf] }
 0x31d   : > { %6308 = vmatpush3.bf16.msra.mxu0 %v6862_v40 }
 0x31e   : > { %v2376_v29 = vshll.u32 %v5446_v62, 16  ;;  %v2374_v16 = vshrl.u32 %v5446_v62, 16  ;;  %v2585_v8 = vrot.slane %v5480_v6, 1  ;;  %6309 = vmatprep.subr.bf16.mxu0 %v7207_v31 }
 0x320   : > { %v2378_v34 = vrot.slane %v2376_v29, 1  ;;  %v2587_v20 = vsel %vm834_vm3, %v2585_v8, %v2586_v57 }
 0x321   : > { %6310 = vmatpush3.bf16.msra.mxu0 %v6863_v15 }
 0x322   : > { %v2379_v49 = vor.u32 %v2378_v34, %v2374_v16  ;;  %6311 = vmatprep.subr.bf16.mxu0 %v7207_v31 }
 0x324   : > { %v2384_v59 = vsel %vm1480_vm1, %v2379_v49, %v2383_v50 }
 0x325   : > { %6256 = vmatmul.mubr.bf16.vlgmr.msra.gmra.mrb[56].mxu1 %v2384_v59  ;;  %6312 = vmatpush3.bf16.msra.mxu0 %v6864_v7 }
 0x326   : > { %6260 = vmatpush3.bf16.msra.mxu1 %v6841_v32  ;;  %6275 = vmatprep.mubr.msk.bf16.mxu1 %vm7208_vm2, %v7207_v31 }
 0x327   : > { %6261 = vmatprep.subr.bf16.mxu1 %v7207_v31  ;;  %6313 = vmatprep.subr.bf16.mxu0 %v7207_v31 }
 0x329   : > { %6314 = vmatpush3.bf16.msra.mxu0 %v6865_v25 }
 0x32a   : > { %6262 = vmatpush3.bf16.msra.mxu1 %v6842_v52  ;;  %6319 = vmatprep.subr.bf16.mxu0 %v7207_v31 }
 0x32b   : > { %6263 = vmatprep.subr.bf16.mxu1 %v7207_v31 }
 0x32e   : > { %6264 = vmatpush3.bf16.msra.mxu1 %v6843_v18 }
 0x32f   : > { %6265 = vmatprep.subr.bf16.mxu1 %v7207_v31 }
 0x332   : > { %6266 = vmatpush3.bf16.msra.mxu1 %v6844_v11 }
 0x333   : > { %6267 = vmatprep.subr.bf16.mxu1 %v7207_v31 }
 0x336   : > { %6268 = vmatpush3.bf16.msra.mxu1 %v6845_v1 }
 0x337   : > { %6269 = vmatprep.subr.bf16.mxu1 %v7207_v31 }
 0x33a   : > { %6270 = vmatpush3.bf16.msra.mxu1 %v6846_v38 }
 0x33b   : > { %6271 = vmatprep.subr.bf16.mxu1 %v7207_v31 }
 0x33e   : > { %6272 = vmatpush3.bf16.msra.mxu1 %v6847_v55 }
 0x33f   : > { %6273 = vmatprep.subr.bf16.mxu1 %v7207_v31 }
 0x342   : > { %6274 = vmatpush3.bf16.msra.mxu1 %v6848_v5 }
 0x343   : > { %6279 = vmatprep.subr.bf16.mxu1 %v7207_v31 }
 0x345   : > { %6276 = vmatmul.mubr.bf16.vlgmr.msra.gmra.mrb[56].mxu1 %v5446_v62 }
 0x346   : > { %6280 = vmatpush3.bf16.msra.mxu1 %v6849_v41  ;;  %6295 = vmatprep.mubr.msk.bf16.mxu1 %vm7208_vm2, %v7207_v31 }
 0x347   : > { %6281 = vmatprep.subr.bf16.mxu1 %v7207_v31 }
 0x34a   : > { %6282 = vmatpush3.bf16.msra.mxu1 %v6850_v45 }
 0x34b   : > { %6283 = vmatprep.subr.bf16.mxu1 %v7207_v31 }
 0x34e   : > { %6284 = vmatpush3.bf16.msra.mxu1 %v6851_v44 }
 0x34f   : > { %6285 = vmatprep.subr.bf16.mxu1 %v7207_v31 }
 0x352   : > { %6286 = vmatpush3.bf16.msra.mxu1 %v6852_v42 }
 0x353   : > { %6287 = vmatprep.subr.bf16.mxu1 %v7207_v31 }
 0x356   : > { %6288 = vmatpush3.bf16.msra.mxu1 %v6853_v58 }
 0x357   : > { %6289 = vmatprep.subr.bf16.mxu1 %v7207_v31 }
 0x35a   : > { %6290 = vmatpush3.bf16.msra.mxu1 %v6854_v21 }
 0x35b   : > { %6291 = vmatprep.subr.bf16.mxu1 %v7207_v31 }
 0x35e   : > { %6292 = vmatpush3.bf16.msra.mxu1 %v6855_v4 }
 0x35f   : > { %6293 = vmatprep.subr.bf16.mxu1 %v7207_v31 }
 0x362   : > { %6294 = vmatpush3.bf16.msra.mxu1 %v6856_v14 }
 0x363   : > { %6359 = vmatprep.subr.bf16.mxu1 %v7207_v31 }
 0x365   : > { %6296 = vmatmul.mubr.bf16.vlgmr.msra.gmra.mrb[56].mxu1 %v2587_v20 }
 0x366   : > { %6375 = vmatprep.mubr.msk.bf16.mxu1 %vm7208_vm2, %v7207_v31 }
 0x438   : > { %v2671_v43 = vpop.f32.mrb[56].mxu1 }
 0x439   : > { %v2692_v27 = vrot.slane %v2671_v43, 4  ;;  %v6297_v47 = vpop.f32.mrb[57].mxu1 }
 0x43a   : > { %v2674_v28 = vpop.f32.mrb[58].mxu1 }
 0x43b   : > { %v2698_v35 = vadd.f32 %v2692_v27, %v2681_v0  ;;  %v2693_v53 = vrot.slane %v2674_v28, 4  ;;  %v6298_v46 = vpop.f32.mrb[59].mxu1 }
 0x43d   : > { %v5489_v23 = vmul.f32 -1.442695, %v2698_v35  ;;  %v2694_v56 = vsel %vm8785_vm5, %v2692_v27, %v2693_v53  ;;  %v2700_v48 = vadd.f32 %v2693_v53, %v2685_v12  ;;  %vm8125_vm5 = vmor %vm2756_vm15, %vm2757_vm0  ;;  %v2795_v53 = vld [vmem:[#allocation3 + $0x8] sm:$0x1]  ;;  %vm3222_vm15 = vsmask.f32 1280 }
 0x43e   : > { %v2699_v63 = vadd.f32 %v2694_v56, %v2683_v60  ;;  %v2791_v60 = vld [vmem:[#allocation3] sm:$0xf]  ;;  %vm3223_vm0 = vsmask.f32 5392 }
 0x43f   : > { %7023 = vpow2.f32 %v5489_v23  ;;  %v5491_v33 = vmul.f32 -1.442695, %v2700_v48  ;;  %vm8260_vm13 = vmor %vm3222_vm15, %vm3223_vm0 }
 0x440   : > { %v5490_v13 = vmul.f32 -1.442695, %v2699_v63 }
 0x441   : > { %7025 = vpow2.f32 %v5491_v33 }
 0x442   : > { %7027 = vpow2.f32 %v5490_v13 }
 0x443   : > { %7029 = vtanh.f32 %v2680_v61 }
 0x444   : > { %7031 = vtanh.f32 %v2682_v51 }
 0x449   : > { %v7024_v17 = vpop.eup %7023 }
 0x44a   : > { %v2710_v3 = vadd.f32 1.0, %v7024_v17 }
 0x44b   : > { %v7026_v62 = vpop.eup %7025 }
 0x44c   : > { %v7028_v29 = vpop.eup %7027  ;;  %7033 = vrcp.f32 %v2710_v3  ;;  %v2712_v54 = vadd.f32 1.0, %v7026_v62 }
 0x44d   : > { %7035 = vtanh.f32 %v2684_v30  ;;  %v2711_v16 = vadd.f32 1.0, %v7028_v29  ;;  %v7030_v34 = vpop.eup %7029 }
 0x44e   : > { %7037 = vrcp.f32 %v2712_v54  ;;  %v7032_v49 = vpop.eup %7031 }
 0x44f   : > { %7039 = vrcp.f32 %v2711_v16  ;;  %v6868_v16 = vld [vmem:[%s8781_s2] sm:$0xff]  }
 0x456   : > { %v7034_v50 = vpop.eup %7033 }
 0x457   : > { %v7036_v32 = vpop.eup %7035  ;;  %v2719_v59 = vmul.f32 %v7034_v50, %v7030_v34  ;;  %v5860_v52 = vpack.c.bf16 %v7034_v50, %v7034_v50  ;;  %v6870_v50 = vld [vmem:[%s8781_s2 + $0x10] sm:$0xff]  }
 0x458   : > { %v7038_v18 = vpop.eup %7037 }
 0x459   : > { %v7040_v11 = vpop.eup %7039  ;;  %v5857_v1 = vpack.c.bf16 %v2719_v59, %v2719_v59  ;;  %v2760_v38 = vshrl.u32 %v5860_v52, 16  ;;  %v2763_v55 = vshll.u32 %v5860_v52, 16  ;;  %v2721_v5 = vmul.f32 %v7038_v18, %v7036_v32  ;;  %v6871_v32 = vld [vmem:[%s8781_s2 + $0x18] sm:$0xff]   ;;  %v6872_v59 = vld [vmem:[%s8781_s2 + $0x20] sm:$0xff]   ;;  %v6873_v52 = vld [vmem:[%s8781_s2 + $0x28] sm:$0xff]  }
 0x45a   : > { %v2720_v41 = vmul.f32 %v7040_v11, %v7032_v49  ;;  %v5861_v45 = vpack.c.bf16 %v7040_v11, %v7040_v11  ;;  %v5862_v44 = vpack.c.bf16 %v7038_v18, %v7038_v18  ;;  %v6869_v49 = vld [vmem:[%s8781_s2 + $0x8] sm:$0xff]   ;;  %v6874_v18 = vld [vmem:[%s8781_s2 + $0x30] sm:$0xff]   ;;  %v6875_v11 = vld [vmem:[%s8781_s2 + $0x38] sm:$0xff]  }
 0x45b   : > { %v2762_v42 = vrot.slane %v2760_v38, 5  ;;  %v2765_v58 = vrot.slane %v2763_v55, 6  ;;  %v5859_v21 = vpack.c.bf16 %v2721_v5, %v2721_v5  ;;  %v5495_v57 = vrot.slane %v5857_v1, 10  ;;  %v6876_v1 = vld [vmem:[%s8781_s2 + $0x80] sm:$0xff]   ;;  %v6877_v38 = vld [vmem:[%s8781_s2 + $0x88] sm:$0xff]   ;;  %v6878_v55 = vld [vmem:[%s8781_s2 + $0x90] sm:$0xff]  }
 0x45c   : > { %v5858_v4 = vpack.c.bf16 %v2720_v41, %v2720_v41  ;;  %v2769_v39 = vshrl.u32 %v5861_v45, 16  ;;  %v2772_v6 = vshll.u32 %v5861_v45, 16  ;;  %v2779_v14 = vshrl.u32 %v5862_v44, 16  ;;  %v6879_v5 = vld [vmem:[%s8781_s2 + $0x98] sm:$0xff]   ;;  %v6880_v41 = vld [vmem:[%s8781_s2 + $0xa0] sm:$0xff]   ;;  %v6881_v45 = vld [vmem:[%s8781_s2 + $0xa8] sm:$0xff]  }
 0x45d   : > { %v2766_v20 = vor.u32 %v2765_v58, %v2762_v42  ;;  %v2782_v37 = vshll.u32 %v5862_v44, 16  ;;  %v2740_v7 = vrot.slane %v5859_v21, 6  ;;  %v6882_v42 = vld [vmem:[%s8781_s2 + $0xb0] sm:$0xff]   ;;  %v6883_v21 = vld [vmem:[%s8781_s2 + $0xb8] sm:$0xff]  }
 0x45e   : > { %v2737_v19 = vrot.slane %v5858_v4, 6  ;;  %v2771_v26 = vrot.slane %v2769_v39, 5  ;;  %v2774_v9 = vrot.slane %v2772_v6, 6  ;;  %v2781_v40 = vrot.slane %v2779_v14, 5  ;;  %v6885_v14 = vld [vmem:[%s8781_s2 + $0x40] sm:$0xff]  }
 0x45f   : > { %v2767_v15 = vrot.slane %v2766_v20, 4  ;;  %v2784_v43 = vrot.slane %v2782_v37, 6  ;;  %6360 = vmatpush3.bf16.msra.mxu1 %v6885_v14  ;;  %v6887_v20 = vld [vmem:[%s8781_s2 + $0x50] sm:$0xff]   ;;  %v6888_v37 = vld [vmem:[%s8781_s2 + $0x58] sm:$0xff]  }
 0x460   : > { %v2738_v27 = vsel %vm8119_vm6, %v5495_v57, %v2737_v19  ;;  %v2739_v47 = vrot.slane %v2737_v19, 4  ;;  %v2775_v0 = vor.u32 %v2774_v9, %v2771_v26  ;;  %v2787_v28 = vrot.slane %v2781_v40, 4  ;;  %6361 = vmatprep.subr.bf16.mxu1 %v7207_v31  ;;  %v6886_v57 = vld [vmem:[%s8781_s2 + $0x48] sm:$0xff]   ;;  %v6889_v19 = vld [vmem:[%s8781_s2 + $0x60] sm:$0xff]   ;;  %v6891_v9 = vld [vmem:[%s8781_s2 + $0x70] sm:$0xff]  }
 0x461   : > { %2744 = vst [vmem:[%s7853_s25 + $0x10] sm:$0xf] %v2738_v27  ;;  %v2785_v35 = vor.u32 %v2784_v43, %v2781_v40  ;;  %v6890_v26 = vld [vmem:[%s8781_s2 + $0x68] sm:$0xff]   ;;  %v6892_v40 = vld [vmem:[%s8781_s2 + $0x78] sm:$0xff]  }
 0x462   : > { %v2741_v46 = vsel %vm8119_vm6, %v2739_v47, %v2740_v7  ;;  %v2776_v12 = vsel %vm8125_vm5, %v2767_v15, %v2775_v0  ;;  %v2777_v23 = vrot.slane %v2775_v0, 4  ;;  %v2796_v56 = vsel %vm7866_vm12, %v2787_v28, %v2795_v53  ;;  %v3149_v27 = vld [vmem:[#allocation2 + $0x68] sm:$0xc0]  ;;  %v3153_v53 = vld [vmem:[#allocation2 + $0x88] sm:$0x3f] }
 0x463   : > { %2745 = vst [vmem:[%s7853_s25 + $0x14] sm:$0xf] %v2741_v46  ;;  %v2792_v48 = vsel %vm7856_vm10, %v2776_v12, %v2791_v60  ;;  %2797 = vst [vmem:[#allocation3 + $0x8] sm:$0x1] %v2796_v56  ;;  %6362 = vmatpush3.bf16.msra.mxu1 %v6886_v57  ;;  %v3151_v12 = vld [vmem:[#allocation2 + $0x78] sm:$0xff] }
 0x464   : > { %v2786_v63 = vsel %vm8125_vm5, %v2777_v23, %v2785_v35  ;;  %2793 = vst [vmem:[#allocation3] sm:$0xf] %v2792_v48  ;;  %6363 = vmatprep.subr.bf16.mxu1 %v7207_v31 }
 0x465   : > { %2794 = vst [vmem:[#allocation3 + $0x4] sm:$0xf] %v2786_v63 }
 0x467   : > { %6364 = vmatpush3.bf16.msra.mxu1 %v6887_v20 }
 0x468   : > { %6365 = vmatprep.subr.bf16.mxu1 %v7207_v31 }
 0x46a   : > { %v8143_v13 = vld [vmem:[#allocation3 + $0x8] ss:$0 sps:$4 sm:$0x11]  }
 0x46b   : > { %v2798_v33 = vld [vmem:[#allocation3] sm:$0xf]  ;;  %v2849_v3 = vshll.u32 %v8143_v13, 16  ;;  %v3054_v39 = vrot.slane %v8143_v13, 1  ;;  %6366 = vmatpush3.bf16.msra.mxu1 %v6888_v37  ;;  %v3150_v13 = vld [vmem:[#allocation2 + $0x70] sm:$0xff] }
 0x46c   : > { %v2799_v61 = vld [vmem:[#allocation3 + $0x4] sm:$0xf]  ;;  %v3033_v44 = vld [vmem:[#allocation3] sm:$0xe]  ;;  %6367 = vmatprep.subr.bf16.mxu1 %v7207_v31 }
 0x46d   : > { %v5515_v51 = vcombine.low %v2798_v33, %v2799_v61  ;;  %v2851_v54 = vrot.slane %v2849_v3, 1  ;;  %v5549_v58 = vcombine.low %v3033_v44, %v2799_v61  ;;  %v3148_v33 = vld [vmem:[#allocation2 + $0x60] sm:$0xc0] }
 0x46f   : > { %v2844_v17 = vshll.u32 %v5515_v51, 16  ;;  %v2842_v30 = vshrl.u32 %v5515_v51, 16  ;;  %v3053_v4 = vrot.slane %v5549_v58, 1  ;;  %6368 = vmatpush3.bf16.msra.mxu1 %v6889_v19 }
 0x470   : > { %6369 = vmatprep.subr.bf16.mxu1 %v7207_v31 }
 0x471   : > { %v2846_v62 = vrot.slane %v2844_v17, 1  ;;  %v3055_v6 = vsel %vm834_vm3, %v3053_v4, %v3054_v39  ;;  %v3152_v17 = vld [vmem:[#allocation2 + $0x80] sm:$0x3f] }
 0x473   : > { %v2847_v29 = vor.u32 %v2846_v62, %v2842_v30  ;;  %6370 = vmatpush3.bf16.msra.mxu1 %v6890_v26 }
 0x474   : > { %6371 = vmatprep.subr.bf16.mxu1 %v7207_v31 }
 0x475   : > { %v2852_v34 = vsel %vm1480_vm1, %v2847_v29, %v2851_v54 }
 0x476   : > { %6316 = vmatmul.mubr.bf16.vlgmr.msra.gmra.mrb[60].mxu0 %v2852_v34 }
 0x477   : > { %6320 = vmatpush3.bf16.msra.mxu0 %v6868_v16  ;;  %6335 = vmatprep.mubr.msk.bf16.mxu0 %vm7208_vm2, %v7207_v31 }
 0x478   : > { %6321 = vmatprep.subr.bf16.mxu0 %v7207_v31  ;;  %6372 = vmatpush3.bf16.msra.mxu1 %v6891_v9 }
 0x479   : > { %6373 = vmatprep.subr.bf16.mxu1 %v7207_v31 }
 0x47b   : > { %6322 = vmatpush3.bf16.msra.mxu0 %v6869_v49 }
 0x47c   : > { %6323 = vmatprep.subr.bf16.mxu0 %v7207_v31  ;;  %6374 = vmatpush3.bf16.msra.mxu1 %v6892_v40 }
 0x47d   : > { %6379 = vmatprep.subr.bf16.mxu1 %v7207_v31 }
 0x47f   : > { %6324 = vmatpush3.bf16.msra.mxu0 %v6870_v50 }
 0x480   : > { %6325 = vmatprep.subr.bf16.mxu0 %v7207_v31 }
 0x483   : > { %6326 = vmatpush3.bf16.msra.mxu0 %v6871_v32 }
 0x484   : > { %6327 = vmatprep.subr.bf16.mxu0 %v7207_v31 }
 0x487   : > { %6328 = vmatpush3.bf16.msra.mxu0 %v6872_v59 }
 0x488   : > { %6329 = vmatprep.subr.bf16.mxu0 %v7207_v31 }
 0x48b   : > { %6330 = vmatpush3.bf16.msra.mxu0 %v6873_v52 }
 0x48c   : > { %6331 = vmatprep.subr.bf16.mxu0 %v7207_v31 }
 0x48f   : > { %6332 = vmatpush3.bf16.msra.mxu0 %v6874_v18 }
 0x490   : > { %6333 = vmatprep.subr.bf16.mxu0 %v7207_v31 }
 0x493   : > { %6334 = vmatpush3.bf16.msra.mxu0 %v6875_v11 }
 0x494   : > { %6339 = vmatprep.subr.bf16.mxu0 %v7207_v31 }
 0x496   : > { %6336 = vmatmul.mubr.bf16.vlgmr.msra.gmra.mrb[60].mxu0 %v5515_v51 }
 0x497   : > { %6340 = vmatpush3.bf16.msra.mxu0 %v6876_v1  ;;  %6355 = vmatprep.mubr.msk.bf16.mxu0 %vm7208_vm2, %v7207_v31 }
 0x498   : > { %6341 = vmatprep.subr.bf16.mxu0 %v7207_v31 }
 0x49b   : > { %6342 = vmatpush3.bf16.msra.mxu0 %v6877_v38 }
 0x49c   : > { %6343 = vmatprep.subr.bf16.mxu0 %v7207_v31 }
 0x49f   : > { %6344 = vmatpush3.bf16.msra.mxu0 %v6878_v55 }
 0x4a0   : > { %6345 = vmatprep.subr.bf16.mxu0 %v7207_v31 }
 0x4a3   : > { %6346 = vmatpush3.bf16.msra.mxu0 %v6879_v5 }
 0x4a4   : > { %6347 = vmatprep.subr.bf16.mxu0 %v7207_v31 }
 0x4a7   : > { %6348 = vmatpush3.bf16.msra.mxu0 %v6880_v41 }
 0x4a8   : > { %6349 = vmatprep.subr.bf16.mxu0 %v7207_v31 }
 0x4ab   : > { %6350 = vmatpush3.bf16.msra.mxu0 %v6881_v45 }
 0x4ac   : > { %6351 = vmatprep.subr.bf16.mxu0 %v7207_v31 }
 0x4af   : > { %6352 = vmatpush3.bf16.msra.mxu0 %v6882_v42 }
 0x4b0   : > { %6353 = vmatprep.subr.bf16.mxu0 %v7207_v31 }
 0x4b3   : > { %6354 = vmatpush3.bf16.msra.mxu0 %v6883_v21 }
 0x4b4   : > { %6419 = vmatprep.subr.bf16.mxu0 %v7207_v31 }
 0x4b6   : > { %6356 = vmatmul.mubr.bf16.vlgmr.msra.gmra.mrb[60].mxu0 %v3055_v6 }
 0x4b7   : > { %6435 = vmatprep.mubr.msk.bf16.mxu0 %vm7208_vm2, %v7207_v31 }
 0x589   : > { %v3139_v15 = vpop.f32.mrb[60].mxu0 }
 0x58a   : > { %v3159_v7 = vrot.slane %v3139_v15, 2  ;;  %v6357_v43 = vpop.f32.mrb[61].mxu0 }
 0x58b   : > { %v3142_v47 = vpop.f32.mrb[62].mxu0 }
 0x58c   : > { %v3165_v0 = vadd.f32 %v3159_v7, %v3149_v27  ;;  %v3160_v28 = vrot.slane %v3142_v47, 2  ;;  %v6358_v35 = vpop.f32.mrb[63].mxu0 }
 0x58e   : > { %v5558_v46 = vmul.f32 -1.442695, %v3165_v0  ;;  %v3161_v23 = vsel %vm8786_vm4, %v3159_v7, %v3160_v28  ;;  %v3167_v60 = vadd.f32 %v3160_v28, %v3153_v53  ;;  %vm8254_vm4 = vmor %vm1858_vm9, %vm3199_vm14  ;;  %v3261_v53 = vld [vmem:[#allocation3 + $0x8] sm:$0x1]  ;;  %vm8808_vm9 = vcmask 1041408  }
 0x58f   : > { %v3166_v56 = vadd.f32 %v3161_v23, %v3151_v12 }
 0x590   : > { %7041 = vpow2.f32 %v5558_v46  ;;  %v5560_v48 = vmul.f32 -1.442695, %v3167_v60  ;;  %v3257_v60 = vld [vmem:[#allocation3] sm:$0xf] }
 0x591   : > { %v5559_v63 = vmul.f32 -1.442695, %v3166_v56 }
 0x592   : > { %7043 = vpow2.f32 %v5560_v48 }
 0x593   : > { %7045 = vpow2.f32 %v5559_v63 }
 0x594   : > { %7047 = vtanh.f32 %v3148_v33 }
 0x595   : > { %7049 = vtanh.f32 %v3150_v13 }
 0x59a   : > { %v7042_v61 = vpop.eup %7041 }
 0x59b   : > { %v3177_v51 = vadd.f32 1.0, %v7042_v61 }
 0x59c   : > { %v7044_v3 = vpop.eup %7043 }
 0x59d   : > { %v7046_v30 = vpop.eup %7045  ;;  %7051 = vrcp.f32 %v3177_v51  ;;  %v3179_v62 = vadd.f32 1.0, %v7044_v3 }
 0x59e   : > { %7053 = vtanh.f32 %v3152_v17  ;;  %v3178_v29 = vadd.f32 1.0, %v7046_v30  ;;  %v7048_v54 = vpop.eup %7047 }
 0x59f   : > { %7055 = vrcp.f32 %v3179_v62  ;;  %v7050_v16 = vpop.eup %7049 }
 0x5a0   : > { %7057 = vrcp.f32 %v3178_v29 }
 0x5a7   : > { %v7052_v34 = vpop.eup %7051 }
 0x5a8   : > { %v7054_v49 = vpop.eup %7053  ;;  %v3186_v50 = vmul.f32 %v7052_v34, %v7048_v54  ;;  %v5866_v32 = vpack.c.bf16 %v7052_v34, %v7052_v34 }
 0x5a9   : > { %v7056_v59 = vpop.eup %7055 }
 0x5aa   : > { %v7058_v52 = vpop.eup %7057  ;;  %v5863_v18 = vpack.c.bf16 %v3186_v50, %v3186_v50  ;;  %v3226_v11 = vshrl.u32 %v5866_v32, 16  ;;  %v3229_v1 = vshll.u32 %v5866_v32, 16  ;;  %v3188_v38 = vmul.f32 %v7056_v59, %v7054_v49  ;;  %v6896_v49 = vld [vmem:[%s8781_s2 + $0x8] sm:$0xff]   ;;  %v6897_v50 = vld [vmem:[%s8781_s2 + $0x10] sm:$0xff]   ;;  %v6898_v32 = vld [vmem:[%s8781_s2 + $0x18] sm:$0xff]  }
 0x5ab   : > { %v3187_v55 = vmul.f32 %v7058_v52, %v7050_v16  ;;  %v5867_v5 = vpack.c.bf16 %v7058_v52, %v7058_v52  ;;  %v5868_v41 = vpack.c.bf16 %v7056_v59, %v7056_v59  ;;  %v6895_v16 = vld [vmem:[%s8781_s2] sm:$0xff]   ;;  %v6900_v52 = vld [vmem:[%s8781_s2 + $0x28] sm:$0xff]  }
 0x5ac   : > { %v3228_v45 = vrot.slane %v3226_v11, 6  ;;  %v3231_v44 = vrot.slane %v3229_v1, 7  ;;  %v5865_v42 = vpack.c.bf16 %v3188_v38, %v3188_v38  ;;  %v5564_v6 = vrot.slane %v5863_v18, 11  ;;  %v6899_v59 = vld [vmem:[%s8781_s2 + $0x20] sm:$0xff]   ;;  %v6901_v18 = vld [vmem:[%s8781_s2 + $0x30] sm:$0xff]   ;;  %v6902_v11 = vld [vmem:[%s8781_s2 + $0x38] sm:$0xff]  }
 0x5ad   : > { %v5864_v58 = vpack.c.bf16 %v3187_v55, %v3187_v55  ;;  %v3235_v21 = vshrl.u32 %v5867_v5, 16  ;;  %v3238_v4 = vshll.u32 %v5867_v5, 16  ;;  %v3245_v39 = vshrl.u32 %v5868_v41, 16  ;;  %v6903_v1 = vld [vmem:[%s8781_s2 + $0x80] sm:$0xff]   ;;  %v6904_v38 = vld [vmem:[%s8781_s2 + $0x88] sm:$0xff]   ;;  %v6905_v55 = vld [vmem:[%s8781_s2 + $0x90] sm:$0xff]  }
 0x5ae   : > { %v3232_v14 = vor.u32 %v3231_v44, %v3228_v45  ;;  %v3248_v20 = vshll.u32 %v5868_v41, 16  ;;  %v3206_v15 = vrot.slane %v5865_v42, 7  ;;  %v6906_v5 = vld [vmem:[%s8781_s2 + $0x98] sm:$0xff]   ;;  %v6907_v41 = vld [vmem:[%s8781_s2 + $0xa0] sm:$0xff]   ;;  %v6908_v45 = vld [vmem:[%s8781_s2 + $0xa8] sm:$0xff]  }
 0x5af   : > { %v3203_v37 = vrot.slane %v5864_v58, 7  ;;  %v3237_v19 = vrot.slane %v3235_v21, 6  ;;  %v3240_v26 = vrot.slane %v3238_v4, 7  ;;  %v3247_v9 = vrot.slane %v3245_v39, 6  ;;  %v6909_v42 = vld [vmem:[%s8781_s2 + $0xb0] sm:$0xff]   ;;  %v6910_v21 = vld [vmem:[%s8781_s2 + $0xb8] sm:$0xff]  }
 0x5b0   : > { %v3233_v40 = vrot.slane %v3232_v14, 4  ;;  %v3250_v43 = vrot.slane %v3248_v20, 7  ;;  %v6912_v14 = vld [vmem:[%s8781_s2 + $0x40] sm:$0xff]   ;;  %v6913_v20 = vld [vmem:[%s8781_s2 + $0x48] sm:$0xff]  }
 0x5b1   : > { %v3204_v27 = vsel %vm8254_vm4, %v5564_v6, %v3203_v37  ;;  %v3205_v47 = vrot.slane %v3203_v37, 4  ;;  %v3241_v0 = vor.u32 %v3240_v26, %v3237_v19  ;;  %v3253_v28 = vrot.slane %v3247_v9, 4  ;;  %6420 = vmatpush3.bf16.msra.mxu0 %v6912_v14  ;;  %v6914_v37 = vld [vmem:[%s8781_s2 + $0x50] sm:$0xff]   ;;  %v6915_v19 = vld [vmem:[%s8781_s2 + $0x58] sm:$0xff]   ;;  %v6916_v26 = vld [vmem:[%s8781_s2 + $0x60] sm:$0xff]  }
 0x5b2   : > { %3210 = vst [vmem:[%s7853_s25 + $0x18] sm:$0xf] %v3204_v27  ;;  %v3251_v35 = vor.u32 %v3250_v43, %v3247_v9  ;;  %6421 = vmatprep.subr.bf16.mxu0 %v7207_v31  ;;  %v6917_v9 = vld [vmem:[%s8781_s2 + $0x68] sm:$0xff]   ;;  %v3615_v27 = vld [vmem:[#allocation2 + $0x98] sm:$0xff] }
 0x5b3   : > { %v3207_v46 = vsel %vm8254_vm4, %v3205_v47, %v3206_v15  ;;  %v3242_v12 = vsel %vm8260_vm13, %v3233_v40, %v3241_v0  ;;  %v3243_v23 = vrot.slane %v3241_v0, 4  ;;  %v3262_v56 = vsel %vm7866_vm12, %v3253_v28, %v3261_v53  ;;  %v6918_v40 = vld [vmem:[%s8781_s2 + $0x70] sm:$0xff]   ;;  %v6919_v15 = vld [vmem:[%s8781_s2 + $0x78] sm:$0xff]  }
 0x5b4   : > { %3211 = vst [vmem:[%s7853_s25 + $0x1c] sm:$0xf] %v3207_v46  ;;  %v3258_v48 = vsel %vm7856_vm10, %v3242_v12, %v3257_v60  ;;  %3263 = vst [vmem:[#allocation3 + $0x8] sm:$0x1] %v3262_v56  ;;  %v3614_v60 = vld [vmem:[#allocation2 + $0x90] sm:$0xff] }
 0x5b5   : > { %v3252_v63 = vsel %vm8260_vm13, %v3243_v23, %v3251_v35  ;;  %3259 = vst [vmem:[#allocation3] sm:$0xf] %v3258_v48  ;;  %6422 = vmatpush3.bf16.msra.mxu0 %v6913_v20  ;;  %v3617_v35 = vld [vmem:[#allocation2 + $0xa8] sm:$0xff] }
 0x5b6   : > { %3260 = vst [vmem:[#allocation3 + $0x4] sm:$0xf] %v3252_v63  ;;  %6423 = vmatprep.subr.bf16.mxu0 %v7207_v31  ;;  %v3616_v63 = vld [vmem:[#allocation2 + $0xa0] sm:$0xff] }
 0x5b9   : > { %6424 = vmatpush3.bf16.msra.mxu0 %v6914_v37 }
 0x5ba   : > { %6425 = vmatprep.subr.bf16.mxu0 %v7207_v31 }
 0x5bb   : > { %v8278_v13 = vld [vmem:[#allocation3 + $0x8] ss:$0 sps:$4 sm:$0x11]  }
 0x5bc   : > { %v3264_v33 = vld [vmem:[#allocation3] sm:$0xf]  ;;  %v3315_v3 = vshll.u32 %v8278_v13, 16  ;;  %v3520_v39 = vrot.slane %v8278_v13, 1 }
 0x5bd   : > { %v3265_v61 = vld [vmem:[#allocation3 + $0x4] sm:$0xf]  ;;  %v3499_v44 = vld [vmem:[#allocation3] sm:$0xe]  ;;  %6426 = vmatpush3.bf16.msra.mxu0 %v6915_v19 }
 0x5be   : > { %v5584_v51 = vcombine.low %v3264_v33, %v3265_v61  ;;  %v3317_v54 = vrot.slane %v3315_v3, 1  ;;  %v5618_v58 = vcombine.low %v3499_v44, %v3265_v61  ;;  %6427 = vmatprep.subr.bf16.mxu0 %v7207_v31 }
 0x5c0   : > { %v3310_v17 = vshll.u32 %v5584_v51, 16  ;;  %v3308_v30 = vshrl.u32 %v5584_v51, 16  ;;  %v3519_v4 = vrot.slane %v5618_v58, 1 }
 0x5c1   : > { %6428 = vmatpush3.bf16.msra.mxu0 %v6916_v26 }
 0x5c2   : > { %v3312_v62 = vrot.slane %v3310_v17, 1  ;;  %v3521_v6 = vsel %vm834_vm3, %v3519_v4, %v3520_v39  ;;  %6429 = vmatprep.subr.bf16.mxu0 %v7207_v31 }
 0x5c4   : > { %v3313_v29 = vor.u32 %v3312_v62, %v3308_v30 }
 0x5c5   : > { %6430 = vmatpush3.bf16.msra.mxu0 %v6917_v9  ;;  %v6923_v9 = vld [vmem:[%s8781_s2 + $0x8] sm:$0xff]  }
 0x5c6   : > { %v3318_v34 = vsel %vm1480_vm1, %v3313_v29, %v3317_v54  ;;  %6431 = vmatprep.subr.bf16.mxu0 %v7207_v31 }
 0x5c7   : > { %6376 = vmatmul.mubr.bf16.vlgmr.msra.gmra.mrb[60].mxu1 %v3318_v34 }
 0x5c8   : > { %6380 = vmatpush3.bf16.msra.mxu1 %v6895_v16  ;;  %6395 = vmatprep.mubr.msk.bf16.mxu1 %vm7208_vm2, %v7207_v31 }
 0x5c9   : > { %6381 = vmatprep.subr.bf16.mxu1 %v7207_v31  ;;  %6432 = vmatpush3.bf16.msra.mxu0 %v6918_v40  ;;  %v6924_v40 = vld [vmem:[%s8781_s2 + $0x10] sm:$0xff]  }
 0x5ca   : > { %6433 = vmatprep.subr.bf16.mxu0 %v7207_v31 }
 0x5cc   : > { %6382 = vmatpush3.bf16.msra.mxu1 %v6896_v49 }
 0x5cd   : > { %6383 = vmatprep.subr.bf16.mxu1 %v7207_v31  ;;  %6434 = vmatpush3.bf16.msra.mxu0 %v6919_v15  ;;  %v6925_v15 = vld [vmem:[%s8781_s2 + $0x18] sm:$0xff]  }
 0x5ce   : > { %6439 = vmatprep.subr.bf16.mxu0 %v7207_v31 }
 0x5d0   : > { %6384 = vmatpush3.bf16.msra.mxu1 %v6897_v50 }
 0x5d1   : > { %6385 = vmatprep.subr.bf16.mxu1 %v7207_v31 }
 0x5d4   : > { %6386 = vmatpush3.bf16.msra.mxu1 %v6898_v32 }
 0x5d5   : > { %6387 = vmatprep.subr.bf16.mxu1 %v7207_v31 }
 0x5d8   : > { %6388 = vmatpush3.bf16.msra.mxu1 %v6899_v59 }
 0x5d9   : > { %6389 = vmatprep.subr.bf16.mxu1 %v7207_v31 }
 0x5dc   : > { %6390 = vmatpush3.bf16.msra.mxu1 %v6900_v52 }
 0x5dd   : > { %6391 = vmatprep.subr.bf16.mxu1 %v7207_v31 }
 0x5e0   : > { %6392 = vmatpush3.bf16.msra.mxu1 %v6901_v18 }
 0x5e1   : > { %6393 = vmatprep.subr.bf16.mxu1 %v7207_v31 }
 0x5e4   : > { %6394 = vmatpush3.bf16.msra.mxu1 %v6902_v11  ;;  %v3672_v11 = vld [vmem:[#allocation3] sm:$0xf] }
 0x5e5   : > { %6399 = vmatprep.subr.bf16.mxu1 %v7207_v31 }
 0x5e7   : > { %6396 = vmatmul.mubr.bf16.vlgmr.msra.gmra.mrb[60].mxu1 %v5584_v51 }
 0x5e8   : > { %6400 = vmatpush3.bf16.msra.mxu1 %v6903_v1  ;;  %6415 = vmatprep.mubr.msk.bf16.mxu1 %vm7208_vm2, %v7207_v31 }
 0x5e9   : > { %6401 = vmatprep.subr.bf16.mxu1 %v7207_v31 }
 0x5ec   : > { %6402 = vmatpush3.bf16.msra.mxu1 %v6904_v38 }
 0x5ed   : > { %6403 = vmatprep.subr.bf16.mxu1 %v7207_v31 }
 0x5f0   : > { %6404 = vmatpush3.bf16.msra.mxu1 %v6905_v55 }
 0x5f1   : > { %6405 = vmatprep.subr.bf16.mxu1 %v7207_v31 }
 0x5f4   : > { %6406 = vmatpush3.bf16.msra.mxu1 %v6906_v5 }
 0x5f5   : > { %6407 = vmatprep.subr.bf16.mxu1 %v7207_v31 }
 0x5f8   : > { %6408 = vmatpush3.bf16.msra.mxu1 %v6907_v41  ;;  %v3676_v41 = vld [vmem:[#allocation3 + $0x8] sm:$0x1] }
 0x5f9   : > { %6409 = vmatprep.subr.bf16.mxu1 %v7207_v31 }
 0x5fc   : > { %6410 = vmatpush3.bf16.msra.mxu1 %v6908_v45 }
 0x5fd   : > { %6411 = vmatprep.subr.bf16.mxu1 %v7207_v31 }
 0x600   : > { %6412 = vmatpush3.bf16.msra.mxu1 %v6909_v42 }
 0x601   : > { %6413 = vmatprep.subr.bf16.mxu1 %v7207_v31 }
 0x604   : > { %6414 = vmatpush3.bf16.msra.mxu1 %v6910_v21 }
 0x605   : > { %6479 = vmatprep.subr.bf16.mxu1 %v7207_v31 }
 0x607   : > { %6416 = vmatmul.mubr.bf16.vlgmr.msra.gmra.mrb[60].mxu1 %v3521_v6 }
 0x608   : > { %6495 = vmatprep.mubr.msk.bf16.mxu1 %vm7208_vm2, %v7207_v31 }
 0x6da   : > { %v3605_v43 = vpop.f32.mrb[60].mxu1 }
 0x6db   : > { %v3620_v47 = vadd.f32 %v3615_v27, %v3605_v43  ;;  %v6417_v0 = vpop.f32.mrb[61].mxu1  ;;  %v6926_v43 = vld [vmem:[%s8781_s2 + $0x20] sm:$0xff]   ;;  %v6927_v27 = vld [vmem:[%s8781_s2 + $0x28] sm:$0xff]  }
 0x6dc   : > { %v3608_v28 = vpop.f32.mrb[62].mxu1  ;;  %v6929_v0 = vld [vmem:[%s8781_s2 + $0x38] sm:$0xff]  }
 0x6dd   : > { %v5627_v53 = vmul.f32 -1.442695, %v3620_v47  ;;  %v3621_v46 = vadd.f32 %v3617_v35, %v3608_v28  ;;  %v6418_v12 = vpop.f32.mrb[63].mxu1  ;;  %v6928_v47 = vld [vmem:[%s8781_s2 + $0x30] sm:$0xff]   ;;  %v6930_v28 = vld [vmem:[%s8781_s2 + $0x80] sm:$0xff]   ;;  %v6931_v35 = vld [vmem:[%s8781_s2 + $0x88] sm:$0xff]  }
 0x6de   : > { %v6934_v12 = vld [vmem:[%s8781_s2 + $0xa0] sm:$0xff]  }
 0x6df   : > { %7059 = vpow2.f32 %v5627_v53  ;;  %v5628_v23 = vmul.f32 -1.442695, %v3621_v46  ;;  %v6932_v53 = vld [vmem:[%s8781_s2 + $0x90] sm:$0xff]   ;;  %v6933_v46 = vld [vmem:[%s8781_s2 + $0x98] sm:$0xff]  }
 0x6e1   : > { %7061 = vpow2.f32 %v5628_v23  ;;  %v6935_v23 = vld [vmem:[%s8781_s2 + $0xa8] sm:$0xff]  }
 0x6e2   : > { %7063 = vtanh.f32 %v3614_v60  ;;  %v6936_v60 = vld [vmem:[%s8781_s2 + $0xb0] sm:$0xff]  }
 0x6e9   : > { %v7060_v56 = vpop.eup %7059 }
 0x6ea   : > { %v3628_v48 = vadd.f32 1.0, %v7060_v56 }
 0x6eb   : > { %v7062_v33 = vpop.eup %7061 }
 0x6ec   : > { %7065 = vrcp.f32 %v3628_v48  ;;  %v3629_v13 = vadd.f32 1.0, %v7062_v33  ;;  %v7064_v61 = vpop.eup %7063 }
 0x6ed   : > { %7067 = vtanh.f32 %v3616_v63  ;;  %v6937_v63 = vld [vmem:[%s8781_s2 + $0xb8] sm:$0xff]  }
 0x6ee   : > { %7069 = vrcp.f32 %v3629_v13 }
 0x6f6   : > { %v7066_v51 = vpop.eup %7065 }
 0x6f7   : > { %v7068_v17 = vpop.eup %7067  ;;  %v5871_v3 = vpack.c.bf16 %v7066_v51, %v7066_v51  ;;  %v3634_v62 = vmul.f32 %v7066_v51, %v7064_v61  ;;  %v6939_v51 = vld [vmem:[%s8781_s2 + $0x40] sm:$0xff]  }
 0x6f8   : > { %v7070_v30 = vpop.eup %7069  ;;  %6480 = vmatpush3.bf16.msra.mxu1 %v6939_v51 }
 0x6f9   : > { %v3653_v29 = vshrl.u32 %v5871_v3, 16  ;;  %v3635_v54 = vmul.f32 %v7070_v30, %v7068_v17  ;;  %v5872_v16 = vpack.c.bf16 %v7070_v30, %v7070_v30  ;;  %v3656_v49 = vshll.u32 %v5871_v3, 16  ;;  %6481 = vmatprep.subr.bf16.mxu1 %v7207_v31  ;;  %v6940_v17 = vld [vmem:[%s8781_s2 + $0x48] sm:$0xff]   ;;  %v6941_v3 = vld [vmem:[%s8781_s2 + $0x50] sm:$0xff]   ;;  %v6942_v30 = vld [vmem:[%s8781_s2 + $0x58] sm:$0xff]  }
 0x6fb   : > { %v3655_v34 = vrot.slane %v3653_v29, 7  ;;  %v5900_v50 = vpack.c.bf16 %v3635_v54, %v3634_v62  ;;  %v3661_v32 = vshrl.u32 %v5872_v16, 16  ;;  %v3664_v18 = vshll.u32 %v5872_v16, 16  ;;  %v6943_v62 = vld [vmem:[%s8781_s2 + $0x60] sm:$0xff]   ;;  %v6944_v29 = vld [vmem:[%s8781_s2 + $0x68] sm:$0xff]   ;;  %v6945_v54 = vld [vmem:[%s8781_s2 + $0x70] sm:$0xff]  }
 0x6fc   : > { %6482 = vmatpush3.bf16.msra.mxu1 %v6940_v17  ;;  %v6946_v16 = vld [vmem:[%s8781_s2 + $0x78] sm:$0xff]  }
 0x6fd   : > { %v3658_v59 = vor.u32 %v3656_v49, %v3655_v34  ;;  %5902 = vst [vmem:[%s7853_s25 + $0x20] sm:$0xff] %v5900_v50   ;;  %v3663_v52 = vrot.slane %v3661_v32, 7  ;;  %v3659_v1 = vrot.slane %v3655_v34, 4  ;;  %6483 = vmatprep.subr.bf16.mxu1 %v7207_v31  ;;  %v4030_v32 = vld [vmem:[#allocation2 + $0xb8] sm:$0xfc] }
 0x6ff   : > { %v3673_v38 = vsel %vm7856_vm10, %v3658_v59, %v3672_v11  ;;  %v3666_v55 = vor.u32 %v3664_v18, %v3663_v52  ;;  %v3668_v5 = vrot.slane %v3663_v52, 4 }
 0x700   : > { %3674 = vst [vmem:[#allocation3] sm:$0xf] %v3673_v38  ;;  %6484 = vmatpush3.bf16.msra.mxu1 %v6941_v3 }
 0x701   : > { %v3667_v45 = vsel %vm7861_vm11, %v3659_v1, %v3666_v55  ;;  %v3677_v44 = vsel %vm7866_vm12, %v3668_v5, %v3676_v41  ;;  %6485 = vmatprep.subr.bf16.mxu1 %v7207_v31  ;;  %v4034_v1 = vld [vmem:[#allocation2 + $0xd8] sm:$0x3]  ;;  %v4032_v55 = vld [vmem:[#allocation2 + $0xc8] sm:$0xff]  ;;  %vm8809_vm11 = vcmask 1043456  }
 0x702   : > { %3675 = vst [vmem:[#allocation3 + $0x4] sm:$0xf] %v3667_v45  ;;  %3678 = vst [vmem:[#allocation3 + $0x8] sm:$0x1] %v3677_v44 }
 0x704   : > { %6486 = vmatpush3.bf16.msra.mxu1 %v6942_v30 }
 0x705   : > { %6487 = vmatprep.subr.bf16.mxu1 %v7207_v31 }
 0x707   : > { %v3679_v42 = vld [vmem:[#allocation3] sm:$0xf] }
 0x708   : > { %v3914_v56 = vld [vmem:[#allocation3] sm:$0xe]  ;;  %6488 = vmatpush3.bf16.msra.mxu1 %v6943_v62 }
 0x709   : > { %v3680_v58 = vld [vmem:[#allocation3 + $0x4] sm:$0xf]  ;;  %v8393_v4 = vld [vmem:[#allocation3 + $0x8] ss:$0 sps:$4 sm:$0x11]   ;;  %6489 = vmatprep.subr.bf16.mxu1 %v7207_v31 }
 0x70a   : > { %v5649_v21 = vcombine.low %v3679_v42, %v3680_v58  ;;  %v3730_v6 = vshll.u32 %v8393_v4, 16  ;;  %v5683_v48 = vcombine.low %v3914_v56, %v3680_v58  ;;  %v3935_v13 = vrot.slane %v8393_v4, 1  ;;  %v4029_v58 = vld [vmem:[#allocation2 + $0xb0] sm:$0xfc] }
 0x70c   : > { %v3725_v39 = vshll.u32 %v5649_v21, 16  ;;  %v3723_v14 = vshrl.u32 %v5649_v21, 16  ;;  %v3732_v19 = vrot.slane %v3730_v6, 1  ;;  %v3934_v33 = vrot.slane %v5683_v48, 1  ;;  %6490 = vmatpush3.bf16.msra.mxu1 %v6944_v29  ;;  %v4033_v6 = vld [vmem:[#allocation2 + $0xd0] sm:$0x3] }
 0x70d   : > { %6491 = vmatprep.subr.bf16.mxu1 %v7207_v31 }
 0x70e   : > { %v3727_v20 = vrot.slane %v3725_v39, 1  ;;  %v3936_v61 = vsel %vm834_vm3, %v3934_v33, %v3935_v13 }
 0x710   : > { %v3728_v37 = vor.u32 %v3727_v20, %v3723_v14  ;;  %6492 = vmatpush3.bf16.msra.mxu1 %v6945_v54  ;;  %v4136_v54 = vld [vmem:[#allocation3 + $0x8] sm:$0x1] }
 0x711   : > { %6493 = vmatprep.subr.bf16.mxu1 %v7207_v31 }
 0x712   : > { %v3733_v26 = vsel %vm1480_vm1, %v3728_v37, %v3732_v19 }
 0x713   : > { %6436 = vmatmul.mubr.bf16.vlgmr.msra.gmra.mrb[64].mxu0 %v3733_v26 }
 0x714   : > { %6440 = vmatpush3.bf16.msra.mxu0 %v6922_v36  ;;  %6455 = vmatprep.mubr.msk.bf16.mxu0 %vm7208_vm2, %v7207_v31 }
 0x715   : > { %6441 = vmatprep.subr.bf16.mxu0 %v7207_v31  ;;  %6494 = vmatpush3.bf16.msra.mxu1 %v6946_v16 }
 0x716   : > { %6499 = vmatprep.subr.bf16.mxu1 %v7207_v31 }
 0x718   : > { %6442 = vmatpush3.bf16.msra.mxu0 %v6923_v9 }
 0x719   : > { %6443 = vmatprep.subr.bf16.mxu0 %v7207_v31 }
 0x71c   : > { %6444 = vmatpush3.bf16.msra.mxu0 %v6924_v40 }
 0x71d   : > { %6445 = vmatprep.subr.bf16.mxu0 %v7207_v31 }
 0x720   : > { %6446 = vmatpush3.bf16.msra.mxu0 %v6925_v15 }
 0x721   : > { %6447 = vmatprep.subr.bf16.mxu0 %v7207_v31 }
 0x724   : > { %6448 = vmatpush3.bf16.msra.mxu0 %v6926_v43 }
 0x725   : > { %6449 = vmatprep.subr.bf16.mxu0 %v7207_v31 }
 0x728   : > { %6450 = vmatpush3.bf16.msra.mxu0 %v6927_v27 }
 0x729   : > { %6451 = vmatprep.subr.bf16.mxu0 %v7207_v31 }
 0x72c   : > { %6452 = vmatpush3.bf16.msra.mxu0 %v6928_v47 }
 0x72d   : > { %6453 = vmatprep.subr.bf16.mxu0 %v7207_v31 }
 0x730   : > { %6454 = vmatpush3.bf16.msra.mxu0 %v6929_v0 }
 0x731   : > { %6459 = vmatprep.subr.bf16.mxu0 %v7207_v31 }
 0x733   : > { %6456 = vmatmul.mubr.bf16.vlgmr.msra.gmra.mrb[64].mxu0 %v5649_v21  ;;  %v4031_v21 = vld [vmem:[#allocation2 + $0xc0] sm:$0xff] }
 0x734   : > { %6460 = vmatpush3.bf16.msra.mxu0 %v6930_v28  ;;  %6475 = vmatprep.mubr.msk.bf16.mxu0 %vm7208_vm2, %v7207_v31 }
 0x735   : > { %6461 = vmatprep.subr.bf16.mxu0 %v7207_v31 }
 0x738   : > { %6462 = vmatpush3.bf16.msra.mxu0 %v6931_v35 }
 0x739   : > { %6463 = vmatprep.subr.bf16.mxu0 %v7207_v31 }
 0x73c   : > { %6464 = vmatpush3.bf16.msra.mxu0 %v6932_v53 }
 0x73d   : > { %6465 = vmatprep.subr.bf16.mxu0 %v7207_v31 }
 0x740   : > { %6466 = vmatpush3.bf16.msra.mxu0 %v6933_v46 }
 0x741   : > { %6467 = vmatprep.subr.bf16.mxu0 %v7207_v31 }
 0x744   : > { %6468 = vmatpush3.bf16.msra.mxu0 %v6934_v12 }
 0x745   : > { %6469 = vmatprep.subr.bf16.mxu0 %v7207_v31 }
 0x748   : > { %6470 = vmatpush3.bf16.msra.mxu0 %v6935_v23 }
 0x749   : > { %6471 = vmatprep.subr.bf16.mxu0 %v7207_v31 }
 0x74c   : > { %6472 = vmatpush3.bf16.msra.mxu0 %v6936_v60 }
 0x74d   : > { %6473 = vmatprep.subr.bf16.mxu0 %v7207_v31 }
 0x750   : > { %6474 = vmatpush3.bf16.msra.mxu0 %v6937_v63 }
 0x751   : > { %6539 = vmatprep.subr.bf16.mxu0 %v7207_v31 }
 0x753   : > { %6476 = vmatmul.mubr.bf16.vlgmr.msra.gmra.mrb[64].mxu0 %v3936_v61 }
 0x754   : > { %6555 = vmatprep.mubr.msk.bf16.mxu0 %vm7208_vm2, %v7207_v31 }
 0x826   : > { %v4020_v34 = vpop.f32.mrb[64].mxu0 }
 0x827   : > { %v4040_v49 = vrot.slane %v4020_v34, 6  ;;  %v6477_v50 = vpop.f32.mrb[65].mxu0 }
 0x828   : > { %v4023_v59 = vpop.f32.mrb[66].mxu0 }
 0x829   : > { %v4046_v52 = vadd.f32 %v4040_v49, %v4030_v32  ;;  %v4041_v18 = vrot.slane %v4023_v59, 6  ;;  %v6478_v11 = vpop.f32.mrb[67].mxu0 }
 0x82b   : > { %v5692_v38 = vmul.f32 -1.442695, %v4046_v52  ;;  %v4042_v5 = vsel %vm8808_vm9, %v4040_v49, %v4041_v18  ;;  %v4048_v41 = vadd.f32 %v4041_v18, %v4034_v1  ;;  %v4132_v18 = vld [vmem:[#allocation3] sm:$0xf] }
 0x82c   : > { %v4047_v45 = vadd.f32 %v4042_v5, %v4032_v55 }
 0x82d   : > { %7071 = vpow2.f32 %v5692_v38  ;;  %v5694_v44 = vmul.f32 -1.442695, %v4048_v41 }
 0x82e   : > { %v5693_v42 = vmul.f32 -1.442695, %v4047_v45 }
 0x82f   : > { %7073 = vpow2.f32 %v5694_v44 }
 0x830   : > { %7075 = vpow2.f32 %v5693_v42 }
 0x831   : > { %7077 = vtanh.f32 %v4029_v58 }
 0x832   : > { %7079 = vtanh.f32 %v4031_v21 }
 0x837   : > { %v7072_v4 = vpop.eup %7071 }
 0x838   : > { %v4058_v39 = vadd.f32 1.0, %v7072_v4 }
 0x839   : > { %v7074_v14 = vpop.eup %7073 }
 0x83a   : > { %v7076_v20 = vpop.eup %7075  ;;  %7081 = vrcp.f32 %v4058_v39  ;;  %v4060_v37 = vadd.f32 1.0, %v7074_v14  ;;  %v6949_v14 = vld [vmem:[%s8781_s2] sm:$0xff]  }
 0x83b   : > { %7083 = vtanh.f32 %v4033_v6  ;;  %v4059_v19 = vadd.f32 1.0, %v7076_v20  ;;  %v7078_v36 = vpop.eup %7077  ;;  %v6950_v20 = vld [vmem:[%s8781_s2 + $0x8] sm:$0xff]  }
 0x83c   : > { %7085 = vrcp.f32 %v4060_v37  ;;  %v7080_v26 = vpop.eup %7079  ;;  %v6951_v37 = vld [vmem:[%s8781_s2 + $0x10] sm:$0xff]  }
 0x83d   : > { %7087 = vrcp.f32 %v4059_v19  ;;  %v6952_v19 = vld [vmem:[%s8781_s2 + $0x18] sm:$0xff]  }
 0x844   : > { %v7082_v9 = vpop.eup %7081 }
 0x845   : > { %v7084_v40 = vpop.eup %7083  ;;  %v4067_v15 = vmul.f32 %v7082_v9, %v7078_v36  ;;  %v5876_v43 = vpack.c.bf16 %v7082_v9, %v7082_v9  ;;  %v6953_v36 = vld [vmem:[%s8781_s2 + $0x20] sm:$0xff]   ;;  %v6955_v9 = vld [vmem:[%s8781_s2 + $0x30] sm:$0xff]  }
 0x846   : > { %v7086_v27 = vpop.eup %7085 }
 0x847   : > { %v7088_v47 = vpop.eup %7087  ;;  %v5873_v0 = vpack.c.bf16 %v4067_v15, %v4067_v15  ;;  %v4102_v28 = vshrl.u32 %v5876_v43, 16  ;;  %v4105_v35 = vshll.u32 %v5876_v43, 16  ;;  %v4069_v53 = vmul.f32 %v7086_v27, %v7084_v40  ;;  %v6956_v40 = vld [vmem:[%s8781_s2 + $0x38] sm:$0xff]   ;;  %v6957_v15 = vld [vmem:[%s8781_s2 + $0x80] sm:$0xff]   ;;  %v6958_v43 = vld [vmem:[%s8781_s2 + $0x88] sm:$0xff]  }
 0x848   : > { %v4068_v46 = vmul.f32 %v7088_v47, %v7080_v26  ;;  %v5877_v12 = vpack.c.bf16 %v7088_v47, %v7088_v47  ;;  %v5878_v23 = vpack.c.bf16 %v7086_v27, %v7086_v27  ;;  %v6954_v26 = vld [vmem:[%s8781_s2 + $0x28] sm:$0xff]   ;;  %v6959_v27 = vld [vmem:[%s8781_s2 + $0x90] sm:$0xff]   ;;  %v6960_v47 = vld [vmem:[%s8781_s2 + $0x98] sm:$0xff]  }
 0x849   : > { %v4104_v60 = vrot.slane %v4102_v28, 4  ;;  %v4107_v56 = vrot.slane %v4105_v35, 5  ;;  %v5875_v63 = vpack.c.bf16 %v4069_v53, %v4069_v53  ;;  %v5698_v61 = vrot.slane %v5873_v0, 9  ;;  %v6961_v0 = vld [vmem:[%s8781_s2 + $0xa0] sm:$0xff]   ;;  %v6962_v28 = vld [vmem:[%s8781_s2 + $0xa8] sm:$0xff]   ;;  %v6963_v35 = vld [vmem:[%s8781_s2 + $0xb0] sm:$0xff]  }
 0x84a   : > { %v5874_v48 = vpack.c.bf16 %v4068_v46, %v4068_v46  ;;  %v4111_v33 = vshll.u32 %v5877_v12, 16  ;;  %v4115_v13 = vshrl.u32 %v5877_v12, 16  ;;  %v4125_v17 = vshrl.u32 %v5878_v23, 16  ;;  %v6964_v12 = vld [vmem:[%s8781_s2 + $0xb8] sm:$0xff]  }
 0x84b   : > { %v4108_v51 = vor.u32 %v4107_v56, %v4104_v60  ;;  %v4121_v29 = vshll.u32 %v5878_v23, 16  ;;  %v4085_v32 = vrot.slane %v5875_v63, 5  ;;  %v6967_v63 = vld [vmem:[%s8781_s2 + $0x48] sm:$0xff]  }
 0x84c   : > { %v4082_v3 = vrot.slane %v5874_v48, 5  ;;  %v4113_v30 = vrot.slane %v4111_v33, 5  ;;  %v4117_v62 = vrot.slane %v4115_v13, 4  ;;  %v4137_v34 = vsel %vm7866_vm12, %v4125_v17, %v4136_v54  ;;  %v6966_v48 = vld [vmem:[%s8781_s2 + $0x40] sm:$0xff]   ;;  %v6968_v33 = vld [vmem:[%s8781_s2 + $0x50] sm:$0xff]   ;;  %v6969_v13 = vld [vmem:[%s8781_s2 + $0x58] sm:$0xff]  }
 0x84d   : > { %v4109_v16 = vrot.slane %v4108_v51, 4  ;;  %4138 = vst [vmem:[#allocation3 + $0x8] sm:$0x1] %v4137_v34  ;;  %v4123_v38 = vrot.slane %v4121_v29, 5  ;;  %6540 = vmatpush3.bf16.msra.mxu0 %v6966_v48  ;;  %v6971_v51 = vld [vmem:[%s8781_s2 + $0x68] sm:$0xff]   ;;  %v6972_v17 = vld [vmem:[%s8781_s2 + $0x70] sm:$0xff]  }
 0x84e   : > { %v4083_v49 = vsel %vm7986_vm7, %v5698_v61, %v4082_v3  ;;  %v4084_v50 = vrot.slane %v4082_v3, 4  ;;  %v4118_v59 = vor.u32 %v4117_v62, %v4113_v30  ;;  %6541 = vmatprep.subr.bf16.mxu0 %v7207_v31  ;;  %v6970_v61 = vld [vmem:[%s8781_s2 + $0x60] sm:$0xff]   ;;  %v6973_v3 = vld [vmem:[%s8781_s2 + $0x78] sm:$0xff]  }
 0x84f   : > { %4089 = vst [vmem:[%s7853_s25 + $0x28] sm:$0xf] %v4083_v49  ;;  %v4114_v52 = vsel %vm7990_vm8, %v4109_v16, %v4113_v30  ;;  %v4490_v54 = vld [vmem:[#allocation2 + $0xd8] sm:$0xf0] }
 0x850   : > { %v4086_v11 = vsel %vm7986_vm7, %v4084_v50, %v4085_v32  ;;  %v4119_v1 = vrot.slane %v4118_v59, 4  ;;  %v4133_v55 = vsel %vm7856_vm10, %v4114_v52, %v4132_v18  ;;  %v4494_v32 = vld [vmem:[#allocation2 + $0xf8] sm:$0xf]  ;;  %v4492_v52 = vld [vmem:[#allocation2 + $0xe8] sm:$0xff] }
 0x851   : > { %4090 = vst [vmem:[%s7853_s25 + $0x2c] sm:$0xf] %v4086_v11  ;;  %4134 = vst [vmem:[#allocation3] sm:$0xf] %v4133_v55  ;;  %6542 = vmatpush3.bf16.msra.mxu0 %v6967_v63 }
 0x852   : > { %v4124_v5 = vsel %vm7990_vm8, %v4119_v1, %v4123_v38  ;;  %6543 = vmatprep.subr.bf16.mxu0 %v7207_v31 }
 0x853   : > { %4135 = vst [vmem:[#allocation3 + $0x4] sm:$0xf] %v4124_v5  ;;  %v4489_v5 = vld [vmem:[#allocation2 + $0xd0] sm:$0xf0] }
 0x854   : > { %v8516_v41 = vld [vmem:[#allocation3 + $0x8] ss:$0 sps:$4 sm:$0x11]  }
 0x855   : > { %v4190_v24 = vshll.u32 %v8516_v41, 16  ;;  %v4395_v60 = vrot.slane %v8516_v41, 1  ;;  %6544 = vmatpush3.bf16.msra.mxu0 %v6968_v33  ;;  %v4491_v41 = vld [vmem:[#allocation2 + $0xe0] sm:$0xff] }
 0x856   : > { %6545 = vmatprep.subr.bf16.mxu0 %v7207_v31 }
 0x857   : > { %v4192_v6 = vrot.slane %v4190_v24, 1 }
 0x858   : > { %v4139_v45 = vld [vmem:[#allocation3] sm:$0xf] }
 0x859   : > { %v4374_v53 = vld [vmem:[#allocation3] sm:$0xe]  ;;  %6546 = vmatpush3.bf16.msra.mxu0 %v6969_v13 }
 0x85a   : > { %v4140_v44 = vld [vmem:[#allocation3 + $0x4] sm:$0xf]  ;;  %6547 = vmatprep.subr.bf16.mxu0 %v7207_v31 }
 0x85b   : > { %v5719_v42 = vcombine.low %v4139_v45, %v4140_v44  ;;  %v5753_v46 = vcombine.low %v4374_v53, %v4140_v44 }
 0x85d   : > { %v4185_v58 = vshll.u32 %v5719_v42, 16  ;;  %v4183_v21 = vshrl.u32 %v5719_v42, 16  ;;  %v4394_v23 = vrot.slane %v5753_v46, 1  ;;  %6548 = vmatpush3.bf16.msra.mxu0 %v6970_v61 }
 0x85e   : > { %6549 = vmatprep.subr.bf16.mxu0 %v7207_v31 }
 0x85f   : > { %v4187_v4 = vrot.slane %v4185_v58, 1  ;;  %v4396_v56 = vsel %vm834_vm3, %v4394_v23, %v4395_v60 }
 0x861   : > { %v4188_v39 = vor.u32 %v4187_v4, %v4183_v21  ;;  %6550 = vmatpush3.bf16.msra.mxu0 %v6971_v51 }
 0x862   : > { %6551 = vmatprep.subr.bf16.mxu0 %v7207_v31 }
 0x863   : > { %v4193_v22 = vsel %vm1480_vm1, %v4188_v39, %v4192_v6 }
 0x864   : > { %6496 = vmatmul.mubr.bf16.vlgmr.msra.gmra.mrb[64].mxu1 %v4193_v22 }
 0x865   : > { %6500 = vmatpush3.bf16.msra.mxu1 %v6949_v14  ;;  %6515 = vmatprep.mubr.msk.bf16.mxu1 %vm7208_vm2, %v7207_v31 }
 0x866   : > { %6501 = vmatprep.subr.bf16.mxu1 %v7207_v31  ;;  %6552 = vmatpush3.bf16.msra.mxu0 %v6972_v17 }
 0x867   : > { %6553 = vmatprep.subr.bf16.mxu0 %v7207_v31 }
 0x869   : > { %6502 = vmatpush3.bf16.msra.mxu1 %v6950_v20 }
 0x86a   : > { %6503 = vmatprep.subr.bf16.mxu1 %v7207_v31  ;;  %6554 = vmatpush3.bf16.msra.mxu0 %v6973_v3 }
 0x86b   : > { %6559 = vmatprep.subr.bf16.mxu0 %v7207_v31 }
 0x86d   : > { %6504 = vmatpush3.bf16.msra.mxu1 %v6951_v37 }
 0x86e   : > { %6505 = vmatprep.subr.bf16.mxu1 %v7207_v31 }
 0x871   : > { %6506 = vmatpush3.bf16.msra.mxu1 %v6952_v19 }
 0x872   : > { %6507 = vmatprep.subr.bf16.mxu1 %v7207_v31 }
 0x875   : > { %6508 = vmatpush3.bf16.msra.mxu1 %v6953_v36 }
 0x876   : > { %6509 = vmatprep.subr.bf16.mxu1 %v7207_v31 }
 0x879   : > { %6510 = vmatpush3.bf16.msra.mxu1 %v6954_v26 }
 0x87a   : > { %6511 = vmatprep.subr.bf16.mxu1 %v7207_v31 }
 0x87d   : > { %6512 = vmatpush3.bf16.msra.mxu1 %v6955_v9 }
 0x87e   : > { %6513 = vmatprep.subr.bf16.mxu1 %v7207_v31 }
 0x881   : > { %6514 = vmatpush3.bf16.msra.mxu1 %v6956_v40 }
 0x882   : > { %6519 = vmatprep.subr.bf16.mxu1 %v7207_v31 }
 0x884   : > { %6516 = vmatmul.mubr.bf16.vlgmr.msra.gmra.mrb[64].mxu1 %v5719_v42  ;;  %v4493_v42 = vld [vmem:[#allocation2 + $0xf0] sm:$0xf] }
 0x885   : > { %6520 = vmatpush3.bf16.msra.mxu1 %v6957_v15  ;;  %6535 = vmatprep.mubr.msk.bf16.mxu1 %vm7208_vm2, %v7207_v31 }
 0x886   : > { %6521 = vmatprep.subr.bf16.mxu1 %v7207_v31 }
 0x889   : > { %6522 = vmatpush3.bf16.msra.mxu1 %v6958_v43 }
 0x88a   : > { %6523 = vmatprep.subr.bf16.mxu1 %v7207_v31 }
 0x88d   : > { %6524 = vmatpush3.bf16.msra.mxu1 %v6959_v27 }
 0x88e   : > { %6525 = vmatprep.subr.bf16.mxu1 %v7207_v31 }
 0x891   : > { %6526 = vmatpush3.bf16.msra.mxu1 %v6960_v47 }
 0x892   : > { %6527 = vmatprep.subr.bf16.mxu1 %v7207_v31 }
 0x895   : > { %6528 = vmatpush3.bf16.msra.mxu1 %v6961_v0 }
 0x896   : > { %6529 = vmatprep.subr.bf16.mxu1 %v7207_v31 }
 0x899   : > { %6530 = vmatpush3.bf16.msra.mxu1 %v6962_v28 }
 0x89a   : > { %6531 = vmatprep.subr.bf16.mxu1 %v7207_v31 }
 0x89d   : > { %6532 = vmatpush3.bf16.msra.mxu1 %v6963_v35 }
 0x89e   : > { %6533 = vmatprep.subr.bf16.mxu1 %v7207_v31 }
 0x8a1   : > { %6534 = vmatpush3.bf16.msra.mxu1 %v6964_v12 }
 0x8a4   : > { %6536 = vmatmul.mubr.bf16.vlgmr.msra.gmra.mrb[64].mxu1 %v4396_v56 }
 0x977   : > { %v4480_v30 = vpop.f32.mrb[64].mxu1 }
 0x978   : > { %v4500_v62 = vrot.slane %v4480_v30, 4  ;;  %v6537_v29 = vpop.f32.mrb[65].mxu1 }
 0x979   : > { %v4483_v16 = vpop.f32.mrb[66].mxu1 }
 0x97a   : > { %v4506_v34 = vadd.f32 %v4500_v62, %v4490_v54  ;;  %v4501_v49 = vrot.slane %v4483_v16, 4  ;;  %v6538_v50 = vpop.f32.mrb[67].mxu1 }
 0x97c   : > { %v5762_v59 = vmul.f32 -1.442695, %v4506_v34  ;;  %v4502_v18 = vsel %vm8809_vm11, %v4500_v62, %v4501_v49  ;;  %v4508_v11 = vadd.f32 %v4501_v49, %v4494_v32  ;;  %v4597_v34 = vld [vmem:[#allocation3 + $0x8] sm:$0x1] }
 0x97d   : > { %v4507_v1 = vadd.f32 %v4502_v18, %v4492_v52 }
 0x97e   : > { %7089 = vpow2.f32 %v5762_v59  ;;  %v5764_v38 = vmul.f32 -1.442695, %v4508_v11  ;;  %v4593_v59 = vld [vmem:[#allocation3] sm:$0xf] }
 0x97f   : > { %v5763_v55 = vmul.f32 -1.442695, %v4507_v1 }
 0x980   : > { %7091 = vpow2.f32 %v5764_v38 }
 0x981   : > { %7093 = vpow2.f32 %v5763_v55 }
 0x982   : > { %7095 = vtanh.f32 %v4489_v5 }
 0x983   : > { %7097 = vtanh.f32 %v4491_v41 }
 0x988   : > { %v7090_v45 = vpop.eup %7089 }
 0x989   : > { %v4518_v44 = vadd.f32 1.0, %v7090_v45 }
 0x98a   : > { %v7092_v58 = vpop.eup %7091 }
 0x98b   : > { %v7094_v24 = vpop.eup %7093  ;;  %7099 = vrcp.f32 %v4518_v44  ;;  %v4520_v21 = vadd.f32 1.0, %v7092_v58 }
 0x98c   : > { %7101 = vtanh.f32 %v4493_v42  ;;  %v4519_v4 = vadd.f32 1.0, %v7094_v24  ;;  %v7096_v39 = vpop.eup %7095  ;;  %v6976_v24 = vld [vmem:[%s8781_s2] sm:$0xff]  }
 0x98d   : > { %7103 = vrcp.f32 %v4520_v21  ;;  %v7098_v6 = vpop.eup %7097  ;;  %v6977_v21 = vld [vmem:[%s8781_s2 + $0x8] sm:$0xff]  }
 0x98e   : > { %7105 = vrcp.f32 %v4519_v4  ;;  %v6978_v4 = vld [vmem:[%s8781_s2 + $0x10] sm:$0xff]  }
 0x995   : > { %v7100_v14 = vpop.eup %7099 }
 0x996   : > { %v7102_v22 = vpop.eup %7101  ;;  %v4527_v20 = vmul.f32 %v7100_v14, %v7096_v39  ;;  %v5882_v37 = vpack.c.bf16 %v7100_v14, %v7100_v14  ;;  %v6979_v39 = vld [vmem:[%s8781_s2 + $0x18] sm:$0xff]   ;;  %v6981_v14 = vld [vmem:[%s8781_s2 + $0x28] sm:$0xff]  }
 0x997   : > { %v7104_v19 = vpop.eup %7103 }
 0x998   : > { %v7106_v36 = vpop.eup %7105  ;;  %v5879_v26 = vpack.c.bf16 %v4527_v20, %v4527_v20  ;;  %v4562_v9 = vshrl.u32 %v5882_v37, 16  ;;  %v4565_v40 = vshll.u32 %v5882_v37, 16  ;;  %v4529_v15 = vmul.f32 %v7104_v19, %v7102_v22  ;;  %v6982_v22 = vld [vmem:[%s8781_s2 + $0x30] sm:$0xff]   ;;  %v6983_v20 = vld [vmem:[%s8781_s2 + $0x38] sm:$0xff]   ;;  %v6984_v37 = vld [vmem:[%s8781_s2 + $0x80] sm:$0xff]  }
 0x999   : > { %v4528_v43 = vmul.f32 %v7106_v36, %v7098_v6  ;;  %v5883_v27 = vpack.c.bf16 %v7106_v36, %v7106_v36  ;;  %v5884_v47 = vpack.c.bf16 %v7104_v19, %v7104_v19  ;;  %v6980_v6 = vld [vmem:[%s8781_s2 + $0x20] sm:$0xff]   ;;  %v6985_v19 = vld [vmem:[%s8781_s2 + $0x88] sm:$0xff]   ;;  %v6986_v36 = vld [vmem:[%s8781_s2 + $0x90] sm:$0xff]  }
 0x99a   : > { %v4564_v0 = vrot.slane %v4562_v9, 5  ;;  %v4567_v28 = vrot.slane %v4565_v40, 6  ;;  %v5881_v35 = vpack.c.bf16 %v4529_v15, %v4529_v15  ;;  %v5768_v60 = vrot.slane %v5879_v26, 10  ;;  %v6987_v26 = vld [vmem:[%s8781_s2 + $0x98] sm:$0xff]   ;;  %v6988_v9 = vld [vmem:[%s8781_s2 + $0xa0] sm:$0xff]   ;;  %v6989_v40 = vld [vmem:[%s8781_s2 + $0xa8] sm:$0xff]  }
 0x99b   : > { %v5880_v53 = vpack.c.bf16 %v4528_v43, %v4528_v43  ;;  %v4571_v46 = vshrl.u32 %v5883_v27, 16  ;;  %v4574_v12 = vshll.u32 %v5883_v27, 16  ;;  %v4581_v23 = vshrl.u32 %v5884_v47, 16  ;;  %v6990_v43 = vld [vmem:[%s8781_s2 + $0xb0] sm:$0xff]  }
 0x99c   : > { %v4568_v56 = vor.u32 %v4567_v28, %v4564_v0  ;;  %v4584_v48 = vshll.u32 %v5884_v47, 16  ;;  %v4545_v17 = vrot.slane %v5881_v35, 6  ;;  %v6991_v47 = vld [vmem:[%s8781_s2 + $0xb8] sm:$0xff]  }
 0x99d   : > { %v4542_v63 = vrot.slane %v5880_v53, 6  ;;  %v4573_v33 = vrot.slane %v4571_v46, 5  ;;  %v4576_v13 = vrot.slane %v4574_v12, 6  ;;  %v4583_v61 = vrot.slane %v4581_v23, 5  ;;  %v4951_v23 = vld [vmem:[#allocation2 + $0xf8] sm:$0xc0] }
 0x99e   : > { %v4569_v51 = vrot.slane %v4568_v56, 4  ;;  %v4586_v3 = vrot.slane %v4584_v48, 6 }
 0x99f   : > { %v4543_v30 = vsel %vm8119_vm6, %v5768_v60, %v4542_v63  ;;  %v4544_v62 = vrot.slane %v4542_v63, 4  ;;  %v4577_v29 = vor.u32 %v4576_v13, %v4573_v33  ;;  %v4589_v54 = vrot.slane %v4583_v61, 4  ;;  %v4955_v33 = vld [vmem:[#allocation2 + $0x118] sm:$0x3f] }
 0x9a0   : > { %4549 = vst [vmem:[%s7853_s25 + $0x30] sm:$0xf] %v4543_v30  ;;  %v4587_v16 = vor.u32 %v4586_v3, %v4583_v61  ;;  %v4953_v61 = vld [vmem:[#allocation2 + $0x108] sm:$0xff] }
 0x9a1   : > { %v4546_v49 = vsel %vm8119_vm6, %v4544_v62, %v4545_v17  ;;  %v4578_v50 = vsel %vm8125_vm5, %v4569_v51, %v4577_v29  ;;  %v4579_v32 = vrot.slane %v4577_v29, 4  ;;  %v4598_v52 = vsel %vm7866_vm12, %v4589_v54, %v4597_v34  ;;  %v4950_v62 = vld [vmem:[#allocation2 + $0xf0] sm:$0xc0]  ;;  %v4954_v54 = vld [vmem:[#allocation2 + $0x110] sm:$0x3f] }
 0x9a2   : > { %4550 = vst [vmem:[%s7853_s25 + $0x34] sm:$0xf] %v4546_v49  ;;  %v4594_v18 = vsel %vm7856_vm10, %v4578_v50, %v4593_v59  ;;  %4599 = vst [vmem:[#allocation3 + $0x8] sm:$0x1] %v4598_v52 }
 0x9a3   : > { %v4588_v11 = vsel %vm8125_vm5, %v4579_v32, %v4587_v16  ;;  %4595 = vst [vmem:[#allocation3] sm:$0xf] %v4594_v18  ;;  %v7125_v16 = vld [vmem:[#allocation2 + $0x100] sm:$0xff] }
 0x9a4   : > { %4596 = vst [vmem:[#allocation3 + $0x4] sm:$0xf] %v4588_v11 }
 0x9a9   : > { %v8636_v1 = vld [vmem:[#allocation3 + $0x8] ss:$0 sps:$4 sm:$0x11]  }
 0x9aa   : > { %v4600_v8 = vld [vmem:[#allocation3] sm:$0xf]  ;;  %v4651_v41 = vshll.u32 %v8636_v1, 16  ;;  %v4856_v28 = vrot.slane %v8636_v1, 1 }
 0x9ab   : > { %v4601_v38 = vld [vmem:[#allocation3 + $0x4] sm:$0xf]  ;;  %v4835_v15 = vld [vmem:[#allocation3] sm:$0xe] }
 0x9ac   : > { %v5788_v55 = vcombine.low %v4600_v8, %v4601_v38  ;;  %v4653_v58 = vrot.slane %v4651_v41, 1  ;;  %v5822_v27 = vcombine.low %v4835_v15, %v4601_v38 }
 0x9ae   : > { %v4646_v5 = vshll.u32 %v5788_v55, 16  ;;  %v4644_v45 = vshrl.u32 %v5788_v55, 16  ;;  %v4855_v0 = vrot.slane %v5822_v27, 1 }
 0x9b0   : > { %v4648_v44 = vrot.slane %v4646_v5, 1  ;;  %v4857_v35 = vsel %vm834_vm3, %v4855_v0, %v4856_v28 }
 0x9b2   : > { %v4649_v42 = vor.u32 %v4648_v44, %v4644_v45 }
 0x9b4   : > { %v4654_v25 = vsel %vm1480_vm1, %v4649_v42, %v4653_v58  ;;  %vm8810_vm1 = vcmask 1045504  }
 0x9b5   : > { %6556 = vmatmul.mubr.bf16.vlgmr.msra.gmra.mrb[68].mxu0 %v4654_v25 }
 0x9b6   : > { %6560 = vmatpush3.bf16.msra.mxu0 %v6976_v24  ;;  %6575 = vmatprep.mubr.msk.bf16.mxu0 %vm7208_vm2, %v7207_v31 }
 0x9b7   : > { %6561 = vmatprep.subr.bf16.mxu0 %v7207_v31 }
 0x9ba   : > { %6562 = vmatpush3.bf16.msra.mxu0 %v6977_v21 }
 0x9bb   : > { %6563 = vmatprep.subr.bf16.mxu0 %v7207_v31 }
 0x9be   : > { %6564 = vmatpush3.bf16.msra.mxu0 %v6978_v4 }
 0x9bf   : > { %6565 = vmatprep.subr.bf16.mxu0 %v7207_v31 }
 0x9c2   : > { %6566 = vmatpush3.bf16.msra.mxu0 %v6979_v39 }
 0x9c3   : > { %6567 = vmatprep.subr.bf16.mxu0 %v7207_v31 }
 0x9c6   : > { %6568 = vmatpush3.bf16.msra.mxu0 %v6980_v6 }
 0x9c7   : > { %6569 = vmatprep.subr.bf16.mxu0 %v7207_v31 }
 0x9ca   : > { %6570 = vmatpush3.bf16.msra.mxu0 %v6981_v14 }
 0x9cb   : > { %6571 = vmatprep.subr.bf16.mxu0 %v7207_v31 }
 0x9ce   : > { %6572 = vmatpush3.bf16.msra.mxu0 %v6982_v22 }
 0x9cf   : > { %6573 = vmatprep.subr.bf16.mxu0 %v7207_v31 }
 0x9d2   : > { %6574 = vmatpush3.bf16.msra.mxu0 %v6983_v20 }
 0x9d3   : > { %6579 = vmatprep.subr.bf16.mxu0 %v7207_v31 }
 0x9d5   : > { %6576 = vmatmul.mubr.bf16.vlgmr.msra.gmra.mrb[68].mxu0 %v5788_v55 }
 0x9d6   : > { %6580 = vmatpush3.bf16.msra.mxu0 %v6984_v37  ;;  %6595 = vmatprep.mubr.msk.bf16.mxu0 %vm7208_vm2, %v7207_v31 }
 0x9d7   : > { %6581 = vmatprep.subr.bf16.mxu0 %v7207_v31 }
 0x9da   : > { %6582 = vmatpush3.bf16.msra.mxu0 %v6985_v19 }
 0x9db   : > { %6583 = vmatprep.subr.bf16.mxu0 %v7207_v31 }
 0x9de   : > { %6584 = vmatpush3.bf16.msra.mxu0 %v6986_v36 }
 0x9df   : > { %6585 = vmatprep.subr.bf16.mxu0 %v7207_v31 }
 0x9e2   : > { %6586 = vmatpush3.bf16.msra.mxu0 %v6987_v26 }
 0x9e3   : > { %6587 = vmatprep.subr.bf16.mxu0 %v7207_v31 }
 0x9e6   : > { %6588 = vmatpush3.bf16.msra.mxu0 %v6988_v9 }
 0x9e7   : > { %6589 = vmatprep.subr.bf16.mxu0 %v7207_v31 }
 0x9ea   : > { %6590 = vmatpush3.bf16.msra.mxu0 %v6989_v40 }
 0x9eb   : > { %6591 = vmatprep.subr.bf16.mxu0 %v7207_v31 }
 0x9ee   : > { %6592 = vmatpush3.bf16.msra.mxu0 %v6990_v43 }
 0x9ef   : > { %6593 = vmatprep.subr.bf16.mxu0 %v7207_v31 }
 0x9f2   : > { %6594 = vmatpush3.bf16.msra.mxu0 %v6991_v47 }
 0x9f5   : > { %6596 = vmatmul.mubr.bf16.vlgmr.msra.gmra.mrb[68].mxu0 %v4857_v35 }
 0xac8   : > { %v4941_v53 = vpop.f32.mrb[68].mxu0 }
 0xac9   : > { %v4961_v46 = vrot.slane %v4941_v53, 2  ;;  %v6597_v12 = vpop.f32.mrb[69].mxu0 }
 0xaca   : > { %v4944_v60 = vpop.f32.mrb[70].mxu0 }
 0xacb   : > { %v4967_v56 = vadd.f32 %v4961_v46, %v4951_v23  ;;  %v4962_v48 = vrot.slane %v4944_v60, 2  ;;  %v6598_v63 = vpop.f32.mrb[71].mxu0 }
 0xacd   : > { %v5831_v13 = vmul.f32 -1.442695, %v4967_v56  ;;  %v4963_v31 = vsel %vm8810_vm1, %v4961_v46, %v4962_v48  ;;  %v4969_v51 = vadd.f32 %v4962_v48, %v4955_v33 }
 0xace   : > { %v4968_v17 = vadd.f32 %v4963_v31, %v4953_v61 }
 0xacf   : > { %7107 = vpow2.f32 %v5831_v13  ;;  %v5833_v3 = vmul.f32 -1.442695, %v4969_v51 }
 0xad0   : > { %v5832_v30 = vmul.f32 -1.442695, %v4968_v17 }
 0xad1   : > { %7109 = vpow2.f32 %v5833_v3 }
 0xad2   : > { %7111 = vpow2.f32 %v5832_v30 }
 0xad3   : > { %7113 = vtanh.f32 %v7125_v16 }
 0xad4   : > { %7115 = vtanh.f32 %v4950_v62 }
 0xad9   : > { %v7108_v29 = vpop.eup %7107 }
 0xada   : > { %v4979_v34 = vadd.f32 1.0, %v7108_v29 }
 0xadb   : > { %v7110_v49 = vpop.eup %7109 }
 0xadc   : > { %v7112_v50 = vpop.eup %7111  ;;  %7117 = vrcp.f32 %v4979_v34  ;;  %v4981_v32 = vadd.f32 1.0, %v7110_v49 }
 0xadd   : > { %7119 = vtanh.f32 %v4954_v54  ;;  %v4980_v59 = vadd.f32 1.0, %v7112_v50  ;;  %v7114_v52 = vpop.eup %7113 }
 0xade   : > { %7121 = vrcp.f32 %v4981_v32  ;;  %v7116_v18 = vpop.eup %7115 }
 0xadf   : > { %7123 = vrcp.f32 %v4980_v59 }
 0xae6   : > { %v7118_v11 = vpop.eup %7117 }
 0xae7   : > { %v7120_v8 = vpop.eup %7119  ;;  %v4988_v1 = vmul.f32 %v7118_v11, %v7116_v18  ;;  %v5888_v38 = vpack.c.bf16 %v7118_v11, %v7118_v11  ;;  %5061 = vst [vmem:[%s253_s27 - $0x6] sm:$0xc0] %v7118_v11 }
 0xae8   : > { %v7122_v55 = vpop.eup %7121 }
 0xae9   : > { %v7124_v5 = vpop.eup %7123  ;;  %v5885_v41 = vpack.c.bf16 %v4988_v1, %v4988_v1  ;;  %v5023_v45 = vshrl.u32 %v5888_v38, 16  ;;  %v5026_v44 = vshll.u32 %v5888_v38, 16  ;;  %v4990_v42 = vmul.f32 %v7122_v55, %v7120_v8  ;;  %5063 = vst [vmem:[%s253_s27 + $0xa] sm:$0x3f] %v7122_v55 }
 0xaea   : > { %v4989_v58 = vmul.f32 %v7124_v5, %v7114_v52  ;;  %v5889_v24 = vpack.c.bf16 %v7124_v5, %v7124_v5  ;;  %v5890_v25 = vpack.c.bf16 %v7122_v55, %v7122_v55  ;;  %5062 = vst [vmem:[%s253_s27 + $0x2] sm:$0xff] %v7124_v5 }
 0xaeb   : > { %v5025_v21 = vrot.slane %v5023_v45, 6  ;;  %v5028_v4 = vrot.slane %v5026_v44, 7  ;;  %v5887_v39 = vpack.c.bf16 %v4990_v42, %v4990_v42 }
 0xaec   : > { %7139 = shalt.err (!%p7136_p5)
}
 0xaed   : > { %s7140_s15 = scalar_lea.hbm %s8715_s29, 256  ;;  %s7144_s24 = scalar_lea.hbm %s8784_s5, 512 }
 0xaee   : > { %p7141_p6 = scmp.ne.s32.totalorder %s8715_s29, %s7140_s15  ;;  %p7145_p10 = scmp.lt.u32.totalorder %s8715_s29, %s8784_s5 }
 0xaef   : > { %p7146_p11 = scmp.lt.u32.totalorder %s7144_s24, %s7140_s15  ;;  %p7148_p13 = scmp.lt.u32.totalorder %s7140_s15, %s8715_s29 }
 0xaf0   : > { %p7142_p7 = pnand %p7141_p6, %p7282_p4 }
 0xaf1   : > { %p7147_p12 = por %p7146_p11, %p7145_p10 }
 0xaf2   : > { %p7143_p9 = pneg %p7142_p7 }
 0xaf3   : > { %p7149_p0 = por %p7148_p13, %p7147_p12 }
 0xaf5   : > { %p7150_p1 = pnand %p7149_p0, %p7143_p9 }
 0xaf7   : > { %7153 = shalt.err (!%p7150_p1)
}
 0xaf8   : > { %s7210_s8 = smov 128   ;;  %s7211_s9 = smov 8   ;;  %v5886_v6 = vpack.c.bf16 %v4989_v58, %v4989_v58  ;;  %v5032_v14 = vshrl.u32 %v5889_v24, 16  ;;  %v5035_v22 = vshll.u32 %v5889_v24, 16  ;;  %v5042_v20 = vshrl.u32 %v5890_v25, 16 }
 0xaf9   : > { %6672 = dma.vmem_to_hbm [thread:$0]  (%p7282_p4), %s8717_s7, 256, %s8715_s29, %s8719_s21, %s7210_s8, %s7210_s8, %s7211_s9   ;;  %v5837_v37 = vrot.slane %v5885_v41, 11  ;;  %v5029_v19 = vor.u32 %v5028_v4, %v5025_v21  ;;  %v5045_v36 = vshll.u32 %v5890_v25, 16  ;;  %v5006_v27 = vrot.slane %v5887_v39, 7  ;;  %v5058_v12 = vld [vmem:[#allocation3 + $0x8] sm:$0x1] }
 0xafa   : > { %v5003_v26 = vrot.slane %v5886_v6, 7  ;;  %v5034_v9 = vrot.slane %v5032_v14, 6  ;;  %v5037_v40 = vrot.slane %v5035_v22, 7  ;;  %v5044_v15 = vrot.slane %v5042_v20, 6  ;;  %v5054_v48 = vld [vmem:[#allocation3] sm:$0xf] }
 0xafb   : > { %v5030_v43 = vrot.slane %v5029_v19, 4  ;;  %v5047_v47 = vrot.slane %v5045_v36, 7 }
 0xafc   : > { %v5004_v0 = vsel %vm8254_vm4, %v5837_v37, %v5003_v26  ;;  %v5005_v28 = vrot.slane %v5003_v26, 4  ;;  %v5038_v35 = vor.u32 %v5037_v40, %v5034_v9  ;;  %v5050_v53 = vrot.slane %v5044_v15, 4 }
 0xafd   : > { %5010 = vst [vmem:[%s7853_s25 + $0x38] sm:$0xf] %v5004_v0  ;;  %v5048_v46 = vor.u32 %v5047_v47, %v5044_v15 }
 0xafe   : > { %v5007_v23 = vsel %vm8254_vm4, %v5005_v28, %v5006_v27  ;;  %v5039_v60 = vsel %vm8260_vm13, %v5030_v43, %v5038_v35  ;;  %v5040_v56 = vrot.slane %v5038_v35, 4  ;;  %v5059_v63 = vsel %vm7866_vm12, %v5050_v53, %v5058_v12 }
 0xaff   : > { %5011 = vst [vmem:[%s7853_s25 + $0x3c] sm:$0xf] %v5007_v23  ;;  %v5055_v33 = vsel %vm7856_vm10, %v5039_v60, %v5054_v48  ;;  %5060 = vst [vmem:[#allocation3 + $0x8] sm:$0x1] %v5059_v63 }
 0xb00   : > { %v5049_v13 = vsel %vm8260_vm13, %v5040_v56, %v5048_v46  ;;  %5056 = vst [vmem:[#allocation3] sm:$0xf] %v5055_v33 }
 0xb01   : > { %5057 = vst [vmem:[#allocation3 + $0x4] sm:$0xf] %v5049_v13 }
 0xb02 PF: > { %p6678_p4 = scmp.ge.s32.totalorder %s7204_s23, 2  ;;  %s5117_s28 = sand.u32 1, %s7184_s18  }
 0xb03   : > { %s5118_s7 = scalar_lea.sflag [#allocation5], %s5117_s28 }
 0xb04   : > { %p6675_p2 = pnand %p6678_p4, %p7289_p8 }
 0xb06   : > { %7179 = dma.done.wait (!%p6675_p2), %s5118_s7, 256  }
 0xb07   : > { %7181 = vsyncadd (!%p6675_p2), %s5118_s7, 4294967040  ;;  %s19_s23 = sadd.s32 1, %s7204_s23   ;;  %s8811_s18 = smov %s7188_s19 }
 0xb08   : > { %p16_p3 = scmp.ge.s32.totalorder %s19_s23, 4   ;;  %s8812_s19 = smov %s7192_s20 }
 0xb09   : > { %s8813_s20 = smov %s7295_s6  ;;  %s8814_s21 = smov %s7200_s22 }
 0xb0a   : > { %s8815_s22 = smov %s8817_s26  ;;  %18 = sbr.rel (!%p16_p3) target bundleno = 4 (0x4), region = 91 }
 0xb11   :  { %5123 = vsyncpa [#allocation5], 1 }
 0xb12   :  { %5125 = vsyncpa [#allocation5 + $0x1], 1 }

// kernel: _lambda_.3
= control target key start
LH: loop header
LB: loop body
LE: loop exit
PB: predicated region body
PF: predicated region fallthrough
CT: control target
= control target key end

     0   :  { %s7118_s18 = smov 0   ;;  %s7120_s19 = smov 0   ;;  %s8605_s0 = inlined_call_operand.vmem [shape: bf16[1,2,144,128], index: 0, kind: input, shape index: {}]   ;;  %s8606_s1 = inlined_call_operand.vmem [shape: bf16[3,128,256], index: 1, kind: input, shape index: {}]   ;;  %s8607_s2 = inlined_call_operand.vmem [shape: bf16[3,128,128], index: 2, kind: input, shape index: {}]   ;;  %s8608_s3 = inlined_call_operand.vmem [shape: f32[1,256], index: 3, kind: input, shape index: {}]   ;;  %s8609_s4 = inlined_call_operand.vmem [shape: f32[1,2,128,128], index: 4, kind: output, shape index: {0}]   ;;  %s8610_s5 = inlined_call_operand.vmem [shape: f32[2,16,128], index: 5, kind: output, shape index: {1}]  }
   0x1   :  { %s7122_s20 = smov 0  }
   0x2 LB: > { %s28_s21 = sadd.s32 1, %s7079_s19  ;;  %p5188_p0 = scmp.ge.s32.totalorder %s7083_s20, 1  ;;  %s7083_s20 = sphi %s7122_s20, %s16_s20   ;;  %s7079_s19 = sphi %s7120_s19, %s8627_s19   ;;  %s7075_s18 = sphi %s7118_s18, %s8626_s18  }
   0x3   : > { %p30_p1 = scmp.ge.s32.totalorder %s28_s21, 2  ;;  %p210_p2 = scmp.lt.s32.totalorder %s7083_s20, 3 }
   0x5   : > { %s8629_s21 = smov (%p30_p1, %s28_s21), 0  ;;  %p211_p3 = pnand %p5188_p0, %p210_p2 }
   0x6   : > { %v6631_v0 = vld [vmem:[%s8606_s1 + $0x4] ss:$8 sps:$4 sm:$0xff] (!%p211_p3)   ;;  %p253_p4 = scmp.lt.s32.totalorder (!%p211_p3), %s7075_s18, 1  ;;  %v6633_v1 = vld [vmem:[%s8606_s1] ss:$8 sps:$4 sm:$0xff] (!%p211_p3)   ;;  %v7085_v2 = vmov (!%p211_p3), 0  }
   0x7   : > { %214 = sbr.rel (%p211_p3) target bundleno = 2822 (0xb06), region = 36  ;;  %534 = vmatprep.mubr.bf16.mxu1 (!%p211_p3), %v7085_v2  ;;  %279 = vst [vmem:[#allocation3] sm:$0xf] (!%p211_p3), %v7085_v2  ;;  %280 = vst [vmem:[#allocation3 + $0x4] sm:$0xf] (!%p211_p3), %v7085_v2  ;;  %494 = vmatprep.mubr.bf16.mxu0 (!%p211_p3), %v7085_v2  ;;  %v8611_v58 = vmov (!%p211_p3), 0.0  }
   0x8   : > { %281 = vst [vmem:[#allocation3 + $0x8] sm:$0x1] (!%p211_p3), %v7085_v2  ;;  %6523 = vmatprep.subr.bf16.mxu1 (!%p211_p3), %v6631_v0  ;;  %v6634_v3 = vld [vmem:[%s8606_s1 + $0x14] ss:$8 sps:$4 sm:$0xff] (!%p211_p3)   ;;  %462 = vmatprep.subr.bf16.mxu0 (!%p211_p3), %v6631_v0  ;;  %v6636_v4 = vld [vmem:[%s8606_s1 + $0x10] ss:$8 sps:$4 sm:$0xff] (!%p211_p3)  }
   0x9   : > { %6531 = vmatpush1.bf16.msra.mxu1 (!%p211_p3), %v6633_v1  ;;  %463 = vmatpush1.bf16.msra.mxu0 (!%p211_p3), %v6633_v1  ;;  %v6637_v5 = vld [vmem:[%s8606_s1 + $0x24] ss:$8 sps:$4 sm:$0xff] (!%p211_p3)   ;;  %v6639_v6 = vld [vmem:[%s8606_s1 + $0x20] ss:$8 sps:$4 sm:$0xff] (!%p211_p3)   ;;  %v6640_v7 = vld [vmem:[%s8606_s1 + $0x34] ss:$8 sps:$4 sm:$0xff] (!%p211_p3)  }
   0xa   : > { %6524 = vmatprep.subr.bf16.mxu1 (!%p211_p3), %v6634_v3  ;;  %464 = vmatprep.subr.bf16.mxu0 (!%p211_p3), %v6634_v3  ;;  %v6642_v8 = vld [vmem:[%s8606_s1 + $0x30] ss:$8 sps:$4 sm:$0xff] (!%p211_p3)   ;;  %v6643_v9 = vld [vmem:[%s8606_s1 + $0x44] ss:$8 sps:$4 sm:$0xff] (!%p211_p3)   ;;  %v6645_v10 = vld [vmem:[%s8606_s1 + $0x40] ss:$8 sps:$4 sm:$0xff] (!%p211_p3)  }
   0xb   : > { %v6646_v11 = vld [vmem:[%s8606_s1 + $0x54] ss:$8 sps:$4 sm:$0xff] (!%p211_p3)   ;;  %v6648_v12 = vld [vmem:[%s8606_s1 + $0x50] ss:$8 sps:$4 sm:$0xff] (!%p211_p3)   ;;  %v6649_v13 = vld [vmem:[%s8606_s1 + $0x64] ss:$8 sps:$4 sm:$0xff] (!%p211_p3)  }
   0xc   : > { %v6651_v14 = vld [vmem:[%s8606_s1 + $0x60] ss:$8 sps:$4 sm:$0xff] (!%p211_p3)   ;;  %v6652_v15 = vld [vmem:[%s8606_s1 + $0x74] ss:$8 sps:$4 sm:$0xff] (!%p211_p3)   ;;  %v6654_v16 = vld [vmem:[%s8606_s1 + $0x70] ss:$8 sps:$4 sm:$0xff] (!%p211_p3)  }
   0xd   : > { %6532 = vmatpush1.bf16.msra.mxu1 (!%p211_p3), %v6636_v4  ;;  %465 = vmatpush1.bf16.msra.mxu0 (!%p211_p3), %v6636_v4  ;;  %v6658_v17 = vld [vmem:[%s8606_s1 + $0x84] ss:$8 sps:$4 sm:$0xff] (!%p211_p3)   ;;  %v6656_v20 = vld [vmem:[%s8606_s1 + $0x80] ss:$8 sps:$4 sm:$0xff] (!%p211_p3)   ;;  %v6661_v22 = vld [vmem:[%s8606_s1 + $0x94] ss:$8 sps:$4 sm:$0xff] (!%p211_p3)  }
   0xe   : > { %s8631_s18 = smov (!%p253_p4, %s7075_s18), 1  ;;  %6525 = vmatprep.subr.bf16.mxu1 %v6637_v5  ;;  %466 = vmatprep.subr.bf16.mxu0 %v6637_v5  ;;  %v6673_v18 = vld [vmem:[%s8606_s1 + $0x104] ss:$8 sps:$4 sm:$0xff]   ;;  %v6671_v23 = vld [vmem:[%s8606_s1 + $0x100] ss:$8 sps:$4 sm:$0xff]   ;;  %v6714_v61 = vld [vmem:[%s8607_s2 + $0x50] sm:$0xff]  }
   0xf   : > { %s6603_s7 = smul.u32 72, %s8631_s18  ;;  %v6679_v24 = vld [vmem:[%s8606_s1 + $0x114] ss:$8 sps:$4 sm:$0xff]   ;;  %v6659_v25 = vld [vmem:[%s8606_s1 + $0x90] ss:$8 sps:$4 sm:$0xff]   ;;  %v6705_v59 = vld [vmem:[%s8607_s2 + $0x40] sm:$0xff]  }
  0x10   : > { %v6665_v26 = vld [vmem:[%s8606_s1 + $0xa4] ss:$8 sps:$4 sm:$0xff]   ;;  %v6677_v28 = vld [vmem:[%s8606_s1 + $0x110] ss:$8 sps:$4 sm:$0xff]   ;;  %v6663_v31 = vld [vmem:[%s8606_s1 + $0xa0] ss:$8 sps:$4 sm:$0xff]  }
  0x11   : > { %s7168_s14 = scalar_lea.vmem %s8605_s0, %s6603_s7  ;;  %6533 = vmatpush1.bf16.msra.mxu1 %v6639_v6  ;;  %467 = vmatpush1.bf16.msra.mxu0 %v6639_v6  ;;  %v6687_v29 = vld [vmem:[%s8606_s1 + $0x124] ss:$8 sps:$4 sm:$0xff]   ;;  %v6668_v32 = vld [vmem:[%s8606_s1 + $0xb4] ss:$8 sps:$4 sm:$0xff]   ;;  %v6685_v33 = vld [vmem:[%s8606_s1 + $0x120] ss:$8 sps:$4 sm:$0xff]  }
  0x12   : > { %6526 = vmatprep.subr.bf16.mxu1 %v6640_v7  ;;  %468 = vmatprep.subr.bf16.mxu0 %v6640_v7  ;;  %v7204_v19 = vld [vmem:[%s7168_s14 + $0x20] sm:$0xff]   ;;  %v7231_v27 = vld [vmem:[%s7168_s14 + $0x28] sm:$0xff]   ;;  %v6693_v34 = vld [vmem:[%s8606_s1 + $0x134] ss:$8 sps:$4 sm:$0xff]   ;;  %vm1607_vm0 = vsmask.f32 7424 }
  0x13   : > { %v7210_v21 = vld [vmem:[%s7168_s14] sm:$0xff]   ;;  %v7241_v30 = vld [vmem:[%s7168_s14 + $0x8] sm:$0xff]   ;;  %v6666_v35 = vld [vmem:[%s8606_s1 + $0xb0] ss:$8 sps:$4 sm:$0xff]   ;;  %vm7087_vm1 = vmmov 0   ;;  %vm913_vm2 = vcmask 1046528  }
  0x14   : > { %v6676_v36 = vld [vmem:[%s8606_s1 + $0xc4] ss:$8 sps:$4 sm:$0xff]   ;;  %v7265_v37 = vld [vmem:[%s7168_s14 + $0x30] sm:$0xff]   ;;  %v6674_v39 = vld [vmem:[%s8606_s1 + $0xc0] ss:$8 sps:$4 sm:$0xff]   ;;  %vm1384_vm3 = vcmask 1045504  }
  0x15   : > { %6534 = vmatpush1.bf16.msra.mxu1 %v6642_v8  ;;  %469 = vmatpush1.bf16.msra.mxu0 %v6642_v8  ;;  %v6691_v38 = vld [vmem:[%s8606_s1 + $0x130] ss:$8 sps:$4 sm:$0xff]   ;;  %v6698_v40 = vld [vmem:[%s8606_s1 + $0x144] ss:$8 sps:$4 sm:$0xff]   ;;  %v6683_v42 = vld [vmem:[%s8606_s1 + $0xd4] ss:$8 sps:$4 sm:$0xff]  }
  0x16   : > { %6527 = vmatprep.subr.bf16.mxu1 %v6643_v9  ;;  %470 = vmatprep.subr.bf16.mxu0 %v6643_v9  ;;  %v7278_v41 = vld [vmem:[%s7168_s14 + $0x10] sm:$0xff]   ;;  %v6696_v43 = vld [vmem:[%s8606_s1 + $0x140] ss:$8 sps:$4 sm:$0xff]   ;;  %v7296_v46 = vld [vmem:[%s7168_s14 + $0x38] sm:$0xff]   ;;  %s5803_s23 = sshll.u32 %s8631_s18, 7  ;;  %vm1970_vm4 = vcmask 1043456  }
  0x17   : > { %v6704_v44 = vld [vmem:[%s8606_s1 + $0x154] ss:$8 sps:$4 sm:$0xff]   ;;  %v6681_v45 = vld [vmem:[%s8606_s1 + $0xd0] ss:$8 sps:$4 sm:$0xff]   ;;  %v6690_v47 = vld [vmem:[%s8606_s1 + $0xe4] ss:$8 sps:$4 sm:$0xff]   ;;  %s7758_s26 = scalar_lea.vmem %s8609_s4, %s5803_s23 }
  0x18   : > { %v6702_v48 = vld [vmem:[%s8606_s1 + $0x150] ss:$8 sps:$4 sm:$0xff]   ;;  %v6688_v49 = vld [vmem:[%s8606_s1 + $0xe0] ss:$8 sps:$4 sm:$0xff]   ;;  %v6709_v50 = vld [vmem:[%s8606_s1 + $0x164] ss:$8 sps:$4 sm:$0xff]  }
  0x19   : > { %6535 = vmatpush1.bf16.msra.mxu1 %v6645_v10  ;;  %471 = vmatpush1.bf16.msra.mxu0 %v6645_v10  ;;  %v6701_v51 = vld [vmem:[%s8606_s1 + $0xf4] ss:$8 sps:$4 sm:$0xff]   ;;  %v6707_v53 = vld [vmem:[%s8606_s1 + $0x160] ss:$8 sps:$4 sm:$0xff]   ;;  %v6699_v55 = vld [vmem:[%s8606_s1 + $0xf0] ss:$8 sps:$4 sm:$0xff]  }
  0x1a   : > { %6528 = vmatprep.subr.bf16.mxu1 %v6646_v11  ;;  %472 = vmatprep.subr.bf16.mxu0 %v6646_v11  ;;  %v7315_v52 = vld [vmem:[%s7168_s14 + $0x18] sm:$0xff]   ;;  %v7334_v57 = vld [vmem:[%s7168_s14 + $0x40] sm:$0xff]   ;;  %v6713_v60 = vld [vmem:[%s8607_s2 + $0x48] sm:$0xff]   ;;  %vm1971_vm5 = vsmask.f32 7938  ;;  %vm1977_vm8 = vcmask 1040384  }
  0x1b   : > { %v6712_v54 = vld [vmem:[%s8606_s1 + $0x174] ss:$8 sps:$4 sm:$0xff]   ;;  %v6710_v56 = vld [vmem:[%s8606_s1 + $0x170] ss:$8 sps:$4 sm:$0xff]   ;;  %v1563_v62 = vld [vmem:[#allocation3] sm:$0xf] }
  0x1c   : > { %v7356_v63 = vld [vmem:[#allocation3 + $0x4] sm:$0xf]  ;;  %v7359_v0 = vld [vmem:[#allocation3 + $0x8] ss:$0 sps:$4 sm:$0x11]   ;;  %v6715_v1 = vld [vmem:[%s8607_s2 + $0x58] sm:$0xff]  }
  0x1d   : > { %6536 = vmatpush1.bf16.msra.mxu1 %v6648_v12  ;;  %473 = vmatpush1.bf16.msra.mxu0 %v6648_v12  ;;  %v7366_v3 = vcombine.low %v1563_v62, %v7356_v63  ;;  %v6716_v5 = vld [vmem:[%s8607_s2 + $0x60] sm:$0xff]   ;;  %v1616_v7 = vshll.u32 %v7359_v0, 16  ;;  %v6717_v8 = vld [vmem:[%s8607_s2 + $0x68] sm:$0xff]   ;;  %v6718_v9 = vld [vmem:[%s8607_s2 + $0x70] sm:$0xff]   ;;  %vm1947_vm6 = vsmask.f32 256 }
  0x1e   : > { %6529 = vmatprep.subr.bf16.mxu1 %v6649_v13  ;;  %474 = vmatprep.subr.bf16.mxu0 %v6649_v13  ;;  %v6719_v10 = vld [vmem:[%s8607_s2 + $0x78] sm:$0xff]   ;;  %vm1948_vm7 = vsmask.f32 4368  ;;  %vm7763_vm9 = vmand %vm1970_vm4, %vm1971_vm5  ;;  %vm2343_vm12 = vcmask 1041408   ;;  %vm2387_vm13 = vsmask.f32 3328 }
  0x1f   : > { %v1609_v4 = vshrl.u32 %v7366_v3, 16  ;;  %v1611_v6 = vshll.u32 %v7366_v3, 16  ;;  %v1618_v12 = vrot.slane %v1616_v7, 1  ;;  %vm7767_vm10 = vmor %vm1947_vm6, %vm1948_vm7  ;;  %vm2388_vm14 = vsmask.f32 7440  ;;  %s5804_s27 = sshll.u32 %s8631_s18, 4 }
  0x20   : > { %vm7771_vm11 = vmand %vm1977_vm8, %vm1947_vm6  ;;  %vm2833_vm5 = vsmask.f32 2304  ;;  %vm2834_vm6 = vsmask.f32 6416  ;;  %vm3279_vm8 = vsmask.f32 1280  ;;  %s273_s30 = scalar_lea.vmem %s8610_s5, %s5804_s27 }
  0x21   : > { %6537 = vmatpush1.bf16.msra.mxu1 %v6651_v14  ;;  %475 = vmatpush1.bf16.msra.mxu0 %v6651_v14  ;;  %v1613_v11 = vrot.slane %v1611_v6, 1  ;;  %v6722_v14 = vld [vmem:[%s8607_s2] sm:$0xff]   ;;  %vm7896_vm15 = vmor %vm2387_vm13, %vm2388_vm14  ;;  %vm3280_vm13 = vsmask.f32 5392 }
  0x22   : > { %6530 = vmatprep.subr.bf16.mxu1 %v6652_v15  ;;  %476 = vmatprep.subr.bf16.mxu0 %v6652_v15  ;;  %vm8018_vm7 = vmor %vm2833_vm5, %vm2834_vm6 }
  0x23   : > { %v1614_v13 = vor.u32 %v1613_v11, %v1609_v4  ;;  %vm8142_vm14 = vmor %vm3279_vm8, %vm3280_vm13 }
  0x25   : > { %6538 = vmatpush1.bf16.msra.mxu1 %v6654_v16  ;;  %477 = vmatpush1.bf16.msra.mxu0 %v6654_v16  ;;  %v1619_v15 = vsel %vm1607_vm0, %v1614_v13, %v1618_v12  ;;  %v6724_v16 = vld [vmem:[%s8607_s2 + $0x10] sm:$0xff]  }
  0x26   : > { %718 = vmatprep.subr.bf16.mxu1 %v6658_v17  ;;  %1189 = vmatprep.subr.bf16.mxu0 %v6673_v18  ;;  %v6725_v17 = vld [vmem:[%s8607_s2 + $0x18] sm:$0xff]   ;;  %v6726_v18 = vld [vmem:[%s8607_s2 + $0x20] sm:$0xff]  }
  0x28   : > { %535 = vmatmul.mubr.bf16.vlgmr.msra.gmra.mrb[0].mxu1 %v7204_v19  ;;  %495 = vmatmul.mubr.bf16.vlgmr.msra.gmra.mrb[0].mxu0 %v7210_v21 }
  0x29   : > { %719 = vmatpush1.bf16.msra.mxu1 %v6656_v20  ;;  %544 = vmatprep.mubr.bf16.mxu1 %v7085_v2  ;;  %v6728_v20 = vld [vmem:[%s8607_s2 + $0x30] sm:$0xff]  }
  0x2a   : > { %720 = vmatprep.subr.bf16.mxu1 %v6661_v22  ;;  %1190 = vmatpush1.bf16.msra.mxu0 %v6671_v23  ;;  %v6730_v22 = vld [vmem:[%s8607_s2 + $0x80] sm:$0xff]   ;;  %v6731_v23 = vld [vmem:[%s8607_s2 + $0x88] sm:$0xff]  }
  0x2b   : > { %1191 = vmatprep.subr.bf16.mxu0 %v6679_v24  ;;  %504 = vmatprep.mubr.bf16.mxu0 %v7085_v2  ;;  %v6732_v24 = vld [vmem:[%s8607_s2 + $0x90] sm:$0xff]  }
  0x2d   : > { %721 = vmatpush1.bf16.msra.mxu1 %v6659_v25  ;;  %v6733_v25 = vld [vmem:[%s8607_s2 + $0x98] sm:$0xff]  }
  0x2e   : > { %722 = vmatprep.subr.bf16.mxu1 %v6665_v26  ;;  %1192 = vmatpush1.bf16.msra.mxu0 %v6677_v28  ;;  %v6734_v26 = vld [vmem:[%s8607_s2 + $0xa0] sm:$0xff]  }
  0x2f   : > { %1193 = vmatprep.subr.bf16.mxu0 %v6687_v29  ;;  %v1800_v28 = vld [vmem:[#allocation3] sm:$0xe]  ;;  %v6736_v29 = vld [vmem:[%s8607_s2 + $0xb0] sm:$0xff]  }
  0x30   : > { %545 = vmatmul.mubr.bf16.gmra.mrb[4].mxu1 %v7231_v27  ;;  %505 = vmatmul.mubr.bf16.gmra.mrb[4].mxu0 %v7241_v30 }
  0x31   : > { %723 = vmatpush1.bf16.msra.mxu1 %v6663_v31  ;;  %554 = vmatprep.mubr.bf16.mxu1 %v7085_v2  ;;  %v6737_v31 = vld [vmem:[%s8607_s2 + $0xb8] sm:$0xff]  }
  0x32   : > { %724 = vmatprep.subr.bf16.mxu1 %v6668_v32  ;;  %1194 = vmatpush1.bf16.msra.mxu0 %v6685_v33  ;;  %v1823_v33 = vrot.slane %v7359_v0, 1 }
  0x33   : > { %1195 = vmatprep.subr.bf16.mxu0 %v6693_v34  ;;  %514 = vmatprep.mubr.bf16.mxu0 %v7085_v2 }
  0x35   : > { %725 = vmatpush1.bf16.msra.mxu1 %v6666_v35 }
  0x36   : > { %726 = vmatprep.subr.bf16.mxu1 %v6676_v36  ;;  %1196 = vmatpush1.bf16.msra.mxu0 %v6691_v38 }
  0x37   : > { %1197 = vmatprep.subr.bf16.mxu0 %v6698_v40 }
  0x38   : > { %555 = vmatmul.mubr.bf16.gmra.mrb[8].mxu1 %v7265_v37  ;;  %515 = vmatmul.mubr.bf16.gmra.mrb[8].mxu0 %v7278_v41 }
  0x39   : > { %727 = vmatpush1.bf16.msra.mxu1 %v6674_v39  ;;  %564 = vmatprep.mubr.bf16.mxu1 %v7085_v2  ;;  %v6739_v39 = vld [vmem:[%s8607_s2 + $0x40] sm:$0xff]  }
  0x3a   : > { %728 = vmatprep.subr.bf16.mxu1 %v6683_v42  ;;  %1198 = vmatpush1.bf16.msra.mxu0 %v6696_v43 }
  0x3b   : > { %1199 = vmatprep.subr.bf16.mxu0 %v6704_v44  ;;  %524 = vmatprep.mubr.bf16.mxu0 %v7085_v2  ;;  %v6740_v44 = vld [vmem:[%s8607_s2 + $0x48] sm:$0xff]  }
  0x3d   : > { %729 = vmatpush1.bf16.msra.mxu1 %v6681_v45  ;;  %v318_v45 = vlaneseq }
  0x3e   : > { %730 = vmatprep.subr.bf16.mxu1 %v6690_v47  ;;  %1200 = vmatpush1.bf16.msra.mxu0 %v6702_v48 }
  0x3f   : > { %1201 = vmatprep.subr.bf16.mxu0 %v6709_v50  ;;  %v319_v48 = vshrl.u32 %v318_v45, 7 }
  0x40   : > { %565 = vmatmul.mubr.bf16.gmra.mrb[12].mxu1 %v7296_v46  ;;  %525 = vmatmul.mubr.bf16.gmra.mrb[12].mxu0 %v7315_v52 }
  0x41   : > { %574 = vmatprep.mubr.bf16.mxu1 %v7085_v2  ;;  %731 = vmatpush1.bf16.msra.mxu1 %v6688_v49 }
  0x42   : > { %732 = vmatprep.subr.bf16.mxu1 %v6701_v51  ;;  %1202 = vmatpush1.bf16.msra.mxu0 %v6707_v53 }
  0x43   : > { %1203 = vmatprep.subr.bf16.mxu0 %v6712_v54  ;;  %1221 = vmatprep.mubr.bf16.mxu0 %v7085_v2 }
  0x45   : > { %733 = vmatpush1.bf16.msra.mxu1 %v6699_v55  ;;  %v320_v55 = vsub.s32 0, %v319_v48 }
  0x46   : > { %6043 = vmatprep.subr.bf16.mxu1 %v8611_v58  ;;  %1204 = vmatpush1.bf16.msra.mxu0 %v6710_v56  ;;  %v316_v56 = vld [vmem:[%s8608_s3] sm:$0x3] }
  0x47   : > { %6103 = vmatprep.subr.bf16.mxu0 %v8611_v58 }
  0x48   : > { %575 = vmatmul.mubr.bf16.gmra.mrb[16].mxu1 %v7334_v57 }
  0x49   : > { %750 = vmatprep.mubr.bf16.mxu1 %v7085_v2  ;;  %1222 = vmatmul.mubr.bf16.vlgmr.msra.gmra.mrb[16].mxu0 %v7210_v21 }
  0x4a   : > { %1231 = vmatprep.mubr.bf16.mxu0 %v7085_v2  ;;  %6104 = vmatpush3.bf16.msra.mxu0 %v6739_v39 }
  0x4b   : > { %6105 = vmatprep.subr.bf16.mxu0 %v8611_v58 }
  0x4e   : > { %6106 = vmatpush3.bf16.msra.mxu0 %v6740_v44 }
  0x4f   : > { %6107 = vmatprep.subr.bf16.mxu0 %v8611_v58 }
  0x50   : > { %751 = vmatmul.mubr.bf16.vlgmr.msra.gmra.mrb[20].mxu1 %v7210_v21  ;;  %v6729_v21 = vld [vmem:[%s8607_s2 + $0x38] sm:$0xff]  }
  0x51   : > { %6044 = vmatpush3.bf16.msra.mxu1 %v6705_v59  ;;  %760 = vmatprep.mubr.bf16.mxu1 %v7085_v2 }
  0x52   : > { %6045 = vmatprep.subr.bf16.mxu1 %v8611_v58  ;;  %1232 = vmatmul.mubr.bf16.gmra.mrb[20].mxu0 %v7241_v30 }
  0x53   : > { %1241 = vmatprep.mubr.bf16.mxu0 %v7085_v2 }
  0x55   : > { %6046 = vmatpush3.bf16.msra.mxu1 %v6713_v60 }
  0x56   : > { %6047 = vmatprep.subr.bf16.mxu1 %v8611_v58 }
  0x58   : > { %761 = vmatmul.mubr.bf16.gmra.mrb[24].mxu1 %v7241_v30  ;;  %v5333_v30 = vcombine.low %v1800_v28, %v7356_v63 }
  0x59   : > { %770 = vmatprep.mubr.bf16.mxu1 %v7085_v2  ;;  %6048 = vmatpush3.bf16.msra.mxu1 %v6714_v61  ;;  %v7542_v61 = vrot.slane %v316_v56, %v320_v55 }
  0x5a   : > { %1242 = vmatmul.mubr.bf16.gmra.mrb[24].mxu0 %v7278_v41  ;;  %6049 = vmatprep.subr.bf16.mxu1 %v8611_v58  ;;  %v1822_v32 = vrot.slane %v5333_v30, 1 }
  0x5b   : > { %1251 = vmatprep.mubr.bf16.mxu0 %v7085_v2 }
  0x5c   : > { %v1824_v34 = vsel %vm913_vm2, %v1822_v32, %v1823_v33 }
  0x5d   : > { %6050 = vmatpush3.bf16.msra.mxu1 %v6715_v1 }
  0x5e   : > { %6051 = vmatprep.subr.bf16.mxu1 %v8611_v58 }
  0x60   : > { %771 = vmatmul.mubr.bf16.gmra.mrb[28].mxu1 %v7278_v41 }
  0x61   : > { %780 = vmatprep.mubr.bf16.mxu1 %v7085_v2  ;;  %6052 = vmatpush3.bf16.msra.mxu1 %v6716_v5 }
  0x62   : > { %1252 = vmatmul.mubr.bf16.gmra.mrb[28].mxu0 %v7315_v52  ;;  %6053 = vmatprep.subr.bf16.mxu1 %v8611_v58 }
  0x63   : > { %1261 = vmatprep.mubr.bf16.mxu0 %v7085_v2 }
  0x65   : > { %6054 = vmatpush3.bf16.msra.mxu1 %v6717_v8 }
  0x66   : > { %6055 = vmatprep.subr.bf16.mxu1 %v8611_v58 }
  0x68   : > { %781 = vmatmul.mubr.bf16.gmra.mrb[32].mxu1 %v7315_v52 }
  0x69   : > { %790 = vmatprep.mubr.bf16.mxu1 %v7085_v2  ;;  %6056 = vmatpush3.bf16.msra.mxu1 %v6718_v9 }
  0x6a   : > { %1262 = vmatmul.mubr.bf16.gmra.mrb[32].mxu0 %v7204_v19  ;;  %6057 = vmatprep.subr.bf16.mxu1 %v8611_v58 }
  0x6b   : > { %1271 = vmatprep.mubr.bf16.mxu0 %v7085_v2 }
  0x6d   : > { %6058 = vmatpush3.bf16.msra.mxu1 %v6719_v10 }
  0x6e   : > { %6063 = vmatprep.subr.bf16.mxu1 %v8611_v58 }
  0x70   : > { %791 = vmatmul.mubr.bf16.gmra.mrb[36].mxu1 %v7204_v19  ;;  %v6727_v19 = vld [vmem:[%s8607_s2 + $0x28] sm:$0xff]  }
  0x71   : > { %800 = vmatprep.mubr.bf16.mxu1 %v7085_v2 }
  0x72   : > { %1272 = vmatmul.mubr.bf16.gmra.mrb[36].mxu0 %v7231_v27 }
  0x73   : > { %1281 = vmatprep.mubr.bf16.mxu0 %v7085_v2 }
  0x78   : > { %801 = vmatmul.mubr.bf16.gmra.mrb[40].mxu1 %v7231_v27  ;;  %v6735_v27 = vld [vmem:[%s8607_s2 + $0xa8] sm:$0xff]  }
  0x79   : > { %810 = vmatprep.mubr.bf16.mxu1 %v7085_v2 }
  0x7a   : > { %1282 = vmatmul.mubr.bf16.gmra.mrb[40].mxu0 %v7265_v37 }
  0x7b   : > { %1291 = vmatprep.mubr.bf16.mxu0 %v7085_v2 }
  0x80   : > { %811 = vmatmul.mubr.bf16.gmra.mrb[44].mxu1 %v7265_v37 }
  0x81   : > { %820 = vmatprep.mubr.bf16.mxu1 %v7085_v2 }
  0x82   : > { %1292 = vmatmul.mubr.bf16.gmra.mrb[44].mxu0 %v7296_v46 }
  0x83   : > { %1301 = vmatprep.mubr.bf16.mxu0 %v7085_v2 }
  0x88   : > { %821 = vmatmul.mubr.bf16.gmra.mrb[48].mxu1 %v7296_v46 }
  0x89   : > { %830 = vmatprep.mubr.bf16.mxu1 %v7085_v2  ;;  %v6723_v2 = vld [vmem:[%s8607_s2 + $0x8] sm:$0xff]  }
  0x8a   : > { %1302 = vmatmul.mubr.bf16.gmra.mrb[48].mxu0 %v7334_v57 }
  0x8b   : > { %6119 = vmatprep.mubr.msk.bf16.mxu0 %vm7087_vm1, %v8611_v58 }
  0x90   : > { %831 = vmatmul.mubr.bf16.gmra.mrb[52].mxu1 %v7334_v57  ;;  %v324_v57 = vsub.s32 1, %v319_v48 }
  0x91   : > { %6059 = vmatprep.mubr.msk.bf16.mxu1 %vm7087_vm1, %v8611_v58 }
  0x92   : > { %v7548_v0 = vrot.slane %v316_v56, %v324_v57 }
  0x98   : > { %6060 = vmatmul.mubr.bf16.vlgmr.msra.gmra.mrb[56].mxu1 %v1619_v15 }
  0x99   : > { %6064 = vmatpush3.bf16.msra.mxu1 %v6722_v14  ;;  %6079 = vmatprep.mubr.msk.bf16.mxu1 %vm7087_vm1, %v8611_v58 }
  0x9a   : > { %6065 = vmatprep.subr.bf16.mxu1 %v8611_v58 }
  0x9d   : > { %6066 = vmatpush3.bf16.msra.mxu1 %v6723_v2 }
  0x9e   : > { %6067 = vmatprep.subr.bf16.mxu1 %v8611_v58 }
  0xa1   : > { %6068 = vmatpush3.bf16.msra.mxu1 %v6724_v16 }
  0xa2   : > { %6069 = vmatprep.subr.bf16.mxu1 %v8611_v58 }
  0xa5   : > { %6070 = vmatpush3.bf16.msra.mxu1 %v6725_v17 }
  0xa6   : > { %6071 = vmatprep.subr.bf16.mxu1 %v8611_v58 }
  0xa9   : > { %6072 = vmatpush3.bf16.msra.mxu1 %v6726_v18 }
  0xaa   : > { %6073 = vmatprep.subr.bf16.mxu1 %v8611_v58 }
  0xad   : > { %6074 = vmatpush3.bf16.msra.mxu1 %v6727_v19 }
  0xae   : > { %6075 = vmatprep.subr.bf16.mxu1 %v8611_v58 }
  0xb1   : > { %6076 = vmatpush3.bf16.msra.mxu1 %v6728_v20 }
  0xb2   : > { %6077 = vmatprep.subr.bf16.mxu1 %v8611_v58 }
  0xb5   : > { %6078 = vmatpush3.bf16.msra.mxu1 %v6729_v21 }
  0xb6   : > { %6083 = vmatprep.subr.bf16.mxu1 %v8611_v58 }
  0xb8   : > { %6080 = vmatmul.mubr.bf16.vlgmr.msra.gmra.mrb[56].mxu1 %v7366_v3 }
  0xb9   : > { %6084 = vmatpush3.bf16.msra.mxu1 %v6730_v22  ;;  %6099 = vmatprep.mubr.msk.bf16.mxu1 %vm7087_vm1, %v8611_v58 }
  0xba   : > { %6085 = vmatprep.subr.bf16.mxu1 %v8611_v58 }
  0xbd   : > { %6086 = vmatpush3.bf16.msra.mxu1 %v6731_v23 }
  0xbe   : > { %6087 = vmatprep.subr.bf16.mxu1 %v8611_v58 }
  0xc1   : > { %6088 = vmatpush3.bf16.msra.mxu1 %v6732_v24 }
  0xc2   : > { %6089 = vmatprep.subr.bf16.mxu1 %v8611_v58 }
  0xc5   : > { %6090 = vmatpush3.bf16.msra.mxu1 %v6733_v25 }
  0xc6   : > { %6091 = vmatprep.subr.bf16.mxu1 %v8611_v58 }
  0xc9   : > { %6092 = vmatpush3.bf16.msra.mxu1 %v6734_v26 }
  0xca   : > { %6093 = vmatprep.subr.bf16.mxu1 %v8611_v58 }
  0xcd   : > { %6094 = vmatpush3.bf16.msra.mxu1 %v6735_v27 }
  0xce   : > { %6095 = vmatprep.subr.bf16.mxu1 %v8611_v58 }
  0xd1   : > { %6096 = vmatpush3.bf16.msra.mxu1 %v6736_v29 }
  0xd2   : > { %6097 = vmatprep.subr.bf16.mxu1 %v8611_v58 }
  0xd5   : > { %6098 = vmatpush3.bf16.msra.mxu1 %v6737_v31 }
  0xd6   : > { %6163 = vmatprep.subr.bf16.mxu1 %v8611_v58 }
  0xd8   : > { %6100 = vmatmul.mubr.bf16.vlgmr.msra.gmra.mrb[56].mxu1 %v1824_v34 }
  0xd9   : > { %6179 = vmatprep.mubr.msk.bf16.mxu1 %vm7087_vm1, %v8611_v58 }
  0xfb   : > { %v7495_v35 = vpop.f32.mrb[0].mxu1  ;;  %v7497_v36 = vpop.f32.mrb[0].mxu0 }
  0xfc   : > { %v7499_v37 = vpop.f32.mrb[1].mxu1  ;;  %v7501_v38 = vpop.f32.mrb[1].mxu0  ;;  %v497_v55 = vadd.f32 %v7497_v36, %v7542_v61 }
  0xfd   : > { %v7506_v40 = vpop.f32.mrb[2].mxu1  ;;  %v7508_v41 = vpop.f32.mrb[2].mxu0 }
  0xfe   : > { %v7510_v42 = vpop.f32.mrb[3].mxu1  ;;  %v7512_v43 = vpop.f32.mrb[3].mxu0 }
 0x103   : > { %v7518_v46 = vpop.f32.mrb[4].mxu1  ;;  %v7520_v47 = vpop.f32.mrb[4].mxu0 }
 0x104   : > { %v7523_v49 = vpop.f32.mrb[5].mxu1  ;;  %v7525_v50 = vpop.f32.mrb[5].mxu0 }
 0x105   : > { %v7527_v51 = vpop.f32.mrb[6].mxu1  ;;  %v7529_v52 = vpop.f32.mrb[6].mxu0 }
 0x106   : > { %v7531_v53 = vpop.f32.mrb[7].mxu1  ;;  %v7533_v54 = vpop.f32.mrb[7].mxu0 }
 0x10b   : > { %v7538_v59 = vpop.f32.mrb[8].mxu1  ;;  %v7540_v60 = vpop.f32.mrb[8].mxu0 }
 0x10c   : > { %v7544_v62 = vpop.f32.mrb[9].mxu1  ;;  %v7546_v63 = vpop.f32.mrb[9].mxu0 }
 0x10d   : > { %v560_v1 = vpop.f32.mrb[10].mxu1  ;;  %v7550_v3 = vpop.f32.mrb[10].mxu0 }
 0x10e   : > { %v7553_v4 = vadd.f32 %v560_v1, %v7542_v61  ;;  %v562_v5 = vpop.f32.mrb[11].mxu1  ;;  %v7555_v6 = vpop.f32.mrb[11].mxu0  ;;  %v499_v1 = vadd.f32 %v7501_v38, %v7548_v0 }
 0x10f   : > { %v7558_v7 = vadd.f32 %v562_v5, %v7548_v0 }
 0x113   : > { %v566_v8 = vpop.f32.mrb[12].mxu1  ;;  %v7560_v9 = vpop.f32.mrb[12].mxu0 }
 0x114   : > { %v7563_v10 = vadd.f32 %v566_v8, %v7542_v61  ;;  %v568_v11 = vpop.f32.mrb[13].mxu1  ;;  %v7565_v12 = vpop.f32.mrb[13].mxu0 }
 0x115   : > { %v7568_v13 = vadd.f32 %v568_v11, %v7548_v0  ;;  %v570_v14 = vpop.f32.mrb[14].mxu1  ;;  %v7570_v15 = vpop.f32.mrb[14].mxu0 }
 0x116   : > { %v7573_v2 = vadd.f32 %v570_v14, %v7542_v61  ;;  %v572_v16 = vpop.f32.mrb[15].mxu1  ;;  %v7575_v17 = vpop.f32.mrb[15].mxu0 }
 0x117   : > { %v7578_v18 = vadd.f32 %v572_v16, %v7548_v0 }
 0x11b   : > { %v576_v19 = vpop.f32.mrb[16].mxu1 }
 0x11c   : > { %v7581_v20 = vadd.f32 %v576_v19, %v7542_v61  ;;  %v578_v21 = vpop.f32.mrb[17].mxu1  ;;  %v1223_v22 = vpop.f32.mrb[16].mxu0 }
 0x11d   : > { %v7584_v23 = vadd.f32 %v578_v21, %v7548_v0  ;;  %v580_v24 = vpop.f32.mrb[18].mxu1  ;;  %v1385_v25 = vrot.slane %v1223_v22, 2  ;;  %v1225_v26 = vpop.f32.mrb[17].mxu0 }
 0x11e   : > { %v581_v27 = vadd.f32 %v580_v24, %v7542_v61  ;;  %v582_v28 = vpop.f32.mrb[19].mxu1  ;;  %v1388_v29 = vrot.slane %v1225_v26, 2  ;;  %v1227_v30 = vpop.f32.mrb[18].mxu0 }
 0x11f   : > { %v583_v31 = vadd.f32 %v582_v28, %v7548_v0  ;;  %v1386_v32 = vrot.slane %v1227_v30, 2  ;;  %v1229_v33 = vpop.f32.mrb[19].mxu0 }
 0x120   : > { %619 = vst [vmem:[#allocation2 + $0x110] sm:$0xff] %v581_v27  ;;  %v1389_v34 = vrot.slane %v1229_v33, 2 }
 0x121   : > { %620 = vst [vmem:[#allocation2 + $0x118] sm:$0xff] %v583_v31  ;;  %v1387_v39 = vsel %vm1384_vm3, %v1385_v25, %v1386_v32 }
 0x122   : > { %v1390_v44 = vsel %vm1384_vm3, %v1388_v29, %v1389_v34 }
 0x123   : > { %v752_v45 = vpop.f32.mrb[20].mxu1 }
 0x124   : > { %v754_v48 = vpop.f32.mrb[21].mxu1  ;;  %v914_v5 = vrot.slane %v752_v45, 1  ;;  %v501_v45 = vadd.f32 %v7508_v41, %v7542_v61  ;;  %v509_v41 = vadd.f32 %v7525_v50, %v7548_v0 }
 0x125   : > { %v756_v56 = vpop.f32.mrb[22].mxu1  ;;  %v1233_v57 = vpop.f32.mrb[20].mxu0  ;;  %v917_v19 = vrot.slane %v754_v48, 1 }
 0x126   : > { %v915_v8 = vrot.slane %v756_v56, 1  ;;  %v758_v11 = vpop.f32.mrb[23].mxu1  ;;  %v1391_v14 = vrot.slane %v1233_v57, 2  ;;  %v1235_v16 = vpop.f32.mrb[21].mxu0 }
 0x127   : > { %v918_v21 = vrot.slane %v758_v11, 1  ;;  %v1393_v22 = vrot.slane %v1235_v16, 2  ;;  %v1237_v24 = vpop.f32.mrb[22].mxu0 }
 0x128   : > { %v916_v25 = vsel %vm913_vm2, %v914_v5, %v915_v8  ;;  %v1392_v26 = vsel %vm1384_vm3, %v1386_v32, %v1391_v14  ;;  %v1395_v27 = vrot.slane %v1237_v24, 2  ;;  %v1239_v36 = vpop.f32.mrb[23].mxu0  ;;  %v503_v32 = vadd.f32 %v7512_v43, %v7548_v0 }
 0x129   : > { %v1020_v28 = vadd.f32 %v916_v25, %v497_v55  ;;  %v919_v29 = vsel %vm913_vm2, %v917_v19, %v918_v21  ;;  %v1394_v38 = vsel %vm1384_vm3, %v1389_v34, %v1393_v22  ;;  %v1397_v30 = vrot.slane %v1239_v36, 2 }
 0x12a   : > { %v1021_v31 = vadd.f32 %v919_v29, %v499_v1  ;;  %v1396_v33 = vsel %vm1384_vm3, %v1391_v14, %v1395_v27  ;;  %v507_v34 = vadd.f32 %v7520_v47, %v7542_v61 }
 0x12b   : > { %v762_v48 = vpop.f32.mrb[24].mxu1  ;;  %v7601_v56 = vadd.f32 %v1387_v39, %v1020_v28  ;;  %v1398_v57 = vsel %vm1384_vm3, %v1393_v22, %v1397_v30 }
 0x12c   : > { %v920_v55 = vrot.slane %v762_v48, 1  ;;  %v764_v5 = vpop.f32.mrb[25].mxu1  ;;  %v7606_v11 = vadd.f32 %v1390_v44, %v1021_v31 }
 0x12d   : > { %v922_v1 = vrot.slane %v764_v5, 1  ;;  %v766_v14 = vpop.f32.mrb[26].mxu1  ;;  %v1243_v16 = vpop.f32.mrb[24].mxu0 }
 0x12e   : > { %v921_v39 = vsel %vm913_vm2, %v915_v8, %v920_v55  ;;  %v924_v19 = vrot.slane %v766_v14, 1  ;;  %v768_v22 = vpop.f32.mrb[27].mxu1  ;;  %v1399_v24 = vrot.slane %v1243_v16, 2  ;;  %v1245_v25 = vpop.f32.mrb[25].mxu0 }
 0x12f   : > { %v1022_v43 = vadd.f32 %v921_v39, %v501_v45  ;;  %v923_v36 = vsel %vm913_vm2, %v918_v21, %v922_v1  ;;  %v926_v44 = vrot.slane %v768_v22, 1  ;;  %v1401_v28 = vrot.slane %v1245_v25, 2  ;;  %v1247_v29 = vpop.f32.mrb[26].mxu0 }
 0x130   : > { %v1023_v31 = vadd.f32 %v923_v36, %v503_v32  ;;  %v925_v47 = vsel %vm913_vm2, %v920_v55, %v924_v19  ;;  %v1400_v48 = vsel %vm1384_vm3, %v1395_v27, %v1399_v24  ;;  %v1403_v5 = vrot.slane %v1247_v29, 2  ;;  %v1249_v58 = vpop.f32.mrb[27].mxu0 }
 0x131   : > { %v1024_v50 = vadd.f32 %v925_v47, %v507_v34  ;;  %v927_v8 = vsel %vm913_vm2, %v922_v1, %v926_v44  ;;  %v7617_v14 = vadd.f32 %v1392_v26, %v1022_v43  ;;  %v1402_v16 = vsel %vm1384_vm3, %v1397_v30, %v1401_v28 }
 0x132   : > { %v1025_v45 = vadd.f32 %v927_v8, %v509_v41  ;;  %v7620_v39 = vadd.f32 %v1394_v38, %v1023_v31  ;;  %v1404_v21 = vsel %vm1384_vm3, %v1399_v24, %v1403_v5  ;;  %v1405_v22 = vrot.slane %v1249_v58, 2 }
 0x133   : > { %v511_v32 = vadd.f32 %v7529_v52, %v7542_v61  ;;  %v772_v55 = vpop.f32.mrb[28].mxu1  ;;  %v1495_v27 = vadd.f32 %v1396_v33, %v1024_v50  ;;  %v513_v34 = vadd.f32 %v7533_v54, %v7548_v0  ;;  %v517_v38 = vadd.f32 %v7540_v60, %v7542_v61 }
 0x134   : > { %v928_v25 = vrot.slane %v772_v55, 1  ;;  %v774_v1 = vpop.f32.mrb[29].mxu1  ;;  %v1496_v26 = vadd.f32 %v1398_v57, %v1025_v45  ;;  %v1406_v43 = vsel %vm1384_vm3, %v1401_v28, %v1405_v22  ;;  %v519_v52 = vadd.f32 %v7546_v63, %v7548_v0 }
 0x135   : > { %v930_v30 = vrot.slane %v774_v1, 1  ;;  %v776_v41 = vpop.f32.mrb[30].mxu1  ;;  %1531 = vst [vmem:[#allocation2 + $0x20] sm:$0xff] %v1495_v27  ;;  %v1253_v58 = vpop.f32.mrb[28].mxu0 }
 0x136   : > { %v929_v33 = vsel %vm913_vm2, %v924_v19, %v928_v25  ;;  %v932_v24 = vrot.slane %v776_v41, 1  ;;  %v778_v36 = vpop.f32.mrb[31].mxu1  ;;  %1532 = vst [vmem:[#allocation2 + $0x28] sm:$0xff] %v1496_v26  ;;  %v1407_v54 = vrot.slane %v1253_v58, 2  ;;  %v1255_v29 = vpop.f32.mrb[29].mxu0 }
 0x137   : > { %v1026_v57 = vadd.f32 %v929_v33, %v511_v32  ;;  %v931_v28 = vsel %vm913_vm2, %v926_v44, %v930_v30  ;;  %v934_v31 = vrot.slane %v778_v36, 1  ;;  %v1409_v47 = vrot.slane %v1255_v29, 2  ;;  %v1257_v60 = vpop.f32.mrb[30].mxu0 }
 0x138   : > { %v1027_v50 = vadd.f32 %v931_v28, %v513_v34  ;;  %v933_v8 = vsel %vm913_vm2, %v928_v25, %v932_v24  ;;  %v1408_v45 = vsel %vm1384_vm3, %v1403_v5, %v1407_v54  ;;  %v1411_v55 = vrot.slane %v1257_v60, 2  ;;  %v1259_v63 = vpop.f32.mrb[31].mxu0 }
 0x139   : > { %v1028_v27 = vadd.f32 %v933_v8, %v517_v38  ;;  %v935_v19 = vsel %vm913_vm2, %v930_v30, %v934_v31  ;;  %v1497_v1 = vadd.f32 %v1400_v48, %v1026_v57  ;;  %v1410_v26 = vsel %vm1384_vm3, %v1405_v22, %v1409_v47 }
 0x13a   : > { %v1029_v41 = vadd.f32 %v935_v19, %v519_v52  ;;  %v7638_v32 = vadd.f32 %v1402_v16, %v1027_v50  ;;  %v1412_v44 = vsel %vm1384_vm3, %v1407_v54, %v1411_v55  ;;  %v1413_v58 = vrot.slane %v1259_v63, 2 }
 0x13b   : > { %v521_v34 = vadd.f32 %v7550_v3, %v7542_v61  ;;  %v782_v25 = vpop.f32.mrb[32].mxu1  ;;  %1533 = vst [vmem:[#allocation2 + $0x30] sm:$0xff] %v1497_v1  ;;  %v1499_v5 = vadd.f32 %v1404_v21, %v1028_v27  ;;  %v523_v38 = vadd.f32 %v7555_v6, %v7548_v0  ;;  %v527_v16 = vadd.f32 %v7560_v9, %v7542_v61 }
 0x13c   : > { %v936_v33 = vrot.slane %v782_v25, 1  ;;  %v784_v30 = vpop.f32.mrb[33].mxu1  ;;  %v1500_v48 = vadd.f32 %v1406_v43, %v1029_v41  ;;  %v1414_v22 = vsel %vm1384_vm3, %v1409_v47, %v1413_v58  ;;  %v529_v3 = vadd.f32 %v7565_v12, %v7548_v0 }
 0x13d   : > { %v938_v52 = vrot.slane %v784_v30, 1  ;;  %v786_v36 = vpop.f32.mrb[34].mxu1  ;;  %1535 = vst [vmem:[#allocation2 + $0x40] sm:$0xff] %v1499_v5  ;;  %v1263_v54 = vpop.f32.mrb[32].mxu0 }
 0x13e   : > { %v937_v21 = vsel %vm913_vm2, %v932_v24, %v936_v33  ;;  %v940_v29 = vrot.slane %v786_v36, 1  ;;  %v788_v57 = vpop.f32.mrb[35].mxu1  ;;  %1536 = vst [vmem:[#allocation2 + $0x48] sm:$0xff] %v1500_v48  ;;  %v1415_v6 = vrot.slane %v1263_v54, 2  ;;  %v1265_v28 = vpop.f32.mrb[33].mxu0 }
 0x13f   : > { %v1030_v43 = vadd.f32 %v937_v21, %v521_v34  ;;  %v939_v47 = vsel %vm913_vm2, %v934_v31, %v938_v52  ;;  %v942_v60 = vrot.slane %v788_v57, 1  ;;  %v1417_v50 = vrot.slane %v1265_v28, 2  ;;  %v1267_v9 = vpop.f32.mrb[34].mxu0 }
 0x140   : > { %v1031_v8 = vadd.f32 %v939_v47, %v523_v38  ;;  %v941_v63 = vsel %vm913_vm2, %v936_v33, %v940_v29  ;;  %v1416_v27 = vsel %vm1384_vm3, %v1411_v55, %v1415_v6  ;;  %v1419_v19 = vrot.slane %v1267_v9, 2  ;;  %v1269_v12 = vpop.f32.mrb[35].mxu0 }
 0x141   : > { %v1032_v1 = vadd.f32 %v941_v63, %v527_v16  ;;  %v943_v24 = vsel %vm913_vm2, %v938_v52, %v942_v60  ;;  %v1501_v41 = vadd.f32 %v1408_v45, %v1030_v43  ;;  %v1418_v25 = vsel %vm1384_vm3, %v1413_v58, %v1417_v50 }
 0x142   : > { %v1033_v5 = vadd.f32 %v943_v24, %v529_v3  ;;  %v1502_v34 = vadd.f32 %v1410_v26, %v1031_v8  ;;  %v1420_v31 = vsel %vm1384_vm3, %v1415_v6, %v1419_v19  ;;  %v1421_v30 = vrot.slane %v1269_v12, 2 }
 0x143   : > { %v531_v38 = vadd.f32 %v7570_v15, %v7542_v61  ;;  %v792_v48 = vpop.f32.mrb[36].mxu1  ;;  %1537 = vst [vmem:[#allocation2 + $0x50] sm:$0xff] %v1501_v41  ;;  %v1503_v33 = vadd.f32 %v1412_v44, %v1032_v1  ;;  %v533_v55 = vadd.f32 %v7575_v17, %v7548_v0  ;;  %v537_v26 = vadd.f32 %v7495_v35, %v7542_v61 }
 0x144   : > { %v944_v16 = vrot.slane %v792_v48, 1  ;;  %v794_v36 = vpop.f32.mrb[37].mxu1  ;;  %1538 = vst [vmem:[#allocation2 + $0x58] sm:$0xff] %v1502_v34  ;;  %v1504_v45 = vadd.f32 %v1414_v22, %v1033_v5  ;;  %v1422_v58 = vsel %vm1384_vm3, %v1417_v50, %v1421_v30  ;;  %v539_v15 = vadd.f32 %v7499_v37, %v7548_v0 }
 0x145   : > { %v946_v52 = vrot.slane %v794_v36, 1  ;;  %v796_v54 = vpop.f32.mrb[38].mxu1  ;;  %1539 = vst [vmem:[#allocation2 + $0x60] sm:$0xff] %v1503_v33  ;;  %v1273_v3 = vpop.f32.mrb[36].mxu0  ;;  %v547_v36 = vadd.f32 %v7518_v46, %v7542_v61 }
 0x146   : > { %v945_v44 = vsel %vm913_vm2, %v940_v29, %v944_v16  ;;  %v948_v21 = vrot.slane %v796_v54, 1  ;;  %v798_v17 = vpop.f32.mrb[39].mxu1  ;;  %1540 = vst [vmem:[#allocation2 + $0x68] sm:$0xff] %v1504_v45  ;;  %v1423_v57 = vrot.slane %v1273_v3, 2  ;;  %v1275_v6 = vpop.f32.mrb[37].mxu0 }
 0x147   : > { %v1034_v22 = vadd.f32 %v945_v44, %v531_v38  ;;  %v947_v28 = vsel %vm913_vm2, %v942_v60, %v946_v52  ;;  %v950_v43 = vrot.slane %v798_v17, 1  ;;  %v1425_v47 = vrot.slane %v1275_v6, 2  ;;  %v1277_v35 = vpop.f32.mrb[38].mxu0  ;;  %v6741_v38 = vld [vmem:[%s8607_s2 + $0x50] sm:$0xff]  }
 0x148   : > { %v1035_v50 = vadd.f32 %v947_v28, %v533_v55  ;;  %v949_v9 = vsel %vm913_vm2, %v944_v16, %v948_v21  ;;  %v1424_v8 = vsel %vm1384_vm3, %v1419_v19, %v1423_v57  ;;  %v1427_v63 = vrot.slane %v1277_v35, 2  ;;  %v1279_v37 = vpop.f32.mrb[39].mxu0  ;;  %6108 = vmatpush3.bf16.msra.mxu0 %v6741_v38 }
 0x149   : > { %v1036_v12 = vadd.f32 %v949_v9, %v537_v26  ;;  %v951_v29 = vsel %vm913_vm2, %v946_v52, %v950_v43  ;;  %v1505_v1 = vadd.f32 %v1416_v27, %v1034_v22  ;;  %v1426_v24 = vsel %vm1384_vm3, %v1421_v30, %v1425_v47 }
 0x14a   : > { %v1037_v41 = vadd.f32 %v951_v29, %v539_v15  ;;  %v1506_v5 = vadd.f32 %v1418_v25, %v1035_v50  ;;  %v1428_v60 = vsel %vm1384_vm3, %v1423_v57, %v1427_v63  ;;  %v1429_v34 = vrot.slane %v1279_v37, 2 }
 0x14b   : > { %v802_v48 = vpop.f32.mrb[40].mxu1  ;;  %1541 = vst [vmem:[#allocation2 + $0x70] sm:$0xff] %v1505_v1  ;;  %v1507_v19 = vadd.f32 %v1420_v31, %v1036_v12  ;;  %v541_v25 = vadd.f32 %v7506_v40, %v7542_v61  ;;  %v543_v30 = vadd.f32 %v7510_v42, %v7548_v0  ;;  %v8613_v52 = vmov 0.0   ;;  %v6742_v42 = vld [vmem:[%s8607_s2 + $0x58] sm:$0xff]  }
 0x14c   : > { %v952_v33 = vrot.slane %v802_v48, 1  ;;  %v804_v55 = vpop.f32.mrb[41].mxu1  ;;  %1542 = vst [vmem:[#allocation2 + $0x78] sm:$0xff] %v1506_v5  ;;  %v1508_v16 = vadd.f32 %v1422_v58, %v1037_v41  ;;  %v1430_v27 = vsel %vm1384_vm3, %v1425_v47, %v1429_v34  ;;  %6109 = vmatprep.subr.bf16.mxu0 %v8613_v52  ;;  %v549_v58 = vadd.f32 %v7523_v49, %v7548_v0 }
 0x14d   : > { %v954_v45 = vrot.slane %v804_v55, 1  ;;  %v806_v26 = vpop.f32.mrb[42].mxu1  ;;  %1543 = vst [vmem:[#allocation2 + $0x80] sm:$0xff] %v1507_v19  ;;  %v1283_v31 = vpop.f32.mrb[40].mxu0  ;;  %6110 = vmatpush3.bf16.msra.mxu0 %v6742_v42  ;;  %v553_v55 = vadd.f32 %v7531_v53, %v7548_v0 }
 0x14e   : > { %v953_v54 = vsel %vm913_vm2, %v948_v21, %v952_v33  ;;  %v956_v3 = vrot.slane %v806_v26, 1  ;;  %v808_v15 = vpop.f32.mrb[43].mxu1  ;;  %1544 = vst [vmem:[#allocation2 + $0x88] sm:$0xff] %v1508_v16  ;;  %v1431_v40 = vrot.slane %v1283_v31, 2  ;;  %v1285_v44 = vpop.f32.mrb[41].mxu0  ;;  %6111 = vmatprep.subr.bf16.mxu0 %v8613_v52 }
 0x14f   : > { %v1038_v46 = vadd.f32 %v953_v54, %v541_v25  ;;  %v955_v17 = vsel %vm913_vm2, %v950_v43, %v954_v45  ;;  %v958_v57 = vrot.slane %v808_v15, 1  ;;  %v1433_v6 = vrot.slane %v1285_v44, 2  ;;  %v1287_v22 = vpop.f32.mrb[42].mxu0 }
 0x150   : > { %v1039_v28 = vadd.f32 %v955_v17, %v543_v30  ;;  %v957_v49 = vsel %vm913_vm2, %v952_v33, %v956_v3  ;;  %v1432_v21 = vsel %vm1384_vm3, %v1427_v63, %v1431_v40  ;;  %v1435_v47 = vrot.slane %v1287_v22, 2  ;;  %v1289_v35 = vpop.f32.mrb[43].mxu0  ;;  %v6743_v63 = vld [vmem:[%s8607_s2 + $0x60] sm:$0xff]  }
 0x151   : > { %v1040_v50 = vadd.f32 %v957_v49, %v547_v36  ;;  %v959_v9 = vsel %vm913_vm2, %v954_v45, %v958_v57  ;;  %v1509_v37 = vadd.f32 %v1424_v8, %v1038_v46  ;;  %v1434_v12 = vsel %vm1384_vm3, %v1429_v34, %v1433_v6  ;;  %6112 = vmatpush3.bf16.msra.mxu0 %v6743_v63 }
 0x152   : > { %v1041_v43 = vadd.f32 %v959_v9, %v549_v58  ;;  %v1510_v29 = vadd.f32 %v1426_v24, %v1039_v28  ;;  %v1436_v1 = vsel %vm1384_vm3, %v1431_v40, %v1435_v47  ;;  %v1437_v41 = vrot.slane %v1289_v35, 2  ;;  %v6744_v24 = vld [vmem:[%s8607_s2 + $0x68] sm:$0xff]   ;;  %6113 = vmatprep.subr.bf16.mxu0 %v8613_v52 }
 0x153   : > { %v812_v5 = vpop.f32.mrb[44].mxu1  ;;  %1545 = vst [vmem:[#allocation2 + $0x90] sm:$0xff] %v1509_v37  ;;  %v1511_v38 = vadd.f32 %v1428_v60, %v1040_v50  ;;  %v551_v33 = vadd.f32 %v7527_v51, %v7542_v61  ;;  %v557_v60 = vadd.f32 %v7538_v59, %v7542_v61  ;;  %v559_v30 = vadd.f32 %v7544_v62, %v7548_v0  ;;  %v6745_v0 = vld [vmem:[%s8607_s2 + $0x70] sm:$0xff]  }
 0x154   : > { %v960_v48 = vrot.slane %v812_v5, 1  ;;  %v814_v19 = vpop.f32.mrb[45].mxu1  ;;  %1546 = vst [vmem:[#allocation2 + $0x98] sm:$0xff] %v1510_v29  ;;  %v1512_v8 = vadd.f32 %v1430_v27, %v1041_v43  ;;  %v1438_v34 = vsel %vm1384_vm3, %v1433_v6, %v1437_v41 }
 0x155   : > { %v962_v16 = vrot.slane %v814_v19, 1  ;;  %v816_v25 = vpop.f32.mrb[46].mxu1  ;;  %1547 = vst [vmem:[#allocation2 + $0xa0] sm:$0xff] %v1511_v38  ;;  %v1293_v27 = vpop.f32.mrb[44].mxu0  ;;  %6114 = vmatpush3.bf16.msra.mxu0 %v6744_v24 }
 0x156   : > { %v961_v36 = vsel %vm913_vm2, %v956_v3, %v960_v48  ;;  %v964_v45 = vrot.slane %v816_v25, 1  ;;  %v818_v26 = vpop.f32.mrb[47].mxu1  ;;  %1548 = vst [vmem:[#allocation2 + $0xa8] sm:$0xff] %v1512_v8  ;;  %v1439_v51 = vrot.slane %v1293_v27, 2  ;;  %v1295_v31 = vpop.f32.mrb[45].mxu0  ;;  %6115 = vmatprep.subr.bf16.mxu0 %v8613_v52 }
 0x157   : > { %v1042_v53 = vadd.f32 %v961_v36, %v551_v33  ;;  %v963_v58 = vsel %vm913_vm2, %v958_v57, %v962_v16  ;;  %v966_v59 = vrot.slane %v818_v26, 1  ;;  %v1441_v61 = vrot.slane %v1295_v31, 2  ;;  %v1297_v54 = vpop.f32.mrb[46].mxu0 }
 0x158   : > { %v1043_v15 = vadd.f32 %v963_v58, %v553_v55  ;;  %v965_v40 = vsel %vm913_vm2, %v960_v48, %v964_v45  ;;  %v1440_v44 = vsel %vm1384_vm3, %v1435_v47, %v1439_v51  ;;  %v1443_v42 = vrot.slane %v1297_v54, 2  ;;  %v1299_v62 = vpop.f32.mrb[47].mxu0 }
 0x159   : > { %v1044_v3 = vadd.f32 %v965_v40, %v557_v60  ;;  %v967_v46 = vsel %vm913_vm2, %v962_v16, %v966_v59  ;;  %v1513_v17 = vadd.f32 %v1432_v21, %v1042_v53  ;;  %v1442_v57 = vsel %vm1384_vm3, %v1437_v41, %v1441_v61  ;;  %6116 = vmatpush3.bf16.msra.mxu0 %v6745_v0  ;;  %v6746_v21 = vld [vmem:[%s8607_s2 + $0x78] sm:$0xff]  }
 0x15a   : > { %v1045_v6 = vadd.f32 %v967_v46, %v559_v30  ;;  %v1514_v22 = vadd.f32 %v1434_v12, %v1043_v15  ;;  %v1444_v28 = vsel %vm1384_vm3, %v1439_v51, %v1443_v42  ;;  %v1445_v49 = vrot.slane %v1299_v62, 2  ;;  %6117 = vmatprep.subr.bf16.mxu0 %v8613_v52 }
 0x15b   : > { %v822_v47 = vpop.f32.mrb[48].mxu1  ;;  %1549 = vst [vmem:[#allocation2 + $0xb0] sm:$0xff] %v1513_v17  ;;  %v1515_v35 = vadd.f32 %v1436_v1, %v1044_v3  ;;  %v875_v3 = vld [vmem:[#allocation2 + $0x110] sm:$0x3f] }
 0x15c   : > { %v968_v50 = vrot.slane %v822_v47, 1  ;;  %v824_v9 = vpop.f32.mrb[49].mxu1  ;;  %1550 = vst [vmem:[#allocation2 + $0xb8] sm:$0xff] %v1514_v22  ;;  %v1516_v37 = vadd.f32 %v1438_v34, %v1045_v6  ;;  %v1446_v43 = vsel %vm1384_vm3, %v1441_v61, %v1445_v49  ;;  %v876_v22 = vld [vmem:[#allocation2 + $0x118] sm:$0x3f] }
 0x15d   : > { %v970_v29 = vrot.slane %v824_v9, 1  ;;  %v826_v41 = vpop.f32.mrb[50].mxu1  ;;  %1551 = vst [vmem:[#allocation2 + $0xc0] sm:$0xff] %v1515_v35  ;;  %v1303_v12 = vpop.f32.mrb[48].mxu0  ;;  %6118 = vmatpush3.bf16.msra.mxu0 %v6746_v21 }
 0x15e   : > { %v969_v63 = vsel %vm913_vm2, %v964_v45, %v968_v50  ;;  %v972_v1 = vrot.slane %v826_v41, 1  ;;  %v828_v5 = vpop.f32.mrb[51].mxu1  ;;  %1552 = vst [vmem:[#allocation2 + $0xc8] sm:$0xff] %v1516_v37  ;;  %v1447_v38 = vrot.slane %v1303_v12, 2  ;;  %v1305_v48 = vpop.f32.mrb[49].mxu0  ;;  %6123 = vmatprep.subr.bf16.mxu0 %v8613_v52 }
 0x15f   : > { %v1046_v19 = vadd.f32 %v969_v63, %v7553_v4  ;;  %v971_v8 = vsel %vm913_vm2, %v966_v59, %v970_v29  ;;  %v974_v34 = vrot.slane %v828_v5, 1  ;;  %v1449_v24 = vrot.slane %v1305_v48, 2  ;;  %v1307_v33 = vpop.f32.mrb[50].mxu0 }
 0x160   : > { %v1047_v55 = vadd.f32 %v971_v8, %v7558_v7  ;;  %v973_v60 = vsel %vm913_vm2, %v968_v50, %v972_v1  ;;  %v1448_v16 = vsel %vm1384_vm3, %v1443_v42, %v1447_v38  ;;  %v1451_v25 = vrot.slane %v1307_v33, 2  ;;  %v1309_v27 = vpop.f32.mrb[51].mxu0 }
 0x161   : > { %v1048_v30 = vadd.f32 %v973_v60, %v7563_v10  ;;  %v975_v36 = vsel %vm913_vm2, %v970_v29, %v974_v34  ;;  %v1517_v45 = vadd.f32 %v1440_v44, %v1046_v19  ;;  %v1450_v4 = vsel %vm1384_vm3, %v1445_v49, %v1449_v24 }
 0x162   : > { %v1049_v26 = vadd.f32 %v975_v36, %v7568_v13  ;;  %v1518_v51 = vadd.f32 %v1442_v57, %v1047_v55  ;;  %v1452_v7 = vsel %vm1384_vm3, %v1447_v38, %v1451_v25  ;;  %v1453_v31 = vrot.slane %v1309_v27, 2 }
 0x163   : > { %v832_v53 = vpop.f32.mrb[52].mxu1  ;;  %1553 = vst [vmem:[#allocation2 + $0xd0] sm:$0xff] %v1517_v45  ;;  %v1519_v58 = vadd.f32 %v1444_v28, %v1048_v30  ;;  %v1973_v45 = vld [vmem:[#allocation3] sm:$0xf] }
 0x164   : > { %v976_v59 = vrot.slane %v832_v53, 1  ;;  %v834_v61 = vpop.f32.mrb[53].mxu1  ;;  %1554 = vst [vmem:[#allocation2 + $0xd8] sm:$0xff] %v1518_v51  ;;  %v1520_v10 = vadd.f32 %v1446_v43, %v1049_v26  ;;  %v1454_v54 = vsel %vm1384_vm3, %v1449_v24, %v1453_v31  ;;  %v1979_v53 = vld [vmem:[#allocation3 + $0x8] sm:$0x1]  ;;  %v6857_v26 = vld [vmem:[%s8607_s2] sm:$0xff]  }
 0x165   : > { %v978_v15 = vrot.slane %v834_v61, 1  ;;  %v836_v40 = vpop.f32.mrb[54].mxu1  ;;  %1555 = vst [vmem:[#allocation2 + $0xe0] sm:$0xff] %v1519_v58 }
 0x166   : > { %v977_v44 = vsel %vm913_vm2, %v972_v1, %v976_v59  ;;  %v980_v42 = vrot.slane %v836_v40, 1  ;;  %v838_v13 = vpop.f32.mrb[55].mxu1  ;;  %1556 = vst [vmem:[#allocation2 + $0xe8] sm:$0xff] %v1520_v10 }
 0x167   : > { %v1050_v62 = vadd.f32 %v977_v44, %v7573_v2  ;;  %v979_v0 = vsel %vm913_vm2, %v974_v34, %v978_v15  ;;  %v982_v46 = vrot.slane %v838_v13, 1 }
 0x168   : > { %v1051_v17 = vadd.f32 %v979_v0, %v7578_v18  ;;  %v981_v57 = vsel %vm913_vm2, %v976_v59, %v980_v42  ;;  %v1054_v6 = vadd.f32 %v980_v42, %v875_v3 }
 0x169   : > { %v1052_v28 = vadd.f32 %v981_v57, %v7581_v20  ;;  %v983_v49 = vsel %vm913_vm2, %v978_v15, %v982_v46  ;;  %v1055_v47 = vadd.f32 %v982_v46, %v876_v22  ;;  %v1521_v35 = vadd.f32 %v1448_v16, %v1050_v62 }
 0x16a   : > { %1090 = vst [vmem:[#allocation2 + $0x110] sm:$0x3f] %v1054_v6  ;;  %v1053_v50 = vadd.f32 %v983_v49, %v7584_v23  ;;  %v1522_v2 = vadd.f32 %v1450_v4, %v1051_v17  ;;  %v6749_v6 = vld [vmem:[%s8607_s2] sm:$0xff]   ;;  %v6751_v49 = vld [vmem:[%s8607_s2 + $0x10] sm:$0xff]  }
 0x16b   : > { %1091 = vst [vmem:[#allocation2 + $0x118] sm:$0x3f] %v1055_v47  ;;  %1557 = vst [vmem:[#allocation2 + $0xf0] sm:$0xff] %v1521_v35  ;;  %v1523_v9 = vadd.f32 %v1452_v7, %v1052_v28  ;;  %v6750_v28 = vld [vmem:[%s8607_s2 + $0x8] sm:$0xff]   ;;  %v6752_v47 = vld [vmem:[%s8607_s2 + $0x18] sm:$0xff]  }
 0x16c   : > { %1558 = vst [vmem:[#allocation2 + $0xf8] sm:$0xff] %v1522_v2  ;;  %v1524_v37 = vadd.f32 %v1454_v54, %v1053_v50  ;;  %v6753_v35 = vld [vmem:[%s8607_s2 + $0x20] sm:$0xff]   ;;  %v6754_v50 = vld [vmem:[%s8607_s2 + $0x28] sm:$0xff]   ;;  %v6755_v2 = vld [vmem:[%s8607_s2 + $0x30] sm:$0xff]  }
 0x16d   : > { %1559 = vst [vmem:[#allocation2 + $0x100] sm:$0xff] %v1523_v9  ;;  %v6756_v9 = vld [vmem:[%s8607_s2 + $0x38] sm:$0xff]  }
 0x16e   : > { %1560 = vst [vmem:[#allocation2 + $0x108] sm:$0xff] %v1524_v37  ;;  %v6757_v37 = vld [vmem:[%s8607_s2 + $0x80] sm:$0xff]  }
 0x171   : > { %v1346_v18 = vld [vmem:[#allocation2 + $0x110] sm:$0x3f] }
 0x172   : > { %v1525_v43 = vadd.f32 %v1451_v25, %v1346_v18  ;;  %v1347_v21 = vld [vmem:[#allocation2 + $0x118] sm:$0x3f]  ;;  %v6758_v18 = vld [vmem:[%s8607_s2 + $0x88] sm:$0xff]  }
 0x173   : > { %v1526_v29 = vadd.f32 %v1453_v31, %v1347_v21  ;;  %v6760_v21 = vld [vmem:[%s8607_s2 + $0x98] sm:$0xff]  }
 0x174   : > { %1561 = vst [vmem:[#allocation2 + $0x110] sm:$0x3f] %v1525_v43  ;;  %v6759_v43 = vld [vmem:[%s8607_s2 + $0x90] sm:$0xff]  }
 0x175   : > { %1562 = vst [vmem:[#allocation2 + $0x118] sm:$0x3f] %v1526_v29  ;;  %v6761_v29 = vld [vmem:[%s8607_s2 + $0xa0] sm:$0xff]  }
 0x1ab   : > { %v1908_v20 = vpop.f32.mrb[56].mxu1 }
 0x1ac   : > { %v1923_v41 = vadd.f32 %v1908_v20, %v7606_v11  ;;  %v6101_v12 = vpop.f32.mrb[57].mxu1  ;;  %v6762_v20 = vld [vmem:[%s8607_s2 + $0xa8] sm:$0xff]  }
 0x1ad   : > { %v1911_v23 = vpop.f32.mrb[58].mxu1 }
 0x1ae   : > { %v5342_v63 = vmul.f32 -1.442695, %v1923_v41  ;;  %v1924_v1 = vadd.f32 %v1911_v23, %v7620_v39  ;;  %v6102_v5 = vpop.f32.mrb[59].mxu1  ;;  %v6763_v41 = vld [vmem:[%s8607_s2 + $0xb0] sm:$0xff]  }
 0x1b0   : > { %6928 = vpow2.f32 %v5342_v63  ;;  %v5343_v38 = vmul.f32 -1.442695, %v1924_v1  ;;  %v6764_v63 = vld [vmem:[%s8607_s2 + $0xb8] sm:$0xff]  }
 0x1b2   : > { %6930 = vpow2.f32 %v5343_v38 }
 0x1b3   : > { %6932 = vtanh.f32 %v7601_v56 }
 0x1ba   : > { %v6929_v48 = vpop.eup %6928 }
 0x1bb   : > { %v1931_v19 = vadd.f32 1.0, %v6929_v48  ;;  %v6766_v48 = vld [vmem:[%s8607_s2 + $0x40] sm:$0xff]  }
 0x1bc   : > { %v6931_v8 = vpop.eup %6930  ;;  %6164 = vmatpush3.bf16.msra.mxu1 %v6766_v48 }
 0x1bd   : > { %6934 = vrcp.f32 %v1931_v19  ;;  %v1932_v34 = vadd.f32 1.0, %v6931_v8  ;;  %v6933_v11 = vpop.eup %6932  ;;  %6165 = vmatprep.subr.bf16.mxu1 %v8613_v52  ;;  %v6767_v19 = vld [vmem:[%s8607_s2 + $0x48] sm:$0xff]   ;;  %v6768_v8 = vld [vmem:[%s8607_s2 + $0x50] sm:$0xff]  }
 0x1be   : > { %6936 = vtanh.f32 %v7617_v14 }
 0x1bf   : > { %6938 = vrcp.f32 %v1932_v34  ;;  %v6769_v34 = vld [vmem:[%s8607_s2 + $0x58] sm:$0xff]  }
 0x1c0   : > { %6166 = vmatpush3.bf16.msra.mxu1 %v6767_v19 }
 0x1c1   : > { %6167 = vmatprep.subr.bf16.mxu1 %v8613_v52 }
 0x1c4   : > { %6168 = vmatpush3.bf16.msra.mxu1 %v6768_v8 }
 0x1c5   : > { %6169 = vmatprep.subr.bf16.mxu1 %v8613_v52 }
 0x1c7   : > { %v6935_v24 = vpop.eup %6934 }
 0x1c8   : > { %v6937_v39 = vpop.eup %6936  ;;  %v1937_v33 = vmul.f32 %v6935_v24, %v6933_v11  ;;  %v5805_v55 = vpack.c.bf16 %v6935_v24, %v6935_v24  ;;  %6170 = vmatpush3.bf16.msra.mxu1 %v6769_v34  ;;  %v6770_v11 = vld [vmem:[%s8607_s2 + $0x60] sm:$0xff]   ;;  %v6771_v24 = vld [vmem:[%s8607_s2 + $0x68] sm:$0xff]  }
 0x1c9   : > { %v6939_v60 = vpop.eup %6938  ;;  %6171 = vmatprep.subr.bf16.mxu1 %v8613_v52 }
 0x1ca   : > { %1939 = vst [vmem:[%s7758_s26] sm:$0xff] %v1937_v33  ;;  %v1951_v56 = vshrl.u32 %v5805_v55, 16  ;;  %v1938_v14 = vmul.f32 %v6939_v60, %v6937_v39  ;;  %v5806_v16 = vpack.c.bf16 %v6939_v60, %v6939_v60  ;;  %v1954_v27 = vshll.u32 %v5805_v55, 16  ;;  %v6772_v39 = vld [vmem:[%s8607_s2 + $0x70] sm:$0xff]   ;;  %v6773_v33 = vld [vmem:[%s8607_s2 + $0x78] sm:$0xff]  }
 0x1cc   : > { %v1953_v25 = vrot.slane %v1951_v56, 7  ;;  %1940 = vst [vmem:[%s7758_s26 + $0x8] sm:$0xff] %v1938_v14  ;;  %v1959_v30 = vshrl.u32 %v5806_v16, 16  ;;  %v1962_v7 = vshll.u32 %v5806_v16, 16  ;;  %6172 = vmatpush3.bf16.msra.mxu1 %v6770_v11  ;;  %v2333_v14 = vld [vmem:[#allocation2 + $0x28] sm:$0xfc] }
 0x1cd   : > { %6173 = vmatprep.subr.bf16.mxu1 %v8613_v52 }
 0x1ce   : > { %v1956_v4 = vor.u32 %v1954_v27, %v1953_v25  ;;  %v1961_v51 = vrot.slane %v1959_v30, 7  ;;  %v1957_v58 = vrot.slane %v1953_v25, 4 }
 0x1d0   : > { %v1974_v59 = vsel %vm7763_vm9, %v1956_v4, %v1973_v45  ;;  %v1964_v61 = vor.u32 %v1962_v7, %v1961_v51  ;;  %v1966_v10 = vrot.slane %v1961_v51, 4  ;;  %6174 = vmatpush3.bf16.msra.mxu1 %v6771_v24  ;;  %v2337_v45 = vld [vmem:[#allocation2 + $0x48] sm:$0x3] }
 0x1d1   : > { %1975 = vst [vmem:[#allocation3] sm:$0xf] %v1974_v59  ;;  %6175 = vmatprep.subr.bf16.mxu1 %v8613_v52 }
 0x1d2   : > { %v1965_v54 = vsel %vm7767_vm10, %v1957_v58, %v1964_v61  ;;  %v1980_v15 = vsel %vm7771_vm11, %v1966_v10, %v1979_v53  ;;  %v2332_v61 = vld [vmem:[#allocation2 + $0x20] sm:$0xfc]  ;;  %v2334_v10 = vld [vmem:[#allocation2 + $0x30] sm:$0xff] }
 0x1d3   : > { %1976 = vst [vmem:[#allocation3 + $0x4] sm:$0xf] %v1965_v54  ;;  %1981 = vst [vmem:[#allocation3 + $0x8] sm:$0x1] %v1980_v15 }
 0x1d4   : > { %6176 = vmatpush3.bf16.msra.mxu1 %v6772_v39 }
 0x1d5   : > { %6177 = vmatprep.subr.bf16.mxu1 %v8613_v52 }
 0x1d8   : > { %v1982_v40 = vld [vmem:[#allocation3] sm:$0xf]  ;;  %6178 = vmatpush3.bf16.msra.mxu1 %v6773_v33 }
 0x1d9   : > { %v2217_v12 = vld [vmem:[#allocation3] sm:$0xe]  ;;  %6183 = vmatprep.subr.bf16.mxu1 %v8613_v52 }
 0x1da   : > { %v1983_v44 = vld [vmem:[#allocation3 + $0x4] sm:$0xf]  ;;  %v7781_v13 = vld [vmem:[#allocation3 + $0x8] ss:$0 sps:$4 sm:$0x11]  }
 0x1db   : > { %v5362_v42 = vcombine.low %v1982_v40, %v1983_v44  ;;  %v2033_v0 = vshll.u32 %v7781_v13, 16  ;;  %v5396_v23 = vcombine.low %v2217_v12, %v1983_v44  ;;  %v2238_v5 = vrot.slane %v7781_v13, 1  ;;  %v2336_v40 = vld [vmem:[#allocation2 + $0x40] sm:$0x3] }
 0x1dc   : > { %v2421_v19 = vld [vmem:[#allocation3] sm:$0xf] }
 0x1dd   : > { %v2028_v62 = vshll.u32 %v5362_v42, 16  ;;  %v2026_v3 = vshrl.u32 %v5362_v42, 16  ;;  %v2035_v57 = vrot.slane %v2033_v0, 1  ;;  %v2237_v1 = vrot.slane %v5396_v23, 1 }
 0x1df   : > { %v2030_v46 = vrot.slane %v2028_v62, 1  ;;  %v2239_v38 = vsel %vm913_vm2, %v2237_v1, %v2238_v5 }
 0x1e1   : > { %v2031_v17 = vor.u32 %v2030_v46, %v2026_v3 }
 0x1e3   : > { %v2036_v22 = vsel %vm1607_vm0, %v2031_v17, %v2035_v57 }
 0x1e4   : > { %6120 = vmatmul.mubr.bf16.vlgmr.msra.gmra.mrb[52].mxu0 %v2036_v22 }
 0x1e5   : > { %6124 = vmatpush3.bf16.msra.mxu0 %v6749_v6  ;;  %6139 = vmatprep.mubr.msk.bf16.mxu0 %vm7087_vm1, %v8613_v52 }
 0x1e6   : > { %6125 = vmatprep.subr.bf16.mxu0 %v8613_v52 }
 0x1e9   : > { %6126 = vmatpush3.bf16.msra.mxu0 %v6750_v28 }
 0x1ea   : > { %6127 = vmatprep.subr.bf16.mxu0 %v8613_v52 }
 0x1ed   : > { %6128 = vmatpush3.bf16.msra.mxu0 %v6751_v49 }
 0x1ee   : > { %6129 = vmatprep.subr.bf16.mxu0 %v8613_v52 }
 0x1f1   : > { %6130 = vmatpush3.bf16.msra.mxu0 %v6752_v47 }
 0x1f2   : > { %6131 = vmatprep.subr.bf16.mxu0 %v8613_v52 }
 0x1f5   : > { %6132 = vmatpush3.bf16.msra.mxu0 %v6753_v35 }
 0x1f6   : > { %6133 = vmatprep.subr.bf16.mxu0 %v8613_v52 }
 0x1f9   : > { %6134 = vmatpush3.bf16.msra.mxu0 %v6754_v50 }
 0x1fa   : > { %6135 = vmatprep.subr.bf16.mxu0 %v8613_v52 }
 0x1fd   : > { %6136 = vmatpush3.bf16.msra.mxu0 %v6755_v2 }
 0x1fe   : > { %6137 = vmatprep.subr.bf16.mxu0 %v8613_v52 }
 0x201   : > { %6138 = vmatpush3.bf16.msra.mxu0 %v6756_v9 }
 0x202   : > { %6143 = vmatprep.subr.bf16.mxu0 %v8613_v52 }
 0x204   : > { %6140 = vmatmul.mubr.bf16.vlgmr.msra.gmra.mrb[52].mxu0 %v5362_v42 }
 0x205   : > { %6144 = vmatpush3.bf16.msra.mxu0 %v6757_v37  ;;  %6159 = vmatprep.mubr.msk.bf16.mxu0 %vm7087_vm1, %v8613_v52 }
 0x206   : > { %6145 = vmatprep.subr.bf16.mxu0 %v8613_v52 }
 0x209   : > { %6146 = vmatpush3.bf16.msra.mxu0 %v6758_v18 }
 0x20a   : > { %6147 = vmatprep.subr.bf16.mxu0 %v8613_v52 }
 0x20d   : > { %6148 = vmatpush3.bf16.msra.mxu0 %v6759_v43 }
 0x20e   : > { %6149 = vmatprep.subr.bf16.mxu0 %v8613_v52 }
 0x211   : > { %6150 = vmatpush3.bf16.msra.mxu0 %v6760_v21 }
 0x212   : > { %6151 = vmatprep.subr.bf16.mxu0 %v8613_v52 }
 0x215   : > { %6152 = vmatpush3.bf16.msra.mxu0 %v6761_v29  ;;  %v2425_v29 = vld [vmem:[#allocation3 + $0x8] sm:$0x1] }
 0x216   : > { %6153 = vmatprep.subr.bf16.mxu0 %v8613_v52 }
 0x219   : > { %6154 = vmatpush3.bf16.msra.mxu0 %v6762_v20 }
 0x21a   : > { %6155 = vmatprep.subr.bf16.mxu0 %v8613_v52 }
 0x21d   : > { %6156 = vmatpush3.bf16.msra.mxu0 %v6763_v41 }
 0x21e   : > { %6157 = vmatprep.subr.bf16.mxu0 %v8613_v52 }
 0x221   : > { %6158 = vmatpush3.bf16.msra.mxu0 %v6764_v63 }
 0x222   : > { %6223 = vmatprep.subr.bf16.mxu0 %v8613_v52 }
 0x224   : > { %6160 = vmatmul.mubr.bf16.vlgmr.msra.gmra.mrb[52].mxu0 %v2239_v38 }
 0x225   : > { %6239 = vmatprep.mubr.msk.bf16.mxu0 %vm7087_vm1, %v8613_v52 }
 0x2f7   : > { %v2323_v55 = vpop.f32.mrb[52].mxu0 }
 0x2f8   : > { %v2344_v60 = vrot.slane %v2323_v55, 6  ;;  %v6161_v56 = vpop.f32.mrb[53].mxu0 }
 0x2f9   : > { %v2326_v16 = vpop.f32.mrb[54].mxu0 }
 0x2fa   : > { %v2350_v25 = vadd.f32 %v2344_v60, %v2333_v14  ;;  %v2345_v27 = vrot.slane %v2326_v16, 6  ;;  %v6162_v30 = vpop.f32.mrb[55].mxu0 }
 0x2fc   : > { %v5405_v4 = vmul.f32 -1.442695, %v2350_v25  ;;  %v2346_v51 = vsel %vm2343_vm12, %v2344_v60, %v2345_v27  ;;  %v2352_v7 = vadd.f32 %v2345_v27, %v2337_v45  ;;  %v6776_v45 = vld [vmem:[%s8607_s2] sm:$0xff]  }
 0x2fd   : > { %v2351_v53 = vadd.f32 %v2346_v51, %v7638_v32  ;;  %v6777_v51 = vld [vmem:[%s8607_s2 + $0x8] sm:$0xff]  }
 0x2fe   : > { %6940 = vpow2.f32 %v5405_v4  ;;  %v5407_v58 = vmul.f32 -1.442695, %v2352_v7  ;;  %v6778_v7 = vld [vmem:[%s8607_s2 + $0x10] sm:$0xff]  }
 0x2ff   : > { %v5406_v59 = vmul.f32 -1.442695, %v2351_v53  ;;  %v6779_v53 = vld [vmem:[%s8607_s2 + $0x18] sm:$0xff]  }
 0x300   : > { %6942 = vpow2.f32 %v5407_v58  ;;  %v6780_v58 = vld [vmem:[%s8607_s2 + $0x20] sm:$0xff]  }
 0x301   : > { %6944 = vpow2.f32 %v5406_v59  ;;  %v6781_v59 = vld [vmem:[%s8607_s2 + $0x28] sm:$0xff]  }
 0x302   : > { %6946 = vtanh.f32 %v2332_v61  ;;  %v6782_v61 = vld [vmem:[%s8607_s2 + $0x30] sm:$0xff]  }
 0x303   : > { %6948 = vtanh.f32 %v2334_v10  ;;  %v6783_v10 = vld [vmem:[%s8607_s2 + $0x38] sm:$0xff]  }
 0x308   : > { %v6941_v54 = vpop.eup %6940 }
 0x309   : > { %v2362_v15 = vadd.f32 1.0, %v6941_v54  ;;  %v6784_v54 = vld [vmem:[%s8607_s2 + $0x80] sm:$0xff]  }
 0x30a   : > { %v6943_v44 = vpop.eup %6942 }
 0x30b   : > { %v6945_v42 = vpop.eup %6944  ;;  %6950 = vrcp.f32 %v2362_v15  ;;  %v2364_v13 = vadd.f32 1.0, %v6943_v44  ;;  %v6785_v15 = vld [vmem:[%s8607_s2 + $0x88] sm:$0xff]   ;;  %v6787_v44 = vld [vmem:[%s8607_s2 + $0x98] sm:$0xff]  }
 0x30c   : > { %6952 = vtanh.f32 %v2336_v40  ;;  %v2363_v62 = vadd.f32 1.0, %v6945_v42  ;;  %v6947_v32 = vpop.eup %6946  ;;  %v6786_v40 = vld [vmem:[%s8607_s2 + $0x90] sm:$0xff]   ;;  %v6788_v42 = vld [vmem:[%s8607_s2 + $0xa0] sm:$0xff]  }
 0x30d   : > { %6954 = vrcp.f32 %v2364_v13  ;;  %v6949_v0 = vpop.eup %6948  ;;  %v6789_v13 = vld [vmem:[%s8607_s2 + $0xa8] sm:$0xff]  }
 0x30e   : > { %6956 = vrcp.f32 %v2363_v62  ;;  %v6790_v62 = vld [vmem:[%s8607_s2 + $0xb0] sm:$0xff]  }
 0x315   : > { %v6951_v3 = vpop.eup %6950 }
 0x316   : > { %v6953_v46 = vpop.eup %6952  ;;  %v2371_v17 = vmul.f32 %v6951_v3, %v6947_v32  ;;  %v5807_v57 = vpack.c.bf16 %v6951_v3, %v6951_v3  ;;  %v6791_v3 = vld [vmem:[%s8607_s2 + $0xb8] sm:$0xff]  }
 0x317   : > { %v6955_v6 = vpop.eup %6954 }
 0x318   : > { %v6957_v22 = vpop.eup %6956  ;;  %2374 = vst [vmem:[%s7758_s26 + $0xe] sm:$0xfc] %v2371_v17  ;;  %v2391_v28 = vshrl.u32 %v5807_v57, 16  ;;  %v2394_v49 = vshll.u32 %v5807_v57, 16  ;;  %v2373_v47 = vmul.f32 %v6955_v6, %v6953_v46  ;;  %v5809_v35 = vpack.c.bf16 %v6955_v6, %v6955_v6  ;;  %v6793_v6 = vld [vmem:[%s8607_s2 + $0x40] sm:$0xff]  }
 0x319   : > { %v2372_v50 = vmul.f32 %v6957_v22, %v6949_v0  ;;  %v5808_v2 = vpack.c.bf16 %v6957_v22, %v6957_v22  ;;  %6224 = vmatpush3.bf16.msra.mxu0 %v6793_v6  ;;  %v6794_v22 = vld [vmem:[%s8607_s2 + $0x48] sm:$0xff]  }
 0x31a   : > { %v2393_v9 = vrot.slane %v2391_v28, 4  ;;  %v2396_v37 = vrot.slane %v2394_v49, 5  ;;  %2376 = vst [vmem:[%s7758_s26 + $0x1e] sm:$0x3] %v2373_v47  ;;  %v2414_v18 = vshrl.u32 %v5809_v35, 16  ;;  %v2410_v1 = vshll.u32 %v5809_v35, 16  ;;  %6225 = vmatprep.subr.bf16.mxu0 %v8613_v52 }
 0x31b   : > { %2375 = vst [vmem:[%s7758_s26 + $0x16] sm:$0xff] %v2372_v50  ;;  %v2400_v43 = vshll.u32 %v5808_v2, 16  ;;  %v2404_v21 = vshrl.u32 %v5808_v2, 16  ;;  %v6795_v28 = vld [vmem:[%s8607_s2 + $0x50] sm:$0xff]   ;;  %v6796_v49 = vld [vmem:[%s8607_s2 + $0x58] sm:$0xff]   ;;  %v6797_v47 = vld [vmem:[%s8607_s2 + $0x60] sm:$0xff]  }
 0x31c   : > { %v2397_v20 = vor.u32 %v2396_v37, %v2393_v9  ;;  %v2426_v41 = vsel %vm7771_vm11, %v2414_v18, %v2425_v29  ;;  %v2412_v34 = vrot.slane %v2410_v1, 5  ;;  %v6798_v35 = vld [vmem:[%s8607_s2 + $0x68] sm:$0xff]   ;;  %v6799_v50 = vld [vmem:[%s8607_s2 + $0x70] sm:$0xff]   ;;  %v6800_v2 = vld [vmem:[%s8607_s2 + $0x78] sm:$0xff]  }
 0x31d   : > { %v2402_v23 = vrot.slane %v2400_v43, 5  ;;  %v2406_v63 = vrot.slane %v2404_v21, 4  ;;  %2427 = vst [vmem:[#allocation3 + $0x8] sm:$0x1] %v2426_v41  ;;  %6226 = vmatpush3.bf16.msra.mxu0 %v6794_v22  ;;  %v2779_v43 = vld [vmem:[#allocation2 + $0x48] sm:$0xf0] }
 0x31e   : > { %v2398_v5 = vrot.slane %v2397_v20, 4  ;;  %6227 = vmatprep.subr.bf16.mxu0 %v8613_v52  ;;  %v2781_v1 = vld [vmem:[#allocation2 + $0x58] sm:$0xff] }
 0x31f   : > { %v2407_v38 = vor.u32 %v2406_v63, %v2402_v23 }
 0x320   : > { %v2403_v48 = vsel %vm7896_vm15, %v2398_v5, %v2402_v23  ;;  %v2783_v23 = vld [vmem:[#allocation2 + $0x68] sm:$0xf] }
 0x321   : > { %v2408_v8 = vrot.slane %v2407_v38, 4  ;;  %v2422_v11 = vsel %vm7763_vm9, %v2403_v48, %v2421_v19  ;;  %6228 = vmatpush3.bf16.msra.mxu0 %v6795_v28 }
 0x322   : > { %2423 = vst [vmem:[#allocation3] sm:$0xf] %v2422_v11  ;;  %6229 = vmatprep.subr.bf16.mxu0 %v8613_v52  ;;  %v2780_v11 = vld [vmem:[#allocation2 + $0x50] sm:$0xff] }
 0x323   : > { %v2413_v24 = vsel %vm7896_vm15, %v2408_v8, %v2412_v34  ;;  %v2778_v34 = vld [vmem:[#allocation2 + $0x40] sm:$0xf0] }
 0x324   : > { %2424 = vst [vmem:[#allocation3 + $0x4] sm:$0xf] %v2413_v24  ;;  %v7906_v39 = vld [vmem:[#allocation3 + $0x8] ss:$0 sps:$4 sm:$0x11]  }
 0x325   : > { %v2479_v14 = vshll.u32 %v7906_v39, 16  ;;  %v2684_v17 = vrot.slane %v7906_v39, 1  ;;  %6230 = vmatpush3.bf16.msra.mxu0 %v6796_v49  ;;  %v2872_v49 = vld [vmem:[#allocation3 + $0x8] sm:$0x1] }
 0x326   : > { %6231 = vmatprep.subr.bf16.mxu0 %v8613_v52 }
 0x327   : > { %v2481_v30 = vrot.slane %v2479_v14, 1 }
 0x329   : > { %v2428_v33 = vld [vmem:[#allocation3] sm:$0xf]  ;;  %6232 = vmatpush3.bf16.msra.mxu0 %v6797_v47 }
 0x32a   : > { %v2663_v32 = vld [vmem:[#allocation3] sm:$0xe]  ;;  %6233 = vmatprep.subr.bf16.mxu0 %v8613_v52 }
 0x32b   : > { %v2429_v55 = vld [vmem:[#allocation3 + $0x4] sm:$0xf] }
 0x32c   : > { %v5428_v60 = vcombine.low %v2428_v33, %v2429_v55  ;;  %v5462_v0 = vcombine.low %v2663_v32, %v2429_v55  ;;  %v2782_v33 = vld [vmem:[#allocation2 + $0x60] sm:$0xf] }
 0x32d   : > { %6234 = vmatpush3.bf16.msra.mxu0 %v6798_v35 }
 0x32e   : > { %v2474_v56 = vshll.u32 %v5428_v60, 16  ;;  %v2472_v16 = vshrl.u32 %v5428_v60, 16  ;;  %v2683_v46 = vrot.slane %v5462_v0, 1  ;;  %6235 = vmatprep.subr.bf16.mxu0 %v8613_v52 }
 0x330   : > { %v2476_v25 = vrot.slane %v2474_v56, 1  ;;  %v2685_v57 = vsel %vm913_vm2, %v2683_v46, %v2684_v17 }
 0x331   : > { %6236 = vmatpush3.bf16.msra.mxu0 %v6799_v50 }
 0x332   : > { %v2477_v27 = vor.u32 %v2476_v25, %v2472_v16  ;;  %6237 = vmatprep.subr.bf16.mxu0 %v8613_v52 }
 0x334   : > { %v2482_v4 = vsel %vm1607_vm0, %v2477_v27, %v2481_v30 }
 0x335   : > { %6180 = vmatmul.mubr.bf16.vlgmr.msra.gmra.mrb[60].mxu1 %v2482_v4  ;;  %6238 = vmatpush3.bf16.msra.mxu0 %v6800_v2 }
 0x336   : > { %6184 = vmatpush3.bf16.msra.mxu1 %v6776_v45  ;;  %6199 = vmatprep.mubr.msk.bf16.mxu1 %vm7087_vm1, %v8613_v52 }
 0x337   : > { %6185 = vmatprep.subr.bf16.mxu1 %v8613_v52  ;;  %6243 = vmatprep.subr.bf16.mxu0 %v8613_v52 }
 0x33a   : > { %6186 = vmatpush3.bf16.msra.mxu1 %v6777_v51 }
 0x33b   : > { %6187 = vmatprep.subr.bf16.mxu1 %v8613_v52 }
 0x33e   : > { %6188 = vmatpush3.bf16.msra.mxu1 %v6778_v7 }
 0x33f   : > { %6189 = vmatprep.subr.bf16.mxu1 %v8613_v52 }
 0x342   : > { %6190 = vmatpush3.bf16.msra.mxu1 %v6779_v53 }
 0x343   : > { %6191 = vmatprep.subr.bf16.mxu1 %v8613_v52 }
 0x346   : > { %6192 = vmatpush3.bf16.msra.mxu1 %v6780_v58 }
 0x347   : > { %6193 = vmatprep.subr.bf16.mxu1 %v8613_v52 }
 0x34a   : > { %6194 = vmatpush3.bf16.msra.mxu1 %v6781_v59 }
 0x34b   : > { %6195 = vmatprep.subr.bf16.mxu1 %v8613_v52 }
 0x34e   : > { %6196 = vmatpush3.bf16.msra.mxu1 %v6782_v61 }
 0x34f   : > { %6197 = vmatprep.subr.bf16.mxu1 %v8613_v52 }
 0x352   : > { %6198 = vmatpush3.bf16.msra.mxu1 %v6783_v10 }
 0x353   : > { %6203 = vmatprep.subr.bf16.mxu1 %v8613_v52 }
 0x355   : > { %6200 = vmatmul.mubr.bf16.vlgmr.msra.gmra.mrb[60].mxu1 %v5428_v60 }
 0x356   : > { %6204 = vmatpush3.bf16.msra.mxu1 %v6784_v54  ;;  %6219 = vmatprep.mubr.msk.bf16.mxu1 %vm7087_vm1, %v8613_v52 }
 0x357   : > { %6205 = vmatprep.subr.bf16.mxu1 %v8613_v52 }
 0x35a   : > { %6206 = vmatpush3.bf16.msra.mxu1 %v6785_v15 }
 0x35b   : > { %6207 = vmatprep.subr.bf16.mxu1 %v8613_v52 }
 0x35e   : > { %6208 = vmatpush3.bf16.msra.mxu1 %v6786_v40 }
 0x35f   : > { %6209 = vmatprep.subr.bf16.mxu1 %v8613_v52 }
 0x362   : > { %6210 = vmatpush3.bf16.msra.mxu1 %v6787_v44 }
 0x363   : > { %6211 = vmatprep.subr.bf16.mxu1 %v8613_v52 }
 0x366   : > { %6212 = vmatpush3.bf16.msra.mxu1 %v6788_v42 }
 0x367   : > { %6213 = vmatprep.subr.bf16.mxu1 %v8613_v52 }
 0x36a   : > { %6214 = vmatpush3.bf16.msra.mxu1 %v6789_v13 }
 0x36b   : > { %6215 = vmatprep.subr.bf16.mxu1 %v8613_v52 }
 0x36e   : > { %6216 = vmatpush3.bf16.msra.mxu1 %v6790_v62 }
 0x36f   : > { %6217 = vmatprep.subr.bf16.mxu1 %v8613_v52 }
 0x372   : > { %6218 = vmatpush3.bf16.msra.mxu1 %v6791_v3 }
 0x373   : > { %6283 = vmatprep.subr.bf16.mxu1 %v8613_v52 }
 0x375   : > { %6220 = vmatmul.mubr.bf16.vlgmr.msra.gmra.mrb[60].mxu1 %v2685_v57 }
 0x376   : > { %6299 = vmatprep.mubr.msk.bf16.mxu1 %vm7087_vm1, %v8613_v52 }
 0x448   : > { %v2769_v9 = vpop.f32.mrb[60].mxu1 }
 0x449   : > { %v2790_v37 = vrot.slane %v2769_v9, 4  ;;  %v6221_v18 = vpop.f32.mrb[61].mxu1  ;;  %v2868_v9 = vld [vmem:[#allocation3] sm:$0xf] }
 0x44a   : > { %v2772_v21 = vpop.f32.mrb[62].mxu1 }
 0x44b   : > { %v2796_v29 = vadd.f32 %v2790_v37, %v2779_v43  ;;  %v2791_v20 = vrot.slane %v2772_v21, 4  ;;  %v6222_v41 = vpop.f32.mrb[63].mxu1 }
 0x44d   : > { %v5471_v63 = vmul.f32 -1.442695, %v2796_v29  ;;  %v2792_v5 = vsel %vm1970_vm4, %v2790_v37, %v2791_v20  ;;  %v2798_v38 = vadd.f32 %v2791_v20, %v2783_v23 }
 0x44e   : > { %v2797_v48 = vadd.f32 %v2792_v5, %v2781_v1 }
 0x44f   : > { %6958 = vpow2.f32 %v5471_v63  ;;  %v5473_v19 = vmul.f32 -1.442695, %v2798_v38 }
 0x450   : > { %v5472_v8 = vmul.f32 -1.442695, %v2797_v48  ;;  %v6803_v48 = vld [vmem:[%s8607_s2] sm:$0xff]  }
 0x451   : > { %6960 = vpow2.f32 %v5473_v19 }
 0x452   : > { %6962 = vpow2.f32 %v5472_v8  ;;  %v6804_v8 = vld [vmem:[%s8607_s2 + $0x8] sm:$0xff]  }
 0x453   : > { %6964 = vtanh.f32 %v2778_v34  ;;  %v6805_v34 = vld [vmem:[%s8607_s2 + $0x10] sm:$0xff]  }
 0x454   : > { %6966 = vtanh.f32 %v2780_v11  ;;  %v6806_v11 = vld [vmem:[%s8607_s2 + $0x18] sm:$0xff]  }
 0x459   : > { %v6959_v24 = vpop.eup %6958 }
 0x45a   : > { %v2808_v39 = vadd.f32 1.0, %v6959_v24  ;;  %v6807_v24 = vld [vmem:[%s8607_s2 + $0x20] sm:$0xff]  }
 0x45b   : > { %v6961_v55 = vpop.eup %6960 }
 0x45c   : > { %v6963_v60 = vpop.eup %6962  ;;  %6968 = vrcp.f32 %v2808_v39  ;;  %v2810_v56 = vadd.f32 1.0, %v6961_v55  ;;  %v6808_v39 = vld [vmem:[%s8607_s2 + $0x28] sm:$0xff]   ;;  %v6810_v55 = vld [vmem:[%s8607_s2 + $0x38] sm:$0xff]  }
 0x45d   : > { %6970 = vtanh.f32 %v2782_v33  ;;  %v2809_v14 = vadd.f32 1.0, %v6963_v60  ;;  %v6965_v16 = vpop.eup %6964  ;;  %v6809_v33 = vld [vmem:[%s8607_s2 + $0x30] sm:$0xff]   ;;  %v6811_v60 = vld [vmem:[%s8607_s2 + $0x80] sm:$0xff]  }
 0x45e   : > { %6972 = vrcp.f32 %v2810_v56  ;;  %v6967_v25 = vpop.eup %6966  ;;  %v6812_v56 = vld [vmem:[%s8607_s2 + $0x88] sm:$0xff]  }
 0x45f   : > { %6974 = vrcp.f32 %v2809_v14  ;;  %v6813_v14 = vld [vmem:[%s8607_s2 + $0x90] sm:$0xff]  }
 0x466   : > { %v6969_v27 = vpop.eup %6968 }
 0x467   : > { %v6971_v30 = vpop.eup %6970  ;;  %v2817_v45 = vmul.f32 %v6969_v27, %v6965_v16  ;;  %v5810_v4 = vpack.c.bf16 %v6969_v27, %v6969_v27  ;;  %v6814_v16 = vld [vmem:[%s8607_s2 + $0x98] sm:$0xff]   ;;  %v6816_v27 = vld [vmem:[%s8607_s2 + $0xa8] sm:$0xff]  }
 0x468   : > { %v6973_v51 = vpop.eup %6972 }
 0x469   : > { %v6975_v7 = vpop.eup %6974  ;;  %2820 = vst [vmem:[%s7758_s26 + $0x1c] sm:$0xf0] %v2817_v45  ;;  %v2837_v53 = vshrl.u32 %v5810_v4, 16  ;;  %v2840_v58 = vshll.u32 %v5810_v4, 16  ;;  %v2819_v59 = vmul.f32 %v6973_v51, %v6971_v30  ;;  %v5812_v61 = vpack.c.bf16 %v6973_v51, %v6973_v51  ;;  %v6817_v45 = vld [vmem:[%s8607_s2 + $0xb0] sm:$0xff]   ;;  %v6818_v51 = vld [vmem:[%s8607_s2 + $0xb8] sm:$0xff]  }
 0x46a   : > { %v2818_v10 = vmul.f32 %v6975_v7, %v6967_v25  ;;  %v5811_v54 = vpack.c.bf16 %v6975_v7, %v6975_v7  ;;  %v6815_v25 = vld [vmem:[%s8607_s2 + $0xa0] sm:$0xff]  }
 0x46b   : > { %v2839_v15 = vrot.slane %v2837_v53, 5  ;;  %v2842_v40 = vrot.slane %v2840_v58, 6  ;;  %2822 = vst [vmem:[%s7758_s26 + $0x2c] sm:$0xf] %v2819_v59  ;;  %v2856_v44 = vshrl.u32 %v5812_v61, 16  ;;  %v2859_v42 = vshll.u32 %v5812_v61, 16 }
 0x46c   : > { %2821 = vst [vmem:[%s7758_s26 + $0x24] sm:$0xff] %v2818_v10  ;;  %v2846_v13 = vshrl.u32 %v5811_v54, 16  ;;  %v2849_v62 = vshll.u32 %v5811_v54, 16  ;;  %v6820_v59 = vld [vmem:[%s8607_s2 + $0x40] sm:$0xff]   ;;  %v6821_v61 = vld [vmem:[%s8607_s2 + $0x48] sm:$0xff]   ;;  %v6822_v10 = vld [vmem:[%s8607_s2 + $0x50] sm:$0xff]  }
 0x46d   : > { %v2843_v32 = vor.u32 %v2842_v40, %v2839_v15  ;;  %v2858_v0 = vrot.slane %v2856_v44, 5  ;;  %v2861_v17 = vrot.slane %v2859_v42, 6  ;;  %6284 = vmatpush3.bf16.msra.mxu1 %v6820_v59  ;;  %v6823_v54 = vld [vmem:[%s8607_s2 + $0x58] sm:$0xff]   ;;  %v6824_v15 = vld [vmem:[%s8607_s2 + $0x60] sm:$0xff]   ;;  %v6825_v40 = vld [vmem:[%s8607_s2 + $0x68] sm:$0xff]  }
 0x46e   : > { %v2848_v3 = vrot.slane %v2846_v13, 5  ;;  %v2851_v46 = vrot.slane %v2849_v62, 6  ;;  %6285 = vmatprep.subr.bf16.mxu1 %v8613_v52  ;;  %v6826_v44 = vld [vmem:[%s8607_s2 + $0x70] sm:$0xff]   ;;  %v6827_v42 = vld [vmem:[%s8607_s2 + $0x78] sm:$0xff]  }
 0x46f   : > { %v2844_v57 = vrot.slane %v2843_v32, 4  ;;  %v2864_v22 = vrot.slane %v2858_v0, 4  ;;  %v2862_v2 = vor.u32 %v2861_v17, %v2858_v0  ;;  %v3226_v0 = vld [vmem:[#allocation2 + $0x68] sm:$0xc0] }
 0x470   : > { %v2852_v28 = vor.u32 %v2851_v46, %v2848_v3 }
 0x471   : > { %v2873_v47 = vsel %vm7771_vm11, %v2864_v22, %v2872_v49  ;;  %6286 = vmatpush3.bf16.msra.mxu1 %v6821_v61  ;;  %v3230_v22 = vld [vmem:[#allocation2 + $0x88] sm:$0x3f]  ;;  %v3228_v49 = vld [vmem:[#allocation2 + $0x78] sm:$0xff] }
 0x472   : > { %v2853_v35 = vsel %vm8018_vm7, %v2844_v57, %v2852_v28  ;;  %v2854_v50 = vrot.slane %v2852_v28, 4  ;;  %2874 = vst [vmem:[#allocation3 + $0x8] sm:$0x1] %v2873_v47  ;;  %6287 = vmatprep.subr.bf16.mxu1 %v8613_v52 }
 0x473   : > { %v2869_v37 = vsel %vm7763_vm9, %v2853_v35, %v2868_v9 }
 0x474   : > { %v2863_v18 = vsel %vm8018_vm7, %v2854_v50, %v2862_v2  ;;  %2870 = vst [vmem:[#allocation3] sm:$0xf] %v2869_v37  ;;  %v3225_v37 = vld [vmem:[#allocation2 + $0x60] sm:$0xc0] }
 0x475   : > { %2871 = vst [vmem:[#allocation3 + $0x4] sm:$0xf] %v2863_v18  ;;  %6288 = vmatpush3.bf16.msra.mxu1 %v6822_v10  ;;  %v3227_v18 = vld [vmem:[#allocation2 + $0x70] sm:$0xff] }
 0x476   : > { %6289 = vmatprep.subr.bf16.mxu1 %v8613_v52 }
 0x479   : > { %v8030_v21 = vld [vmem:[#allocation3 + $0x8] ss:$0 sps:$4 sm:$0x11]   ;;  %6290 = vmatpush3.bf16.msra.mxu1 %v6823_v54 }
 0x47a   : > { %v2926_v23 = vshll.u32 %v8030_v21, 16  ;;  %v3131_v53 = vrot.slane %v8030_v21, 1  ;;  %6291 = vmatprep.subr.bf16.mxu1 %v8613_v52 }
 0x47b   : > { %v2875_v43 = vld [vmem:[#allocation3] sm:$0xf] }
 0x47c   : > { %v2876_v29 = vld [vmem:[#allocation3 + $0x4] sm:$0xf]  ;;  %v2928_v38 = vrot.slane %v2926_v23, 1  ;;  %v3110_v30 = vld [vmem:[#allocation3] sm:$0xe] }
 0x47d   : > { %v5493_v20 = vcombine.low %v2875_v43, %v2876_v29  ;;  %v5527_v4 = vcombine.low %v3110_v30, %v2876_v29  ;;  %6292 = vmatpush3.bf16.msra.mxu1 %v6824_v15  ;;  %v3229_v29 = vld [vmem:[#allocation2 + $0x80] sm:$0x3f]  ;;  %v3318_v15 = vld [vmem:[#allocation3 + $0x8] sm:$0x1] }
 0x47e   : > { %6293 = vmatprep.subr.bf16.mxu1 %v8613_v52 }
 0x47f   : > { %v2921_v41 = vshll.u32 %v5493_v20, 16  ;;  %v2919_v63 = vshrl.u32 %v5493_v20, 16  ;;  %v3130_v7 = vrot.slane %v5527_v4, 1 }
 0x481   : > { %v2923_v1 = vrot.slane %v2921_v41, 1  ;;  %v3132_v58 = vsel %vm913_vm2, %v3130_v7, %v3131_v53  ;;  %6294 = vmatpush3.bf16.msra.mxu1 %v6825_v40 }
 0x482   : > { %6295 = vmatprep.subr.bf16.mxu1 %v8613_v52 }
 0x483   : > { %v2924_v5 = vor.u32 %v2923_v1, %v2919_v63 }
 0x485   : > { %v2929_v19 = vsel %vm1607_vm0, %v2924_v5, %v2928_v38  ;;  %6296 = vmatpush3.bf16.msra.mxu1 %v6826_v44 }
 0x486   : > { %6240 = vmatmul.mubr.bf16.vlgmr.msra.gmra.mrb[56].mxu0 %v2929_v19  ;;  %6297 = vmatprep.subr.bf16.mxu1 %v8613_v52 }
 0x487   : > { %6244 = vmatpush3.bf16.msra.mxu0 %v6803_v48  ;;  %6259 = vmatprep.mubr.msk.bf16.mxu0 %vm7087_vm1, %v8613_v52 }
 0x488   : > { %6245 = vmatprep.subr.bf16.mxu0 %v8613_v52 }
 0x489   : > { %6298 = vmatpush3.bf16.msra.mxu1 %v6827_v42 }
 0x48a   : > { %6303 = vmatprep.subr.bf16.mxu1 %v8613_v52 }
 0x48b   : > { %6246 = vmatpush3.bf16.msra.mxu0 %v6804_v8 }
 0x48c   : > { %6247 = vmatprep.subr.bf16.mxu0 %v8613_v52 }
 0x48f   : > { %6248 = vmatpush3.bf16.msra.mxu0 %v6805_v34 }
 0x490   : > { %6249 = vmatprep.subr.bf16.mxu0 %v8613_v52 }
 0x493   : > { %6250 = vmatpush3.bf16.msra.mxu0 %v6806_v11 }
 0x494   : > { %6251 = vmatprep.subr.bf16.mxu0 %v8613_v52 }
 0x497   : > { %6252 = vmatpush3.bf16.msra.mxu0 %v6807_v24 }
 0x498   : > { %6253 = vmatprep.subr.bf16.mxu0 %v8613_v52 }
 0x49b   : > { %6254 = vmatpush3.bf16.msra.mxu0 %v6808_v39 }
 0x49c   : > { %6255 = vmatprep.subr.bf16.mxu0 %v8613_v52 }
 0x49f   : > { %6256 = vmatpush3.bf16.msra.mxu0 %v6809_v33 }
 0x4a0   : > { %6257 = vmatprep.subr.bf16.mxu0 %v8613_v52 }
 0x4a3   : > { %6258 = vmatpush3.bf16.msra.mxu0 %v6810_v55 }
 0x4a4   : > { %6263 = vmatprep.subr.bf16.mxu0 %v8613_v52 }
 0x4a6   : > { %6260 = vmatmul.mubr.bf16.vlgmr.msra.gmra.mrb[56].mxu0 %v5493_v20 }
 0x4a7   : > { %6264 = vmatpush3.bf16.msra.mxu0 %v6811_v60  ;;  %6279 = vmatprep.mubr.msk.bf16.mxu0 %vm7087_vm1, %v8613_v52 }
 0x4a8   : > { %6265 = vmatprep.subr.bf16.mxu0 %v8613_v52 }
 0x4ab   : > { %6266 = vmatpush3.bf16.msra.mxu0 %v6812_v56 }
 0x4ac   : > { %6267 = vmatprep.subr.bf16.mxu0 %v8613_v52 }
 0x4af   : > { %6268 = vmatpush3.bf16.msra.mxu0 %v6813_v14 }
 0x4b0   : > { %6269 = vmatprep.subr.bf16.mxu0 %v8613_v52 }
 0x4b3   : > { %6270 = vmatpush3.bf16.msra.mxu0 %v6814_v16 }
 0x4b4   : > { %6271 = vmatprep.subr.bf16.mxu0 %v8613_v52 }
 0x4b7   : > { %6272 = vmatpush3.bf16.msra.mxu0 %v6815_v25 }
 0x4b8   : > { %6273 = vmatprep.subr.bf16.mxu0 %v8613_v52 }
 0x4bb   : > { %6274 = vmatpush3.bf16.msra.mxu0 %v6816_v27 }
 0x4bc   : > { %6275 = vmatprep.subr.bf16.mxu0 %v8613_v52 }
 0x4bf   : > { %6276 = vmatpush3.bf16.msra.mxu0 %v6817_v45 }
 0x4c0   : > { %6277 = vmatprep.subr.bf16.mxu0 %v8613_v52 }
 0x4c3   : > { %6278 = vmatpush3.bf16.msra.mxu0 %v6818_v51 }
 0x4c4   : > { %6343 = vmatprep.subr.bf16.mxu0 %v8613_v52 }
 0x4c6   : > { %6280 = vmatmul.mubr.bf16.vlgmr.msra.gmra.mrb[56].mxu0 %v3132_v58 }
 0x4c7   : > { %6359 = vmatprep.mubr.msk.bf16.mxu0 %vm7087_vm1, %v8613_v52 }
 0x599   : > { %v3216_v13 = vpop.f32.mrb[56].mxu0 }
 0x59a   : > { %v3236_v62 = vrot.slane %v3216_v13, 2  ;;  %v6281_v32 = vpop.f32.mrb[57].mxu0 }
 0x59b   : > { %v3219_v3 = vpop.f32.mrb[58].mxu0 }
 0x59c   : > { %v3242_v46 = vadd.f32 %v3236_v62, %v3226_v0  ;;  %v3237_v17 = vrot.slane %v3219_v3, 2  ;;  %v6282_v57 = vpop.f32.mrb[59].mxu0 }
 0x59e   : > { %v5536_v28 = vmul.f32 -1.442695, %v3242_v46  ;;  %v3238_v47 = vsel %vm1384_vm3, %v3236_v62, %v3237_v17  ;;  %v3244_v35 = vadd.f32 %v3237_v17, %v3230_v22  ;;  %v3314_v62 = vld [vmem:[#allocation3] sm:$0xf] }
 0x59f   : > { %v3243_v50 = vadd.f32 %v3238_v47, %v3228_v49 }
 0x5a0   : > { %6976 = vpow2.f32 %v5536_v28  ;;  %v5538_v2 = vmul.f32 -1.442695, %v3244_v35 }
 0x5a1   : > { %v5537_v9 = vmul.f32 -1.442695, %v3243_v50 }
 0x5a2   : > { %6978 = vpow2.f32 %v5538_v2  ;;  %v6830_v2 = vld [vmem:[%s8607_s2] sm:$0xff]  }
 0x5a3   : > { %6980 = vpow2.f32 %v5537_v9 }
 0x5a4   : > { %6982 = vtanh.f32 %v3225_v37  ;;  %v6831_v37 = vld [vmem:[%s8607_s2 + $0x8] sm:$0xff]  }
 0x5a5   : > { %6984 = vtanh.f32 %v3227_v18  ;;  %v6832_v18 = vld [vmem:[%s8607_s2 + $0x10] sm:$0xff]  }
 0x5aa   : > { %v6977_v43 = vpop.eup %6976 }
 0x5ab   : > { %v3254_v21 = vadd.f32 1.0, %v6977_v43  ;;  %v6833_v43 = vld [vmem:[%s8607_s2 + $0x18] sm:$0xff]  }
 0x5ac   : > { %v6979_v20 = vpop.eup %6978 }
 0x5ad   : > { %v6981_v41 = vpop.eup %6980  ;;  %6986 = vrcp.f32 %v3254_v21  ;;  %v3256_v23 = vadd.f32 1.0, %v6979_v20  ;;  %v6834_v21 = vld [vmem:[%s8607_s2 + $0x20] sm:$0xff]   ;;  %v6836_v20 = vld [vmem:[%s8607_s2 + $0x30] sm:$0xff]  }
 0x5ae   : > { %6988 = vtanh.f32 %v3229_v29  ;;  %v3255_v63 = vadd.f32 1.0, %v6981_v41  ;;  %v6983_v1 = vpop.eup %6982  ;;  %v6835_v29 = vld [vmem:[%s8607_s2 + $0x28] sm:$0xff]   ;;  %v6837_v41 = vld [vmem:[%s8607_s2 + $0x38] sm:$0xff]  }
 0x5af   : > { %6990 = vrcp.f32 %v3256_v23  ;;  %v6985_v5 = vpop.eup %6984  ;;  %v6838_v23 = vld [vmem:[%s8607_s2 + $0x80] sm:$0xff]  }
 0x5b0   : > { %6992 = vrcp.f32 %v3255_v63  ;;  %v6839_v63 = vld [vmem:[%s8607_s2 + $0x88] sm:$0xff]  }
 0x5b7   : > { %v6987_v38 = vpop.eup %6986 }
 0x5b8   : > { %v6989_v48 = vpop.eup %6988  ;;  %v3263_v19 = vmul.f32 %v6987_v38, %v6983_v1  ;;  %v5813_v8 = vpack.c.bf16 %v6987_v38, %v6987_v38  ;;  %v6840_v1 = vld [vmem:[%s8607_s2 + $0x90] sm:$0xff]   ;;  %v6842_v38 = vld [vmem:[%s8607_s2 + $0xa0] sm:$0xff]  }
 0x5b9   : > { %v6991_v34 = vpop.eup %6990 }
 0x5ba   : > { %v6993_v11 = vpop.eup %6992  ;;  %3266 = vst [vmem:[%s7758_s26 + $0x2a] sm:$0xc0] %v3263_v19  ;;  %v3283_v24 = vshrl.u32 %v5813_v8, 16  ;;  %v3286_v39 = vshll.u32 %v5813_v8, 16  ;;  %v3265_v33 = vmul.f32 %v6991_v34, %v6989_v48  ;;  %v5815_v55 = vpack.c.bf16 %v6991_v34, %v6991_v34  ;;  %v6843_v48 = vld [vmem:[%s8607_s2 + $0xa8] sm:$0xff]   ;;  %v6844_v8 = vld [vmem:[%s8607_s2 + $0xb0] sm:$0xff]  }
 0x5bb   : > { %v3264_v60 = vmul.f32 %v6993_v11, %v6985_v5  ;;  %v5814_v56 = vpack.c.bf16 %v6993_v11, %v6993_v11  ;;  %v6841_v5 = vld [vmem:[%s8607_s2 + $0x98] sm:$0xff]  }
 0x5bc   : > { %v3285_v14 = vrot.slane %v3283_v24, 6  ;;  %v3288_v16 = vrot.slane %v3286_v39, 7  ;;  %3268 = vst [vmem:[%s7758_s26 + $0x3a] sm:$0x3f] %v3265_v33  ;;  %v3302_v25 = vshrl.u32 %v5815_v55, 16  ;;  %v3305_v27 = vshll.u32 %v5815_v55, 16 }
 0x5bd   : > { %3267 = vst [vmem:[%s7758_s26 + $0x32] sm:$0xff] %v3264_v60  ;;  %v3292_v30 = vshrl.u32 %v5814_v56, 16  ;;  %v3295_v45 = vshll.u32 %v5814_v56, 16  ;;  %v6845_v11 = vld [vmem:[%s8607_s2 + $0xb8] sm:$0xff]   ;;  %v6847_v55 = vld [vmem:[%s8607_s2 + $0x40] sm:$0xff]   ;;  %v6848_v60 = vld [vmem:[%s8607_s2 + $0x48] sm:$0xff]  }
 0x5be   : > { %v3289_v4 = vor.u32 %v3288_v16, %v3285_v14  ;;  %v3304_v51 = vrot.slane %v3302_v25, 6  ;;  %v3307_v58 = vrot.slane %v3305_v27, 7  ;;  %6344 = vmatpush3.bf16.msra.mxu0 %v6847_v55  ;;  %v6849_v56 = vld [vmem:[%s8607_s2 + $0x50] sm:$0xff]   ;;  %v6850_v14 = vld [vmem:[%s8607_s2 + $0x58] sm:$0xff]   ;;  %v6851_v16 = vld [vmem:[%s8607_s2 + $0x60] sm:$0xff]  }
 0x5bf   : > { %v3294_v7 = vrot.slane %v3292_v30, 6  ;;  %v3297_v53 = vrot.slane %v3295_v45, 7  ;;  %6345 = vmatprep.subr.bf16.mxu0 %v8613_v52  ;;  %v6852_v25 = vld [vmem:[%s8607_s2 + $0x68] sm:$0xff]   ;;  %v6853_v27 = vld [vmem:[%s8607_s2 + $0x70] sm:$0xff]   ;;  %v6854_v30 = vld [vmem:[%s8607_s2 + $0x78] sm:$0xff]  }
 0x5c0   : > { %v3290_v59 = vrot.slane %v3289_v4, 4  ;;  %v3310_v10 = vrot.slane %v3304_v51, 4  ;;  %v3308_v13 = vor.u32 %v3307_v58, %v3304_v51  ;;  %v3672_v4 = vld [vmem:[#allocation2 + $0x98] sm:$0xff]  ;;  %v3674_v58 = vld [vmem:[#allocation2 + $0xa8] sm:$0xff] }
 0x5c1   : > { %v3298_v54 = vor.u32 %v3297_v53, %v3294_v7 }
 0x5c2   : > { %v3319_v40 = vsel %vm7771_vm11, %v3310_v10, %v3318_v15  ;;  %6346 = vmatpush3.bf16.msra.mxu0 %v6848_v60  ;;  %v6858_v60 = vld [vmem:[%s8607_s2 + $0x8] sm:$0xff]  }
 0x5c3   : > { %v3299_v44 = vsel %vm8142_vm14, %v3290_v59, %v3298_v54  ;;  %v3300_v42 = vrot.slane %v3298_v54, 4  ;;  %3320 = vst [vmem:[#allocation3 + $0x8] sm:$0x1] %v3319_v40  ;;  %6347 = vmatprep.subr.bf16.mxu0 %v8613_v52  ;;  %v3671_v40 = vld [vmem:[#allocation2 + $0x90] sm:$0xff] }
 0x5c4   : > { %v3315_v32 = vsel %vm7763_vm9, %v3299_v44, %v3314_v62 }
 0x5c5   : > { %v3309_v0 = vsel %vm8142_vm14, %v3300_v42, %v3308_v13  ;;  %3316 = vst [vmem:[#allocation3] sm:$0xf] %v3315_v32  ;;  %v3673_v13 = vld [vmem:[#allocation2 + $0xa0] sm:$0xff] }
 0x5c6   : > { %3317 = vst [vmem:[#allocation3 + $0x4] sm:$0xf] %v3309_v0  ;;  %6348 = vmatpush3.bf16.msra.mxu0 %v6849_v56  ;;  %v6859_v56 = vld [vmem:[%s8607_s2 + $0x10] sm:$0xff]  }
 0x5c7   : > { %6349 = vmatprep.subr.bf16.mxu0 %v8613_v52 }
 0x5ca   : > { %v8154_v46 = vld [vmem:[#allocation3 + $0x8] ss:$0 sps:$4 sm:$0x11]   ;;  %6350 = vmatpush3.bf16.msra.mxu0 %v6850_v14  ;;  %v6860_v14 = vld [vmem:[%s8607_s2 + $0x18] sm:$0xff]  }
 0x5cb   : > { %v3372_v28 = vshll.u32 %v8154_v46, 16  ;;  %v3577_v39 = vrot.slane %v8154_v46, 1  ;;  %6351 = vmatprep.subr.bf16.mxu0 %v8613_v52 }
 0x5cc   : > { %v3321_v3 = vld [vmem:[#allocation3] sm:$0xf] }
 0x5cd   : > { %v3322_v17 = vld [vmem:[#allocation3 + $0x4] sm:$0xf]  ;;  %v3374_v50 = vrot.slane %v3372_v28, 1  ;;  %v3556_v19 = vld [vmem:[#allocation3] sm:$0xe] }
 0x5ce   : > { %v5558_v57 = vcombine.low %v3321_v3, %v3322_v17  ;;  %v5592_v34 = vcombine.low %v3556_v19, %v3322_v17  ;;  %6352 = vmatpush3.bf16.msra.mxu0 %v6851_v16  ;;  %v6861_v16 = vld [vmem:[%s8607_s2 + $0x20] sm:$0xff]  }
 0x5cf   : > { %6353 = vmatprep.subr.bf16.mxu0 %v8613_v52 }
 0x5d0   : > { %v3367_v22 = vshll.u32 %v5558_v57, 16  ;;  %v3365_v49 = vshrl.u32 %v5558_v57, 16  ;;  %v3576_v24 = vrot.slane %v5592_v34, 1 }
 0x5d2   : > { %v3369_v47 = vrot.slane %v3367_v22, 1  ;;  %v3578_v33 = vsel %vm913_vm2, %v3576_v24, %v3577_v39  ;;  %6354 = vmatpush3.bf16.msra.mxu0 %v6852_v25  ;;  %v6862_v25 = vld [vmem:[%s8607_s2 + $0x28] sm:$0xff]  }
 0x5d3   : > { %6355 = vmatprep.subr.bf16.mxu0 %v8613_v52 }
 0x5d4   : > { %v3370_v35 = vor.u32 %v3369_v47, %v3365_v49 }
 0x5d6   : > { %v3375_v9 = vsel %vm1607_vm0, %v3370_v35, %v3374_v50  ;;  %6356 = vmatpush3.bf16.msra.mxu0 %v6853_v27  ;;  %v6863_v27 = vld [vmem:[%s8607_s2 + $0x30] sm:$0xff]  }
 0x5d7   : > { %6300 = vmatmul.mubr.bf16.vlgmr.msra.gmra.mrb[64].mxu1 %v3375_v9  ;;  %6357 = vmatprep.subr.bf16.mxu0 %v8613_v52 }
 0x5d8   : > { %6304 = vmatpush3.bf16.msra.mxu1 %v6830_v2  ;;  %6319 = vmatprep.mubr.msk.bf16.mxu1 %vm7087_vm1, %v8613_v52 }
 0x5d9   : > { %6305 = vmatprep.subr.bf16.mxu1 %v8613_v52 }
 0x5da   : > { %6358 = vmatpush3.bf16.msra.mxu0 %v6854_v30  ;;  %v6864_v30 = vld [vmem:[%s8607_s2 + $0x38] sm:$0xff]  }
 0x5db   : > { %6363 = vmatprep.subr.bf16.mxu0 %v8613_v52 }
 0x5dc   : > { %6306 = vmatpush3.bf16.msra.mxu1 %v6831_v37 }
 0x5dd   : > { %6307 = vmatprep.subr.bf16.mxu1 %v8613_v52 }
 0x5e0   : > { %6308 = vmatpush3.bf16.msra.mxu1 %v6832_v18 }
 0x5e1   : > { %6309 = vmatprep.subr.bf16.mxu1 %v8613_v52 }
 0x5e4   : > { %6310 = vmatpush3.bf16.msra.mxu1 %v6833_v43  ;;  %v3721_v43 = vld [vmem:[#allocation3] sm:$0xf] }
 0x5e5   : > { %6311 = vmatprep.subr.bf16.mxu1 %v8613_v52 }
 0x5e8   : > { %6312 = vmatpush3.bf16.msra.mxu1 %v6834_v21 }
 0x5e9   : > { %6313 = vmatprep.subr.bf16.mxu1 %v8613_v52 }
 0x5ec   : > { %6314 = vmatpush3.bf16.msra.mxu1 %v6835_v29 }
 0x5ed   : > { %6315 = vmatprep.subr.bf16.mxu1 %v8613_v52 }
 0x5f0   : > { %6316 = vmatpush3.bf16.msra.mxu1 %v6836_v20 }
 0x5f1   : > { %6317 = vmatprep.subr.bf16.mxu1 %v8613_v52 }
 0x5f4   : > { %6318 = vmatpush3.bf16.msra.mxu1 %v6837_v41 }
 0x5f5   : > { %6323 = vmatprep.subr.bf16.mxu1 %v8613_v52 }
 0x5f7   : > { %6320 = vmatmul.mubr.bf16.vlgmr.msra.gmra.mrb[64].mxu1 %v5558_v57 }
 0x5f8   : > { %6324 = vmatpush3.bf16.msra.mxu1 %v6838_v23  ;;  %6339 = vmatprep.mubr.msk.bf16.mxu1 %vm7087_vm1, %v8613_v52  ;;  %v3725_v23 = vld [vmem:[#allocation3 + $0x8] sm:$0x1] }
 0x5f9   : > { %6325 = vmatprep.subr.bf16.mxu1 %v8613_v52 }
 0x5fc   : > { %6326 = vmatpush3.bf16.msra.mxu1 %v6839_v63 }
 0x5fd   : > { %6327 = vmatprep.subr.bf16.mxu1 %v8613_v52 }
 0x600   : > { %6328 = vmatpush3.bf16.msra.mxu1 %v6840_v1 }
 0x601   : > { %6329 = vmatprep.subr.bf16.mxu1 %v8613_v52 }
 0x604   : > { %6330 = vmatpush3.bf16.msra.mxu1 %v6841_v5 }
 0x605   : > { %6331 = vmatprep.subr.bf16.mxu1 %v8613_v52 }
 0x608   : > { %6332 = vmatpush3.bf16.msra.mxu1 %v6842_v38 }
 0x609   : > { %6333 = vmatprep.subr.bf16.mxu1 %v8613_v52 }
 0x60c   : > { %6334 = vmatpush3.bf16.msra.mxu1 %v6843_v48 }
 0x60d   : > { %6335 = vmatprep.subr.bf16.mxu1 %v8613_v52 }
 0x610   : > { %6336 = vmatpush3.bf16.msra.mxu1 %v6844_v8 }
 0x611   : > { %6337 = vmatprep.subr.bf16.mxu1 %v8613_v52 }
 0x614   : > { %6338 = vmatpush3.bf16.msra.mxu1 %v6845_v11 }
 0x615   : > { %6403 = vmatprep.subr.bf16.mxu1 %v8613_v52 }
 0x617   : > { %6340 = vmatmul.mubr.bf16.vlgmr.msra.gmra.mrb[64].mxu1 %v3578_v33 }
 0x618   : > { %6419 = vmatprep.mubr.msk.bf16.mxu1 %vm7087_vm1, %v8613_v52 }
 0x6ea   : > { %v3662_v45 = vpop.f32.mrb[64].mxu1 }
 0x6eb   : > { %v3677_v51 = vadd.f32 %v3672_v4, %v3662_v45  ;;  %v6341_v7 = vpop.f32.mrb[65].mxu1  ;;  %v6865_v45 = vld [vmem:[%s8607_s2 + $0x80] sm:$0xff]   ;;  %v6866_v4 = vld [vmem:[%s8607_s2 + $0x88] sm:$0xff]  }
 0x6ec   : > { %v3665_v53 = vpop.f32.mrb[66].mxu1  ;;  %v6868_v7 = vld [vmem:[%s8607_s2 + $0x98] sm:$0xff]  }
 0x6ed   : > { %v5601_v59 = vmul.f32 -1.442695, %v3677_v51  ;;  %v3678_v10 = vadd.f32 %v3674_v58, %v3665_v53  ;;  %v6342_v54 = vpop.f32.mrb[67].mxu1  ;;  %v6867_v51 = vld [vmem:[%s8607_s2 + $0x90] sm:$0xff]   ;;  %v6869_v53 = vld [vmem:[%s8607_s2 + $0xa0] sm:$0xff]   ;;  %v6870_v58 = vld [vmem:[%s8607_s2 + $0xa8] sm:$0xff]  }
 0x6ef   : > { %6994 = vpow2.f32 %v5601_v59  ;;  %v5602_v15 = vmul.f32 -1.442695, %v3678_v10  ;;  %v6871_v59 = vld [vmem:[%s8607_s2 + $0xb0] sm:$0xff]  }
 0x6f1   : > { %6996 = vpow2.f32 %v5602_v15  ;;  %v6872_v15 = vld [vmem:[%s8607_s2 + $0xb8] sm:$0xff]  }
 0x6f2   : > { %6998 = vtanh.f32 %v3671_v40 }
 0x6f9   : > { %v6995_v44 = vpop.eup %6994 }
 0x6fa   : > { %v3685_v42 = vadd.f32 1.0, %v6995_v44 }
 0x6fb   : > { %v6997_v62 = vpop.eup %6996 }
 0x6fc   : > { %7000 = vrcp.f32 %v3685_v42  ;;  %v3686_v32 = vadd.f32 1.0, %v6997_v62  ;;  %v6999_v0 = vpop.eup %6998  ;;  %v6875_v62 = vld [vmem:[%s8607_s2 + $0x48] sm:$0xff]  }
 0x6fd   : > { %7002 = vtanh.f32 %v3673_v13  ;;  %v6874_v13 = vld [vmem:[%s8607_s2 + $0x40] sm:$0xff]  }
 0x6fe   : > { %7004 = vrcp.f32 %v3686_v32  ;;  %6404 = vmatpush3.bf16.msra.mxu1 %v6874_v13  ;;  %v6876_v32 = vld [vmem:[%s8607_s2 + $0x50] sm:$0xff]  }
 0x6ff   : > { %6405 = vmatprep.subr.bf16.mxu1 %v8613_v52 }
 0x702   : > { %6406 = vmatpush3.bf16.msra.mxu1 %v6875_v62 }
 0x703   : > { %6407 = vmatprep.subr.bf16.mxu1 %v8613_v52 }
 0x706   : > { %v7001_v3 = vpop.eup %7000  ;;  %6408 = vmatpush3.bf16.msra.mxu1 %v6876_v32 }
 0x707   : > { %v7003_v46 = vpop.eup %7002  ;;  %v3691_v17 = vmul.f32 %v7001_v3, %v6999_v0  ;;  %v5816_v57 = vpack.c.bf16 %v7001_v3, %v7001_v3  ;;  %6409 = vmatprep.subr.bf16.mxu1 %v8613_v52  ;;  %v6877_v0 = vld [vmem:[%s8607_s2 + $0x58] sm:$0xff]   ;;  %v6878_v3 = vld [vmem:[%s8607_s2 + $0x60] sm:$0xff]  }
 0x708   : > { %v7005_v22 = vpop.eup %7004 }
 0x709   : > { %3693 = vst [vmem:[%s7758_s26 + $0x40] sm:$0xff] %v3691_v17  ;;  %v3702_v28 = vshrl.u32 %v5816_v57, 16  ;;  %v3692_v49 = vmul.f32 %v7005_v22, %v7003_v46  ;;  %v5817_v47 = vpack.c.bf16 %v7005_v22, %v7005_v22  ;;  %v3705_v50 = vshll.u32 %v5816_v57, 16  ;;  %v6879_v46 = vld [vmem:[%s8607_s2 + $0x68] sm:$0xff]   ;;  %v6880_v17 = vld [vmem:[%s8607_s2 + $0x70] sm:$0xff]   ;;  %v6881_v57 = vld [vmem:[%s8607_s2 + $0x78] sm:$0xff]  }
 0x70a   : > { %6410 = vmatpush3.bf16.msra.mxu1 %v6877_v0 }
 0x70b   : > { %v3704_v35 = vrot.slane %v3702_v28, 7  ;;  %3694 = vst [vmem:[%s7758_s26 + $0x48] sm:$0xff] %v3692_v49  ;;  %v3710_v2 = vshrl.u32 %v5817_v47, 16  ;;  %v3713_v18 = vshll.u32 %v5817_v47, 16  ;;  %6411 = vmatprep.subr.bf16.mxu1 %v8613_v52  ;;  %v4079_v47 = vld [vmem:[#allocation2 + $0xb8] sm:$0xfc] }
 0x70d   : > { %v3707_v9 = vor.u32 %v3705_v50, %v3704_v35  ;;  %v3712_v37 = vrot.slane %v3710_v2, 7  ;;  %v3708_v21 = vrot.slane %v3704_v35, 4 }
 0x70e   : > { %6412 = vmatpush3.bf16.msra.mxu1 %v6878_v3 }
 0x70f   : > { %v3722_v29 = vsel %vm7763_vm9, %v3707_v9, %v3721_v43  ;;  %v3715_v20 = vor.u32 %v3713_v18, %v3712_v37  ;;  %v3717_v41 = vrot.slane %v3712_v37, 4  ;;  %6413 = vmatprep.subr.bf16.mxu1 %v8613_v52  ;;  %v4083_v37 = vld [vmem:[#allocation2 + $0xd8] sm:$0x3]  ;;  %v4081_v43 = vld [vmem:[#allocation2 + $0xc8] sm:$0xff] }
 0x710   : > { %3723 = vst [vmem:[#allocation3] sm:$0xf] %v3722_v29 }
 0x711   : > { %v3716_v63 = vsel %vm7767_vm10, %v3708_v21, %v3715_v20  ;;  %v3726_v1 = vsel %vm7771_vm11, %v3717_v41, %v3725_v23 }
 0x712   : > { %3724 = vst [vmem:[#allocation3 + $0x4] sm:$0xf] %v3716_v63  ;;  %3727 = vst [vmem:[#allocation3 + $0x8] sm:$0x1] %v3726_v1  ;;  %6414 = vmatpush3.bf16.msra.mxu1 %v6879_v46  ;;  %v4078_v63 = vld [vmem:[#allocation2 + $0xb0] sm:$0xfc] }
 0x713   : > { %6415 = vmatprep.subr.bf16.mxu1 %v8613_v52  ;;  %v4080_v1 = vld [vmem:[#allocation2 + $0xc0] sm:$0xff] }
 0x716   : > { %6416 = vmatpush3.bf16.msra.mxu1 %v6880_v17 }
 0x717   : > { %v3728_v5 = vld [vmem:[#allocation3] sm:$0xf]  ;;  %6417 = vmatprep.subr.bf16.mxu1 %v8613_v52 }
 0x718   : > { %v3963_v10 = vld [vmem:[#allocation3] sm:$0xe] }
 0x719   : > { %v3729_v38 = vld [vmem:[#allocation3 + $0x4] sm:$0xf]  ;;  %v8270_v19 = vld [vmem:[#allocation3 + $0x8] ss:$0 sps:$4 sm:$0x11]  }
 0x71a   : > { %v5621_v48 = vcombine.low %v3728_v5, %v3729_v38  ;;  %v3779_v34 = vshll.u32 %v8270_v19, 16  ;;  %v5655_v54 = vcombine.low %v3963_v10, %v3729_v38  ;;  %v3984_v44 = vrot.slane %v8270_v19, 1  ;;  %6418 = vmatpush3.bf16.msra.mxu1 %v6881_v57  ;;  %v4167_v10 = vld [vmem:[#allocation3 + $0x8] sm:$0x1]  ;;  %v4163_v0 = vld [vmem:[#allocation3] sm:$0xf] }
 0x71b   : > { %6423 = vmatprep.subr.bf16.mxu1 %v8613_v52 }
 0x71c   : > { %v3774_v8 = vshll.u32 %v5621_v48, 16  ;;  %v3772_v11 = vshrl.u32 %v5621_v48, 16  ;;  %v3781_v33 = vrot.slane %v3779_v34, 1  ;;  %v3983_v40 = vrot.slane %v5655_v54, 1 }
 0x71e   : > { %v3776_v24 = vrot.slane %v3774_v8, 1  ;;  %v3985_v42 = vsel %vm913_vm2, %v3983_v40, %v3984_v44 }
 0x720   : > { %v3777_v39 = vor.u32 %v3776_v24, %v3772_v11 }
 0x722   : > { %v3782_v55 = vsel %vm1607_vm0, %v3777_v39, %v3781_v33 }
 0x723   : > { %6360 = vmatmul.mubr.bf16.vlgmr.msra.gmra.mrb[60].mxu0 %v3782_v55 }
 0x724   : > { %6364 = vmatpush3.bf16.msra.mxu0 %v6857_v26  ;;  %6379 = vmatprep.mubr.msk.bf16.mxu0 %vm7087_vm1, %v8613_v52 }
 0x725   : > { %6365 = vmatprep.subr.bf16.mxu0 %v8613_v52 }
 0x728   : > { %6366 = vmatpush3.bf16.msra.mxu0 %v6858_v60 }
 0x729   : > { %6367 = vmatprep.subr.bf16.mxu0 %v8613_v52 }
 0x72c   : > { %6368 = vmatpush3.bf16.msra.mxu0 %v6859_v56 }
 0x72d   : > { %6369 = vmatprep.subr.bf16.mxu0 %v8613_v52 }
 0x730   : > { %6370 = vmatpush3.bf16.msra.mxu0 %v6860_v14 }
 0x731   : > { %6371 = vmatprep.subr.bf16.mxu0 %v8613_v52 }
 0x734   : > { %6372 = vmatpush3.bf16.msra.mxu0 %v6861_v16 }
 0x735   : > { %6373 = vmatprep.subr.bf16.mxu0 %v8613_v52 }
 0x738   : > { %6374 = vmatpush3.bf16.msra.mxu0 %v6862_v25 }
 0x739   : > { %6375 = vmatprep.subr.bf16.mxu0 %v8613_v52 }
 0x73c   : > { %6376 = vmatpush3.bf16.msra.mxu0 %v6863_v27 }
 0x73d   : > { %6377 = vmatprep.subr.bf16.mxu0 %v8613_v52 }
 0x740   : > { %6378 = vmatpush3.bf16.msra.mxu0 %v6864_v30 }
 0x741   : > { %6383 = vmatprep.subr.bf16.mxu0 %v8613_v52 }
 0x743   : > { %6380 = vmatmul.mubr.bf16.vlgmr.msra.gmra.mrb[60].mxu0 %v5621_v48  ;;  %v4082_v48 = vld [vmem:[#allocation2 + $0xd0] sm:$0x3] }
 0x744   : > { %6384 = vmatpush3.bf16.msra.mxu0 %v6865_v45  ;;  %6399 = vmatprep.mubr.msk.bf16.mxu0 %vm7087_vm1, %v8613_v52 }
 0x745   : > { %6385 = vmatprep.subr.bf16.mxu0 %v8613_v52 }
 0x748   : > { %6386 = vmatpush3.bf16.msra.mxu0 %v6866_v4 }
 0x749   : > { %6387 = vmatprep.subr.bf16.mxu0 %v8613_v52 }
 0x74c   : > { %6388 = vmatpush3.bf16.msra.mxu0 %v6867_v51 }
 0x74d   : > { %6389 = vmatprep.subr.bf16.mxu0 %v8613_v52 }
 0x750   : > { %6390 = vmatpush3.bf16.msra.mxu0 %v6868_v7 }
 0x751   : > { %6391 = vmatprep.subr.bf16.mxu0 %v8613_v52 }
 0x754   : > { %6392 = vmatpush3.bf16.msra.mxu0 %v6869_v53 }
 0x755   : > { %6393 = vmatprep.subr.bf16.mxu0 %v8613_v52 }
 0x758   : > { %6394 = vmatpush3.bf16.msra.mxu0 %v6870_v58 }
 0x759   : > { %6395 = vmatprep.subr.bf16.mxu0 %v8613_v52 }
 0x75c   : > { %6396 = vmatpush3.bf16.msra.mxu0 %v6871_v59 }
 0x75d   : > { %6397 = vmatprep.subr.bf16.mxu0 %v8613_v52 }
 0x760   : > { %6398 = vmatpush3.bf16.msra.mxu0 %v6872_v15 }
 0x761   : > { %6463 = vmatprep.subr.bf16.mxu0 %v8613_v52 }
 0x763   : > { %6400 = vmatmul.mubr.bf16.vlgmr.msra.gmra.mrb[60].mxu0 %v3985_v42 }
 0x764   : > { %6479 = vmatprep.mubr.msk.bf16.mxu0 %vm7087_vm1, %v8613_v52 }
 0x836   : > { %v4069_v22 = vpop.f32.mrb[60].mxu0 }
 0x837   : > { %v4089_v28 = vrot.slane %v4069_v22, 6  ;;  %v6401_v49 = vpop.f32.mrb[61].mxu0 }
 0x838   : > { %v4072_v35 = vpop.f32.mrb[62].mxu0 }
 0x839   : > { %v4095_v50 = vadd.f32 %v4089_v28, %v4079_v47  ;;  %v4090_v2 = vrot.slane %v4072_v35, 6  ;;  %v6402_v9 = vpop.f32.mrb[63].mxu0 }
 0x83b   : > { %v5664_v18 = vmul.f32 -1.442695, %v4095_v50  ;;  %v4091_v21 = vsel %vm2343_vm12, %v4089_v28, %v4090_v2  ;;  %v4097_v29 = vadd.f32 %v4090_v2, %v4083_v37 }
 0x83c   : > { %v4096_v20 = vadd.f32 %v4091_v21, %v4081_v43  ;;  %v6884_v43 = vld [vmem:[%s8607_s2] sm:$0xff]   ;;  %v6885_v21 = vld [vmem:[%s8607_s2 + $0x8] sm:$0xff]  }
 0x83d   : > { %7006 = vpow2.f32 %v5664_v18  ;;  %v5666_v41 = vmul.f32 -1.442695, %v4097_v29  ;;  %v6886_v29 = vld [vmem:[%s8607_s2 + $0x10] sm:$0xff]  }
 0x83e   : > { %v5665_v23 = vmul.f32 -1.442695, %v4096_v20  ;;  %v6887_v20 = vld [vmem:[%s8607_s2 + $0x18] sm:$0xff]  }
 0x83f   : > { %7008 = vpow2.f32 %v5666_v41  ;;  %v6888_v41 = vld [vmem:[%s8607_s2 + $0x20] sm:$0xff]  }
 0x840   : > { %7010 = vpow2.f32 %v5665_v23  ;;  %v6889_v23 = vld [vmem:[%s8607_s2 + $0x28] sm:$0xff]  }
 0x841   : > { %7012 = vtanh.f32 %v4078_v63  ;;  %v6890_v63 = vld [vmem:[%s8607_s2 + $0x30] sm:$0xff]  }
 0x842   : > { %7014 = vtanh.f32 %v4080_v1  ;;  %v6891_v1 = vld [vmem:[%s8607_s2 + $0x38] sm:$0xff]  }
 0x847   : > { %v7007_v5 = vpop.eup %7006 }
 0x848   : > { %v4107_v38 = vadd.f32 1.0, %v7007_v5  ;;  %v6892_v5 = vld [vmem:[%s8607_s2 + $0x80] sm:$0xff]  }
 0x849   : > { %v7009_v19 = vpop.eup %7008 }
 0x84a   : > { %v7011_v8 = vpop.eup %7010  ;;  %7016 = vrcp.f32 %v4107_v38  ;;  %v4109_v34 = vadd.f32 1.0, %v7009_v19  ;;  %v6893_v38 = vld [vmem:[%s8607_s2 + $0x88] sm:$0xff]   ;;  %v6895_v19 = vld [vmem:[%s8607_s2 + $0x98] sm:$0xff]  }
 0x84b   : > { %7018 = vtanh.f32 %v4082_v48  ;;  %v4108_v11 = vadd.f32 1.0, %v7011_v8  ;;  %v7013_v24 = vpop.eup %7012  ;;  %v6894_v48 = vld [vmem:[%s8607_s2 + $0x90] sm:$0xff]   ;;  %v6896_v8 = vld [vmem:[%s8607_s2 + $0xa0] sm:$0xff]  }
 0x84c   : > { %7020 = vrcp.f32 %v4109_v34  ;;  %v7015_v39 = vpop.eup %7014  ;;  %v6897_v34 = vld [vmem:[%s8607_s2 + $0xa8] sm:$0xff]  }
 0x84d   : > { %7022 = vrcp.f32 %v4108_v11  ;;  %v6898_v11 = vld [vmem:[%s8607_s2 + $0xb0] sm:$0xff]  }
 0x854   : > { %v7017_v33 = vpop.eup %7016 }
 0x855   : > { %v7019_v26 = vpop.eup %7018  ;;  %v4116_v55 = vmul.f32 %v7017_v33, %v7013_v24  ;;  %v5818_v60 = vpack.c.bf16 %v7017_v33, %v7017_v33  ;;  %v6899_v33 = vld [vmem:[%s8607_s2 + $0xb8] sm:$0xff]  }
 0x856   : > { %v7021_v56 = vpop.eup %7020 }
 0x857   : > { %v7023_v14 = vpop.eup %7022  ;;  %4119 = vst [vmem:[%s7758_s26 + $0x4e] sm:$0xfc] %v4116_v55  ;;  %v4133_v16 = vshrl.u32 %v5818_v60, 16  ;;  %v4136_v25 = vshll.u32 %v5818_v60, 16  ;;  %v4118_v27 = vmul.f32 %v7021_v56, %v7019_v26  ;;  %v5820_v30 = vpack.c.bf16 %v7021_v56, %v7021_v56  ;;  %v6901_v56 = vld [vmem:[%s8607_s2 + $0x40] sm:$0xff]  }
 0x858   : > { %v4117_v45 = vmul.f32 %v7023_v14, %v7015_v39  ;;  %v5819_v4 = vpack.c.bf16 %v7023_v14, %v7023_v14  ;;  %6464 = vmatpush3.bf16.msra.mxu0 %v6901_v56  ;;  %v6902_v14 = vld [vmem:[%s8607_s2 + $0x48] sm:$0xff]  }
 0x859   : > { %v4135_v51 = vrot.slane %v4133_v16, 4  ;;  %v4138_v7 = vrot.slane %v4136_v25, 5  ;;  %4121 = vst [vmem:[%s7758_s26 + $0x5e] sm:$0x3] %v4118_v27  ;;  %v4156_v53 = vshrl.u32 %v5820_v30, 16  ;;  %v4152_v42 = vshll.u32 %v5820_v30, 16  ;;  %6465 = vmatprep.subr.bf16.mxu0 %v8613_v52 }
 0x85a   : > { %4120 = vst [vmem:[%s7758_s26 + $0x56] sm:$0xff] %v4117_v45  ;;  %v4142_v58 = vshll.u32 %v5819_v4, 16  ;;  %v4146_v59 = vshrl.u32 %v5819_v4, 16  ;;  %v6903_v16 = vld [vmem:[%s8607_s2 + $0x50] sm:$0xff]   ;;  %v6904_v25 = vld [vmem:[%s8607_s2 + $0x58] sm:$0xff]   ;;  %v6905_v27 = vld [vmem:[%s8607_s2 + $0x60] sm:$0xff]  }
 0x85b   : > { %v4139_v54 = vor.u32 %v4138_v7, %v4135_v51  ;;  %v4168_v15 = vsel %vm7771_vm11, %v4156_v53, %v4167_v10  ;;  %v4154_v46 = vrot.slane %v4152_v42, 5  ;;  %v6906_v30 = vld [vmem:[%s8607_s2 + $0x68] sm:$0xff]   ;;  %v6907_v45 = vld [vmem:[%s8607_s2 + $0x70] sm:$0xff]   ;;  %v6908_v4 = vld [vmem:[%s8607_s2 + $0x78] sm:$0xff]  }
 0x85c   : > { %v4144_v40 = vrot.slane %v4142_v58, 5  ;;  %v4148_v44 = vrot.slane %v4146_v59, 4  ;;  %4169 = vst [vmem:[#allocation3 + $0x8] sm:$0x1] %v4168_v15  ;;  %6466 = vmatpush3.bf16.msra.mxu0 %v6902_v14  ;;  %v4521_v58 = vld [vmem:[#allocation2 + $0xd8] sm:$0xf0] }
 0x85d   : > { %v4140_v13 = vrot.slane %v4139_v54, 4  ;;  %6467 = vmatprep.subr.bf16.mxu0 %v8613_v52  ;;  %v4523_v42 = vld [vmem:[#allocation2 + $0xe8] sm:$0xff] }
 0x85e   : > { %v4149_v62 = vor.u32 %v4148_v44, %v4144_v40 }
 0x85f   : > { %v4145_v32 = vsel %vm7896_vm15, %v4140_v13, %v4144_v40  ;;  %v4525_v40 = vld [vmem:[#allocation2 + $0xf8] sm:$0xf] }
 0x860   : > { %v4150_v3 = vrot.slane %v4149_v62, 4  ;;  %v4164_v17 = vsel %vm7763_vm9, %v4145_v32, %v4163_v0  ;;  %6468 = vmatpush3.bf16.msra.mxu0 %v6903_v16 }
 0x861   : > { %4165 = vst [vmem:[#allocation3] sm:$0xf] %v4164_v17  ;;  %6469 = vmatprep.subr.bf16.mxu0 %v8613_v52  ;;  %v4522_v17 = vld [vmem:[#allocation2 + $0xe0] sm:$0xff] }
 0x862   : > { %v4155_v57 = vsel %vm7896_vm15, %v4150_v3, %v4154_v46  ;;  %v4520_v46 = vld [vmem:[#allocation2 + $0xd0] sm:$0xf0] }
 0x863   : > { %4166 = vst [vmem:[#allocation3 + $0x4] sm:$0xf] %v4155_v57  ;;  %v8390_v22 = vld [vmem:[#allocation3 + $0x8] ss:$0 sps:$4 sm:$0x11]  }
 0x864   : > { %v4221_v50 = vshll.u32 %v8390_v22, 16  ;;  %v4426_v55 = vrot.slane %v8390_v22, 1  ;;  %6470 = vmatpush3.bf16.msra.mxu0 %v6904_v25  ;;  %v4610_v16 = vld [vmem:[#allocation3 + $0x8] sm:$0x1] }
 0x865   : > { %6471 = vmatprep.subr.bf16.mxu0 %v8613_v52 }
 0x866   : > { %v4223_v18 = vrot.slane %v4221_v50, 1 }
 0x868   : > { %v4170_v28 = vld [vmem:[#allocation3] sm:$0xf]  ;;  %6472 = vmatpush3.bf16.msra.mxu0 %v6905_v27 }
 0x869   : > { %v4405_v24 = vld [vmem:[#allocation3] sm:$0xe]  ;;  %6473 = vmatprep.subr.bf16.mxu0 %v8613_v52 }
 0x86a   : > { %v4171_v49 = vld [vmem:[#allocation3 + $0x4] sm:$0xf] }
 0x86b   : > { %v5687_v47 = vcombine.low %v4170_v28, %v4171_v49  ;;  %v5721_v39 = vcombine.low %v4405_v24, %v4171_v49  ;;  %v4524_v28 = vld [vmem:[#allocation2 + $0xf0] sm:$0xf] }
 0x86c   : > { %6474 = vmatpush3.bf16.msra.mxu0 %v6906_v30 }
 0x86d   : > { %v4216_v35 = vshll.u32 %v5687_v47, 16  ;;  %v4214_v2 = vshrl.u32 %v5687_v47, 16  ;;  %v4425_v26 = vrot.slane %v5721_v39, 1  ;;  %6475 = vmatprep.subr.bf16.mxu0 %v8613_v52 }
 0x86f   : > { %v4218_v9 = vrot.slane %v4216_v35, 1  ;;  %v4427_v60 = vsel %vm913_vm2, %v4425_v26, %v4426_v55 }
 0x870   : > { %6476 = vmatpush3.bf16.msra.mxu0 %v6907_v45 }
 0x871   : > { %v4219_v37 = vor.u32 %v4218_v9, %v4214_v2  ;;  %6477 = vmatprep.subr.bf16.mxu0 %v8613_v52 }
 0x873   : > { %v4224_v12 = vsel %vm1607_vm0, %v4219_v37, %v4223_v18 }
 0x874   : > { %6420 = vmatmul.mubr.bf16.vlgmr.msra.gmra.mrb[68].mxu1 %v4224_v12  ;;  %6478 = vmatpush3.bf16.msra.mxu0 %v6908_v4  ;;  %v4606_v4 = vld [vmem:[#allocation3] sm:$0xf] }
 0x875   : > { %6424 = vmatpush3.bf16.msra.mxu1 %v6884_v43  ;;  %6439 = vmatprep.mubr.msk.bf16.mxu1 %vm7087_vm1, %v8613_v52 }
 0x876   : > { %6425 = vmatprep.subr.bf16.mxu1 %v8613_v52  ;;  %6483 = vmatprep.subr.bf16.mxu0 %v8613_v52 }
 0x879   : > { %6426 = vmatpush3.bf16.msra.mxu1 %v6885_v21 }
 0x87a   : > { %6427 = vmatprep.subr.bf16.mxu1 %v8613_v52 }
 0x87d   : > { %6428 = vmatpush3.bf16.msra.mxu1 %v6886_v29 }
 0x87e   : > { %6429 = vmatprep.subr.bf16.mxu1 %v8613_v52 }
 0x881   : > { %6430 = vmatpush3.bf16.msra.mxu1 %v6887_v20 }
 0x882   : > { %6431 = vmatprep.subr.bf16.mxu1 %v8613_v52 }
 0x885   : > { %6432 = vmatpush3.bf16.msra.mxu1 %v6888_v41 }
 0x886   : > { %6433 = vmatprep.subr.bf16.mxu1 %v8613_v52 }
 0x889   : > { %6434 = vmatpush3.bf16.msra.mxu1 %v6889_v23 }
 0x88a   : > { %6435 = vmatprep.subr.bf16.mxu1 %v8613_v52 }
 0x88d   : > { %6436 = vmatpush3.bf16.msra.mxu1 %v6890_v63 }
 0x88e   : > { %6437 = vmatprep.subr.bf16.mxu1 %v8613_v52 }
 0x891   : > { %6438 = vmatpush3.bf16.msra.mxu1 %v6891_v1 }
 0x892   : > { %6443 = vmatprep.subr.bf16.mxu1 %v8613_v52 }
 0x894   : > { %6440 = vmatmul.mubr.bf16.vlgmr.msra.gmra.mrb[68].mxu1 %v5687_v47 }
 0x895   : > { %6444 = vmatpush3.bf16.msra.mxu1 %v6892_v5  ;;  %6459 = vmatprep.mubr.msk.bf16.mxu1 %vm7087_vm1, %v8613_v52 }
 0x896   : > { %6445 = vmatprep.subr.bf16.mxu1 %v8613_v52 }
 0x899   : > { %6446 = vmatpush3.bf16.msra.mxu1 %v6893_v38 }
 0x89a   : > { %6447 = vmatprep.subr.bf16.mxu1 %v8613_v52 }
 0x89d   : > { %6448 = vmatpush3.bf16.msra.mxu1 %v6894_v48 }
 0x89e   : > { %6449 = vmatprep.subr.bf16.mxu1 %v8613_v52 }
 0x8a1   : > { %6450 = vmatpush3.bf16.msra.mxu1 %v6895_v19 }
 0x8a2   : > { %6451 = vmatprep.subr.bf16.mxu1 %v8613_v52 }
 0x8a5   : > { %6452 = vmatpush3.bf16.msra.mxu1 %v6896_v8 }
 0x8a6   : > { %6453 = vmatprep.subr.bf16.mxu1 %v8613_v52 }
 0x8a9   : > { %6454 = vmatpush3.bf16.msra.mxu1 %v6897_v34 }
 0x8aa   : > { %6455 = vmatprep.subr.bf16.mxu1 %v8613_v52 }
 0x8ad   : > { %6456 = vmatpush3.bf16.msra.mxu1 %v6898_v11 }
 0x8ae   : > { %6457 = vmatprep.subr.bf16.mxu1 %v8613_v52 }
 0x8b1   : > { %6458 = vmatpush3.bf16.msra.mxu1 %v6899_v33 }
 0x8b4   : > { %6460 = vmatmul.mubr.bf16.vlgmr.msra.gmra.mrb[68].mxu1 %v4427_v60 }
 0x987   : > { %v4511_v51 = vpop.f32.mrb[68].mxu1 }
 0x988   : > { %v4531_v7 = vrot.slane %v4511_v51, 4  ;;  %v6461_v53 = vpop.f32.mrb[69].mxu1 }
 0x989   : > { %v4514_v59 = vpop.f32.mrb[70].mxu1 }
 0x98a   : > { %v4537_v10 = vadd.f32 %v4531_v7, %v4521_v58  ;;  %v4532_v54 = vrot.slane %v4514_v59, 4  ;;  %v6462_v15 = vpop.f32.mrb[71].mxu1 }
 0x98c   : > { %v5730_v44 = vmul.f32 -1.442695, %v4537_v10  ;;  %v4533_v13 = vsel %vm1970_vm4, %v4531_v7, %v4532_v54  ;;  %v4539_v62 = vadd.f32 %v4532_v54, %v4525_v40 }
 0x98d   : > { %v4538_v32 = vadd.f32 %v4533_v13, %v4523_v42 }
 0x98e   : > { %7024 = vpow2.f32 %v5730_v44  ;;  %v5732_v0 = vmul.f32 -1.442695, %v4539_v62  ;;  %v6911_v62 = vld [vmem:[%s8607_s2] sm:$0xff]  }
 0x98f   : > { %v5731_v3 = vmul.f32 -1.442695, %v4538_v32  ;;  %v6912_v32 = vld [vmem:[%s8607_s2 + $0x8] sm:$0xff]  }
 0x990   : > { %7026 = vpow2.f32 %v5732_v0  ;;  %v6913_v0 = vld [vmem:[%s8607_s2 + $0x10] sm:$0xff]  }
 0x991   : > { %7028 = vpow2.f32 %v5731_v3  ;;  %v6914_v3 = vld [vmem:[%s8607_s2 + $0x18] sm:$0xff]  }
 0x992   : > { %7030 = vtanh.f32 %v4520_v46  ;;  %v6915_v46 = vld [vmem:[%s8607_s2 + $0x20] sm:$0xff]  }
 0x993   : > { %7032 = vtanh.f32 %v4522_v17  ;;  %v6916_v17 = vld [vmem:[%s8607_s2 + $0x28] sm:$0xff]  }
 0x998   : > { %v7025_v57 = vpop.eup %7024 }
 0x999   : > { %v4549_v22 = vadd.f32 1.0, %v7025_v57  ;;  %v6917_v57 = vld [vmem:[%s8607_s2 + $0x30] sm:$0xff]  }
 0x99a   : > { %v7027_v49 = vpop.eup %7026 }
 0x99b   : > { %v7029_v47 = vpop.eup %7028  ;;  %7034 = vrcp.f32 %v4549_v22  ;;  %v4551_v35 = vadd.f32 1.0, %v7027_v49  ;;  %v6918_v22 = vld [vmem:[%s8607_s2 + $0x38] sm:$0xff]   ;;  %v6920_v49 = vld [vmem:[%s8607_s2 + $0x88] sm:$0xff]  }
 0x99c   : > { %7036 = vtanh.f32 %v4524_v28  ;;  %v4550_v50 = vadd.f32 1.0, %v7029_v47  ;;  %v7031_v2 = vpop.eup %7030  ;;  %v6919_v28 = vld [vmem:[%s8607_s2 + $0x80] sm:$0xff]   ;;  %v6921_v47 = vld [vmem:[%s8607_s2 + $0x90] sm:$0xff]  }
 0x99d   : > { %7038 = vrcp.f32 %v4551_v35  ;;  %v7033_v9 = vpop.eup %7032  ;;  %v6922_v35 = vld [vmem:[%s8607_s2 + $0x98] sm:$0xff]  }
 0x99e   : > { %7040 = vrcp.f32 %v4550_v50  ;;  %v6923_v50 = vld [vmem:[%s8607_s2 + $0xa0] sm:$0xff]  }
 0x9a5   : > { %v7035_v37 = vpop.eup %7034 }
 0x9a6   : > { %v7037_v18 = vpop.eup %7036  ;;  %v4558_v43 = vmul.f32 %v7035_v37, %v7031_v2  ;;  %v5821_v12 = vpack.c.bf16 %v7035_v37, %v7035_v37  ;;  %v6924_v2 = vld [vmem:[%s8607_s2 + $0xa8] sm:$0xff]   ;;  %v6925_v37 = vld [vmem:[%s8607_s2 + $0xb0] sm:$0xff]  }
 0x9a7   : > { %v7039_v21 = vpop.eup %7038 }
 0x9a8   : > { %v7041_v29 = vpop.eup %7040  ;;  %4561 = vst [vmem:[%s7758_s26 + $0x5c] sm:$0xf0] %v4558_v43  ;;  %v4575_v20 = vshrl.u32 %v5821_v12, 16  ;;  %v4578_v41 = vshll.u32 %v5821_v12, 16  ;;  %v4560_v23 = vmul.f32 %v7039_v21, %v7037_v18  ;;  %v5823_v63 = vpack.c.bf16 %v7039_v21, %v7039_v21  ;;  %v6926_v43 = vld [vmem:[%s8607_s2 + $0xb8] sm:$0xff]  }
 0x9a9   : > { %v4559_v1 = vmul.f32 %v7041_v29, %v7033_v9  ;;  %v5822_v5 = vpack.c.bf16 %v7041_v29, %v7041_v29 }
 0x9aa   : > { %v4577_v38 = vrot.slane %v4575_v20, 5  ;;  %v4580_v48 = vrot.slane %v4578_v41, 6  ;;  %4563 = vst [vmem:[%s7758_s26 + $0x6c] sm:$0xf] %v4560_v23  ;;  %v4594_v19 = vshrl.u32 %v5823_v63, 16  ;;  %v4597_v8 = vshll.u32 %v5823_v63, 16 }
 0x9ab   : > { %4562 = vst [vmem:[%s7758_s26 + $0x64] sm:$0xff] %v4559_v1  ;;  %v4584_v34 = vshrl.u32 %v5822_v5, 16  ;;  %v4587_v11 = vshll.u32 %v5822_v5, 16  ;;  %v4964_v63 = vld [vmem:[#allocation2 + $0xf8] sm:$0xc0] }
 0x9ac   : > { %v4581_v24 = vor.u32 %v4580_v48, %v4577_v38  ;;  %v4596_v39 = vrot.slane %v4594_v19, 5  ;;  %v4599_v55 = vrot.slane %v4597_v8, 6  ;;  %v4968_v19 = vld [vmem:[#allocation2 + $0x118] sm:$0x3f] }
 0x9ad   : > { %v4586_v33 = vrot.slane %v4584_v34, 5  ;;  %v4589_v26 = vrot.slane %v4587_v11, 6  ;;  %v4966_v34 = vld [vmem:[#allocation2 + $0x108] sm:$0xff] }
 0x9ae   : > { %v4582_v60 = vrot.slane %v4581_v24, 4  ;;  %v4602_v56 = vrot.slane %v4596_v39, 4  ;;  %v4600_v45 = vor.u32 %v4599_v55, %v4596_v39 }
 0x9af   : > { %v4590_v14 = vor.u32 %v4589_v26, %v4586_v33  ;;  %v4963_v26 = vld [vmem:[#allocation2 + $0xf0] sm:$0xc0] }
 0x9b0   : > { %v4611_v25 = vsel %vm7771_vm11, %v4602_v56, %v4610_v16  ;;  %v7060_v56 = vld [vmem:[#allocation2 + $0x100] sm:$0xff] }
 0x9b1   : > { %v4591_v27 = vsel %vm8018_vm7, %v4582_v60, %v4590_v14  ;;  %v4592_v30 = vrot.slane %v4590_v14, 4  ;;  %4612 = vst [vmem:[#allocation3 + $0x8] sm:$0x1] %v4611_v25  ;;  %v4967_v60 = vld [vmem:[#allocation2 + $0x110] sm:$0x3f] }
 0x9b2   : > { %v4607_v51 = vsel %vm7763_vm9, %v4591_v27, %v4606_v4 }
 0x9b3   : > { %v4601_v7 = vsel %vm8018_vm7, %v4592_v30, %v4600_v45  ;;  %4608 = vst [vmem:[#allocation3] sm:$0xf] %v4607_v51 }
 0x9b4   : > { %4609 = vst [vmem:[#allocation3 + $0x4] sm:$0xf] %v4601_v7 }
 0x9b8   : > { %v8507_v58 = vld [vmem:[#allocation3 + $0x8] ss:$0 sps:$4 sm:$0x11]  }
 0x9b9   : > { %v4664_v15 = vshll.u32 %v8507_v58, 16  ;;  %v4869_v21 = vrot.slane %v8507_v58, 1 }
 0x9ba   : > { %v4613_v53 = vld [vmem:[#allocation3] sm:$0xf] }
 0x9bb   : > { %v4614_v59 = vld [vmem:[#allocation3 + $0x4] sm:$0xf]  ;;  %v4666_v13 = vrot.slane %v4664_v15, 1  ;;  %v4848_v9 = vld [vmem:[#allocation3] sm:$0xe] }
 0x9bc   : > { %v5752_v10 = vcombine.low %v4613_v53, %v4614_v59  ;;  %v5786_v18 = vcombine.low %v4848_v9, %v4614_v59 }
 0x9be   : > { %v4659_v54 = vshll.u32 %v5752_v10, 16  ;;  %v4657_v40 = vshrl.u32 %v5752_v10, 16  ;;  %v4868_v12 = vrot.slane %v5786_v18, 1 }
 0x9c0   : > { %v4661_v44 = vrot.slane %v4659_v54, 1  ;;  %v4870_v29 = vsel %vm913_vm2, %v4868_v12, %v4869_v21  ;;  %v5049_v12 = vld [vmem:[#allocation3] sm:$0xf] }
 0x9c2   : > { %v4662_v42 = vor.u32 %v4661_v44, %v4657_v40 }
 0x9c4   : > { %v4667_v6 = vsel %vm1607_vm0, %v4662_v42, %v4666_v13 }
 0x9c5   : > { %6480 = vmatmul.mubr.bf16.vlgmr.msra.gmra.mrb[64].mxu0 %v4667_v6 }
 0x9c6   : > { %6484 = vmatpush3.bf16.msra.mxu0 %v6911_v62  ;;  %6499 = vmatprep.mubr.msk.bf16.mxu0 %vm7087_vm1, %v8613_v52 }
 0x9c7   : > { %6485 = vmatprep.subr.bf16.mxu0 %v8613_v52 }
 0x9ca   : > { %6486 = vmatpush3.bf16.msra.mxu0 %v6912_v32 }
 0x9cb   : > { %6487 = vmatprep.subr.bf16.mxu0 %v8613_v52 }
 0x9ce   : > { %6488 = vmatpush3.bf16.msra.mxu0 %v6913_v0 }
 0x9cf   : > { %6489 = vmatprep.subr.bf16.mxu0 %v8613_v52 }
 0x9d2   : > { %6490 = vmatpush3.bf16.msra.mxu0 %v6914_v3 }
 0x9d3   : > { %6491 = vmatprep.subr.bf16.mxu0 %v8613_v52 }
 0x9d6   : > { %6492 = vmatpush3.bf16.msra.mxu0 %v6915_v46 }
 0x9d7   : > { %6493 = vmatprep.subr.bf16.mxu0 %v8613_v52 }
 0x9da   : > { %6494 = vmatpush3.bf16.msra.mxu0 %v6916_v17 }
 0x9db   : > { %6495 = vmatprep.subr.bf16.mxu0 %v8613_v52 }
 0x9de   : > { %6496 = vmatpush3.bf16.msra.mxu0 %v6917_v57 }
 0x9df   : > { %6497 = vmatprep.subr.bf16.mxu0 %v8613_v52 }
 0x9e2   : > { %6498 = vmatpush3.bf16.msra.mxu0 %v6918_v22 }
 0x9e3   : > { %6503 = vmatprep.subr.bf16.mxu0 %v8613_v52 }
 0x9e5   : > { %6500 = vmatmul.mubr.bf16.vlgmr.msra.gmra.mrb[64].mxu0 %v5752_v10 }
 0x9e6   : > { %6504 = vmatpush3.bf16.msra.mxu0 %v6919_v28  ;;  %6519 = vmatprep.mubr.msk.bf16.mxu0 %vm7087_vm1, %v8613_v52 }
 0x9e7   : > { %6505 = vmatprep.subr.bf16.mxu0 %v8613_v52 }
 0x9ea   : > { %6506 = vmatpush3.bf16.msra.mxu0 %v6920_v49 }
 0x9eb   : > { %6507 = vmatprep.subr.bf16.mxu0 %v8613_v52 }
 0x9ee   : > { %6508 = vmatpush3.bf16.msra.mxu0 %v6921_v47 }
 0x9ef   : > { %6509 = vmatprep.subr.bf16.mxu0 %v8613_v52 }
 0x9f2   : > { %6510 = vmatpush3.bf16.msra.mxu0 %v6922_v35 }
 0x9f3   : > { %6511 = vmatprep.subr.bf16.mxu0 %v8613_v52 }
 0x9f6   : > { %6512 = vmatpush3.bf16.msra.mxu0 %v6923_v50 }
 0x9f7   : > { %6513 = vmatprep.subr.bf16.mxu0 %v8613_v52 }
 0x9fa   : > { %6514 = vmatpush3.bf16.msra.mxu0 %v6924_v2  ;;  %v5053_v2 = vld [vmem:[#allocation3 + $0x8] sm:$0x1] }
 0x9fb   : > { %6515 = vmatprep.subr.bf16.mxu0 %v8613_v52 }
 0x9fe   : > { %6516 = vmatpush3.bf16.msra.mxu0 %v6925_v37 }
 0x9ff   : > { %6517 = vmatprep.subr.bf16.mxu0 %v8613_v52 }
 0xa02   : > { %6518 = vmatpush3.bf16.msra.mxu0 %v6926_v43 }
 0xa05   : > { %6520 = vmatmul.mubr.bf16.vlgmr.msra.gmra.mrb[64].mxu0 %v4870_v29 }
 0xad8   : > { %v4954_v20 = vpop.f32.mrb[64].mxu0 }
 0xad9   : > { %v4974_v41 = vrot.slane %v4954_v20, 2  ;;  %v6521_v23 = vpop.f32.mrb[65].mxu0 }
 0xada   : > { %v4957_v1 = vpop.f32.mrb[66].mxu0 }
 0xadb   : > { %v4980_v5 = vadd.f32 %v4974_v41, %v4964_v63  ;;  %v4975_v38 = vrot.slane %v4957_v1, 2  ;;  %v6522_v48 = vpop.f32.mrb[67].mxu0 }
 0xadd   : > { %v5795_v8 = vmul.f32 -1.442695, %v4980_v5  ;;  %v4976_v52 = vsel %vm1384_vm3, %v4974_v41, %v4975_v38  ;;  %v4982_v11 = vadd.f32 %v4975_v38, %v4968_v19 }
 0xade   : > { %v4981_v24 = vadd.f32 %v4976_v52, %v4966_v34 }
 0xadf   : > { %7042 = vpow2.f32 %v5795_v8  ;;  %v5797_v39 = vmul.f32 -1.442695, %v4982_v11 }
 0xae0   : > { %v5796_v33 = vmul.f32 -1.442695, %v4981_v24 }
 0xae1   : > { %7044 = vpow2.f32 %v5797_v39 }
 0xae2   : > { %7046 = vpow2.f32 %v5796_v33 }
 0xae3   : > { %7048 = vtanh.f32 %v7060_v56 }
 0xae4   : > { %7050 = vtanh.f32 %v4963_v26 }
 0xae9   : > { %v7043_v55 = vpop.eup %7042 }
 0xaea   : > { %v4992_v14 = vadd.f32 1.0, %v7043_v55 }
 0xaeb   : > { %v7045_v16 = vpop.eup %7044 }
 0xaec   : > { %v7047_v25 = vpop.eup %7046  ;;  %7052 = vrcp.f32 %v4992_v14  ;;  %v4994_v27 = vadd.f32 1.0, %v7045_v16 }
 0xaed   : > { %7054 = vtanh.f32 %v4967_v60  ;;  %v4993_v30 = vadd.f32 1.0, %v7047_v25  ;;  %v7049_v45 = vpop.eup %7048 }
 0xaee   : > { %7056 = vrcp.f32 %v4994_v27  ;;  %v7051_v4 = vpop.eup %7050 }
 0xaef   : > { %7058 = vrcp.f32 %v4993_v30 }
 0xaf6   : > { %v7053_v51 = vpop.eup %7052 }
 0xaf7   : > { %v7055_v7 = vpop.eup %7054  ;;  %v5001_v53 = vmul.f32 %v7053_v51, %v7051_v4  ;;  %v5824_v58 = vpack.c.bf16 %v7053_v51, %v7053_v51  ;;  %5056 = vst [vmem:[%s273_s30 - $0x6] sm:$0xc0] %v7053_v51 }
 0xaf8   : > { %v7057_v59 = vpop.eup %7056 }
 0xaf9   : > { %v7059_v10 = vpop.eup %7058  ;;  %5004 = vst [vmem:[%s7758_s26 + $0x6a] sm:$0xc0] %v5001_v53  ;;  %v5018_v54 = vshrl.u32 %v5824_v58, 16  ;;  %v5021_v15 = vshll.u32 %v5824_v58, 16  ;;  %v5003_v40 = vmul.f32 %v7057_v59, %v7055_v7  ;;  %v5826_v44 = vpack.c.bf16 %v7057_v59, %v7057_v59  ;;  %5058 = vst [vmem:[%s273_s30 + $0xa] sm:$0x3f] %v7057_v59 }
 0xafa   : > { %v5002_v42 = vmul.f32 %v7059_v10, %v7049_v45  ;;  %v5825_v13 = vpack.c.bf16 %v7059_v10, %v7059_v10  ;;  %5057 = vst [vmem:[%s273_s30 + $0x2] sm:$0xff] %v7059_v10 }
 0xafb   : > { %v5020_v62 = vrot.slane %v5018_v54, 6  ;;  %v5023_v6 = vrot.slane %v5021_v15, 7  ;;  %5006 = vst [vmem:[%s7758_s26 + $0x7a] sm:$0x3f] %v5003_v40  ;;  %v5037_v32 = vshrl.u32 %v5826_v44, 16  ;;  %v5040_v0 = vshll.u32 %v5826_v44, 16 }
 0xafc   : > { %5005 = vst [vmem:[%s7758_s26 + $0x72] sm:$0xff] %v5002_v42  ;;  %v5027_v3 = vshrl.u32 %v5825_v13, 16  ;;  %v5030_v46 = vshll.u32 %v5825_v13, 16 }
 0xafd   : > { %v5024_v17 = vor.u32 %v5023_v6, %v5020_v62  ;;  %v5039_v57 = vrot.slane %v5037_v32, 6  ;;  %v5042_v49 = vrot.slane %v5040_v0, 7 }
 0xafe   : > { %v5029_v22 = vrot.slane %v5027_v3, 6  ;;  %v5032_v28 = vrot.slane %v5030_v46, 7 }
 0xaff   : > { %v5025_v47 = vrot.slane %v5024_v17, 4  ;;  %v5045_v35 = vrot.slane %v5039_v57, 4  ;;  %v5043_v43 = vor.u32 %v5042_v49, %v5039_v57 }
 0xb00   : > { %v5033_v50 = vor.u32 %v5032_v28, %v5029_v22 }
 0xb01   : > { %v5054_v9 = vsel %vm7771_vm11, %v5045_v35, %v5053_v2 }
 0xb02   : > { %v5034_v37 = vsel %vm8142_vm14, %v5025_v47, %v5033_v50  ;;  %v5035_v18 = vrot.slane %v5033_v50, 4  ;;  %5055 = vst [vmem:[#allocation3 + $0x8] sm:$0x1] %v5054_v9 }
 0xb03   : > { %v5050_v21 = vsel %vm7763_vm9, %v5034_v37, %v5049_v12 }
 0xb04   : > { %v5044_v29 = vsel %vm8142_vm14, %v5035_v18, %v5043_v43  ;;  %5051 = vst [vmem:[#allocation3] sm:$0xf] %v5050_v21 }
 0xb05   : > { %5052 = vst [vmem:[#allocation3 + $0x4] sm:$0xf] %v5044_v29 }
 0xb06 PF: > { %s16_s20 = sadd.s32 1, %s7083_s20   ;;  %s8626_s18 = smov %s7079_s19 }
 0xb07   : > { %p13_p5 = scmp.ge.s32.totalorder %s16_s20, 4   ;;  %s8627_s19 = smov %s8629_s21 }
 0xb09   :  { %15 = sbr.rel (!%p13_p5) target bundleno = 2 (0x2), region = 86 }

</bundles_post_ra>
